<compile_context>
chip_gen: v7x
topology: tpu7x:2x2x1
jax: 0.10.0
libtpu: 0.0.40
codegen_flags: <defaults>
</compile_context>

<pallas_src>
import jax
import jax.numpy as jnp
from jax.experimental import pallas as pl
from jax.experimental.pallas import tpu as pltpu

COMPUTE_DTYPE = jnp.bfloat16   # MXU operand dtype (accumulation stays f32)


# ----------------------------------------------------------------------------
# Fused Pallas kernel: backbone + Oriented RPN head for one batch element.
# ----------------------------------------------------------------------------
def _fused_forward_kernel(
    x_ref,                      # (1, H0, W0, Cin)  input image (NHWC)
    wb0_ref, bb0_ref,           # (9*Cin, F), (1, F)    backbone stage-0 conv
    wb1_ref, bb1_ref,           # (9*F,  F), (1, F)     backbone stage-1 conv
    w3_ref, b3_ref,             # (9*F, Cm), (1, Cm)    RPN shared 3x3 conv
    wh_ref, bh_ref,             # (Coff+Csco, Cm), (Coff+Csco, 1)  fused 1x1 heads
    f0_ref, f1_ref,             # (1, F, H0*W0), (1, F, H1*W1)     backbone outs
    off0_ref, sco0_ref,         # (1, Coff, H0*W0), (1, Csco, H0*W0)
    off1_ref, sco1_ref,         # (1, Coff, H1*W1), (1, Csco, H1*W1)
    xpad_scr,                   # VMEM (H0+2, W0+2, Cin)
    f0pad_scr,                  # VMEM (H0+2, W0+2, F)
    f1pad_scr,                  # VMEM (H1+2, W1+2, F)
):
    _, H0, W0, _ = x_ref.shape
    F = f0_ref.shape[1]
    H1, W1 = H0 // 2, W0 // 2
    Coff = off0_ref.shape[1]

    def conv3x3_relu(pad_scr, interior, w_ref, b_ref):
        """Halo-pad in VMEM, im2col, single large-K MXU dot, bias + ReLU."""
        H, W, C = interior.shape
        pad_scr[...] = jnp.zeros_like(pad_scr)            # zero border (cheap)
        pad_scr[1:H + 1, 1:W + 1, :] = interior
        xp = pad_scr[...]                                 # (H+2, W+2, C)
        taps = [xp[dy:dy + H, dx:dx + W, :].reshape(H * W, C)
                for dy in range(3) for dx in range(3)]
        patches = jnp.concatenate(taps, axis=-1).astype(COMPUTE_DTYPE)  # (HW, 9C)
        acc = jnp.dot(patches, w_ref[...],
                      preferred_element_type=jnp.float32)               # (HW, Cout)
        return jnp.maximum(acc + b_ref[...], 0.0)

    def rpn_head(hid):
        """hid: (HW, Cm) -> fused (offsets | scores), channel-major (Ch, HW)."""
        hid_t = jnp.transpose(hid).astype(COMPUTE_DTYPE)                 # (Cm, HW)
        return jnp.dot(wh_ref[...], hid_t,
                       preferred_element_type=jnp.float32) + bh_ref[...]

    # ---- backbone stage 0: 3x3 conv + ReLU -------------------------------
    f0 = conv3x3_relu(xpad_scr, x_ref[0], wb0_ref, bb0_ref)      # (H0*W0, F)
    f0_ref[0] = jnp.transpose(f0)                                # (F, H0*W0)

    # ---- 2x2 max-pool -----------------------------------------------------
    t = f0.reshape(H0, W1, 2, F)
    t = jnp.maximum(t[:, :, 0, :], t[:, :, 1, :])                # (H0, W1, F)
    t = t.reshape(H1, 2, W1, F)
    pooled = jnp.maximum(t[:, 0, :, :], t[:, 1, :, :])           # (H1, W1, F)

    # ---- backbone stage 1: 3x3 conv + ReLU -------------------------------
    f1 = conv3x3_relu(f1pad_scr, pooled, wb1_ref, bb1_ref)       # (H1*W1, F)
    f1_ref[0] = jnp.transpose(f1)                                # (F, H1*W1)

    # ---- Oriented RPN head, level 0 ---------------------------------------
    hid0 = conv3x3_relu(f0pad_scr, f0.reshape(H0, W0, F), w3_ref, b3_ref)
    head0 = rpn_head(hid0)                                       # (Ch, H0*W0)
    off0_ref[0] = head0[:Coff]
    sco0_ref[0] = head0[Coff:]

    # ---- Oriented RPN head, level 1 (reuses the level-1 pad scratch) ------
    hid1 = conv3x3_relu(f1pad_scr, f1.reshape(H1, W1, F), w3_ref, b3_ref)
    head1 = rpn_head(hid1)                                       # (Ch, H1*W1)
    off1_ref[0] = head1[:Coff]
    sco1_ref[0] = head1[Coff:]


# ----------------------------------------------------------------------------
# Deterministic parameter init (Conv2d-like scaling), synthetic weights.
# ----------------------------------------------------------------------------
def _conv_params(key, kh, kw, cin, cout):
    kw_, kb_ = jax.random.split(key)
    fan_in = kh * kw * cin
    bound = 1.0 / jnp.sqrt(fan_in)
    w = jax.random.uniform(kw_, (kh, kw, cin, cout), jnp.float32, -bound, bound)
    b = jax.random.uniform(kb_, (1, cout), jnp.float32, -bound, bound)
    return w, b


def init_params(key, in_ch=4, fpn_ch=32, rpn_ch=32, num_anchors=3):
    keys = jax.random.split(key, 5)
    wb0, bb0 = _conv_params(keys[0], 3, 3, in_ch, fpn_ch)            # backbone stage 0
    wb1, bb1 = _conv_params(keys[1], 3, 3, fpn_ch, fpn_ch)           # backbone stage 1
    w3, b3 = _conv_params(keys[2], 3, 3, fpn_ch, rpn_ch)             # RPN 3x3 conv
    wo4, bo = _conv_params(keys[3], 1, 1, rpn_ch, 6 * num_anchors)   # offsets 1x1
    ws4, bs = _conv_params(keys[4], 1, 1, rpn_ch, num_anchors)       # scores  1x1
    return {
        "backbone": [(wb0, bb0), (wb1, bb1)],
        "rpn": {"w3": w3, "b3": b3,
                "wo": wo4[0, 0], "bo": bo,
                "ws": ws4[0, 0], "bs": bs},
    }


# ----------------------------------------------------------------------------
# OrientedRCNN forward (single fused pallas_call)
# ----------------------------------------------------------------------------
def oriented_rcnn_forward(x_nchw, params):
    N, Cin, H0, W0 = x_nchw.shape
    H1, W1 = H0 // 2, W0 // 2
    (wb0, bb0), (wb1, bb1) = params["backbone"]
    r = params["rpn"]
    F = wb0.shape[-1]
    Cm = r["w3"].shape[-1]
    Coff = r["wo"].shape[-1]
    Csco = r["ws"].shape[-1]
    Ch = Coff + Csco

    # NCHW -> NHWC once at the boundary (tiny); everything else stays on-chip.
    x = jnp.transpose(x_nchw, (0, 2, 3, 1)).astype(jnp.float32)

    # Pre-reshape / fuse weights once in the wrapper for the im2col matmuls
    # and the concatenated 1x1 heads.
    wb0_r = wb0.reshape(9 * Cin, F).astype(COMPUTE_DTYPE)
    wb1_r = wb1.reshape(9 * F, F).astype(COMPUTE_DTYPE)
    w3_r = r["w3"].reshape(9 * F, Cm).astype(COMPUTE_DTYPE)
    wh = jnp.transpose(jnp.concatenate([r["wo"], r["ws"]], axis=1)).astype(COMPUTE_DTYPE)
    bh = jnp.transpose(jnp.concatenate([r["bo"], r["bs"]], axis=1))   # (Ch, 1) f32

    def wspec(shape):
        return pl.BlockSpec(shape, lambda n, _s=shape: (0,) * len(_s))

    f0c, f1c, off0, sco0, off1, sco1 = pl.pallas_call(
        _fused_forward_kernel,
        out_shape=(
            jax.ShapeDtypeStruct((N, F, H0 * W0), jnp.float32),
            jax.ShapeDtypeStruct((N, F, H1 * W1), jnp.float32),
            jax.ShapeDtypeStruct((N, Coff, H0 * W0), jnp.float32),
            jax.ShapeDtypeStruct((N, Csco, H0 * W0), jnp.float32),
            jax.ShapeDtypeStruct((N, Coff, H1 * W1), jnp.float32),
            jax.ShapeDtypeStruct((N, Csco, H1 * W1), jnp.float32),
        ),
        grid=(N,),
        in_specs=[
            pl.BlockSpec((1, H0, W0, Cin), lambda n: (n, 0, 0, 0)),
            wspec((9 * Cin, F)), wspec((1, F)),
            wspec((9 * F, F)), wspec((1, F)),
            wspec((9 * F, Cm)), wspec((1, Cm)),
            wspec((Ch, Cm)), wspec((Ch, 1)),
        ],
        out_specs=(
            pl.BlockSpec((1, F, H0 * W0), lambda n: (n, 0, 0)),
            pl.BlockSpec((1, F, H1 * W1), lambda n: (n, 0, 0)),
            pl.BlockSpec((1, Coff, H0 * W0), lambda n: (n, 0, 0)),
            pl.BlockSpec((1, Csco, H0 * W0), lambda n: (n, 0, 0)),
            pl.BlockSpec((1, Coff, H1 * W1), lambda n: (n, 0, 0)),
            pl.BlockSpec((1, Csco, H1 * W1), lambda n: (n, 0, 0)),
        ),
        scratch_shapes=[
            pltpu.VMEM((H0 + 2, W0 + 2, Cin), jnp.float32),   # padded input
            pltpu.VMEM((H0 + 2, W0 + 2, F), jnp.float32),     # padded f0
            pltpu.VMEM((H1 + 2, W1 + 2, F), jnp.float32),     # padded pooled / f1
        ],
        compiler_params=pltpu.CompilerParams(
            dimension_semantics=("parallel",)),   # batch across v7x TensorCores
    )(x, wb0_r, bb0, wb1_r, bb1, w3_r, r["b3"], wh, bh)

    # Channel-major kernel outputs -> NCHW via free contiguous reshapes.
    backbone_out = {0: f0c.reshape(N, F, H0, W0),
                    1: f1c.reshape(N, F, H1, W1)}
    rpn_out = {
        0: {"anchor_offsets": off0.reshape(N, Coff, H0, W0),
            "objectness_scores": sco0.reshape(N, Csco, H0, W0)},
        1: {"anchor_offsets": off1.reshape(N, Coff, H1, W1),
            "objectness_scores": sco1.reshape(N, Csco, H1, W1)},
    }
    # TODO(synk): proposal decoding / NMS of the paper's full pipeline is not a
    # tensor op in this module's forward and is intentionally not reproduced.
    return {"rpn_out": rpn_out, "backbone_out": backbone_out}


if __name__ == "__main__":
    key = jax.random.PRNGKey(0)
    k_x, k_p = jax.random.split(key)
    x = jax.random.normal(k_x, (2, 4, 16, 16), jnp.float32)   # NCHW input
    params = init_params(k_p, in_ch=4, fpn_ch=32, rpn_ch=32, num_anchors=3)

    fwd = jax.jit(oriented_rcnn_forward)
    out = fwd(x, params)
    jax.block_until_ready(jax.tree_util.tree_leaves(out))

    # light sanity checks on shapes / values
    assert out["backbone_out"][0].shape == (2, 32, 16, 16)
    assert out["backbone_out"][1].shape == (2, 32, 8, 8)
    assert out["rpn_out"][0]["anchor_offsets"].shape == (2, 18, 16, 16)
    assert out["rpn_out"][0]["objectness_scores"].shape == (2, 3, 16, 16)
    assert out["rpn_out"][1]["anchor_offsets"].shape == (2, 18, 8, 8)
    assert out["rpn_out"][1]["objectness_scores"].shape == (2, 3, 8, 8)
    assert all(bool(jnp.all(jnp.isfinite(l)))
               for l in jax.tree_util.tree_leaves(out))
    print("KERNEL_OK")
</pallas_src>

<mosaic_0001>
module attributes {stable_mosaic.version = 11 : i64} {
  func.func @_fused_forward_kernel(%arg0: i32, %arg1: memref<1x16x16x4xf32, #tpu.memory_space<vmem>>, %arg2: memref<36x32xbf16, #tpu.memory_space<vmem>>, %arg3: memref<1x32xf32, #tpu.memory_space<vmem>>, %arg4: memref<288x32xbf16, #tpu.memory_space<vmem>>, %arg5: memref<1x32xf32, #tpu.memory_space<vmem>>, %arg6: memref<288x32xbf16, #tpu.memory_space<vmem>>, %arg7: memref<1x32xf32, #tpu.memory_space<vmem>>, %arg8: memref<21x32xbf16, #tpu.memory_space<vmem>>, %arg9: memref<21x1xf32, #tpu.memory_space<vmem>>, %arg10: memref<1x32x256xf32, #tpu.memory_space<vmem>>, %arg11: memref<1x32x64xf32, #tpu.memory_space<vmem>>, %arg12: memref<1x18x256xf32, #tpu.memory_space<vmem>>, %arg13: memref<1x3x256xf32, #tpu.memory_space<vmem>>, %arg14: memref<1x18x64xf32, #tpu.memory_space<vmem>>, %arg15: memref<1x3x64xf32, #tpu.memory_space<vmem>>, %arg16: memref<18x18x4xf32, #tpu.memory_space<vmem>>, %arg17: memref<18x18x32xf32, #tpu.memory_space<vmem>>, %arg18: memref<10x10x32xf32, #tpu.memory_space<vmem>>) attributes {dimension_semantics = [#tpu.dimension_semantics<parallel>], iteration_bounds = array<i64: 2>, scalar_prefetch = 0 : i64, scratch_operands = 3 : i64, tpu.core_type = #tpu.core_type<tc>, window_params = [{transform_indices = @transform_0, window_bounds = array<i64: 1, 16, 16, 4>}, {pipeline_mode = #tpu.pipeline_mode<synchronous>, transform_indices = @transform_1, window_bounds = array<i64: 36, 32>}, {pipeline_mode = #tpu.pipeline_mode<synchronous>, transform_indices = @transform_2, window_bounds = array<i64: 1, 32>}, {pipeline_mode = #tpu.pipeline_mode<synchronous>, transform_indices = @transform_3, window_bounds = array<i64: 288, 32>}, {pipeline_mode = #tpu.pipeline_mode<synchronous>, transform_indices = @transform_4, window_bounds = array<i64: 1, 32>}, {pipeline_mode = #tpu.pipeline_mode<synchronous>, transform_indices = @transform_5, window_bounds = array<i64: 288, 32>}, {pipeline_mode = #tpu.pipeline_mode<synchronous>, transform_indices = @transform_6, window_bounds = array<i64: 1, 32>}, {pipeline_mode = #tpu.pipeline_mode<synchronous>, transform_indices = @transform_7, window_bounds = array<i64: 21, 32>}, {pipeline_mode = #tpu.pipeline_mode<synchronous>, transform_indices = @transform_8, window_bounds = array<i64: 21, 1>}, {transform_indices = @transform_9, window_bounds = array<i64: 1, 32, 256>}, {transform_indices = @transform_10, window_bounds = array<i64: 1, 32, 64>}, {transform_indices = @transform_11, window_bounds = array<i64: 1, 18, 256>}, {transform_indices = @transform_12, window_bounds = array<i64: 1, 3, 256>}, {transform_indices = @transform_13, window_bounds = array<i64: 1, 18, 64>}, {transform_indices = @transform_14, window_bounds = array<i64: 1, 3, 64>}]} {
    %c0 = arith.constant 0 : index
    %c0_0 = arith.constant 0 : index
    %c0_1 = arith.constant 0 : index
    %c0_2 = arith.constant 0 : index
    %0 = vector.load %arg1[%c0, %c0_0, %c0_1, %c0_2] : memref<1x16x16x4xf32, #tpu.memory_space<vmem>>, vector<1x16x16x4xf32>
    %1 = vector.shape_cast %0 : vector<1x16x16x4xf32> to vector<16x16x4xf32>
    %cst = arith.constant 0.000000e+00 : f32
    %2 = vector.broadcast %cst : f32 to vector<18x18x4xf32>
    %c0_3 = arith.constant 0 : index
    %c0_4 = arith.constant 0 : index
    %c0_5 = arith.constant 0 : index
    %3 = vector.load %arg16[%c0_3, %c0_4, %c0_5] : memref<18x18x4xf32, #tpu.memory_space<vmem>>, vector<18x18x4xf32>
    tpu.vector_store %arg16[%c0_3, %c0_4, %c0_5], %2 {strides = array<i32>} : memref<18x18x4xf32, #tpu.memory_space<vmem>>, vector<18x18x4xf32>,
    %c1 = arith.constant 1 : index
    %c1_6 = arith.constant 1 : index
    %c0_7 = arith.constant 0 : index
    %4 = vector.load %arg16[%c1, %c1_6, %c0_7] : memref<18x18x4xf32, #tpu.memory_space<vmem>>, vector<16x16x4xf32>
    tpu.vector_store %arg16[%c1, %c1_6, %c0_7], %1 {strides = array<i32>} : memref<18x18x4xf32, #tpu.memory_space<vmem>>, vector<16x16x4xf32>,
    %c0_8 = arith.constant 0 : index
    %c0_9 = arith.constant 0 : index
    %c0_10 = arith.constant 0 : index
    %5 = vector.load %arg16[%c0_8, %c0_9, %c0_10] : memref<18x18x4xf32, #tpu.memory_space<vmem>>, vector<18x18x4xf32>
    %6 = vector.extract_strided_slice %5 {offsets = [0, 0, 0], sizes = [16, 16, 4], strides = [1, 1, 1]} : vector<18x18x4xf32> to vector<16x16x4xf32>
    %7 = vector.shape_cast %6 : vector<16x16x4xf32> to vector<256x4xf32>
    %8 = vector.extract_strided_slice %5 {offsets = [0, 1, 0], sizes = [16, 16, 4], strides = [1, 1, 1]} : vector<18x18x4xf32> to vector<16x16x4xf32>
    %9 = vector.shape_cast %8 : vector<16x16x4xf32> to vector<256x4xf32>
    %10 = vector.extract_strided_slice %5 {offsets = [0, 2, 0], sizes = [16, 16, 4], strides = [1, 1, 1]} : vector<18x18x4xf32> to vector<16x16x4xf32>
    %11 = vector.shape_cast %10 : vector<16x16x4xf32> to vector<256x4xf32>
    %12 = vector.extract_strided_slice %5 {offsets = [1, 0, 0], sizes = [16, 16, 4], strides = [1, 1, 1]} : vector<18x18x4xf32> to vector<16x16x4xf32>
    %13 = vector.shape_cast %12 : vector<16x16x4xf32> to vector<256x4xf32>
    %14 = vector.extract_strided_slice %5 {offsets = [1, 1, 0], sizes = [16, 16, 4], strides = [1, 1, 1]} : vector<18x18x4xf32> to vector<16x16x4xf32>
    %15 = vector.shape_cast %14 : vector<16x16x4xf32> to vector<256x4xf32>
    %16 = vector.extract_strided_slice %5 {offsets = [1, 2, 0], sizes = [16, 16, 4], strides = [1, 1, 1]} : vector<18x18x4xf32> to vector<16x16x4xf32>
    %17 = vector.shape_cast %16 : vector<16x16x4xf32> to vector<256x4xf32>
    %18 = vector.extract_strided_slice %5 {offsets = [2, 0, 0], sizes = [16, 16, 4], strides = [1, 1, 1]} : vector<18x18x4xf32> to vector<16x16x4xf32>
    %19 = vector.shape_cast %18 : vector<16x16x4xf32> to vector<256x4xf32>
    %20 = vector.extract_strided_slice %5 {offsets = [2, 1, 0], sizes = [16, 16, 4], strides = [1, 1, 1]} : vector<18x18x4xf32> to vector<16x16x4xf32>
    %21 = vector.shape_cast %20 : vector<16x16x4xf32> to vector<256x4xf32>
    %22 = vector.extract_strided_slice %5 {offsets = [2, 2, 0], sizes = [16, 16, 4], strides = [1, 1, 1]} : vector<18x18x4xf32> to vector<16x16x4xf32>
    %23 = vector.shape_cast %22 : vector<16x16x4xf32> to vector<256x4xf32>
    %24 = tpu.concatenate %7, %9, %11, %13, %15, %17, %19, %21, %23 in 1 : vector<256x4xf32>, vector<256x4xf32>, vector<256x4xf32>, vector<256x4xf32>, vector<256x4xf32>, vector<256x4xf32>, vector<256x4xf32>, vector<256x4xf32>, vector<256x4xf32> -> vector<256x36xf32>
    %25 = arith.truncf %24 : vector<256x36xf32> to vector<256x36xbf16>
    %c0_11 = arith.constant 0 : index
    %c0_12 = arith.constant 0 : index
    %26 = vector.load %arg2[%c0_11, %c0_12] : memref<36x32xbf16, #tpu.memory_space<vmem>>, vector<36x32xbf16>
    %cst_13 = arith.constant dense<0.000000e+00> : vector<256x32xf32>
    %27 = tpu.matmul %25, %26, %cst_13 {dimension_numbers = #tpu.dot_dimension_numbers<[1], [0], [0], [1], [0, 0, 1, 1], [], []>} : vector<256x36xbf16>, vector<36x32xbf16>, vector<256x32xf32> -> vector<256x32xf32>
    %c0_14 = arith.constant 0 : index
    %c0_15 = arith.constant 0 : index
    %28 = vector.load %arg3[%c0_14, %c0_15] : memref<1x32xf32, #tpu.memory_space<vmem>>, vector<1x32xf32>
    %29 = vector.broadcast %28 : vector<1x32xf32> to vector<256x32xf32>
    %30 = arith.addf %27, %29 : vector<256x32xf32>
    %cst_16 = arith.constant 0.000000e+00 : f32
    %31 = vector.broadcast %cst_16 : f32 to vector<256x32xf32>
    %32 = arith.maximumf %30, %31 : vector<256x32xf32>
    %33 = tpu.transpose %32, [1, 0] : vector<256x32xf32> -> vector<32x256xf32>
    %c0_17 = arith.constant 0 : index
    %c0_18 = arith.constant 0 : index
    %c0_19 = arith.constant 0 : index
    %34 = vector.load %arg10[%c0_17, %c0_18, %c0_19] : memref<1x32x256xf32, #tpu.memory_space<vmem>>, vector<1x32x256xf32>
    %35 = vector.shape_cast %34 : vector<1x32x256xf32> to vector<32x256xf32>
    %36 = vector.shape_cast %33 : vector<32x256xf32> to vector<1x32x256xf32>
    tpu.vector_store %arg10[%c0_17, %c0_18, %c0_19], %36 {strides = array<i32>} : memref<1x32x256xf32, #tpu.memory_space<vmem>>, vector<1x32x256xf32>,
    %37 = vector.shape_cast %32 : vector<256x32xf32> to vector<16x8x2x32xf32>
    %38 = vector.extract_strided_slice %37 {offsets = [0, 0, 0, 0], sizes = [16, 8, 1, 32], strides = [1, 1, 1, 1]} : vector<16x8x2x32xf32> to vector<16x8x1x32xf32>
    %39 = vector.shape_cast %38 : vector<16x8x1x32xf32> to vector<16x8x32xf32>
    %40 = vector.extract_strided_slice %37 {offsets = [0, 0, 1, 0], sizes = [16, 8, 1, 32], strides = [1, 1, 1, 1]} : vector<16x8x2x32xf32> to vector<16x8x1x32xf32>
    %41 = vector.shape_cast %40 : vector<16x8x1x32xf32> to vector<16x8x32xf32>
    %42 = arith.maximumf %39, %41 : vector<16x8x32xf32>
    %43 = vector.shape_cast %42 : vector<16x8x32xf32> to vector<8x2x8x32xf32>
    %44 = vector.extract_strided_slice %43 {offsets = [0, 0, 0, 0], sizes = [8, 1, 8, 32], strides = [1, 1, 1, 1]} : vector<8x2x8x32xf32> to vector<8x1x8x32xf32>
    %45 = vector.shape_cast %44 : vector<8x1x8x32xf32> to vector<8x8x32xf32>
    %46 = vector.extract_strided_slice %43 {offsets = [0, 1, 0, 0], sizes = [8, 1, 8, 32], strides = [1, 1, 1, 1]} : vector<8x2x8x32xf32> to vector<8x1x8x32xf32>
    %47 = vector.shape_cast %46 : vector<8x1x8x32xf32> to vector<8x8x32xf32>
    %48 = arith.maximumf %45, %47 : vector<8x8x32xf32>
    %cst_20 = arith.constant 0.000000e+00 : f32
    %49 = vector.broadcast %cst_20 : f32 to vector<10x10x32xf32>
    %c0_21 = arith.constant 0 : index
    %c0_22 = arith.constant 0 : index
    %c0_23 = arith.constant 0 : index
    %50 = vector.load %arg18[%c0_21, %c0_22, %c0_23] : memref<10x10x32xf32, #tpu.memory_space<vmem>>, vector<10x10x32xf32>
    tpu.vector_store %arg18[%c0_21, %c0_22, %c0_23], %49 {strides = array<i32>} : memref<10x10x32xf32, #tpu.memory_space<vmem>>, vector<10x10x32xf32>,
    %c1_24 = arith.constant 1 : index
    %c1_25 = arith.constant 1 : index
    %c0_26 = arith.constant 0 : index
    %51 = vector.load %arg18[%c1_24, %c1_25, %c0_26] : memref<10x10x32xf32, #tpu.memory_space<vmem>>, vector<8x8x32xf32>
    tpu.vector_store %arg18[%c1_24, %c1_25, %c0_26], %48 {strides = array<i32>} : memref<10x10x32xf32, #tpu.memory_space<vmem>>, vector<8x8x32xf32>,
    %c0_27 = arith.constant 0 : index
    %c0_28 = arith.constant 0 : index
    %c0_29 = arith.constant 0 : index
    %52 = vector.load %arg18[%c0_27, %c0_28, %c0_29] : memref<10x10x32xf32, #tpu.memory_space<vmem>>, vector<10x10x32xf32>
    %53 = vector.extract_strided_slice %52 {offsets = [0, 0, 0], sizes = [8, 8, 32], strides = [1, 1, 1]} : vector<10x10x32xf32> to vector<8x8x32xf32>
    %54 = vector.shape_cast %53 : vector<8x8x32xf32> to vector<64x32xf32>
    %55 = vector.extract_strided_slice %52 {offsets = [0, 1, 0], sizes = [8, 8, 32], strides = [1, 1, 1]} : vector<10x10x32xf32> to vector<8x8x32xf32>
    %56 = vector.shape_cast %55 : vector<8x8x32xf32> to vector<64x32xf32>
    %57 = vector.extract_strided_slice %52 {offsets = [0, 2, 0], sizes = [8, 8, 32], strides = [1, 1, 1]} : vector<10x10x32xf32> to vector<8x8x32xf32>
    %58 = vector.shape_cast %57 : vector<8x8x32xf32> to vector<64x32xf32>
    %59 = vector.extract_strided_slice %52 {offsets = [1, 0, 0], sizes = [8, 8, 32], strides = [1, 1, 1]} : vector<10x10x32xf32> to vector<8x8x32xf32>
    %60 = vector.shape_cast %59 : vector<8x8x32xf32> to vector<64x32xf32>
    %61 = vector.extract_strided_slice %52 {offsets = [1, 1, 0], sizes = [8, 8, 32], strides = [1, 1, 1]} : vector<10x10x32xf32> to vector<8x8x32xf32>
    %62 = vector.shape_cast %61 : vector<8x8x32xf32> to vector<64x32xf32>
    %63 = vector.extract_strided_slice %52 {offsets = [1, 2, 0], sizes = [8, 8, 32], strides = [1, 1, 1]} : vector<10x10x32xf32> to vector<8x8x32xf32>
    %64 = vector.shape_cast %63 : vector<8x8x32xf32> to vector<64x32xf32>
    %65 = vector.extract_strided_slice %52 {offsets = [2, 0, 0], sizes = [8, 8, 32], strides = [1, 1, 1]} : vector<10x10x32xf32> to vector<8x8x32xf32>
    %66 = vector.shape_cast %65 : vector<8x8x32xf32> to vector<64x32xf32>
    %67 = vector.extract_strided_slice %52 {offsets = [2, 1, 0], sizes = [8, 8, 32], strides = [1, 1, 1]} : vector<10x10x32xf32> to vector<8x8x32xf32>
    %68 = vector.shape_cast %67 : vector<8x8x32xf32> to vector<64x32xf32>
    %69 = vector.extract_strided_slice %52 {offsets = [2, 2, 0], sizes = [8, 8, 32], strides = [1, 1, 1]} : vector<10x10x32xf32> to vector<8x8x32xf32>
    %70 = vector.shape_cast %69 : vector<8x8x32xf32> to vector<64x32xf32>
    %71 = tpu.concatenate %54, %56, %58, %60, %62, %64, %66, %68, %70 in 1 : vector<64x32xf32>, vector<64x32xf32>, vector<64x32xf32>, vector<64x32xf32>, vector<64x32xf32>, vector<64x32xf32>, vector<64x32xf32>, vector<64x32xf32>, vector<64x32xf32> -> vector<64x288xf32>
    %72 = arith.truncf %71 : vector<64x288xf32> to vector<64x288xbf16>
    %c0_30 = arith.constant 0 : index
    %c0_31 = arith.constant 0 : index
    %73 = vector.load %arg4[%c0_30, %c0_31] : memref<288x32xbf16, #tpu.memory_space<vmem>>, vector<288x32xbf16>
    %cst_32 = arith.constant dense<0.000000e+00> : vector<64x32xf32>
    %74 = tpu.matmul %72, %73, %cst_32 {dimension_numbers = #tpu.dot_dimension_numbers<[1], [0], [0], [1], [0, 0, 1, 1], [], []>} : vector<64x288xbf16>, vector<288x32xbf16>, vector<64x32xf32> -> vector<64x32xf32>
    %c0_33 = arith.constant 0 : index
    %c0_34 = arith.constant 0 : index
    %75 = vector.load %arg5[%c0_33, %c0_34] : memref<1x32xf32, #tpu.memory_space<vmem>>, vector<1x32xf32>
    %76 = vector.broadcast %75 : vector<1x32xf32> to vector<64x32xf32>
    %77 = arith.addf %74, %76 : vector<64x32xf32>
    %cst_35 = arith.constant 0.000000e+00 : f32
    %78 = vector.broadcast %cst_35 : f32 to vector<64x32xf32>
    %79 = arith.maximumf %77, %78 : vector<64x32xf32>
    %80 = tpu.transpose %79, [1, 0] : vector<64x32xf32> -> vector<32x64xf32>
    %c0_36 = arith.constant 0 : index
    %c0_37 = arith.constant 0 : index
    %c0_38 = arith.constant 0 : index
    %81 = vector.load %arg11[%c0_36, %c0_37, %c0_38] : memref<1x32x64xf32, #tpu.memory_space<vmem>>, vector<1x32x64xf32>
    %82 = vector.shape_cast %81 : vector<1x32x64xf32> to vector<32x64xf32>
    %83 = vector.shape_cast %80 : vector<32x64xf32> to vector<1x32x64xf32>
    tpu.vector_store %arg11[%c0_36, %c0_37, %c0_38], %83 {strides = array<i32>} : memref<1x32x64xf32, #tpu.memory_space<vmem>>, vector<1x32x64xf32>,
    %84 = vector.shape_cast %32 : vector<256x32xf32> to vector<16x16x32xf32>
    %cst_39 = arith.constant 0.000000e+00 : f32
    %85 = vector.broadcast %cst_39 : f32 to vector<18x18x32xf32>
    %c0_40 = arith.constant 0 : index
    %c0_41 = arith.constant 0 : index
    %c0_42 = arith.constant 0 : index
    %86 = vector.load %arg17[%c0_40, %c0_41, %c0_42] : memref<18x18x32xf32, #tpu.memory_space<vmem>>, vector<18x18x32xf32>
    tpu.vector_store %arg17[%c0_40, %c0_41, %c0_42], %85 {strides = array<i32>} : memref<18x18x32xf32, #tpu.memory_space<vmem>>, vector<18x18x32xf32>,
    %c1_43 = arith.constant 1 : index
    %c1_44 = arith.constant 1 : index
    %c0_45 = arith.constant 0 : index
    %87 = vector.load %arg17[%c1_43, %c1_44, %c0_45] : memref<18x18x32xf32, #tpu.memory_space<vmem>>, vector<16x16x32xf32>
    tpu.vector_store %arg17[%c1_43, %c1_44, %c0_45], %84 {strides = array<i32>} : memref<18x18x32xf32, #tpu.memory_space<vmem>>, vector<16x16x32xf32>,
    %c0_46 = arith.constant 0 : index
    %c0_47 = arith.constant 0 : index
    %c0_48 = arith.constant 0 : index
    %88 = vector.load %arg17[%c0_46, %c0_47, %c0_48] : memref<18x18x32xf32, #tpu.memory_space<vmem>>, vector<18x18x32xf32>
    %89 = vector.extract_strided_slice %88 {offsets = [0, 0, 0], sizes = [16, 16, 32], strides = [1, 1, 1]} : vector<18x18x32xf32> to vector<16x16x32xf32>
    %90 = vector.shape_cast %89 : vector<16x16x32xf32> to vector<256x32xf32>
    %91 = vector.extract_strided_slice %88 {offsets = [0, 1, 0], sizes = [16, 16, 32], strides = [1, 1, 1]} : vector<18x18x32xf32> to vector<16x16x32xf32>
    %92 = vector.shape_cast %91 : vector<16x16x32xf32> to vector<256x32xf32>
    %93 = vector.extract_strided_slice %88 {offsets = [0, 2, 0], sizes = [16, 16, 32], strides = [1, 1, 1]} : vector<18x18x32xf32> to vector<16x16x32xf32>
    %94 = vector.shape_cast %93 : vector<16x16x32xf32> to vector<256x32xf32>
    %95 = vector.extract_strided_slice %88 {offsets = [1, 0, 0], sizes = [16, 16, 32], strides = [1, 1, 1]} : vector<18x18x32xf32> to vector<16x16x32xf32>
    %96 = vector.shape_cast %95 : vector<16x16x32xf32> to vector<256x32xf32>
    %97 = vector.extract_strided_slice %88 {offsets = [1, 1, 0], sizes = [16, 16, 32], strides = [1, 1, 1]} : vector<18x18x32xf32> to vector<16x16x32xf32>
    %98 = vector.shape_cast %97 : vector<16x16x32xf32> to vector<256x32xf32>
    %99 = vector.extract_strided_slice %88 {offsets = [1, 2, 0], sizes = [16, 16, 32], strides = [1, 1, 1]} : vector<18x18x32xf32> to vector<16x16x32xf32>
    %100 = vector.shape_cast %99 : vector<16x16x32xf32> to vector<256x32xf32>
    %101 = vector.extract_strided_slice %88 {offsets = [2, 0, 0], sizes = [16, 16, 32], strides = [1, 1, 1]} : vector<18x18x32xf32> to vector<16x16x32xf32>
    %102 = vector.shape_cast %101 : vector<16x16x32xf32> to vector<256x32xf32>
    %103 = vector.extract_strided_slice %88 {offsets = [2, 1, 0], sizes = [16, 16, 32], strides = [1, 1, 1]} : vector<18x18x32xf32> to vector<16x16x32xf32>
    %104 = vector.shape_cast %103 : vector<16x16x32xf32> to vector<256x32xf32>
    %105 = vector.extract_strided_slice %88 {offsets = [2, 2, 0], sizes = [16, 16, 32], strides = [1, 1, 1]} : vector<18x18x32xf32> to vector<16x16x32xf32>
    %106 = vector.shape_cast %105 : vector<16x16x32xf32> to vector<256x32xf32>
    %107 = tpu.concatenate %90, %92, %94, %96, %98, %100, %102, %104, %106 in 1 : vector<256x32xf32>, vector<256x32xf32>, vector<256x32xf32>, vector<256x32xf32>, vector<256x32xf32>, vector<256x32xf32>, vector<256x32xf32>, vector<256x32xf32>, vector<256x32xf32> -> vector<256x288xf32>
    %108 = arith.truncf %107 : vector<256x288xf32> to vector<256x288xbf16>
    %c0_49 = arith.constant 0 : index
    %c0_50 = arith.constant 0 : index
    %109 = vector.load %arg6[%c0_49, %c0_50] : memref<288x32xbf16, #tpu.memory_space<vmem>>, vector<288x32xbf16>
    %cst_51 = arith.constant dense<0.000000e+00> : vector<256x32xf32>
    %110 = tpu.matmul %108, %109, %cst_51 {dimension_numbers = #tpu.dot_dimension_numbers<[1], [0], [0], [1], [0, 0, 1, 1], [], []>} : vector<256x288xbf16>, vector<288x32xbf16>, vector<256x32xf32> -> vector<256x32xf32>
    %c0_52 = arith.constant 0 : index
    %c0_53 = arith.constant 0 : index
    %111 = vector.load %arg7[%c0_52, %c0_53] : memref<1x32xf32, #tpu.memory_space<vmem>>, vector<1x32xf32>
    %112 = vector.broadcast %111 : vector<1x32xf32> to vector<256x32xf32>
    %113 = arith.addf %110, %112 : vector<256x32xf32>
    %cst_54 = arith.constant 0.000000e+00 : f32
    %114 = vector.broadcast %cst_54 : f32 to vector<256x32xf32>
    %115 = arith.maximumf %113, %114 : vector<256x32xf32>
    %116 = tpu.transpose %115, [1, 0] : vector<256x32xf32> -> vector<32x256xf32>
    %117 = arith.truncf %116 : vector<32x256xf32> to vector<32x256xbf16>
    %c0_55 = arith.constant 0 : index
    %c0_56 = arith.constant 0 : index
    %118 = vector.load %arg8[%c0_55, %c0_56] : memref<21x32xbf16, #tpu.memory_space<vmem>>, vector<21x32xbf16>
    %cst_57 = arith.constant dense<0.000000e+00> : vector<21x256xf32>
    %119 = tpu.matmul %118, %117, %cst_57 {dimension_numbers = #tpu.dot_dimension_numbers<[1], [0], [0], [1], [0, 0, 1, 1], [], []>} : vector<21x32xbf16>, vector<32x256xbf16>, vector<21x256xf32> -> vector<21x256xf32>
    %c0_58 = arith.constant 0 : index
    %c0_59 = arith.constant 0 : index
    %120 = vector.load %arg9[%c0_58, %c0_59] : memref<21x1xf32, #tpu.memory_space<vmem>>, vector<21x1xf32>
    %121 = vector.broadcast %120 : vector<21x1xf32> to vector<21x256xf32>
    %122 = arith.addf %119, %121 : vector<21x256xf32>
    %123 = vector.extract_strided_slice %122 {offsets = [0, 0], sizes = [18, 256], strides = [1, 1]} : vector<21x256xf32> to vector<18x256xf32>
    %c0_60 = arith.constant 0 : index
    %c0_61 = arith.constant 0 : index
    %c0_62 = arith.constant 0 : index
    %124 = vector.load %arg12[%c0_60, %c0_61, %c0_62] : memref<1x18x256xf32, #tpu.memory_space<vmem>>, vector<1x18x256xf32>
    %125 = vector.shape_cast %124 : vector<1x18x256xf32> to vector<18x256xf32>
    %126 = vector.shape_cast %123 : vector<18x256xf32> to vector<1x18x256xf32>
    tpu.vector_store %arg12[%c0_60, %c0_61, %c0_62], %126 {strides = array<i32>} : memref<1x18x256xf32, #tpu.memory_space<vmem>>, vector<1x18x256xf32>,
    %127 = vector.extract_strided_slice %122 {offsets = [18, 0], sizes = [3, 256], strides = [1, 1]} : vector<21x256xf32> to vector<3x256xf32>
    %c0_63 = arith.constant 0 : index
    %c0_64 = arith.constant 0 : index
    %c0_65 = arith.constant 0 : index
    %128 = vector.load %arg13[%c0_63, %c0_64, %c0_65] : memref<1x3x256xf32, #tpu.memory_space<vmem>>, vector<1x3x256xf32>
    %129 = vector.shape_cast %128 : vector<1x3x256xf32> to vector<3x256xf32>
    %130 = vector.shape_cast %127 : vector<3x256xf32> to vector<1x3x256xf32>
    tpu.vector_store %arg13[%c0_63, %c0_64, %c0_65], %130 {strides = array<i32>} : memref<1x3x256xf32, #tpu.memory_space<vmem>>, vector<1x3x256xf32>,
    %131 = vector.shape_cast %79 : vector<64x32xf32> to vector<8x8x32xf32>
    %cst_66 = arith.constant 0.000000e+00 : f32
    %132 = vector.broadcast %cst_66 : f32 to vector<10x10x32xf32>
    %c0_67 = arith.constant 0 : index
    %c0_68 = arith.constant 0 : index
    %c0_69 = arith.constant 0 : index
    %133 = vector.load %arg18[%c0_67, %c0_68, %c0_69] : memref<10x10x32xf32, #tpu.memory_space<vmem>>, vector<10x10x32xf32>
    tpu.vector_store %arg18[%c0_67, %c0_68, %c0_69], %132 {strides = array<i32>} : memref<10x10x32xf32, #tpu.memory_space<vmem>>, vector<10x10x32xf32>,
    %c1_70 = arith.constant 1 : index
    %c1_71 = arith.constant 1 : index
    %c0_72 = arith.constant 0 : index
    %134 = vector.load %arg18[%c1_70, %c1_71, %c0_72] : memref<10x10x32xf32, #tpu.memory_space<vmem>>, vector<8x8x32xf32>
    tpu.vector_store %arg18[%c1_70, %c1_71, %c0_72], %131 {strides = array<i32>} : memref<10x10x32xf32, #tpu.memory_space<vmem>>, vector<8x8x32xf32>,
    %c0_73 = arith.constant 0 : index
    %c0_74 = arith.constant 0 : index
    %c0_75 = arith.constant 0 : index
    %135 = vector.load %arg18[%c0_73, %c0_74, %c0_75] : memref<10x10x32xf32, #tpu.memory_space<vmem>>, vector<10x10x32xf32>
    %136 = vector.extract_strided_slice %135 {offsets = [0, 0, 0], sizes = [8, 8, 32], strides = [1, 1, 1]} : vector<10x10x32xf32> to vector<8x8x32xf32>
    %137 = vector.shape_cast %136 : vector<8x8x32xf32> to vector<64x32xf32>
    %138 = vector.extract_strided_slice %135 {offsets = [0, 1, 0], sizes = [8, 8, 32], strides = [1, 1, 1]} : vector<10x10x32xf32> to vector<8x8x32xf32>
    %139 = vector.shape_cast %138 : vector<8x8x32xf32> to vector<64x32xf32>
    %140 = vector.extract_strided_slice %135 {offsets = [0, 2, 0], sizes = [8, 8, 32], strides = [1, 1, 1]} : vector<10x10x32xf32> to vector<8x8x32xf32>
    %141 = vector.shape_cast %140 : vector<8x8x32xf32> to vector<64x32xf32>
    %142 = vector.extract_strided_slice %135 {offsets = [1, 0, 0], sizes = [8, 8, 32], strides = [1, 1, 1]} : vector<10x10x32xf32> to vector<8x8x32xf32>
    %143 = vector.shape_cast %142 : vector<8x8x32xf32> to vector<64x32xf32>
    %144 = vector.extract_strided_slice %135 {offsets = [1, 1, 0], sizes = [8, 8, 32], strides = [1, 1, 1]} : vector<10x10x32xf32> to vector<8x8x32xf32>
    %145 = vector.shape_cast %144 : vector<8x8x32xf32> to vector<64x32xf32>
    %146 = vector.extract_strided_slice %135 {offsets = [1, 2, 0], sizes = [8, 8, 32], strides = [1, 1, 1]} : vector<10x10x32xf32> to vector<8x8x32xf32>
    %147 = vector.shape_cast %146 : vector<8x8x32xf32> to vector<64x32xf32>
    %148 = vector.extract_strided_slice %135 {offsets = [2, 0, 0], sizes = [8, 8, 32], strides = [1, 1, 1]} : vector<10x10x32xf32> to vector<8x8x32xf32>
    %149 = vector.shape_cast %148 : vector<8x8x32xf32> to vector<64x32xf32>
    %150 = vector.extract_strided_slice %135 {offsets = [2, 1, 0], sizes = [8, 8, 32], strides = [1, 1, 1]} : vector<10x10x32xf32> to vector<8x8x32xf32>
    %151 = vector.shape_cast %150 : vector<8x8x32xf32> to vector<64x32xf32>
    %152 = vector.extract_strided_slice %135 {offsets = [2, 2, 0], sizes = [8, 8, 32], strides = [1, 1, 1]} : vector<10x10x32xf32> to vector<8x8x32xf32>
    %153 = vector.shape_cast %152 : vector<8x8x32xf32> to vector<64x32xf32>
    %154 = tpu.concatenate %137, %139, %141, %143, %145, %147, %149, %151, %153 in 1 : vector<64x32xf32>, vector<64x32xf32>, vector<64x32xf32>, vector<64x32xf32>, vector<64x32xf32>, vector<64x32xf32>, vector<64x32xf32>, vector<64x32xf32>, vector<64x32xf32> -> vector<64x288xf32>
    %155 = arith.truncf %154 : vector<64x288xf32> to vector<64x288xbf16>
    %c0_76 = arith.constant 0 : index
    %c0_77 = arith.constant 0 : index
    %156 = vector.load %arg6[%c0_76, %c0_77] : memref<288x32xbf16, #tpu.memory_space<vmem>>, vector<288x32xbf16>
    %cst_78 = arith.constant dense<0.000000e+00> : vector<64x32xf32>
    %157 = tpu.matmul %155, %156, %cst_78 {dimension_numbers = #tpu.dot_dimension_numbers<[1], [0], [0], [1], [0, 0, 1, 1], [], []>} : vector<64x288xbf16>, vector<288x32xbf16>, vector<64x32xf32> -> vector<64x32xf32>
    %c0_79 = arith.constant 0 : index
    %c0_80 = arith.constant 0 : index
    %158 = vector.load %arg7[%c0_79, %c0_80] : memref<1x32xf32, #tpu.memory_space<vmem>>, vector<1x32xf32>
    %159 = vector.broadcast %158 : vector<1x32xf32> to vector<64x32xf32>
    %160 = arith.addf %157, %159 : vector<64x32xf32>
    %cst_81 = arith.constant 0.000000e+00 : f32
    %161 = vector.broadcast %cst_81 : f32 to vector<64x32xf32>
    %162 = arith.maximumf %160, %161 : vector<64x32xf32>
    %163 = tpu.transpose %162, [1, 0] : vector<64x32xf32> -> vector<32x64xf32>
    %164 = arith.truncf %163 : vector<32x64xf32> to vector<32x64xbf16>
    %c0_82 = arith.constant 0 : index
    %c0_83 = arith.constant 0 : index
    %165 = vector.load %arg8[%c0_82, %c0_83] : memref<21x32xbf16, #tpu.memory_space<vmem>>, vector<21x32xbf16>
    %cst_84 = arith.constant dense<0.000000e+00> : vector<21x64xf32>
    %166 = tpu.matmul %165, %164, %cst_84 {dimension_numbers = #tpu.dot_dimension_numbers<[1], [0], [0], [1], [0, 0, 1, 1], [], []>} : vector<21x32xbf16>, vector<32x64xbf16>, vector<21x64xf32> -> vector<21x64xf32>
    %c0_85 = arith.constant 0 : index
    %c0_86 = arith.constant 0 : index
    %167 = vector.load %arg9[%c0_85, %c0_86] : memref<21x1xf32, #tpu.memory_space<vmem>>, vector<21x1xf32>
    %168 = vector.broadcast %167 : vector<21x1xf32> to vector<21x64xf32>
    %169 = arith.addf %166, %168 : vector<21x64xf32>
    %170 = vector.extract_strided_slice %169 {offsets = [0, 0], sizes = [18, 64], strides = [1, 1]} : vector<21x64xf32> to vector<18x64xf32>
    %c0_87 = arith.constant 0 : index
    %c0_88 = arith.constant 0 : index
    %c0_89 = arith.constant 0 : index
    %171 = vector.load %arg14[%c0_87, %c0_88, %c0_89] : memref<1x18x64xf32, #tpu.memory_space<vmem>>, vector<1x18x64xf32>
    %172 = vector.shape_cast %171 : vector<1x18x64xf32> to vector<18x64xf32>
    %173 = vector.shape_cast %170 : vector<18x64xf32> to vector<1x18x64xf32>
    tpu.vector_store %arg14[%c0_87, %c0_88, %c0_89], %173 {strides = array<i32>} : memref<1x18x64xf32, #tpu.memory_space<vmem>>, vector<1x18x64xf32>,
    %174 = vector.extract_strided_slice %169 {offsets = [18, 0], sizes = [3, 64], strides = [1, 1]} : vector<21x64xf32> to vector<3x64xf32>
    %c0_90 = arith.constant 0 : index
    %c0_91 = arith.constant 0 : index
    %c0_92 = arith.constant 0 : index
    %175 = vector.load %arg15[%c0_90, %c0_91, %c0_92] : memref<1x3x64xf32, #tpu.memory_space<vmem>>, vector<1x3x64xf32>
    %176 = vector.shape_cast %175 : vector<1x3x64xf32> to vector<3x64xf32>
    %177 = vector.shape_cast %174 : vector<3x64xf32> to vector<1x3x64xf32>
    tpu.vector_store %arg15[%c0_90, %c0_91, %c0_92], %177 {strides = array<i32>} : memref<1x3x64xf32, #tpu.memory_space<vmem>>, vector<1x3x64xf32>,
    return
  }
  func.func @transform_0(%arg0: i32) -> (i32, i32, i32, i32) {
    %c0_i32 = arith.constant 0 : i32
    %c0_i32_0 = arith.constant 0 : i32
    %c0_i32_1 = arith.constant 0 : i32
    %c0_i32_2 = arith.constant 0 : i32
    return %arg0, %c0_i32, %c0_i32_0, %c0_i32_1 : i32, i32, i32, i32
  }
  func.func @transform_1(%arg0: i32) -> (i32, i32) {
    %c0_i32 = arith.constant 0 : i32
    %c0_i32_0 = arith.constant 0 : i32
    %c0_i32_1 = arith.constant 0 : i32
    return %c0_i32, %c0_i32_0 : i32, i32
  }
  func.func @transform_2(%arg0: i32) -> (i32, i32) {
    %c0_i32 = arith.constant 0 : i32
    %c0_i32_0 = arith.constant 0 : i32
    %c0_i32_1 = arith.constant 0 : i32
    return %c0_i32, %c0_i32_0 : i32, i32
  }
  func.func @transform_3(%arg0: i32) -> (i32, i32) {
    %c0_i32 = arith.constant 0 : i32
    %c0_i32_0 = arith.constant 0 : i32
    %c0_i32_1 = arith.constant 0 : i32
    return %c0_i32, %c0_i32_0 : i32, i32
  }
  func.func @transform_4(%arg0: i32) -> (i32, i32) {
    %c0_i32 = arith.constant 0 : i32
    %c0_i32_0 = arith.constant 0 : i32
    %c0_i32_1 = arith.constant 0 : i32
    return %c0_i32, %c0_i32_0 : i32, i32
  }
  func.func @transform_5(%arg0: i32) -> (i32, i32) {
    %c0_i32 = arith.constant 0 : i32
    %c0_i32_0 = arith.constant 0 : i32
    %c0_i32_1 = arith.constant 0 : i32
    return %c0_i32, %c0_i32_0 : i32, i32
  }
  func.func @transform_6(%arg0: i32) -> (i32, i32) {
    %c0_i32 = arith.constant 0 : i32
    %c0_i32_0 = arith.constant 0 : i32
    %c0_i32_1 = arith.constant 0 : i32
    return %c0_i32, %c0_i32_0 : i32, i32
  }
  func.func @transform_7(%arg0: i32) -> (i32, i32) {
    %c0_i32 = arith.constant 0 : i32
    %c0_i32_0 = arith.constant 0 : i32
    %c0_i32_1 = arith.constant 0 : i32
    return %c0_i32, %c0_i32_0 : i32, i32
  }
  func.func @transform_8(%arg0: i32) -> (i32, i32) {
    %c0_i32 = arith.constant 0 : i32
    %c0_i32_0 = arith.constant 0 : i32
    %c0_i32_1 = arith.constant 0 : i32
    return %c0_i32, %c0_i32_0 : i32, i32
  }
  func.func @transform_9(%arg0: i32) -> (i32, i32, i32) {
    %c0_i32 = arith.constant 0 : i32
    %c0_i32_0 = arith.constant 0 : i32
    %c0_i32_1 = arith.constant 0 : i32
    return %arg0, %c0_i32, %c0_i32_0 : i32, i32, i32
  }
  func.func @transform_10(%arg0: i32) -> (i32, i32, i32) {
    %c0_i32 = arith.constant 0 : i32
    %c0_i32_0 = arith.constant 0 : i32
    %c0_i32_1 = arith.constant 0 : i32
    return %arg0, %c0_i32, %c0_i32_0 : i32, i32, i32
  }
  func.func @transform_11(%arg0: i32) -> (i32, i32, i32) {
    %c0_i32 = arith.constant 0 : i32
    %c0_i32_0 = arith.constant 0 : i32
    %c0_i32_1 = arith.constant 0 : i32
    return %arg0, %c0_i32, %c0_i32_0 : i32, i32, i32
  }
  func.func @transform_12(%arg0: i32) -> (i32, i32, i32) {
    %c0_i32 = arith.constant 0 : i32
    %c0_i32_0 = arith.constant 0 : i32
    %c0_i32_1 = arith.constant 0 : i32
    return %arg0, %c0_i32, %c0_i32_0 : i32, i32, i32
  }
  func.func @transform_13(%arg0: i32) -> (i32, i32, i32) {
    %c0_i32 = arith.constant 0 : i32
    %c0_i32_0 = arith.constant 0 : i32
    %c0_i32_1 = arith.constant 0 : i32
    return %arg0, %c0_i32, %c0_i32_0 : i32, i32, i32
  }
  func.func @transform_14(%arg0: i32) -> (i32, i32, i32) {
    %c0_i32 = arith.constant 0 : i32
    %c0_i32_0 = arith.constant 0 : i32
    %c0_i32_1 = arith.constant 0 : i32
    return %arg0, %c0_i32, %c0_i32_0 : i32, i32, i32
  }
}

</mosaic_0001>

<bundles_post_ra>
// kernel: oriented_rcnn_forward.1
= control target key start
LH: loop header
LB: loop body
LE: loop exit
PB: predicated region body
PF: predicated region fallthrough
CT: control target
= control target key end

     0   :  { %s9936_s29 = smov 0   ;;  %s14292_s0 = inlined_call_operand.vmem [shape: f32[2,16,16,4], index: 0, kind: input, shape index: {}]   ;;  %s14293_s1 = inlined_call_operand.vmem [shape: bf16[36,32], index: 1, kind: input, shape index: {}]   ;;  %s14294_s2 = inlined_call_operand.vmem [shape: f32[1,32], index: 2, kind: input, shape index: {}]   ;;  %s14295_s3 = inlined_call_operand.vmem [shape: bf16[288,32], index: 3, kind: input, shape index: {}]   ;;  %s14296_s4 = inlined_call_operand.vmem [shape: f32[1,32], index: 4, kind: input, shape index: {}]   ;;  %s14297_s5 = inlined_call_operand.vmem [shape: bf16[288,32], index: 5, kind: input, shape index: {}]   ;;  %s14298_s6 = inlined_call_operand.vmem [shape: f32[1,32], index: 6, kind: input, shape index: {}]   ;;  %s14299_s7 = inlined_call_operand.vmem [shape: bf16[21,32], index: 7, kind: input, shape index: {}]   ;;  %s14300_s8 = inlined_call_operand.vmem [shape: f32[21,1], index: 8, kind: input, shape index: {}]   ;;  %s14301_s9 = inlined_call_operand.vmem [shape: f32[2,32,256], index: 9, kind: output, shape index: {0}]   ;;  %s14302_s10 = inlined_call_operand.vmem [shape: f32[2,32,64], index: 10, kind: output, shape index: {1}]   ;;  %s14303_s11 = inlined_call_operand.vmem [shape: f32[2,18,256], index: 11, kind: output, shape index: {2}]   ;;  %s14304_s12 = inlined_call_operand.vmem [shape: f32[2,3,256], index: 12, kind: output, shape index: {3}]   ;;  %s14305_s13 = inlined_call_operand.vmem [shape: f32[2,18,64], index: 13, kind: output, shape index: {4}]   ;;  %s14306_s14 = inlined_call_operand.vmem [shape: f32[2,3,64], index: 14, kind: output, shape index: {5}]  }
   0x1 LB: > { %s7661_s30 = sadd.s32 4294967295, %s9846_s29   ;;  %p7665_p0 = scmp.ge.s32.totalorder %s9846_s29, 1  ;;  %s9846_s29 = sphi %s9936_s29, %s25_s29  }
   0x2   : > { %p423_p1 = scmp.lt.s32.totalorder %s9846_s29, 3 }
   0x4   : > { %p424_p2 = pnand %p7665_p0, %p423_p1 }
   0x6   : > { %427 = sbr.rel (%p424_p2) target bundleno = 1893 (0x765), region = 56 }
   0xd   : > { %vm560_vm0 = vcmask 31744   ;;  %vm563_vm1 = vcmask 25600   ;;  %p9946_p3 = scmp.lt.s32.totalorder %s7661_s30, 1  ;;  %v14307_v0 = vmov 0.0   ;;  %vm751_vm2 = vcmask 1046528   ;;  %s9849_s20 = smov 4  }
   0xe   : > { %561 = vst.msk [vmem:[#allocation2] sm:$0xff] %vm560_vm0, %v14307_v0  ;;  %562 = vst.msk [vmem:[#allocation2 + $0x8] sm:$0xff] %vm560_vm0, %v14307_v0  ;;  %vm832_vm3 = vcmask 1045504   ;;  %s9850_s21 = smov 8   ;;  %s9851_s22 = smov 12   ;;  %vm1937_vm4 = vcmask 261120  }
   0xf   : > { %564 = vst.msk [vmem:[#allocation2 + $0x10] sm:$0x3] %vm563_vm1, %v14307_v0  ;;  %567 = vst.msk [vmem:[#allocation2 + $0x28] sm:$0x3] %vm563_vm1, %v14307_v0  ;;  %s14757_s30 = smov (!%p9946_p3, %s7661_s30), 1  ;;  %s9852_s25 = smov 16  }
  0x10   : > { %565 = vst.msk [vmem:[#allocation2 + $0x18] sm:$0xff] %vm560_vm0, %v14307_v0  ;;  %566 = vst.msk [vmem:[#allocation2 + $0x20] sm:$0xff] %vm560_vm0, %v14307_v0  ;;  %s7917_s16 = sshll.u32 %s14757_s30, 8  ;;  %s9853_s28 = smov 20   ;;  %vm2062_vm5 = vcmask 1041408   ;;  %vm1739_vm6 = vcmask 64512  }
  0x11   : > { %568 = vst.msk [vmem:[#allocation2 + $0x30] sm:$0xff] %vm560_vm0, %v14307_v0  ;;  %569 = vst.msk [vmem:[#allocation2 + $0x38] sm:$0xff] %vm560_vm0, %v14307_v0  ;;  %s10068_s19 = scalar_lea.vmem %s14292_s0, %s7917_s16  ;;  %s9854_s15 = smov 24   ;;  %vm1772_vm7 = vcmask 97280   ;;  %vm1805_vm8 = vcmask 130048   ;;  %vm1838_vm9 = vcmask 162816  }
  0x12   : > { %570 = vst.msk [vmem:[#allocation2 + $0x40] sm:$0x3] %vm563_vm1, %v14307_v0  ;;  %573 = vst.msk [vmem:[#allocation2 + $0x58] sm:$0x3] %vm563_vm1, %v14307_v0  ;;  %v530_v1 = vld [vmem:[%s10068_s19 + $0x10] sm:$0xff]  ;;  %v531_v2 = vld [vmem:[%s10068_s19 + $0x18] sm:$0xff] }
  0x13   : > { %571 = vst.msk [vmem:[#allocation2 + $0x48] sm:$0xff] %vm560_vm0, %v14307_v0  ;;  %572 = vst.msk [vmem:[#allocation2 + $0x50] sm:$0xff] %vm560_vm0, %v14307_v0  ;;  %v528_v3 = vld [vmem:[%s10068_s19] sm:$0xff]  ;;  %v529_v4 = vld [vmem:[%s10068_s19 + $0x8] sm:$0xff]  ;;  %s9855_s18 = smov 28   ;;  %vm1871_vm10 = vcmask 195584  }
  0x14   : > { %574 = vst.msk [vmem:[#allocation2 + $0x60] sm:$0xff] %vm560_vm0, %v14307_v0  ;;  %575 = vst.msk [vmem:[#allocation2 + $0x68] sm:$0xff] %vm560_vm0, %v14307_v0  ;;  %v532_v5 = vld [vmem:[%s10068_s19 + $0x20] sm:$0xff]  ;;  %v533_v6 = vld [vmem:[%s10068_s19 + $0x28] sm:$0xff]  ;;  %vm1904_vm11 = vcmask 228352   ;;  %vm2013_vm12 = vcmask 293888  }
  0x15   : > { %576 = vst.msk [vmem:[#allocation2 + $0x70] sm:$0x3] %vm563_vm1, %v14307_v0  ;;  %579 = vst.msk [vmem:[#allocation2 + $0x88] sm:$0x3] %vm563_vm1, %v14307_v0  ;;  %v10079_v7 = vld [vmem:[#allocation2] sm:$0xff]  ;;  %v10081_v8 = vld [vmem:[#allocation2 + $0x8] sm:$0xff] }
  0x16   : > { %577 = vst.msk [vmem:[#allocation2 + $0x78] sm:$0xff] %vm560_vm0, %v14307_v0  ;;  %578 = vst.msk [vmem:[#allocation2 + $0x80] sm:$0xff] %vm560_vm0, %v14307_v0  ;;  %v10083_v9 = vld [vmem:[#allocation2 + $0x10] sm:$0x3]  ;;  %v752_v10 = vrot.slane %v10079_v7, 1  ;;  %v753_v11 = vrot.slane %v10081_v8, 1 }
  0x17   : > { %580 = vst.msk [vmem:[#allocation2 + $0x90] sm:$0xff] %vm560_vm0, %v14307_v0  ;;  %581 = vst.msk [vmem:[#allocation2 + $0x98] sm:$0xff] %vm560_vm0, %v14307_v0  ;;  %v755_v12 = vrot.slane %v10083_v9, 1  ;;  %v534_v13 = vld [vmem:[%s10068_s19 + $0x30] sm:$0xff]  ;;  %v535_v14 = vld [vmem:[%s10068_s19 + $0x38] sm:$0xff]  ;;  %vm3612_vm13 = vcmask 254976  }
  0x18   : > { %582 = vst.msk [vmem:[#allocation2 + $0xa0] sm:$0x3] %vm563_vm1, %v14307_v0  ;;  %585 = vst.msk [vmem:[#allocation2 + $0xb8] sm:$0x3] %vm563_vm1, %v14307_v0  ;;  %v536_v15 = vld [vmem:[%s10068_s19 + $0x40] sm:$0xff]  ;;  %v537_v16 = vld [vmem:[%s10068_s19 + $0x48] sm:$0xff]  ;;  %v754_v18 = vsel %vm751_vm2, %v752_v10, %v753_v11 }
  0x19   : > { %583 = vst.msk [vmem:[#allocation2 + $0xa8] sm:$0xff] %vm560_vm0, %v14307_v0  ;;  %584 = vst.msk [vmem:[#allocation2 + $0xb0] sm:$0xff] %vm560_vm0, %v14307_v0  ;;  %v538_v17 = vld [vmem:[%s10068_s19 + $0x50] sm:$0xff]  ;;  %v756_v19 = vsel %vm751_vm2, %v753_v11, %v755_v12  ;;  %v539_v20 = vld [vmem:[%s10068_s19 + $0x58] sm:$0xff]  ;;  %vm3952_vm14 = vcmask 1041409   ;;  %vm3954_vm15 = vcmask 1042434  }
  0x1a   : > { %586 = vst.msk [vmem:[#allocation2 + $0xc0] sm:$0xff] %vm560_vm0, %v14307_v0  ;;  %587 = vst.msk [vmem:[#allocation2 + $0xc8] sm:$0xff] %vm560_vm0, %v14307_v0  ;;  %v540_v21 = vld [vmem:[%s10068_s19 + $0x60] sm:$0xff]  ;;  %v541_v22 = vld [vmem:[%s10068_s19 + $0x68] sm:$0xff]  ;;  %v8296_v23 = vpack.i.bf16 %v756_v19, %v754_v18  ;;  %s9859_s27 = smov 96   ;;  %s7918_s24 = sshll.u32 %s14757_s30, 6 }
  0x1b   : > { %588 = vst.msk [vmem:[#allocation2 + $0xd0] sm:$0x3] %vm563_vm1, %v14307_v0  ;;  %591 = vst.msk [vmem:[#allocation2 + $0xe8] sm:$0x3] %vm563_vm1, %v14307_v0  ;;  %v542_v24 = vld [vmem:[%s10068_s19 + $0x70] sm:$0xff]  ;;  %v543_v25 = vld [vmem:[%s10068_s19 + $0x78] sm:$0xff] }
  0x1c   : > { %589 = vst.msk [vmem:[#allocation2 + $0xd8] sm:$0xff] %vm560_vm0, %v14307_v0  ;;  %590 = vst.msk [vmem:[#allocation2 + $0xe0] sm:$0xff] %vm560_vm0, %v14307_v0  ;;  %v544_v26 = vld [vmem:[%s10068_s19 + $0x80] sm:$0xff]  ;;  %v545_v27 = vld [vmem:[%s10068_s19 + $0x88] sm:$0xff]  ;;  %8297 = vrot.lane.b32.xlu0 %v8296_v23, %s9849_s20  ;;  %s7676_s16 = sshll.u32 %s14757_s30, 2 }
  0x1d   : > { %592 = vst.msk [vmem:[#allocation2 + $0xf0] sm:$0xff] %vm560_vm0, %v14307_v0  ;;  %593 = vst.msk [vmem:[#allocation2 + $0xf8] sm:$0xff] %vm560_vm0, %v14307_v0  ;;  %v546_v28 = vld [vmem:[%s10068_s19 + $0x90] sm:$0xff]  ;;  %v547_v29 = vld [vmem:[%s10068_s19 + $0x98] sm:$0xff] }
  0x1e   : > { %594 = vst.msk [vmem:[#allocation2 + $0x100] sm:$0x3] %vm563_vm1, %v14307_v0  ;;  %597 = vst.msk [vmem:[#allocation2 + $0x118] sm:$0x3] %vm563_vm1, %v14307_v0 }
  0x1f   : > { %595 = vst.msk [vmem:[#allocation2 + $0x108] sm:$0xff] %vm560_vm0, %v14307_v0  ;;  %596 = vst.msk [vmem:[#allocation2 + $0x110] sm:$0xff] %vm560_vm0, %v14307_v0 }
  0x20   : > { %598 = vst.msk [vmem:[#allocation2 + $0x120] sm:$0xff] %vm560_vm0, %v14307_v0  ;;  %599 = vst.msk [vmem:[#allocation2 + $0x128] sm:$0xff] %vm560_vm0, %v14307_v0 }
  0x21   : > { %600 = vst.msk [vmem:[#allocation2 + $0x130] sm:$0x3] %vm563_vm1, %v14307_v0  ;;  %603 = vst.msk [vmem:[#allocation2 + $0x148] sm:$0x3] %vm563_vm1, %v14307_v0 }
  0x22   : > { %601 = vst.msk [vmem:[#allocation2 + $0x138] sm:$0xff] %vm560_vm0, %v14307_v0  ;;  %602 = vst.msk [vmem:[#allocation2 + $0x140] sm:$0xff] %vm560_vm0, %v14307_v0 }
  0x23   : > { %604 = vst.msk [vmem:[#allocation2 + $0x150] sm:$0xff] %vm560_vm0, %v14307_v0  ;;  %605 = vst.msk [vmem:[#allocation2 + $0x158] sm:$0xff] %vm560_vm0, %v14307_v0 }
  0x24   : > { %606 = vst.msk [vmem:[#allocation2 + $0x160] sm:$0x3] %vm563_vm1, %v14307_v0  ;;  %609 = vst.msk [vmem:[#allocation2 + $0x178] sm:$0x3] %vm563_vm1, %v14307_v0 }
  0x25   : > { %607 = vst.msk [vmem:[#allocation2 + $0x168] sm:$0xff] %vm560_vm0, %v14307_v0  ;;  %608 = vst.msk [vmem:[#allocation2 + $0x170] sm:$0xff] %vm560_vm0, %v14307_v0 }
  0x26   : > { %610 = vst.msk [vmem:[#allocation2 + $0x180] sm:$0xff] %vm560_vm0, %v14307_v0  ;;  %611 = vst.msk [vmem:[#allocation2 + $0x188] sm:$0xff] %vm560_vm0, %v14307_v0 }
  0x27   : > { %612 = vst.msk [vmem:[#allocation2 + $0x190] sm:$0x3] %vm563_vm1, %v14307_v0  ;;  %615 = vst.msk [vmem:[#allocation2 + $0x1a8] sm:$0x3] %vm563_vm1, %v14307_v0  ;;  %vm3958_vm1 = vcmask 1044484  }
  0x28   : > { %613 = vst.msk [vmem:[#allocation2 + $0x198] sm:$0xff] %vm560_vm0, %v14307_v0  ;;  %614 = vst.msk [vmem:[#allocation2 + $0x1a0] sm:$0xff] %vm560_vm0, %v14307_v0 }
  0x29   : > { %619 = vst.msk [vmem:[#allocation2 + $0x31] sm:$0xff] %vm560_vm0, %v530_v1  ;;  %620 = vst.msk [vmem:[#allocation2 + $0x39] sm:$0xff] %vm560_vm0, %v531_v2 }
  0x2a   : > { %617 = vst.msk [vmem:[#allocation2 + $0x19] sm:$0xff] %vm560_vm0, %v528_v3  ;;  %618 = vst.msk [vmem:[#allocation2 + $0x21] sm:$0xff] %vm560_vm0, %v529_v4 }
  0x2b   : > { %621 = vst.msk [vmem:[#allocation2 + $0x49] sm:$0xff] %vm560_vm0, %v532_v5  ;;  %622 = vst.msk [vmem:[#allocation2 + $0x51] sm:$0xff] %vm560_vm0, %v533_v6 }
  0x2c   : > { %623 = vst.msk [vmem:[#allocation2 + $0x61] sm:$0xff] %vm560_vm0, %v534_v13  ;;  %624 = vst.msk [vmem:[#allocation2 + $0x69] sm:$0xff] %vm560_vm0, %v535_v14 }
  0x2d   : > { %625 = vst.msk [vmem:[#allocation2 + $0x79] sm:$0xff] %vm560_vm0, %v536_v15  ;;  %626 = vst.msk [vmem:[#allocation2 + $0x81] sm:$0xff] %vm560_vm0, %v537_v16 }
  0x2e   : > { %627 = vst.msk [vmem:[#allocation2 + $0x91] sm:$0xff] %vm560_vm0, %v538_v17  ;;  %628 = vst.msk [vmem:[#allocation2 + $0x99] sm:$0xff] %vm560_vm0, %v539_v20 }
  0x2f   : > { %629 = vst.msk [vmem:[#allocation2 + $0xa9] sm:$0xff] %vm560_vm0, %v540_v21  ;;  %630 = vst.msk [vmem:[#allocation2 + $0xb1] sm:$0xff] %vm560_vm0, %v541_v22 }
  0x30   : > { %631 = vst.msk [vmem:[#allocation2 + $0xc1] sm:$0xff] %vm560_vm0, %v542_v24  ;;  %632 = vst.msk [vmem:[#allocation2 + $0xc9] sm:$0xff] %vm560_vm0, %v543_v25  ;;  %v10119_v30 = vld [vmem:[#allocation2 + $0x30] sm:$0xff]  ;;  %v10121_v31 = vld [vmem:[#allocation2 + $0x38] sm:$0xff] }
  0x31   : > { %633 = vst.msk [vmem:[#allocation2 + $0xd9] sm:$0xff] %vm560_vm0, %v544_v26  ;;  %v10123_v32 = vld [vmem:[#allocation2 + $0x40] sm:$0x3]  ;;  %634 = vst.msk [vmem:[#allocation2 + $0xe1] sm:$0xff] %vm560_vm0, %v545_v27  ;;  %v762_v33 = vrot.slane %v10119_v30, 1  ;;  %v763_v34 = vrot.slane %v10121_v31, 1 }
  0x32   : > { %635 = vst.msk [vmem:[#allocation2 + $0xf1] sm:$0xff] %vm560_vm0, %v546_v28  ;;  %636 = vst.msk [vmem:[#allocation2 + $0xf9] sm:$0xff] %vm560_vm0, %v547_v29  ;;  %v765_v35 = vrot.slane %v10123_v32, 1  ;;  %v10131_v36 = vld [vmem:[#allocation2 + $0x18] sm:$0xff]  ;;  %v10133_v37 = vld [vmem:[#allocation2 + $0x20] sm:$0xff] }
  0x33   : > { %v10135_v38 = vld [vmem:[#allocation2 + $0x28] sm:$0x3]  ;;  %v757_v39 = vrot.slane %v10131_v36, 1  ;;  %v758_v40 = vrot.slane %v10133_v37, 1  ;;  %v10141_v42 = vld [vmem:[#allocation2 + $0x50] sm:$0xff]  ;;  %v764_v43 = vsel %vm751_vm2, %v762_v33, %v763_v34  ;;  %v10149_v48 = vld [vmem:[#allocation2 + $0x60] sm:$0xff] }
  0x34   : > { %v10139_v41 = vld [vmem:[#allocation2 + $0x48] sm:$0xff]  ;;  %v766_v44 = vsel %vm751_vm2, %v763_v34, %v765_v35  ;;  %v760_v45 = vrot.slane %v10135_v38, 1  ;;  %v10146_v46 = vld [vmem:[#allocation2 + $0x58] sm:$0x3]  ;;  %v768_v52 = vrot.slane %v10141_v42, 1  ;;  %v10162_v56 = vld [vmem:[#allocation2 + $0x80] sm:$0xff] }
  0x35   : > { %v767_v47 = vrot.slane %v10139_v41, 1  ;;  %v10151_v49 = vld [vmem:[#allocation2 + $0x68] sm:$0xff]  ;;  %v10153_v50 = vpack.i.bf16 %v766_v44, %v764_v43  ;;  %v759_v51 = vsel %vm751_vm2, %v757_v39, %v758_v40  ;;  %v770_v53 = vrot.slane %v10146_v46, 1  ;;  %v10158_v54 = vld [vmem:[#allocation2 + $0x70] sm:$0x3]  ;;  %v10160_v55 = vld [vmem:[#allocation2 + $0x78] sm:$0xff] }
  0x36   : > { %v761_v57 = vsel %vm751_vm2, %v758_v40, %v760_v45  ;;  %v772_v58 = vrot.slane %v10149_v48, 1  ;;  %v773_v59 = vrot.slane %v10151_v49, 1  ;;  %v775_v60 = vrot.slane %v10158_v54, 1  ;;  %v10168_v61 = vld [vmem:[#allocation2 + $0x88] sm:$0x3]  ;;  %v10170_v62 = vld [vmem:[#allocation2 + $0x90] sm:$0xff] }
  0x37   : > { %8307 = vrot.lane.b32.xlu1 %v10153_v50, %s9849_s20  ;;  %v10174_v63 = vpack.i.bf16 %v761_v57, %v759_v51  ;;  %v769_v1 = vsel %vm751_vm2, %v767_v47, %v768_v52  ;;  %v771_v2 = vsel %vm751_vm2, %v768_v52, %v770_v53  ;;  %v777_v3 = vrot.slane %v10160_v55, 1  ;;  %v10179_v4 = vld [vmem:[#allocation2 + $0x98] sm:$0xff]  ;;  %v10181_v5 = vld [vmem:[#allocation2 + $0xa0] sm:$0x3]  ;;  %v10183_v6 = vld [vmem:[#allocation2 + $0xa8] sm:$0xff] }
  0x38   : > { %v10185_v10 = vpack.i.bf16 %v771_v2, %v769_v1  ;;  %v774_v11 = vsel %vm751_vm2, %v772_v58, %v773_v59  ;;  %v776_v12 = vsel %vm751_vm2, %v773_v59, %v775_v60  ;;  %v778_v13 = vrot.slane %v10162_v56, 1  ;;  %v10190_v14 = vld [vmem:[#allocation2 + $0xb0] sm:$0xff]  ;;  %v10192_v15 = vld [vmem:[#allocation2 + $0xb8] sm:$0x3]  ;;  %v10194_v16 = vld [vmem:[#allocation2 + $0xc0] sm:$0xff] }
  0x39   : > { %8302 = vrot.lane.b32.xlu0 %v10174_v63, %s9849_s20  ;;  %v10198_v17 = vpack.i.bf16 %v776_v12, %v774_v11  ;;  %v780_v18 = vrot.slane %v10168_v61, 1  ;;  %v782_v19 = vrot.slane %v10170_v62, 1  ;;  %v783_v20 = vrot.slane %v10179_v4, 1  ;;  %v10203_v21 = vld [vmem:[#allocation2 + $0xc8] sm:$0xff]  ;;  %v10205_v22 = vld [vmem:[#allocation2 + $0xd0] sm:$0x3] }
  0x3a   : > { %v779_v23 = vsel %vm751_vm2, %v777_v3, %v778_v13  ;;  %v785_v24 = vrot.slane %v10181_v5, 1  ;;  %v787_v25 = vrot.slane %v10183_v6, 1  ;;  %v788_v26 = vrot.slane %v10190_v14, 1  ;;  %v10211_v27 = vld [vmem:[#allocation2 + $0xd8] sm:$0xff]  ;;  %v10213_v28 = vld [vmem:[#allocation2 + $0xe0] sm:$0xff]  ;;  %v10215_v29 = vld [vmem:[#allocation2 + $0xf0] sm:$0xff] }
  0x3b   : > { %8312 = vrot.lane.b32.xlu1 %v10185_v10, %s9849_s20  ;;  %v781_v33 = vsel %vm751_vm2, %v778_v13, %v780_v18  ;;  %v784_v34 = vsel %vm751_vm2, %v782_v19, %v783_v20  ;;  %v790_v35 = vrot.slane %v10192_v15, 1  ;;  %v792_v39 = vrot.slane %v10194_v16, 1  ;;  %v10223_v40 = vld [vmem:[#allocation2 + $0xe8] sm:$0x3]  ;;  %v10225_v43 = vld [vmem:[#allocation2 + $0xf8] sm:$0xff]  ;;  %v548_v44 = vld [vmem:[%s10068_s19 + $0xa0] sm:$0xff] }
  0x3c   : > { %14440 = vst [vmem:[#allocation5_spill] sm:$0xff] %v10225_v43  ;;  %v10228_v45 = vpack.i.bf16 %v781_v33, %v779_v23  ;;  %v786_v47 = vsel %vm751_vm2, %v783_v20, %v785_v24  ;;  %v789_v51 = vsel %vm751_vm2, %v787_v25, %v788_v26  ;;  %v793_v52 = vrot.slane %v10203_v21, 1  ;;  %v10233_v53 = vld [vmem:[#allocation2 + $0x100] sm:$0x3]  ;;  %v549_v57 = vld [vmem:[%s10068_s19 + $0xa8] sm:$0xff]  ;;  %637 = vst.msk [vmem:[#allocation2 + $0x109] sm:$0xff] %vm560_vm0, %v548_v44 }
  0x3d   : > { %14441 = vst [vmem:[#allocation6_spill] sm:$0xff] %v10233_v53  ;;  %v550_v58 = vld [vmem:[%s10068_s19 + $0xb0] sm:$0xff]  ;;  %8317 = vrot.lane.b32.xlu0 %v10198_v17, %s9849_s20  ;;  %v10240_v59 = vpack.i.bf16 %v786_v47, %v784_v34  ;;  %v791_v60 = vsel %vm751_vm2, %v788_v26, %v790_v35  ;;  %v795_v1 = vrot.slane %v10205_v22, 1  ;;  %v797_v2 = vrot.slane %v10211_v27, 1  ;;  %638 = vst.msk [vmem:[#allocation2 + $0x111] sm:$0xff] %vm560_vm0, %v549_v57  ;;  %v551_v3 = vld [vmem:[%s10068_s19 + $0xb8] sm:$0xff] }
  0x3e   : > { %639 = vst.msk [vmem:[#allocation2 + $0x121] sm:$0xff] %vm560_vm0, %v550_v58  ;;  %v552_v11 = vld [vmem:[%s10068_s19 + $0xc0] sm:$0xff]  ;;  %v553_v12 = vld [vmem:[%s10068_s19 + $0xc8] sm:$0xff]  ;;  %v10250_v13 = vpack.i.bf16 %v791_v60, %v789_v51  ;;  %v794_v18 = vsel %vm751_vm2, %v792_v39, %v793_v52  ;;  %v798_v19 = vrot.slane %v10213_v28, 1  ;;  %v800_v20 = vrot.slane %v10223_v40, 1  ;;  %640 = vst.msk [vmem:[#allocation2 + $0x129] sm:$0xff] %vm560_vm0, %v551_v3 }
  0x3f   : > { %641 = vst.msk [vmem:[#allocation2 + $0x139] sm:$0xff] %vm560_vm0, %v552_v11  ;;  %642 = vst.msk [vmem:[#allocation2 + $0x141] sm:$0xff] %vm560_vm0, %v553_v12  ;;  %v554_v23 = vld [vmem:[%s10068_s19 + $0xd0] sm:$0xff]  ;;  %v555_v24 = vld [vmem:[%s10068_s19 + $0xd8] sm:$0xff]  ;;  %8322 = vrot.lane.b32.xlu1 %v10228_v45, %s9849_s20  ;;  %v796_v26 = vsel %vm751_vm2, %v793_v52, %v795_v1  ;;  %v802_v33 = vrot.slane %v10215_v29, 1  ;;  %v803_v34 = vrot.slane %v10225_v43, 1 }
  0x40   : > { %v556_v25 = vld [vmem:[%s10068_s19 + $0xe0] sm:$0xff]  ;;  %v805_v35 = vrot.slane %v10233_v53, 1  ;;  %643 = vst.msk [vmem:[#allocation2 + $0x151] sm:$0xff] %vm560_vm0, %v554_v23  ;;  %644 = vst.msk [vmem:[#allocation2 + $0x159] sm:$0xff] %vm560_vm0, %v555_v24  ;;  %v557_v39 = vld [vmem:[%s10068_s19 + $0xe8] sm:$0xff]  ;;  %v799_v44 = vsel %vm751_vm2, %v797_v2, %v798_v19  ;;  %v801_v47 = vsel %vm751_vm2, %v798_v19, %v800_v20  ;;  %v10276_v51 = vpack.i.bf16 %v796_v26, %v794_v18 }
  0x41   : > { %645 = vst.msk [vmem:[#allocation2 + $0x169] sm:$0xff] %vm560_vm0, %v556_v25  ;;  %646 = vst.msk [vmem:[#allocation2 + $0x171] sm:$0xff] %vm560_vm0, %v557_v39  ;;  %8327 = vrot.lane.b32.xlu0 %v10240_v59, %s9849_s20  ;;  %v804_v52 = vsel %vm751_vm2, %v802_v33, %v803_v34  ;;  %v836_v58 = vrot.slane %v10083_v9, 2  ;;  %v10283_v60 = vpack.i.bf16 %v801_v47, %v799_v44  ;;  %v833_v18 = vrot.slane %v10079_v7, 2 }
  0x42   : > { %v806_v57 = vsel %vm751_vm2, %v803_v34, %v805_v35 }
  0x43   : > { %8332 = vrot.lane.b32.xlu1 %v10250_v13, %s9849_s20  ;;  %v10285_v1 = vld [vmem:[#allocation2 + $0x108] sm:$0xff]  ;;  %v10297_v9 = vpack.i.bf16 %v806_v57, %v804_v52 }
  0x44   : > { %14442 = vst [vmem:[#allocation7_spill] sm:$0xff] %v10285_v1  ;;  %v10287_v2 = vld [vmem:[#allocation2 + $0x110] sm:$0xff]  ;;  %v10289_v3 = vld [vmem:[#allocation2 + $0x118] sm:$0x3]  ;;  %v807_v11 = vrot.slane %v10285_v1, 1 }
  0x45   : > { %14443 = vst [vmem:[#allocation8_spill] sm:$0xff] %v10287_v2  ;;  %14444 = vst [vmem:[#allocation9_spill] sm:$0xff] %v10289_v3  ;;  %v10292_v12 = vld [vmem:[#allocation2 + $0x120] sm:$0xff]  ;;  %8337 = vrot.lane.b32.xlu0 %v10276_v51, %s9849_s20  ;;  %v808_v19 = vrot.slane %v10287_v2, 1  ;;  %v810_v20 = vrot.slane %v10289_v3, 1  ;;  %v10301_v23 = vld [vmem:[#allocation2 + $0x128] sm:$0xff] }
  0x46   : > { %14445 = vst [vmem:[#allocation10_spill] sm:$0xff] %v10292_v12  ;;  %14446 = vst [vmem:[#allocation11_spill] sm:$0xff] %v10301_v23  ;;  %v687_v24 = vld [vmem:[#allocation2 + $0x130] sm:$0x3]  ;;  %v812_v25 = vrot.slane %v10292_v12, 1  ;;  %v813_v26 = vrot.slane %v10301_v23, 1 }
  0x47   : > { %v815_v33 = vrot.slane %v687_v24, 1  ;;  %v688_v34 = vld [vmem:[#allocation2 + $0x138] sm:$0xff]  ;;  %v689_v35 = vld [vmem:[#allocation2 + $0x140] sm:$0xff]  ;;  %v690_v7 = vld [vmem:[#allocation2 + $0x148] sm:$0x3]  ;;  %8342 = vrot.lane.b32.xlu1 %v10283_v60, %s9849_s20  ;;  %v809_v39 = vsel %vm751_vm2, %v807_v11, %v808_v19  ;;  %v811_v44 = vsel %vm751_vm2, %v808_v19, %v810_v20 }
  0x48   : > { %v817_v47 = vrot.slane %v688_v34, 1  ;;  %v818_v52 = vrot.slane %v689_v35, 1  ;;  %v691_v57 = vld [vmem:[#allocation2 + $0x150] sm:$0xff]  ;;  %v692_v0 = vld [vmem:[#allocation2 + $0x158] sm:$0xff]  ;;  %v693_v3 = vld [vmem:[#allocation2 + $0x160] sm:$0x3]  ;;  %v10309_v2 = vpack.i.bf16 %v811_v44, %v809_v39  ;;  %v814_v23 = vsel %vm751_vm2, %v812_v25, %v813_v26 }
  0x49   : > { %v816_v24 = vsel %vm751_vm2, %v813_v26, %v815_v33  ;;  %v820_v12 = vrot.slane %v690_v7, 1  ;;  %v694_v1 = vld [vmem:[#allocation2 + $0x168] sm:$0xff]  ;;  %v695_v53 = vld [vmem:[#allocation2 + $0x170] sm:$0xff]  ;;  %v696_v43 = vld [vmem:[#allocation2 + $0x178] sm:$0x3]  ;;  %8347 = vrot.lane.b32.xlu0 %v10297_v9, %s9849_s20  ;;  %v822_v20 = vrot.slane %v691_v57, 1 }
  0x4a   : > { %v10315_v11 = vpack.i.bf16 %v816_v24, %v814_v23  ;;  %v819_v19 = vsel %vm751_vm2, %v817_v47, %v818_v52  ;;  %v834_v34 = vrot.slane %v10081_v8, 2  ;;  %v823_v39 = vrot.slane %v692_v0, 1 }
  0x4b   : > { %v821_v35 = vsel %vm751_vm2, %v818_v52, %v820_v12  ;;  %v825_v25 = vrot.slane %v693_v3, 1  ;;  %v838_v26 = vrot.slane %v10131_v36, 2  ;;  %8352 = vrot.lane.b32.xlu1 %v10309_v2, %s9849_s20  ;;  %v827_v7 = vrot.slane %v694_v1, 1 }
  0x4c   : > { %v10323_v33 = vpack.i.bf16 %v821_v35, %v819_v19  ;;  %v828_v44 = vrot.slane %v695_v53, 1  ;;  %v830_v23 = vrot.slane %v696_v43, 1  ;;  %v824_v24 = vsel %vm751_vm2, %v822_v20, %v823_v39 }
  0x4d   : > { %v826_v47 = vsel %vm751_vm2, %v823_v39, %v825_v25  ;;  %v839_v8 = vrot.slane %v10133_v37, 2  ;;  %v841_v12 = vrot.slane %v10135_v38, 2  ;;  %8357 = vrot.lane.b32.xlu0 %v10315_v11, %s9849_s20  ;;  %v835_v53 = vsel %vm832_vm3, %v833_v18, %v834_v34 }
  0x4e   : > { %v10331_v0 = vpack.i.bf16 %v826_v47, %v824_v24  ;;  %v829_v3 = vsel %vm751_vm2, %v827_v7, %v828_v44  ;;  %v831_v52 = vsel %vm751_vm2, %v828_v44, %v830_v23  ;;  %v837_v43 = vsel %vm832_vm3, %v834_v34, %v836_v58  ;;  %v9712_v44 = vld [vmem:[%s14293_s1 + $0x10] ss:$0 sps:$4 sm:$0x33]  }
  0x4f   : > { %8362 = vrot.lane.b32.xlu1 %v10323_v33, %s9849_s20  ;;  %v10339_v1 = vpack.i.bf16 %v831_v52, %v829_v3  ;;  %v840_v38 = vsel %vm832_vm3, %v838_v26, %v839_v8  ;;  %v842_v57 = vsel %vm832_vm3, %v839_v8, %v841_v12  ;;  %v8376_v19 = vpack.i.bf16 %v837_v43, %v835_v53 }
  0x50   : > { %v8381_v20 = vpack.i.bf16 %v842_v57, %v840_v38  ;;  %v8386_v58 = vpack.i.bf16 %v10133_v37, %v10131_v36  ;;  %v846_v18 = vrot.slane %v10123_v32, 2  ;;  %v8391_v34 = vpack.i.bf16 %v10121_v31, %v10119_v30  ;;  %v9710_v36 = vld [vmem:[%s14293_s1] sm:$0xff]  }
  0x51   : > { %8367 = vrot.lane.b32.xlu0 %v10331_v0, %s9849_s20  ;;  %v843_v35 = vrot.slane %v10119_v30, 2  ;;  %v844_v39 = vrot.slane %v10121_v31, 2  ;;  %8166 = vmatprep.subr.bf16.mxu0 %v9710_v36  ;;  %v9711_v31 = vld [vmem:[%s14293_s1 + $0x8] sm:$0xff]   ;;  %v848_v25 = vrot.slane %v10139_v41, 2  ;;  %v849_v26 = vrot.slane %v10141_v42, 2 }
  0x52   : > { %8167 = vmatpush3.bf16.msra.mxu0 %v9710_v36  ;;  %v851_v7 = vrot.slane %v10146_v46, 2  ;;  %v2064_v46 = vsel %vm2062_vm5, %v9712_v44, 0  ;;  %v854_v47 = vrot.slane %v10151_v49, 2  ;;  %v856_v8 = vrot.slane %v10158_v54, 2 }
  0x53   : > { %8372 = vrot.lane.b32.xlu1 %v10339_v1, %s9849_s20  ;;  %v845_v32 = vsel %vm832_vm3, %v843_v35, %v844_v39  ;;  %v847_v37 = vsel %vm832_vm3, %v844_v39, %v846_v18  ;;  %8168 = vmatprep.subr.bf16.mxu0 %v9711_v31  ;;  %v850_v23 = vsel %vm832_vm3, %v848_v25, %v849_v26  ;;  %s9856_s20 = smov 32   ;;  %v859_v53 = vrot.slane %v10162_v56, 2  ;;  %v559_v18 = vld [vmem:[%s10068_s19 + $0xf8] sm:$0xff] }
  0x54   : > { %v10367_v30 = vpack.i.bf16 %v847_v37, %v845_v32  ;;  %v852_v24 = vsel %vm832_vm3, %v849_v26, %v851_v7  ;;  %v8461_v12 = vpack.i.bf16 %v10151_v49, %v10149_v48  ;;  %v857_v52 = vsel %vm832_vm3, %v854_v47, %v856_v8  ;;  %648 = vst.msk [vmem:[#allocation2 + $0x189] sm:$0xff] %vm560_vm0, %v559_v18 }
  0x55   : > { %8377 = vrot.lane.b32.xlu0 %v8376_v19, %s9850_s21  ;;  %v858_v49 = vrot.slane %v10160_v55, 2  ;;  %v861_v43 = vrot.slane %v10168_v61, 2  ;;  %v863_v61 = vrot.slane %v10170_v62, 2  ;;  %v866_v57 = vrot.slane %v10181_v5, 2 }
  0x56   : > { %8169 = vmatpush3.bf16.msra.mxu0 %v9711_v31  ;;  %v868_v5 = vrot.slane %v10183_v6, 2  ;;  %v873_v32 = vrot.slane %v10194_v16, 2  ;;  %v874_v37 = vrot.slane %v10203_v21, 2 }
  0x57   : > { %8382 = vrot.lane.b32.xlu1 %v8381_v20, %s9850_s21  ;;  %8272 = vmatprep.subr.msk.bf16.mxu0 %vm2062_vm5, %v9712_v44  ;;  %v862_v38 = vsel %vm832_vm3, %v859_v53, %v861_v43  ;;  %v14449_v43 = vld [vmem:[#allocation6_spill] sm:$0xff] }
  0x58   : > { %v875_v25 = vsel %vm832_vm3, %v873_v32, %v874_v37 }
  0x59   : > { %8387 = vrot.lane.b32.xlu0 %v8386_v58, %s9851_s22  ;;  %v558_v58 = vld [vmem:[%s10068_s19 + $0xf0] sm:$0xff]  ;;  %s9857_s19 = smov 64  }
  0x5a   : > { %8171 = vmatpush3.bf16.msra.mxu0 %v2064_v46  ;;  %647 = vst.msk [vmem:[#allocation2 + $0x181] sm:$0xff] %vm560_vm0, %v558_v58  ;;  %v14452_v58 = vld [vmem:[#allocation9_spill] sm:$0xff] }
  0x5b   : > { %8392 = vrot.lane.b32.xlu1 %v8391_v34, %s9851_s22  ;;  %v891_v18 = vrot.slane %v14452_v58, 2 }
  0x5d   : > { %8397 = vrot.lane.b32.xlu0 %v10174_v63, %s9852_s25  ;;  %v10377_v63 = vpack.i.bf16 %v10141_v42, %v10139_v41  ;;  %v14447_v41 = vmov 0.0   ;;  %v8441_v42 = vpack.i.bf16 %v852_v24, %v850_v23  ;;  %v8631_v23 = vpack.i.bf16 %v10213_v28, %v10211_v27 }
  0x5e   : > { %3611 = vst.msk [vmem:[#allocation4] sm:$0xff] %vm1937_vm4, %v14447_v41  ;;  %3614 = vst.msk [vmem:[#allocation4 + $0x10] sm:$0xff] %vm1937_vm4, %v14447_v41  ;;  %v879_v24 = vrot.slane %v10213_v28, 2 }
  0x5f   : > { %8402 = vrot.lane.b32.xlu1 %v10153_v50, %s9852_s25  ;;  %3616 = vst.msk [vmem:[#allocation4 + $0x20] sm:$0xff] %vm1937_vm4, %v14447_v41  ;;  %3618 = vst.msk [vmem:[#allocation4 + $0x30] sm:$0xff] %vm1937_vm4, %v14447_v41 }
  0x60   : > { %3620 = vst.msk [vmem:[#allocation4 + $0x40] sm:$0xff] %vm1937_vm4, %v14447_v41  ;;  %3622 = vst.msk [vmem:[#allocation4 + $0x50] sm:$0xff] %vm1937_vm4, %v14447_v41 }
  0x61   : > { %8407 = vrot.lane.b32.xlu0 %v8381_v20, %s9853_s28  ;;  %3624 = vst.msk [vmem:[#allocation4 + $0x60] sm:$0xff] %vm1937_vm4, %v14447_v41  ;;  %3626 = vst.msk [vmem:[#allocation4 + $0x70] sm:$0xff] %vm1937_vm4, %v14447_v41 }
  0x62   : > { %3628 = vst.msk [vmem:[#allocation4 + $0x80] sm:$0xff] %vm1937_vm4, %v14447_v41  ;;  %3630 = vst.msk [vmem:[#allocation4 + $0x90] sm:$0xff] %vm1937_vm4, %v14447_v41 }
  0x63   : > { %8412 = vrot.lane.b32.xlu1 %v10367_v30, %s9853_s28  ;;  %4691 = vst.msk [vmem:[#allocation3] sm:$0xff] %vm1937_vm4, %v14447_v41  ;;  %4692 = vst.msk [vmem:[#allocation3 + $0x8] sm:$0xff] %vm1937_vm4, %v14447_v41 }
  0x64   : > { %4694 = vst.msk [vmem:[#allocation3 + $0x18] sm:$0xff] %vm1937_vm4, %v14447_v41  ;;  %4695 = vst.msk [vmem:[#allocation3 + $0x20] sm:$0xff] %vm1937_vm4, %v14447_v41 }
  0x65   : > { %8417 = vrot.lane.b32.xlu0 %v8391_v34, %s9854_s15  ;;  %4697 = vst.msk [vmem:[#allocation3 + $0x30] sm:$0xff] %vm1937_vm4, %v14447_v41  ;;  %4698 = vst.msk [vmem:[#allocation3 + $0x38] sm:$0xff] %vm1937_vm4, %v14447_v41  ;;  %v871_v34 = vrot.slane %v10192_v15, 2 }
  0x66   : > { %4700 = vst.msk [vmem:[#allocation3 + $0x48] sm:$0xff] %vm1937_vm4, %v14447_v41  ;;  %4701 = vst.msk [vmem:[#allocation3 + $0x50] sm:$0xff] %vm1937_vm4, %v14447_v41 }
  0x67   : > { %8422 = vrot.lane.b32.xlu1 %v10377_v63, %s9854_s15  ;;  %4703 = vst.msk [vmem:[#allocation3 + $0x60] sm:$0xff] %vm1937_vm4, %v14447_v41  ;;  %4704 = vst.msk [vmem:[#allocation3 + $0x68] sm:$0xff] %vm1937_vm4, %v14447_v41 }
  0x68   : > { %4706 = vst.msk [vmem:[#allocation3 + $0x78] sm:$0xff] %vm1937_vm4, %v14447_v41  ;;  %4707 = vst.msk [vmem:[#allocation3 + $0x80] sm:$0xff] %vm1937_vm4, %v14447_v41 }
  0x69   : > { %8427 = vrot.lane.b32.xlu0 %v10153_v50, %s9855_s18  ;;  %4709 = vst.msk [vmem:[#allocation3 + $0x90] sm:$0xff] %vm1937_vm4, %v14447_v41  ;;  %4710 = vst.msk [vmem:[#allocation3 + $0x98] sm:$0xff] %vm1937_vm4, %v14447_v41  ;;  %v853_v50 = vrot.slane %v10149_v48, 2  ;;  %v8491_v48 = vpack.i.bf16 %v10162_v56, %v10160_v55  ;;  %v8531_v56 = vpack.i.bf16 %v10179_v4, %v10170_v62 }
  0x6a   : > { %4712 = vst.msk [vmem:[#allocation3 + $0xa8] sm:$0xff] %vm1937_vm4, %v14447_v41  ;;  %4713 = vst.msk [vmem:[#allocation3 + $0xb0] sm:$0xff] %vm1937_vm4, %v14447_v41 }
  0x6b   : > { %4715 = vst.msk [vmem:[#allocation3 + $0xc0] sm:$0xff] %vm1937_vm4, %v14447_v41  ;;  %4716 = vst.msk [vmem:[#allocation3 + $0xc8] sm:$0xff] %vm1937_vm4, %v14447_v41  ;;  %8432 = vrot.lane.b32.xlu1 %v10185_v10, %s9855_s18  ;;  %v855_v3 = vsel %vm832_vm3, %v853_v50, %v854_v47 }
  0x6c   : > { %4718 = vst.msk [vmem:[#allocation3 + $0xd8] sm:$0xff] %vm1937_vm4, %v14447_v41  ;;  %4719 = vst.msk [vmem:[#allocation3 + $0xe0] sm:$0xff] %vm1937_vm4, %v14447_v41  ;;  %v8481_v54 = vpack.i.bf16 %v857_v52, %v855_v3 }
  0x6d   : > { %4721 = vst.msk [vmem:[#allocation3 + $0xf0] sm:$0xff] %vm1937_vm4, %v14447_v41  ;;  %4722 = vst.msk [vmem:[#allocation3 + $0xf8] sm:$0xff] %vm1937_vm4, %v14447_v41  ;;  %8437 = vrot.lane.b32.xlu0 %v10367_v30, %s9856_s20 }
  0x6e   : > { %4724 = vst.msk [vmem:[#allocation3 + $0x108] sm:$0xff] %vm1937_vm4, %v14447_v41  ;;  %4725 = vst.msk [vmem:[#allocation3 + $0x110] sm:$0xff] %vm1937_vm4, %v14447_v41 }
  0x6f   : > { %4727 = vst.msk [vmem:[#allocation3 + $0x120] sm:$0xff] %vm1937_vm4, %v14447_v41  ;;  %4728 = vst.msk [vmem:[#allocation3 + $0x128] sm:$0xff] %vm1937_vm4, %v14447_v41  ;;  %8442 = vrot.lane.b32.xlu1 %v8441_v42, %s9856_s20 }
  0x70   : > { %4730 = vst.msk [vmem:[#allocation3 + $0x138] sm:$0xff] %vm1937_vm4, %v14447_v41  ;;  %4731 = vst.msk [vmem:[#allocation3 + $0x140] sm:$0xff] %vm1937_vm4, %v14447_v41 }
  0x71   : > { %4733 = vst.msk [vmem:[#allocation3 + $0x150] sm:$0xff] %vm1937_vm4, %v14447_v41  ;;  %4734 = vst.msk [vmem:[#allocation3 + $0x158] sm:$0xff] %vm1937_vm4, %v14447_v41  ;;  %8447 = vrot.lane.b32.xlu0 %v10367_v30, %s9850_s21  ;;  %v876_v30 = vrot.slane %v10205_v22, 2 }
  0x72   : > { %4736 = vst.msk [vmem:[#allocation3 + $0x168] sm:$0xff] %vm1937_vm4, %v14447_v41  ;;  %4737 = vst.msk [vmem:[#allocation3 + $0x170] sm:$0xff] %vm1937_vm4, %v14447_v41 }
  0x73   : > { %4739 = vst.msk [vmem:[#allocation3 + $0x180] sm:$0xff] %vm1937_vm4, %v14447_v41  ;;  %4740 = vst.msk [vmem:[#allocation3 + $0x188] sm:$0xff] %vm1937_vm4, %v14447_v41  ;;  %8452 = vrot.lane.b32.xlu1 %v8441_v42, %s9850_s21  ;;  %v877_v26 = vsel %vm832_vm3, %v874_v37, %v876_v30 }
  0x74   : > { %4742 = vst.msk [vmem:[#allocation3 + $0x198] sm:$0xff] %vm1937_vm4, %v14447_v41  ;;  %4743 = vst.msk [vmem:[#allocation3 + $0x1a0] sm:$0xff] %vm1937_vm4, %v14447_v41  ;;  %v8621_v22 = vpack.i.bf16 %v877_v26, %v875_v25 }
  0x75   : > { %8457 = vrot.lane.b32.xlu0 %v10377_v63, %s9851_s22  ;;  %4699 = vst.msk [vmem:[#allocation3 + $0x40] sm:$0x3] %vm3612_vm13, %v14447_v41  ;;  %3613 = vst.msk [vmem:[#allocation4 + $0x8] sm:$0x3] %vm3612_vm13, %v14447_v41 }
  0x76   : > { %3615 = vst.msk [vmem:[#allocation4 + $0x18] sm:$0x3] %vm3612_vm13, %v14447_v41  ;;  %3617 = vst.msk [vmem:[#allocation4 + $0x28] sm:$0x3] %vm3612_vm13, %v14447_v41 }
  0x77   : > { %8462 = vrot.lane.b32.xlu1 %v8461_v12, %s9851_s22  ;;  %3619 = vst.msk [vmem:[#allocation4 + $0x38] sm:$0x3] %vm3612_vm13, %v14447_v41  ;;  %3621 = vst.msk [vmem:[#allocation4 + $0x48] sm:$0x3] %vm3612_vm13, %v14447_v41 }
  0x78   : > { %3623 = vst.msk [vmem:[#allocation4 + $0x58] sm:$0x3] %vm3612_vm13, %v14447_v41  ;;  %3625 = vst.msk [vmem:[#allocation4 + $0x68] sm:$0x3] %vm3612_vm13, %v14447_v41 }
  0x79   : > { %8467 = vrot.lane.b32.xlu0 %v10185_v10, %s9852_s25  ;;  %v860_v10 = vsel %vm832_vm3, %v858_v49, %v859_v53  ;;  %v883_v49 = vrot.slane %v10215_v29, 2  ;;  %3627 = vst.msk [vmem:[#allocation4 + $0x78] sm:$0x3] %vm3612_vm13, %v14447_v41  ;;  %3629 = vst.msk [vmem:[#allocation4 + $0x88] sm:$0x3] %vm3612_vm13, %v14447_v41 }
  0x7a   : > { %v8511_v55 = vpack.i.bf16 %v862_v38, %v860_v10  ;;  %v886_v10 = vrot.slane %v14449_v43, 2  ;;  %3631 = vst.msk [vmem:[#allocation4 + $0x98] sm:$0x3] %vm3612_vm13, %v14447_v41  ;;  %4693 = vst.msk [vmem:[#allocation3 + $0x10] sm:$0x3] %vm3612_vm13, %v14447_v41 }
  0x7b   : > { %8472 = vrot.lane.b32.xlu1 %v10198_v17, %s9852_s25  ;;  %4696 = vst.msk [vmem:[#allocation3 + $0x28] sm:$0x3] %vm3612_vm13, %v14447_v41  ;;  %4702 = vst.msk [vmem:[#allocation3 + $0x58] sm:$0x3] %vm3612_vm13, %v14447_v41 }
  0x7c   : > { %4705 = vst.msk [vmem:[#allocation3 + $0x70] sm:$0x3] %vm3612_vm13, %v14447_v41  ;;  %4708 = vst.msk [vmem:[#allocation3 + $0x88] sm:$0x3] %vm3612_vm13, %v14447_v41 }
  0x7d   : > { %8477 = vrot.lane.b32.xlu0 %v8441_v42, %s9853_s28  ;;  %v881_v42 = vrot.slane %v10223_v40, 2  ;;  %4711 = vst.msk [vmem:[#allocation3 + $0xa0] sm:$0x3] %vm3612_vm13, %v14447_v41  ;;  %4714 = vst.msk [vmem:[#allocation3 + $0xb8] sm:$0x3] %vm3612_vm13, %v14447_v41 }
  0x7e   : > { %4717 = vst.msk [vmem:[#allocation3 + $0xd0] sm:$0x3] %vm3612_vm13, %v14447_v41  ;;  %4720 = vst.msk [vmem:[#allocation3 + $0xe8] sm:$0x3] %vm3612_vm13, %v14447_v41 }
  0x7f   : > { %8482 = vrot.lane.b32.xlu1 %v8481_v54, %s9853_s28  ;;  %v882_v8 = vsel %vm832_vm3, %v879_v24, %v881_v42  ;;  %v9772_v42 = vld [vmem:[#allocation2] sm:$0xff]  ;;  %4723 = vst.msk [vmem:[#allocation3 + $0x100] sm:$0x3] %vm3612_vm13, %v14447_v41  ;;  %4726 = vst.msk [vmem:[#allocation3 + $0x118] sm:$0x3] %vm3612_vm13, %v14447_v41 }
  0x80   : > { %4729 = vst.msk [vmem:[#allocation3 + $0x130] sm:$0x3] %vm3612_vm13, %v14447_v41  ;;  %4732 = vst.msk [vmem:[#allocation3 + $0x148] sm:$0x3] %vm3612_vm13, %v14447_v41 }
  0x81   : > { %8487 = vrot.lane.b32.xlu0 %v8461_v12, %s9854_s15  ;;  %4735 = vst.msk [vmem:[#allocation3 + $0x160] sm:$0x3] %vm3612_vm13, %v14447_v41  ;;  %4738 = vst.msk [vmem:[#allocation3 + $0x178] sm:$0x3] %vm3612_vm13, %v14447_v41 }
  0x82   : > { %4741 = vst.msk [vmem:[#allocation3 + $0x190] sm:$0x3] %vm3612_vm13, %v14447_v41  ;;  %4744 = vst.msk [vmem:[#allocation3 + $0x1a8] sm:$0x3] %vm3612_vm13, %v14447_v41 }
  0x83   : > { %8492 = vrot.lane.b32.xlu1 %v8491_v48, %s9854_s15 }
  0x85   : > { %8497 = vrot.lane.b32.xlu0 %v10198_v17, %s9855_s18  ;;  %v864_v17 = vrot.slane %v10179_v4, 2  ;;  %v8561_v4 = vpack.i.bf16 %v10190_v14, %v10183_v6 }
  0x87   : > { %8502 = vrot.lane.b32.xlu1 %v10228_v45, %s9855_s18  ;;  %v865_v19 = vsel %vm832_vm3, %v863_v61, %v864_v17  ;;  %v867_v20 = vsel %vm832_vm3, %v864_v17, %v866_v57 }
  0x88   : > { %v8551_v62 = vpack.i.bf16 %v867_v20, %v865_v19  ;;  %v14451_v19 = vld [vmem:[#allocation8_spill] sm:$0xff] }
  0x89   : > { %8507 = vrot.lane.b32.xlu0 %v8481_v54, %s9856_s20  ;;  %v889_v20 = vrot.slane %v14451_v19, 2 }
  0x8b   : > { %8512 = vrot.lane.b32.xlu1 %v8511_v55, %s9856_s20 }
  0x8d   : > { %8517 = vrot.lane.b32.xlu0 %v8481_v54, %s9850_s21  ;;  %v14448_v54 = vld [vmem:[#allocation5_spill] sm:$0xff] }
  0x8e   : > { %v10560_v6 = vpop.permute.xlu0 %8297  ;;  %v884_v53 = vrot.slane %v14448_v54, 2 }
  0x8f   : > { %8522 = vrot.lane.b32.xlu1 %v8511_v55, %s9850_s21 }
  0x90   : > { %v887_v61 = vsel %vm832_vm3, %v884_v53, %v886_v10 }
  0x91   : > { %8527 = vrot.lane.b32.xlu0 %v8491_v48, %s9851_s22  ;;  %v8671_v48 = vpack.i.bf16 %v14448_v54, %v10215_v29  ;;  %v14450_v29 = vld [vmem:[#allocation7_spill] sm:$0xff]  ;;  %v9773_v54 = vld [vmem:[#allocation2 + $0x20] sm:$0xff] }
  0x92   : > { %v888_v57 = vrot.slane %v14450_v29, 2 }
  0x93   : > { %8532 = vrot.lane.b32.xlu1 %v8531_v56, %s9851_s22 }
  0x95   : > { %8537 = vrot.lane.b32.xlu0 %v10228_v45, %s9852_s25  ;;  %v869_v45 = vrot.slane %v10190_v14, 2 }
  0x97   : > { %8542 = vrot.lane.b32.xlu1 %v10240_v59, %s9852_s25  ;;  %v870_v35 = vsel %vm832_vm3, %v868_v5, %v869_v45  ;;  %v872_v39 = vsel %vm832_vm3, %v869_v45, %v871_v34  ;;  %v890_v5 = vsel %vm832_vm3, %v888_v57, %v889_v20  ;;  %v892_v45 = vsel %vm832_vm3, %v889_v20, %v891_v18 }
  0x98   : > { %v8581_v36 = vpack.i.bf16 %v872_v39, %v870_v35  ;;  %v8300_v34 = vunpack.i.h.bf16 %v10560_v6  ;;  %v8299_v35 = vunpack.i.l.bf16 %v10560_v6  ;;  %v10658_v39 = vpack.i.bf16 %v14451_v19, %v14450_v29 }
  0x99   : > { %8547 = vrot.lane.b32.xlu0 %v8511_v55, %s9853_s28  ;;  %v10664_v25 = vpack.i.bf16 %v892_v45, %v890_v5 }
  0x9b   : > { %8552 = vrot.lane.b32.xlu1 %v8551_v62, %s9853_s28 }
  0x9d   : > { %8557 = vrot.lane.b32.xlu0 %v8531_v56, %s9854_s15  ;;  %v885_v56 = vsel %vm832_vm3, %v883_v49, %v884_v53  ;;  %v9774_v53 = vld [vmem:[#allocation2 + $0x18] sm:$0xff] }
  0x9f   : > { %8562 = vrot.lane.b32.xlu1 %v8561_v4, %s9854_s15 }
  0xa1   : > { %8567 = vrot.lane.b32.xlu0 %v10240_v59, %s9855_s18  ;;  %v8601_v59 = vpack.i.bf16 %v10203_v21, %v10194_v16 }
  0xa3   : > { %8572 = vrot.lane.b32.xlu1 %v10250_v13, %s9855_s18 }
  0xa5   : > { %8577 = vrot.lane.b32.xlu0 %v8551_v62, %s9856_s20 }
  0xa7   : > { %8582 = vrot.lane.b32.xlu1 %v8581_v36, %s9856_s20 }
  0xa9   : > { %8587 = vrot.lane.b32.xlu0 %v8551_v62, %s9850_s21  ;;  %v10564_v14 = vpop.permute.xlu1 %8307 }
  0xab   : > { %v10566_v15 = vpop.permute.xlu0 %8302  ;;  %8592 = vrot.lane.b32.xlu1 %v8581_v36, %s9850_s21 }
  0xad   : > { %8597 = vrot.lane.b32.xlu0 %v8561_v4, %s9851_s22  ;;  %v10575_v31 = vpop.permute.xlu1 %8312  ;;  %v10647_v4 = vpack.i.bf16 %v887_v61, %v885_v56 }
  0xaf   : > { %v10577_v63 = vpop.permute.xlu0 %8317  ;;  %8602 = vrot.lane.b32.xlu1 %v8601_v59, %s9851_s22 }
  0xb1   : > { %8607 = vrot.lane.b32.xlu0 %v10250_v13, %s9852_s25  ;;  %v10584_v16 = vpop.permute.xlu1 %8322  ;;  %v878_v13 = vrot.slane %v10211_v27, 2 }
  0xb3   : > { %v10586_v21 = vpop.permute.xlu0 %8327  ;;  %8612 = vrot.lane.b32.xlu1 %v10276_v51, %s9852_s25  ;;  %v880_v47 = vsel %vm832_vm3, %v878_v13, %v879_v24  ;;  %v9771_v24 = vld [vmem:[#allocation2 + $0x8] sm:$0xff] }
  0xb4   : > { %v8651_v40 = vpack.i.bf16 %v882_v8, %v880_v47  ;;  %v1707_v47 = vsel %vm560_vm0, %v9772_v42, %v8299_v35  ;;  %v14453_v8 = vld [vmem:[#allocation10_spill] sm:$0xff] }
  0xb5   : > { %8617 = vrot.lane.b32.xlu0 %v8581_v36, %s9853_s28  ;;  %v10591_v7 = vpop.permute.xlu1 %8332  ;;  %v8305_v36 = vunpack.i.h.bf16 %v10566_v15 }
  0xb7   : > { %v10593_v44 = vpop.permute.xlu0 %8337  ;;  %8622 = vrot.lane.b32.xlu1 %v8621_v22, %s9853_s28  ;;  %v1710_v49 = vsel %vm560_vm0, %v9773_v54, %v8305_v36 }
  0xb9   : > { %8627 = vrot.lane.b32.xlu0 %v8601_v59, %s9854_s15  ;;  %v10602_v46 = vpop.permute.xlu1 %8342  ;;  %v8304_v59 = vunpack.i.l.bf16 %v10566_v15  ;;  %v1708_v15 = vsel %vm560_vm0, %v9771_v24, %v8300_v34 }
  0xbb   : > { %v10604_v50 = vpop.permute.xlu0 %8347  ;;  %8632 = vrot.lane.b32.xlu1 %v8631_v23, %s9854_s15  ;;  %v1709_v43 = vsel %vm560_vm0, %v9774_v53, %v8304_v59 }
  0xbd   : > { %8637 = vrot.lane.b32.xlu0 %v10276_v51, %s9855_s18  ;;  %v10611_v27 = vpop.permute.xlu1 %8352 }
  0xbf   : > { %v10613_v28 = vpop.permute.xlu0 %8357  ;;  %8642 = vrot.lane.b32.xlu1 %v10283_v60, %s9855_s18 }
  0xc1   : > { %8647 = vrot.lane.b32.xlu0 %v8621_v22, %s9856_s20  ;;  %v10618_v12 = vpop.permute.xlu1 %8362 }
  0xc3   : > { %v10620_v3 = vpop.permute.xlu0 %8367  ;;  %8652 = vrot.lane.b32.xlu1 %v8651_v40, %s9856_s20 }
  0xc5   : > { %8657 = vrot.lane.b32.xlu0 %v8621_v22, %s9850_s21  ;;  %v10624_v52 = vpop.permute.xlu1 %8372 }
  0xc7   : > { %v8378_v51 = vpop.permute.xlu0 %8377  ;;  %8662 = vrot.lane.b32.xlu1 %v8651_v40, %s9850_s21 }
  0xc8   : > { %v8380_v37 = vunpack.i.h.bf16 %v8378_v51  ;;  %v8379_v30 = vunpack.i.l.bf16 %v8378_v51 }
  0xc9   : > { %8667 = vrot.lane.b32.xlu0 %v8631_v23, %s9851_s22  ;;  %v8383_v38 = vpop.permute.xlu1 %8382 }
  0xca   : > { %v8385_v26 = vunpack.i.h.bf16 %v8383_v38  ;;  %v8384_v6 = vunpack.i.l.bf16 %v8383_v38  ;;  %v1740_v56 = vsel %vm1739_vm6, %v1707_v47, %v8379_v30 }
  0xcb   : > { %v8388_v55 = vpop.permute.xlu0 %8387  ;;  %8672 = vrot.lane.b32.xlu1 %v8671_v48, %s9851_s22 }
  0xcc   : > { %v8390_v22 = vunpack.i.h.bf16 %v8388_v55  ;;  %v8389_v23 = vunpack.i.l.bf16 %v8388_v55  ;;  %v1741_v55 = vsel %vm1739_vm6, %v1708_v15, %v8380_v37  ;;  %v1742_v57 = vsel %vm1739_vm6, %v1709_v43, %v8384_v6 }
  0xcd   : > { %8677 = vrot.lane.b32.xlu0 %v10283_v60, %s9852_s25  ;;  %v10638_v17 = vpop.permute.xlu1 %8392  ;;  %v1743_v19 = vsel %vm1739_vm6, %v1710_v49, %v8385_v26 }
  0xce   : > { %v8394_v10 = vunpack.i.l.bf16 %v10638_v17  ;;  %v1773_v20 = vsel %vm1772_vm7, %v1740_v56, %v8389_v23 }
  0xcf   : > { %v10643_v62 = vpop.permute.xlu0 %8397  ;;  %8682 = vrot.lane.b32.xlu1 %v10297_v9, %s9852_s25 }
  0xd0   : > { %v8400_v61 = vunpack.i.h.bf16 %v10643_v62  ;;  %v8399_v29 = vunpack.i.l.bf16 %v10643_v62  ;;  %v1775_v62 = vsel %vm1772_vm7, %v1742_v57, %v8394_v10 }
  0xd1   : > { %8687 = vrot.lane.b32.xlu0 %v8651_v40, %s9853_s28  ;;  %v10650_v60 = vpop.permute.xlu1 %8402  ;;  %v14454_v40 = vld [vmem:[#allocation11_spill] sm:$0xff] }
  0xd2   : > { %v8741_v51 = vpack.i.bf16 %v14454_v40, %v14453_v8  ;;  %v8405_v18 = vunpack.i.h.bf16 %v10650_v60  ;;  %v8404_v5 = vunpack.i.l.bf16 %v10650_v60 }
  0xd3   : > { %v8408_v32 = vpop.permute.xlu0 %8407  ;;  %8692 = vrot.lane.b32.xlu1 %v10647_v4, %s9853_s28 }
  0xd4   : > { %v8410_v45 = vunpack.i.h.bf16 %v8408_v32  ;;  %v8409_v34 = vunpack.i.l.bf16 %v8408_v32 }
  0xd5   : > { %8697 = vrot.lane.b32.xlu0 %v8671_v48, %s9854_s15  ;;  %v8413_v13 = vpop.permute.xlu1 %8412  ;;  %v8395_v48 = vunpack.i.h.bf16 %v10638_v17  ;;  %v1774_v17 = vsel %vm1772_vm7, %v1741_v55, %v8390_v22 }
  0xd6   : > { %v8415_v36 = vunpack.i.h.bf16 %v8413_v13  ;;  %v8414_v59 = vunpack.i.l.bf16 %v8413_v13  ;;  %v1807_v30 = vsel %vm1805_vm8, %v1774_v17, %v8400_v61  ;;  %v1808_v13 = vsel %vm1805_vm8, %v1775_v62, %v8404_v5 }
  0xd7   : > { %v8418_v38 = vpop.permute.xlu0 %8417  ;;  %8702 = vrot.lane.b32.xlu1 %v10658_v39, %s9854_s15  ;;  %v1776_v35 = vsel %vm1772_vm7, %v1743_v19, %v8395_v48  ;;  %v1840_v47 = vsel %vm1838_vm9, %v1807_v30, %v8410_v45 }
  0xd8   : > { %v8420_v26 = vunpack.i.h.bf16 %v8418_v38  ;;  %v8419_v6 = vunpack.i.l.bf16 %v8418_v38  ;;  %v1809_v15 = vsel %vm1805_vm8, %v1776_v35, %v8405_v18  ;;  %v1841_v54 = vsel %vm1838_vm9, %v1808_v13, %v8414_v59  ;;  %v9775_v35 = vld [vmem:[#allocation2 + $0x120] sm:$0xff]  ;;  %v9778_v13 = vld [vmem:[#allocation2 + $0x148] sm:$0x3] }
  0xd9   : > { %8707 = vrot.lane.b32.xlu0 %v10297_v9, %s9855_s18  ;;  %v8423_v58 = vpop.permute.xlu1 %8422  ;;  %v1806_v9 = vsel %vm1805_vm8, %v1773_v20, %v8399_v29  ;;  %v1842_v49 = vsel %vm1838_vm9, %v1809_v15, %v8415_v36  ;;  %v893_v36 = vrot.slane %v9775_v35, 2  ;;  %v901_v15 = vrot.slane %v9778_v13, 2 }
  0xda   : > { %v8425_v60 = vunpack.i.h.bf16 %v8423_v58  ;;  %v8424_v22 = vunpack.i.l.bf16 %v8423_v58  ;;  %v1839_v42 = vsel %vm1838_vm9, %v1806_v9, %v8409_v34  ;;  %v1873_v56 = vsel %vm1871_vm10, %v1840_v47, %v8420_v26  ;;  %v9776_v9 = vld [vmem:[#allocation2 + $0x128] sm:$0xff]  ;;  %v9777_v26 = vld [vmem:[#allocation2 + $0x130] sm:$0x3] }
  0xdb   : > { %v8428_v37 = vpop.permute.xlu0 %8427  ;;  %8712 = vrot.lane.b32.xlu1 %v10309_v2, %s9855_s18  ;;  %v1872_v55 = vsel %vm1871_vm10, %v1839_v42, %v8419_v6  ;;  %v894_v30 = vrot.slane %v9776_v9, 2  ;;  %v896_v6 = vrot.slane %v9777_v26, 2  ;;  %v9779_v42 = vld [vmem:[#allocation2 + $0x138] sm:$0xff] }
  0xdc   : > { %v8430_v32 = vunpack.i.h.bf16 %v8428_v37  ;;  %v8429_v23 = vunpack.i.l.bf16 %v8428_v37  ;;  %v1874_v61 = vsel %vm1871_vm10, %v1841_v54, %v8424_v22  ;;  %v1875_v29 = vsel %vm1871_vm10, %v1842_v49, %v8425_v60  ;;  %v9780_v54 = vld [vmem:[#allocation2 + $0x140] sm:$0xff] }
  0xdd   : > { %8717 = vrot.lane.b32.xlu0 %v10647_v4, %s9856_s20  ;;  %v8433_v24 = vpop.permute.xlu1 %8432  ;;  %v898_v47 = vrot.slane %v9779_v42, 2  ;;  %v899_v49 = vrot.slane %v9780_v54, 2 }
  0xde   : > { %v8435_v53 = vunpack.i.h.bf16 %v8433_v24  ;;  %v8434_v43 = vunpack.i.l.bf16 %v8433_v24  ;;  %v1905_v19 = vsel %vm1904_vm11, %v1872_v55, %v8429_v23  ;;  %v1906_v20 = vsel %vm1904_vm11, %v1873_v56, %v8430_v32 }
  0xdf   : > { %v8438_v48 = vpop.permute.xlu0 %8437  ;;  %8722 = vrot.lane.b32.xlu1 %v10664_v25, %s9856_s20  ;;  %v895_v23 = vsel %vm832_vm3, %v893_v36, %v894_v30  ;;  %v897_v24 = vsel %vm832_vm3, %v894_v30, %v896_v6  ;;  %v8309_v55 = vunpack.i.l.bf16 %v10564_v14  ;;  %v8315_v56 = vunpack.i.h.bf16 %v10575_v31 }
  0xe0   : > { %v8440_v10 = vunpack.i.h.bf16 %v8438_v48  ;;  %v8439_v38 = vunpack.i.l.bf16 %v8438_v48  ;;  %v1907_v45 = vsel %vm1904_vm11, %v1874_v61, %v8434_v43  ;;  %v1908_v34 = vsel %vm1904_vm11, %v1875_v29, %v8435_v53  ;;  %v10745_v48 = vld [vmem:[#allocation2 + $0x160] sm:$0x3] }
  0xe1   : > { %8727 = vrot.lane.b32.xlu0 %v10647_v4, %s9850_s21  ;;  %v8443_v57 = vpop.permute.xlu1 %8442  ;;  %v10737_v8 = vpack.i.bf16 %v897_v24, %v895_v23  ;;  %v900_v43 = vsel %vm832_vm3, %v898_v47, %v899_v49  ;;  %v8314_v61 = vunpack.i.l.bf16 %v10575_v31  ;;  %v10754_v29 = vpack.i.bf16 %v9780_v54, %v9779_v42  ;;  %v9782_v31 = vld [vmem:[#allocation2 + $0x38] sm:$0xff] }
  0xe2   : > { %v8445_v17 = vunpack.i.h.bf16 %v8443_v57  ;;  %v8444_v58 = vunpack.i.l.bf16 %v8443_v57  ;;  %v1938_v18 = vsel %vm1937_vm4, %v1905_v19, %v8439_v38  ;;  %v1939_v5 = vsel %vm1937_vm4, %v1906_v20, %v8440_v10 }
  0xe3   : > { %v10717_v62 = vpop.permute.xlu0 %8447  ;;  %8732 = vrot.lane.b32.xlu1 %v10664_v25, %s9850_s21  ;;  %v1970_v4 = vpack.c.bf16 %v1939_v5, %v1938_v18  ;;  %v906_v10 = vrot.slane %v10745_v48, 2  ;;  %v8310_v38 = vunpack.i.h.bf16 %v10564_v14  ;;  %v10834_v48 = vld [vmem:[#allocation2 + $0x188] sm:$0xff] }
  0xe4   : > { %v1940_v59 = vsel %vm1937_vm4, %v1907_v45, %v8444_v58  ;;  %v1941_v37 = vsel %vm1937_vm4, %v1908_v34, %v8445_v17  ;;  %v8450_v57 = vunpack.i.h.bf16 %v10717_v62  ;;  %v8449_v19 = vunpack.i.l.bf16 %v10717_v62  ;;  %v9783_v34 = vld [vmem:[#allocation2 + $0x30] sm:$0xff] }
  0xe5   : > { %8737 = vrot.lane.b32.xlu0 %v10658_v39, %s9851_s22  ;;  %8172 = vmatprep.mubr.msk.bf16.mxu0 %vm2013_vm12, %v1970_v4  ;;  %v8453_v60 = vpop.permute.xlu1 %8452  ;;  %v1971_v22 = vpack.c.bf16 %v1941_v37, %v1940_v59  ;;  %v1712_v45 = vsel %vm560_vm0, %v9782_v31, %v8310_v38  ;;  %v1711_v4 = vsel %vm560_vm0, %v9783_v34, %v8309_v55  ;;  %v9785_v59 = vld [vmem:[#allocation2 + $0x48] sm:$0xff] }
  0xe6   : > { %v8455_v17 = vunpack.i.h.bf16 %v8453_v60  ;;  %v8454_v58 = vunpack.i.l.bf16 %v8453_v60  ;;  %v1713_v62 = vsel %vm560_vm0, %v9785_v59, %v8314_v61  ;;  %v1745_v26 = vsel %vm1739_vm6, %v1712_v45, %v8450_v57 }
  0xe7   : > { %v8458_v32 = vpop.permute.xlu0 %8457  ;;  %8742 = vrot.lane.b32.xlu1 %v8741_v51, %s9851_s22  ;;  %8173 = vmatmul.mubr.msk.bf16.vlgmr.msra.gmra.mrb[0].mxu0 %vm2013_vm12, %v1971_v22  ;;  %v8766_v51 = vpack.i.bf16 %v9776_v9, %v9775_v35  ;;  %v9784_v35 = vld [vmem:[#allocation2 + $0x50] sm:$0xff]  ;;  %v1744_v6 = vsel %vm1739_vm6, %v1711_v4, %v8449_v19 }
  0xe8   : > { %v8460_v18 = vunpack.i.h.bf16 %v8458_v32  ;;  %v8459_v14 = vunpack.i.l.bf16 %v8458_v32  ;;  %v1714_v36 = vsel %vm560_vm0, %v9784_v35, %v8315_v56  ;;  %v1746_v23 = vsel %vm1739_vm6, %v1713_v62, %v8454_v58 }
  0xe9   : > { %8747 = vrot.lane.b32.xlu0 %v10309_v2, %s9852_s25  ;;  %v8463_v39 = vpop.permute.xlu1 %8462  ;;  %v902_v2 = vsel %vm832_vm3, %v899_v49, %v901_v15  ;;  %v1747_v32 = vsel %vm1739_vm6, %v1714_v36, %v8455_v17 }
  0xea   : > { %v10758_v20 = vpack.i.bf16 %v902_v2, %v900_v43  ;;  %v8465_v37 = vunpack.i.h.bf16 %v8463_v39  ;;  %v8464_v9 = vunpack.i.l.bf16 %v8463_v39  ;;  %v1777_v24 = vsel %vm1772_vm7, %v1744_v6, %v8459_v14 }
  0xeb   : > { %v8468_v53 = vpop.permute.xlu0 %8467  ;;  %8752 = vrot.lane.b32.xlu1 %v10315_v11, %s9852_s25  ;;  %v1778_v13 = vsel %vm1772_vm7, %v1745_v26, %v8460_v18 }
  0xec   : > { %v8470_v60 = vunpack.i.h.bf16 %v8468_v53  ;;  %v8469_v22 = vunpack.i.l.bf16 %v8468_v53  ;;  %v1779_v49 = vsel %vm1772_vm7, %v1746_v23, %v8464_v9  ;;  %v1780_v53 = vsel %vm1772_vm7, %v1747_v32, %v8465_v37 }
  0xed   : > { %8757 = vrot.lane.b32.xlu0 %v10664_v25, %s9853_s28  ;;  %v10741_v40 = vpop.permute.xlu1 %8472 }
  0xee   : > { %v8475_v39 = vunpack.i.h.bf16 %v10741_v40  ;;  %v8474_v42 = vunpack.i.l.bf16 %v10741_v40  ;;  %v1810_v38 = vsel %vm1805_vm8, %v1777_v24, %v8469_v22 }
  0xef   : > { %v8478_v25 = vpop.permute.xlu0 %8477  ;;  %8762 = vrot.lane.b32.xlu1 %v10737_v8, %s9853_s28 }
  0xf0   : > { %v8480_v47 = vunpack.i.h.bf16 %v8478_v25  ;;  %v8479_v54 = vunpack.i.l.bf16 %v8478_v25  ;;  %v1812_v17 = vsel %vm1805_vm8, %v1779_v49, %v8474_v42  ;;  %v1813_v58 = vsel %vm1805_vm8, %v1780_v53, %v8475_v39  ;;  %v9786_v42 = vld [vmem:[#allocation2 + $0x150] sm:$0xff] }
  0xf1   : > { %8767 = vrot.lane.b32.xlu0 %v8766_v51, %s9854_s15  ;;  %v8483_v5 = vpop.permute.xlu1 %8482  ;;  %v903_v53 = vrot.slane %v9786_v42, 2 }
  0xf2   : > { %v8485_v51 = vunpack.i.h.bf16 %v8483_v5  ;;  %v8484_v43 = vunpack.i.l.bf16 %v8483_v5  ;;  %v1843_v18 = vsel %vm1838_vm9, %v1810_v38, %v8479_v54  ;;  %v9788_v38 = vld [vmem:[#allocation2 + $0x178] sm:$0x3] }
  0xf3   : > { %v8488_v30 = vpop.permute.xlu0 %8487  ;;  %8772 = vrot.lane.b32.xlu1 %v10754_v29, %s9854_s15 }
  0xf4   : > { %v8490_v55 = vunpack.i.h.bf16 %v8488_v30  ;;  %v8489_v56 = vunpack.i.l.bf16 %v8488_v30  ;;  %v1845_v5 = vsel %vm1838_vm9, %v1812_v17, %v8484_v43  ;;  %v1846_v31 = vsel %vm1838_vm9, %v1813_v58, %v8485_v51 }
  0xf5   : > { %8777 = vrot.lane.b32.xlu0 %v10315_v11, %s9855_s18  ;;  %v8493_v15 = vpop.permute.xlu1 %8492  ;;  %v1811_v11 = vsel %vm1805_vm8, %v1778_v13, %v8470_v60 }
  0xf6   : > { %v8495_v61 = vunpack.i.h.bf16 %v8493_v15  ;;  %v8494_v40 = vunpack.i.l.bf16 %v8493_v15  ;;  %v1844_v14 = vsel %vm1838_vm9, %v1811_v11, %v8480_v47  ;;  %v1876_v35 = vsel %vm1871_vm10, %v1843_v18, %v8489_v56  ;;  %v9787_v47 = vld [vmem:[#allocation2 + $0x158] sm:$0xff]  ;;  %v10826_v18 = vld [vmem:[#allocation2 + $0x180] sm:$0xff] }
  0xf7   : > { %v8498_v2 = vpop.permute.xlu0 %8497  ;;  %8782 = vrot.lane.b32.xlu1 %v10323_v33, %s9855_s18  ;;  %v1877_v36 = vsel %vm1871_vm10, %v1844_v14, %v8490_v55  ;;  %v904_v51 = vrot.slane %v9787_v47, 2  ;;  %v911_v11 = vrot.slane %v9788_v38, 2  ;;  %v9789_v55 = vld [vmem:[#allocation2 + $0x168] sm:$0xff] }
  0xf8   : > { %v8500_v57 = vunpack.i.h.bf16 %v8498_v2  ;;  %v8499_v25 = vunpack.i.l.bf16 %v8498_v2  ;;  %v1878_v37 = vsel %vm1871_vm10, %v1845_v5, %v8494_v40  ;;  %v1879_v9 = vsel %vm1871_vm10, %v1846_v31, %v8495_v61  ;;  %v9790_v61 = vld [vmem:[#allocation2 + $0x170] sm:$0xff] }
  0xf9   : > { %8787 = vrot.lane.b32.xlu0 %v10737_v8, %s9856_s20  ;;  %v8503_v19 = vpop.permute.xlu1 %8502  ;;  %v908_v56 = vrot.slane %v9789_v55, 2  ;;  %v909_v40 = vrot.slane %v9790_v61, 2  ;;  %v10838_v31 = vpack.i.bf16 %v9790_v61, %v9789_v55 }
  0xfa   : > { %v8505_v45 = vunpack.i.h.bf16 %v8503_v19  ;;  %v8504_v34 = vunpack.i.l.bf16 %v8503_v19  ;;  %v1909_v30 = vsel %vm1904_vm11, %v1876_v35, %v8499_v25  ;;  %v1910_v26 = vsel %vm1904_vm11, %v1877_v36, %v8500_v57 }
  0xfb   : > { %v8508_v4 = vpop.permute.xlu0 %8507  ;;  %8792 = vrot.lane.b32.xlu1 %v10758_v20, %s9856_s20  ;;  %v905_v25 = vsel %vm832_vm3, %v903_v53, %v904_v51  ;;  %v910_v17 = vsel %vm832_vm3, %v908_v56, %v909_v40  ;;  %v912_v58 = vsel %vm832_vm3, %v909_v40, %v911_v11  ;;  %v8319_v35 = vunpack.i.l.bf16 %v10577_v63 }
  0xfc   : > { %v8510_v59 = vunpack.i.h.bf16 %v8508_v4  ;;  %v8509_v62 = vunpack.i.l.bf16 %v8508_v4  ;;  %v1911_v24 = vsel %vm1904_vm11, %v1878_v37, %v8504_v34  ;;  %v1912_v13 = vsel %vm1904_vm11, %v1879_v9, %v8505_v45 }
  0xfd   : > { %8797 = vrot.lane.b32.xlu0 %v10737_v8, %s9850_s21  ;;  %v8513_v6 = vpop.permute.xlu1 %8512  ;;  %v8811_v8 = vpack.i.bf16 %v9787_v47, %v9786_v42  ;;  %v10844_v45 = vpack.i.bf16 %v912_v58, %v910_v17  ;;  %v916_v34 = vrot.slane %v10826_v18, 1  ;;  %v8320_v4 = vunpack.i.h.bf16 %v10577_v63  ;;  %v9793_v42 = vld [vmem:[#allocation2 + $0x80] sm:$0xff] }
  0xfe   : > { %v1942_v60 = vsel %vm1937_vm4, %v1909_v30, %v8509_v62  ;;  %v1943_v22 = vsel %vm1937_vm4, %v1910_v26, %v8510_v59  ;;  %v8515_v32 = vunpack.i.h.bf16 %v8513_v6  ;;  %v8514_v23 = vunpack.i.l.bf16 %v8513_v6 }
  0xff   : > { %v10805_v15 = vpop.permute.xlu0 %8517  ;;  %8802 = vrot.lane.b32.xlu1 %v10758_v20, %s9850_s21  ;;  %v1972_v39 = vpack.c.bf16 %v1943_v22, %v1942_v60  ;;  %v917_v36 = vrot.slane %v10834_v48, 1  ;;  %v8325_v62 = vunpack.i.h.bf16 %v10584_v16  ;;  %v8324_v37 = vunpack.i.l.bf16 %v10584_v16 }
 0x100   : > { %v1944_v54 = vsel %vm1937_vm4, %v1911_v24, %v8514_v23  ;;  %v1945_v49 = vsel %vm1937_vm4, %v1912_v13, %v8515_v32  ;;  %v8519_v30 = vunpack.i.l.bf16 %v10805_v15  ;;  %v10859_v26 = vpack.i.bf16 %v10834_v48, %v10826_v18  ;;  %v9791_v32 = vld [vmem:[#allocation2 + $0x68] sm:$0xff]  ;;  %v9792_v24 = vld [vmem:[#allocation2 + $0x60] sm:$0xff] }
 0x101   : > { %8807 = vrot.lane.b32.xlu0 %v10754_v29, %s9851_s22  ;;  %8176 = vmatprep.mubr.msk.bf16.mxu0 %vm2013_vm12, %v1972_v39  ;;  %v10814_v43 = vpop.permute.xlu1 %8522  ;;  %v1973_v2 = vpack.c.bf16 %v1945_v49, %v1944_v54  ;;  %v907_v29 = vsel %vm832_vm3, %v904_v51, %v906_v10  ;;  %v10836_v10 = vld [vmem:[#allocation2 + $0x190] sm:$0x3]  ;;  %v1716_v23 = vsel %vm560_vm0, %v9791_v32, %v8320_v4  ;;  %v9794_v54 = vld [vmem:[#allocation2 + $0x78] sm:$0xff] }
 0x102   : > { %v10832_v5 = vpack.i.bf16 %v907_v29, %v905_v25  ;;  %v919_v59 = vrot.slane %v10836_v10, 1  ;;  %v8525_v63 = vunpack.i.h.bf16 %v10814_v43  ;;  %v8524_v6 = vunpack.i.l.bf16 %v10814_v43 }
 0x103   : > { %v8528_v57 = vpop.permute.xlu0 %8527  ;;  %8812 = vrot.lane.b32.xlu1 %v8811_v8, %s9851_s22  ;;  %8177 = vmatmul.mubr.msk.bf16.gmra.mrb[4].mxu0 %vm2013_vm12, %v1973_v2  ;;  %v1715_v13 = vsel %vm560_vm0, %v9792_v24, %v8319_v35  ;;  %v1718_v47 = vsel %vm560_vm0, %v9793_v42, %v8325_v62  ;;  %v1717_v49 = vsel %vm560_vm0, %v9794_v54, %v8324_v37 }
 0x104   : > { %v8530_v60 = vunpack.i.h.bf16 %v8528_v57  ;;  %v8529_v22 = vunpack.i.l.bf16 %v8528_v57  ;;  %v10870_v39 = vsel %vm751_vm2, %v917_v36, %v919_v59  ;;  %v1748_v43 = vsel %vm1739_vm6, %v1715_v13, %v8519_v30 }
 0x105   : > { %8817 = vrot.lane.b32.xlu0 %v10323_v33, %s9852_s25  ;;  %v8533_v19 = vpop.permute.xlu1 %8532  ;;  %v1751_v55 = vsel %vm1739_vm6, %v1718_v47, %v8525_v63  ;;  %v1750_v56 = vsel %vm1739_vm6, %v1717_v49, %v8524_v6 }
 0x106   : > { %v8534_v53 = vunpack.i.l.bf16 %v8533_v19  ;;  %v1781_v61 = vsel %vm1772_vm7, %v1748_v43, %v8529_v22 }
 0x107   : > { %v10828_v14 = vpop.permute.xlu0 %8537  ;;  %8822 = vrot.lane.b32.xlu1 %v10331_v0, %s9852_s25 }
 0x108   : > { %v8540_v38 = vunpack.i.h.bf16 %v10828_v14  ;;  %v8539_v11 = vunpack.i.l.bf16 %v10828_v14  ;;  %v1783_v58 = vsel %vm1772_vm7, %v1750_v56, %v8534_v53 }
 0x109   : > { %8827 = vrot.lane.b32.xlu0 %v10758_v20, %s9853_s28  ;;  %v10842_v33 = vpop.permute.xlu1 %8542  ;;  %v8520_v20 = vunpack.i.h.bf16 %v10805_v15  ;;  %v10867_v15 = vsel %vm751_vm2, %v916_v34, %v917_v36 }
 0x10a   : > { %v8545_v25 = vunpack.i.h.bf16 %v10842_v33  ;;  %v8544_v29 = vunpack.i.l.bf16 %v10842_v33  ;;  %v1814_v36 = vsel %vm1805_vm8, %v1781_v61, %v8539_v11 }
 0x10b   : > { %v8548_v9 = vpop.permute.xlu0 %8547  ;;  %8832 = vrot.lane.b32.xlu1 %v10832_v5, %s9853_s28  ;;  %v1749_v2 = vsel %vm1739_vm6, %v1716_v23, %v8520_v20 }
 0x10c   : > { %v1782_v40 = vsel %vm1772_vm7, %v1749_v2, %v8530_v60  ;;  %v8549_v17 = vunpack.i.l.bf16 %v8548_v9  ;;  %v1816_v63 = vsel %vm1805_vm8, %v1783_v58, %v8544_v29  ;;  %v921_v29 = vrot.slane %v10826_v18, 2 }
 0x10d   : > { %8837 = vrot.lane.b32.xlu0 %v8811_v8, %s9854_s15  ;;  %v8553_v16 = vpop.permute.xlu1 %8552  ;;  %v8535_v8 = vunpack.i.h.bf16 %v8533_v19  ;;  %v8550_v19 = vunpack.i.h.bf16 %v8548_v9  ;;  %v924_v58 = vrot.slane %v10836_v10, 2 }
 0x10e   : > { %v8555_v34 = vunpack.i.h.bf16 %v8553_v16  ;;  %v8554_v4 = vunpack.i.l.bf16 %v8553_v16  ;;  %v1847_v60 = vsel %vm1838_vm9, %v1814_v36, %v8549_v17  ;;  %v922_v17 = vrot.slane %v10834_v48, 2  ;;  %v702_v36 = vld [vmem:[#allocation2 + $0x1a8] sm:$0x3] }
 0x10f   : > { %v8558_v51 = vpop.permute.xlu0 %8557  ;;  %8842 = vrot.lane.b32.xlu1 %v10838_v31, %s9854_s15  ;;  %v1784_v14 = vsel %vm1772_vm7, %v1751_v55, %v8535_v8  ;;  %v8891_v48 = vpack.i.bf16 %v10870_v39, %v10867_v15  ;;  %v937_v15 = vrot.slane %v702_v36, 2 }
 0x110   : > { %v8560_v59 = vunpack.i.h.bf16 %v8558_v51  ;;  %v8559_v62 = vunpack.i.l.bf16 %v8558_v51  ;;  %v1817_v6 = vsel %vm1805_vm8, %v1784_v14, %v8545_v25  ;;  %v1849_v16 = vsel %vm1838_vm9, %v1816_v63, %v8554_v4  ;;  %v700_v4 = vld [vmem:[#allocation2 + $0x198] sm:$0xff] }
 0x111   : > { %8847 = vrot.lane.b32.xlu0 %v10331_v0, %s9855_s18  ;;  %v8563_v57 = vpop.permute.xlu1 %8562  ;;  %v1815_v0 = vsel %vm1805_vm8, %v1782_v40, %v8540_v38  ;;  %v1850_v32 = vsel %vm1838_vm9, %v1817_v6, %v8555_v34  ;;  %v923_v10 = vsel %vm832_vm3, %v921_v29, %v922_v17  ;;  %v8330_v6 = vunpack.i.h.bf16 %v10586_v21 }
 0x112   : > { %v8565_v37 = vunpack.i.h.bf16 %v8563_v57  ;;  %v8564_v33 = vunpack.i.l.bf16 %v8563_v57  ;;  %v1848_v22 = vsel %vm1838_vm9, %v1815_v0, %v8550_v19  ;;  %v1880_v42 = vsel %vm1871_vm10, %v1847_v60, %v8559_v62 }
 0x113   : > { %v8568_v35 = vpop.permute.xlu0 %8567  ;;  %8852 = vrot.lane.b32.xlu1 %v10339_v1, %s9855_s18  ;;  %v1881_v47 = vsel %vm1871_vm10, %v1848_v22, %v8560_v59  ;;  %v929_v62 = vrot.slane %v700_v4, 1  ;;  %v8329_v60 = vunpack.i.l.bf16 %v10586_v21 }
 0x114   : > { %v8570_v20 = vunpack.i.h.bf16 %v8568_v35  ;;  %v8569_v9 = vunpack.i.l.bf16 %v8568_v35  ;;  %v1882_v8 = vsel %vm1871_vm10, %v1849_v16, %v8564_v33  ;;  %v1883_v53 = vsel %vm1871_vm10, %v1850_v32, %v8565_v37  ;;  %v701_v35 = vld [vmem:[#allocation2 + $0x1a0] sm:$0xff] }
 0x115   : > { %8857 = vrot.lane.b32.xlu0 %v10832_v5, %s9856_s20  ;;  %v8573_v30 = vpop.permute.xlu1 %8572  ;;  %v930_v59 = vrot.slane %v701_v35, 1  ;;  %v932_v37 = vrot.slane %v702_v36, 1  ;;  %v8911_v22 = vpack.i.bf16 %v701_v35, %v700_v4  ;;  %v8335_v16 = vunpack.i.h.bf16 %v10591_v7 }
 0x116   : > { %v8575_v23 = vunpack.i.h.bf16 %v8573_v30  ;;  %v8574_v24 = vunpack.i.l.bf16 %v8573_v30  ;;  %v1913_v51 = vsel %vm1904_vm11, %v1880_v42, %v8569_v9  ;;  %v1914_v43 = vsel %vm1904_vm11, %v1881_v47, %v8570_v20 }
 0x117   : > { %v8578_v13 = vpop.permute.xlu0 %8577  ;;  %8862 = vrot.lane.b32.xlu1 %v10844_v45, %s9856_s20  ;;  %v935_v9 = vrot.slane %v701_v35, 2  ;;  %v934_v30 = vrot.slane %v700_v4, 2  ;;  %v933_v63 = vsel %vm751_vm2, %v930_v59, %v932_v37  ;;  %v8334_v32 = vunpack.i.l.bf16 %v10591_v7 }
 0x118   : > { %v8580_v54 = vunpack.i.h.bf16 %v8578_v13  ;;  %v8579_v49 = vunpack.i.l.bf16 %v8578_v13  ;;  %v1915_v61 = vsel %vm1904_vm11, %v1882_v8, %v8574_v24  ;;  %v1916_v40 = vsel %vm1904_vm11, %v1883_v53, %v8575_v23  ;;  %v9795_v53 = vld [vmem:[#allocation2 + $0x98] sm:$0xff] }
 0x119   : > { %8867 = vrot.lane.b32.xlu0 %v10832_v5, %s9850_s21  ;;  %v8583_v2 = vpop.permute.xlu1 %8582  ;;  %v938_v24 = vsel %vm832_vm3, %v935_v9, %v937_v15 }
 0x11a   : > { %v1946_v38 = vsel %vm1937_vm4, %v1913_v51, %v8579_v49  ;;  %v1947_v11 = vsel %vm1937_vm4, %v1914_v43, %v8580_v54  ;;  %v8585_v55 = vunpack.i.h.bf16 %v8583_v2  ;;  %v8584_v56 = vunpack.i.l.bf16 %v8583_v2  ;;  %v9796_v43 = vld [vmem:[#allocation2 + $0x90] sm:$0xff] }
 0x11b   : > { %v10916_v57 = vpop.permute.xlu0 %8587  ;;  %8872 = vrot.lane.b32.xlu1 %v10844_v45, %s9850_s21  ;;  %v1974_v25 = vpack.c.bf16 %v1947_v11, %v1946_v38  ;;  %v1720_v51 = vsel %vm560_vm0, %v9795_v53, %v8330_v6  ;;  %v1719_v2 = vsel %vm560_vm0, %v9796_v43, %v8329_v60  ;;  %v9797_v11 = vld [vmem:[#allocation2 + $0xb0] sm:$0xff] }
 0x11c   : > { %v1948_v5 = vsel %vm1937_vm4, %v1915_v61, %v8584_v56  ;;  %v1949_v19 = vsel %vm1937_vm4, %v1916_v40, %v8585_v55  ;;  %v8590_v13 = vunpack.i.h.bf16 %v10916_v57  ;;  %v8589_v42 = vunpack.i.l.bf16 %v10916_v57  ;;  %v9798_v56 = vld [vmem:[#allocation2 + $0xa8] sm:$0xff] }
 0x11d   : > { %8877 = vrot.lane.b32.xlu0 %v10838_v31, %s9851_s22  ;;  %8180 = vmatprep.mubr.msk.bf16.mxu0 %vm2013_vm12, %v1974_v25  ;;  %v10928_v14 = vpop.permute.xlu1 %8592  ;;  %v1975_v34 = vpack.c.bf16 %v1949_v19, %v1948_v5  ;;  %v925_v31 = vsel %vm832_vm3, %v922_v17, %v924_v58  ;;  %v1722_v55 = vsel %vm560_vm0, %v9797_v11, %v8335_v16 }
 0x11e   : > { %v10942_v20 = vpack.i.bf16 %v925_v31, %v923_v10  ;;  %v8595_v21 = vunpack.i.h.bf16 %v10928_v14  ;;  %v8594_v54 = vunpack.i.l.bf16 %v10928_v14  ;;  %v1721_v61 = vsel %vm560_vm0, %v9798_v56, %v8334_v32 }
 0x11f   : > { %v8598_v18 = vpop.permute.xlu0 %8597  ;;  %8882 = vrot.lane.b32.xlu1 %v10859_v26, %s9851_s22  ;;  %8181 = vmatmul.mubr.msk.bf16.gmra.mrb[8].mxu0 %vm2013_vm12, %v1975_v34  ;;  %v1753_v29 = vsel %vm1739_vm6, %v1720_v51, %v8590_v13 }
 0x120   : > { %v8600_v49 = vunpack.i.h.bf16 %v8598_v18  ;;  %v8599_v7 = vunpack.i.l.bf16 %v8598_v18  ;;  %v1755_v17 = vsel %vm1739_vm6, %v1722_v55, %v8595_v21  ;;  %v1754_v58 = vsel %vm1739_vm6, %v1721_v61, %v8594_v54 }
 0x121   : > { %8887 = vrot.lane.b32.xlu0 %v10339_v1, %s9852_s25  ;;  %v8603_v0 = vpop.permute.xlu1 %8602  ;;  %v931_v1 = vsel %vm751_vm2, %v929_v62, %v930_v59 }
 0x122   : > { %v8921_v47 = vpack.i.bf16 %v933_v63, %v931_v1  ;;  %v8605_v40 = vunpack.i.h.bf16 %v8603_v0  ;;  %v8604_v57 = vunpack.i.l.bf16 %v8603_v0  ;;  %v1786_v34 = vsel %vm1772_vm7, %v1753_v29, %v8600_v49 }
 0x123   : > { %v10939_v33 = vpop.permute.xlu0 %8607  ;;  %8892 = vrot.lane.b32.xlu1 %v8891_v48, %s9852_s25 }
 0x124   : > { %v8610_v5 = vunpack.i.h.bf16 %v10939_v33  ;;  %v8609_v19 = vunpack.i.l.bf16 %v10939_v33  ;;  %v1787_v31 = vsel %vm1772_vm7, %v1754_v58, %v8604_v57  ;;  %v1788_v0 = vsel %vm1772_vm7, %v1755_v17, %v8605_v40 }
 0x125   : > { %8897 = vrot.lane.b32.xlu0 %v10844_v45, %s9853_s28  ;;  %v10946_v39 = vpop.permute.xlu1 %8612  ;;  %v10957_v45 = vsel %vm832_vm3, %v934_v30, %v935_v9  ;;  %v8340_v17 = vunpack.i.h.bf16 %v10593_v44  ;;  %v8339_v58 = vunpack.i.l.bf16 %v10593_v44  ;;  %v9800_v44 = vld [vmem:[#allocation2 + $0xc0] sm:$0xff] }
 0x126   : > { %v8931_v38 = vpack.i.bf16 %v938_v24, %v10957_v45  ;;  %v8615_v35 = vunpack.i.h.bf16 %v10946_v39  ;;  %v8614_v36 = vunpack.i.l.bf16 %v10946_v39 }
 0x127   : > { %v8618_v23 = vpop.permute.xlu0 %8617  ;;  %8902 = vrot.lane.b32.xlu1 %v10942_v20, %s9853_s28  ;;  %s14179_s28 = scalar_lea.vmem %s14301_s9, %s7918_s24  ;;  %s7920_s24 = sshll.u32 %s14757_s30, 3 }
 0x128   : > { %v8620_v18 = vunpack.i.h.bf16 %v8618_v23  ;;  %v8619_v10 = vunpack.i.l.bf16 %v8618_v23  ;;  %v1820_v60 = vsel %vm1805_vm8, %v1787_v31, %v8614_v36  ;;  %s517_s26 = scalar_lea.vmem %s14304_s12, %s7920_s24 }
 0x129   : > { %8907 = vrot.lane.b32.xlu0 %v10859_v26, %s9854_s15  ;;  %v8623_v8 = vpop.permute.xlu1 %8622  ;;  %v1752_v26 = vsel %vm1739_vm6, %v1719_v2, %v8589_v42 }
 0x12a   : > { %v1785_v14 = vsel %vm1772_vm7, %v1752_v26, %v8599_v7  ;;  %v8625_v59 = vunpack.i.h.bf16 %v8623_v8  ;;  %v8624_v62 = vunpack.i.l.bf16 %v8623_v8 }
 0x12b   : > { %v8628_v25 = vpop.permute.xlu0 %8627  ;;  %8912 = vrot.lane.b32.xlu1 %v8911_v22, %s9854_s15  ;;  %v1818_v33 = vsel %vm1805_vm8, %v1785_v14, %v8609_v19  ;;  %v1821_v22 = vsel %vm1805_vm8, %v1788_v0, %v8615_v35  ;;  %s8274_s15 = smul.u32 24, %s14757_s30 }
 0x12c   : > { %v8630_v9 = vunpack.i.h.bf16 %v8628_v25  ;;  %v8629_v30 = vunpack.i.l.bf16 %v8628_v25  ;;  %v1851_v16 = vsel %vm1838_vm9, %v1818_v33, %v8619_v10  ;;  %v1853_v23 = vsel %vm1838_vm9, %v1820_v60, %v8624_v62 }
 0x12d   : > { %8917 = vrot.lane.b32.xlu0 %v8891_v48, %s9855_s18  ;;  %v8633_v4 = vpop.permute.xlu1 %8632  ;;  %v1819_v48 = vsel %vm1805_vm8, %v1786_v34, %v8610_v5  ;;  %v1854_v45 = vsel %vm1838_vm9, %v1821_v22, %v8625_v59  ;;  %v8345_v34 = vunpack.i.h.bf16 %v10602_v46  ;;  %v9799_v59 = vld [vmem:[#allocation2 + $0xc8] sm:$0xff] }
 0x12e   : > { %v8635_v15 = vunpack.i.h.bf16 %v8633_v4  ;;  %v8634_v1 = vunpack.i.l.bf16 %v8633_v4  ;;  %v1852_v32 = vsel %vm1838_vm9, %v1819_v48, %v8620_v18  ;;  %v8344_v4 = vunpack.i.l.bf16 %v10602_v46 }
 0x12f   : > { %v8638_v37 = vpop.permute.xlu0 %8637  ;;  %8922 = vrot.lane.b32.xlu1 %v8921_v47, %s9855_s18  ;;  %v1885_v47 = vsel %vm1871_vm10, %v1852_v32, %v8630_v9  ;;  %v1724_v62 = vsel %vm560_vm0, %v9799_v59, %v8340_v17  ;;  %s8273_s18 = smul.u32 48, %s14757_s30 }
 0x130   : > { %v8640_v39 = vunpack.i.h.bf16 %v8638_v37  ;;  %v8639_v63 = vunpack.i.l.bf16 %v8638_v37  ;;  %v1886_v49 = vsel %vm1871_vm10, %v1853_v23, %v8634_v1  ;;  %v1887_v7 = vsel %vm1871_vm10, %v1854_v45, %v8635_v15  ;;  %v9801_v1 = vld [vmem:[#allocation2 + $0xe0] sm:$0xff] }
 0x131   : > { %8927 = vrot.lane.b32.xlu0 %v10942_v20, %s9856_s20  ;;  %v8643_v6 = vpop.permute.xlu1 %8642  ;;  %v1884_v20 = vsel %vm1871_vm10, %v1851_v16, %v8629_v30  ;;  %v1723_v37 = vsel %vm560_vm0, %v9800_v44, %v8339_v58  ;;  %s14212_s23 = scalar_lea.vmem %s14303_s11, %s8273_s18  ;;  %s526_s18 = scalar_lea.vmem %s14306_s14, %s7676_s16 }
 0x132   : > { %v8645_v24 = vunpack.i.h.bf16 %v8643_v6  ;;  %v8644_v13 = vunpack.i.l.bf16 %v8643_v6  ;;  %v1917_v8 = vsel %vm1904_vm11, %v1884_v20, %v8639_v63  ;;  %v1918_v53 = vsel %vm1904_vm11, %v1885_v47, %v8640_v39  ;;  %v9802_v63 = vld [vmem:[#allocation2 + $0xd8] sm:$0xff]  ;;  %v4780_v20 = vld [vmem:[#allocation3 + $0x10] sm:$0x3] }
 0x133   : > { %v8648_v42 = vpop.permute.xlu0 %8647  ;;  %8932 = vrot.lane.b32.xlu1 %v8931_v38, %s9856_s20  ;;  %v1726_v39 = vsel %vm560_vm0, %v9801_v1, %v8345_v34  ;;  %v1725_v6 = vsel %vm560_vm0, %v9802_v63, %v8344_v4  ;;  %v4963_v17 = vrot.slane %v4780_v20, 2 }
 0x134   : > { %v8650_v21 = vunpack.i.h.bf16 %v8648_v42  ;;  %v8649_v54 = vunpack.i.l.bf16 %v8648_v42  ;;  %v1919_v55 = vsel %vm1904_vm11, %v1886_v49, %v8644_v13  ;;  %v1920_v56 = vsel %vm1904_vm11, %v1887_v7, %v8645_v24  ;;  %v4778_v13 = vld [vmem:[#allocation3] sm:$0xff]  ;;  %v4779_v42 = vld [vmem:[#allocation3 + $0x8] sm:$0xff] }
 0x135   : > { %v8653_v51 = vpop.permute.xlu1 %8652  ;;  %v4881_v49 = vrot.slane %v4779_v42, 1  ;;  %v4883_v7 = vrot.slane %v4780_v20, 1 }
 0x136   : > { %v1950_v43 = vsel %vm1937_vm4, %v1917_v8, %v8649_v54  ;;  %v1951_v2 = vsel %vm1937_vm4, %v1918_v53, %v8650_v21  ;;  %v8655_v38 = vunpack.i.h.bf16 %v8653_v51  ;;  %v8654_v11 = vunpack.i.l.bf16 %v8653_v51 }
 0x137   : > { %v11007_v61 = vpop.permute.xlu0 %8657  ;;  %v1976_v40 = vpack.c.bf16 %v1951_v2, %v1950_v43  ;;  %v4880_v54 = vrot.slane %v4778_v13, 1 }
 0x138   : > { %v1952_v57 = vsel %vm1937_vm4, %v1919_v55, %v8654_v11  ;;  %v1953_v25 = vsel %vm1937_vm4, %v1920_v56, %v8655_v38  ;;  %v8659_v35 = vunpack.i.l.bf16 %v11007_v61  ;;  %v8660_v18 = vunpack.i.h.bf16 %v11007_v61 }
 0x139   : > { %8184 = vmatprep.mubr.msk.bf16.mxu0 %vm2013_vm12, %v1976_v40  ;;  %v11012_v26 = vpop.permute.xlu1 %8662  ;;  %v1977_v29 = vpack.c.bf16 %v1953_v25, %v1952_v57  ;;  %v4882_v55 = vsel %vm751_vm2, %v4880_v54, %v4881_v49  ;;  %v4884_v56 = vsel %vm751_vm2, %v4881_v49, %v4883_v7 }
 0x13a   : > { %v8665_v10 = vunpack.i.h.bf16 %v11012_v26  ;;  %v8664_v31 = vunpack.i.l.bf16 %v11012_v26  ;;  %v1756_v60 = vsel %vm1739_vm6, %v1723_v37, %v8659_v35  ;;  %v1757_v32 = vsel %vm1739_vm6, %v1724_v62, %v8660_v18 }
 0x13b   : > { %v8668_v5 = vpop.permute.xlu0 %8667  ;;  %8185 = vmatmul.mubr.msk.bf16.gmra.mrb[12].mxu0 %vm2013_vm12, %v1977_v29  ;;  %v8936_v29 = vpack.i.bf16 %v4884_v56, %v4882_v55  ;;  %v8354_v55 = vunpack.i.l.bf16 %v10611_v27 }
 0x13c   : > { %v8669_v0 = vunpack.i.l.bf16 %v8668_v5  ;;  %v8670_v33 = vunpack.i.h.bf16 %v8668_v5  ;;  %v1759_v23 = vsel %vm1739_vm6, %v1726_v39, %v8665_v10  ;;  %v1758_v45 = vsel %vm1739_vm6, %v1725_v6, %v8664_v31 }
 0x13d   : > { %v8673_v19 = vpop.permute.xlu1 %8672  ;;  %v4960_v5 = vrot.slane %v4778_v13, 2  ;;  %8937 = vrot.lane.b32.xlu1 %v8936_v29, %s9856_s20 }
 0x13e   : > { %v8675_v46 = vunpack.i.h.bf16 %v8673_v19  ;;  %v8674_v9 = vunpack.i.l.bf16 %v8673_v19  ;;  %v1789_v24 = vsel %vm1772_vm7, %v1756_v60, %v8669_v0  ;;  %v1790_v47 = vsel %vm1772_vm7, %v1757_v32, %v8670_v33 }
 0x13f   : > { %v8678_v14 = vpop.permute.xlu0 %8677  ;;  %v4961_v19 = vrot.slane %v4779_v42, 2 }
 0x140   : > { %v8680_v30 = vunpack.i.h.bf16 %v8678_v14  ;;  %v8679_v15 = vunpack.i.l.bf16 %v8678_v14  ;;  %v1791_v8 = vsel %vm1772_vm7, %v1758_v45, %v8674_v9  ;;  %v1792_v53 = vsel %vm1772_vm7, %v1759_v23, %v8675_v46 }
 0x141   : > { %v11076_v36 = vpop.permute.xlu1 %8682  ;;  %v4962_v10 = vsel %vm832_vm3, %v4960_v5, %v4961_v19  ;;  %v4964_v31 = vsel %vm832_vm3, %v4961_v19, %v4963_v17  ;;  %v9803_v19 = vld [vmem:[#allocation2 + $0xf8] sm:$0xff] }
 0x142   : > { %v8684_v22 = vunpack.i.l.bf16 %v11076_v36  ;;  %v1822_v51 = vsel %vm1805_vm8, %v1789_v24, %v8679_v15  ;;  %v1823_v43 = vsel %vm1805_vm8, %v1790_v47, %v8680_v30  ;;  %v8685_v2 = vunpack.i.h.bf16 %v11076_v36 }
 0x143   : > { %v8688_v48 = vpop.permute.xlu0 %8687  ;;  %v8941_v9 = vpack.i.bf16 %v4964_v31, %v4962_v10 }
 0x144   : > { %v1824_v38 = vsel %vm1805_vm8, %v1791_v8, %v8684_v22  ;;  %v8690_v61 = vunpack.i.h.bf16 %v8688_v48  ;;  %v8689_v40 = vunpack.i.l.bf16 %v8688_v48  ;;  %v1825_v0 = vsel %vm1805_vm8, %v1792_v53, %v8685_v2 }
 0x145   : > { %v8693_v16 = vpop.permute.xlu1 %8692  ;;  %8942 = vrot.lane.b32.xlu1 %v8941_v9, %s9857_s19  ;;  %v8350_v2 = vunpack.i.h.bf16 %v10604_v50 }
 0x146   : > { %v8695_v57 = vunpack.i.h.bf16 %v8693_v16  ;;  %v8694_v25 = vunpack.i.l.bf16 %v8693_v16  ;;  %v1855_v59 = vsel %vm1838_vm9, %v1822_v51, %v8689_v40  ;;  %v1856_v62 = vsel %vm1838_vm9, %v1823_v43, %v8690_v61 }
 0x147   : > { %v8698_v21 = vpop.permute.xlu0 %8697  ;;  %v1728_v17 = vsel %vm560_vm0, %v9803_v19, %v8350_v2 }
 0x148   : > { %v8700_v58 = vunpack.i.h.bf16 %v8698_v21  ;;  %v8699_v14 = vunpack.i.l.bf16 %v8698_v21  ;;  %v1857_v44 = vsel %vm1838_vm9, %v1824_v38, %v8694_v25  ;;  %v1858_v37 = vsel %vm1838_vm9, %v1825_v0, %v8695_v57 }
 0x149   : > { %v8703_v11 = vpop.permute.xlu1 %8702  ;;  %v8349_v38 = vunpack.i.l.bf16 %v10604_v50 }
 0x14a   : > { %v8705_v34 = vunpack.i.h.bf16 %v8703_v11  ;;  %v8704_v4 = vunpack.i.l.bf16 %v8703_v11  ;;  %v1888_v30 = vsel %vm1871_vm10, %v1855_v59, %v8699_v14  ;;  %v1889_v15 = vsel %vm1871_vm10, %v1856_v62, %v8700_v58  ;;  %v9804_v58 = vld [vmem:[#allocation2 + $0xf0] sm:$0xff] }
 0x14b   : > { %v8708_v26 = vpop.permute.xlu0 %8707  ;;  %v8355_v11 = vunpack.i.h.bf16 %v10611_v27  ;;  %v1727_v14 = vsel %vm560_vm0, %v9804_v58, %v8349_v38 }
 0x14c   : > { %v8710_v35 = vunpack.i.h.bf16 %v8708_v26  ;;  %v8709_v36 = vunpack.i.l.bf16 %v8708_v26  ;;  %v1890_v63 = vsel %vm1871_vm10, %v1857_v44, %v8704_v4  ;;  %v1891_v6 = vsel %vm1871_vm10, %v1858_v37, %v8705_v34  ;;  %v9805_v34 = vld [vmem:[#allocation2 + $0x110] sm:$0xff]  ;;  %v9806_v4 = vld [vmem:[#allocation2 + $0x108] sm:$0xff] }
 0x14d   : > { %v8713_v18 = vpop.permute.xlu1 %8712  ;;  %v1730_v50 = vsel %vm560_vm0, %v9805_v34, %v8355_v11  ;;  %v1729_v27 = vsel %vm560_vm0, %v9806_v4, %v8354_v55 }
 0x14e   : > { %v8715_v33 = vunpack.i.h.bf16 %v8713_v18  ;;  %v8714_v48 = vunpack.i.l.bf16 %v8713_v18  ;;  %v1921_v60 = vsel %vm1904_vm11, %v1888_v30, %v8709_v36  ;;  %v1922_v22 = vsel %vm1904_vm11, %v1889_v15, %v8710_v35 }
 0x14f   : > { %v8718_v46 = vpop.permute.xlu0 %8717 }
 0x150   : > { %v8720_v1 = vunpack.i.h.bf16 %v8718_v46  ;;  %v8719_v39 = vunpack.i.l.bf16 %v8718_v46  ;;  %v1923_v13 = vsel %vm1904_vm11, %v1890_v63, %v8714_v48  ;;  %v1924_v42 = vsel %vm1904_vm11, %v1891_v6, %v8715_v33 }
 0x151   : > { %v8723_v16 = vpop.permute.xlu1 %8722 }
 0x152   : > { %v1954_v32 = vsel %vm1937_vm4, %v1921_v60, %v8719_v39  ;;  %v1955_v23 = vsel %vm1937_vm4, %v1922_v22, %v8720_v1  ;;  %v8725_v45 = vunpack.i.h.bf16 %v8723_v16  ;;  %v8724_v24 = vunpack.i.l.bf16 %v8723_v16 }
 0x153   : > { %v8728_v20 = vpop.permute.xlu0 %8727  ;;  %v1978_v47 = vpack.c.bf16 %v1955_v23, %v1954_v32 }
 0x154   : > { %v1956_v21 = vsel %vm1937_vm4, %v1923_v13, %v8724_v24  ;;  %v1957_v54 = vsel %vm1937_vm4, %v1924_v42, %v8725_v45  ;;  %v8730_v61 = vunpack.i.h.bf16 %v8728_v20  ;;  %v8729_v40 = vunpack.i.l.bf16 %v8728_v20 }
 0x155   : > { %8188 = vmatprep.mubr.msk.bf16.mxu0 %vm2013_vm12, %v1978_v47  ;;  %v8733_v49 = vpop.permute.xlu1 %8732  ;;  %v1979_v7 = vpack.c.bf16 %v1957_v54, %v1956_v21 }
 0x156   : > { %v8735_v57 = vunpack.i.h.bf16 %v8733_v49  ;;  %v8734_v25 = vunpack.i.l.bf16 %v8733_v49  ;;  %v1760_v10 = vsel %vm1739_vm6, %v1727_v14, %v8729_v40  ;;  %v1761_v31 = vsel %vm1739_vm6, %v1728_v17, %v8730_v61 }
 0x157   : > { %v8738_v8 = vpop.permute.xlu0 %8737  ;;  %8189 = vmatmul.mubr.msk.bf16.gmra.mrb[16].mxu0 %vm2013_vm12, %v1979_v7 }
 0x158   : > { %v8740_v26 = vunpack.i.h.bf16 %v8738_v8  ;;  %v8739_v29 = vunpack.i.l.bf16 %v8738_v8  ;;  %v1763_v62 = vsel %vm1739_vm6, %v1730_v50, %v8735_v57  ;;  %v1762_v44 = vsel %vm1739_vm6, %v1729_v27, %v8734_v25 }
 0x159   : > { %v8743_v53 = vpop.permute.xlu1 %8742 }
 0x15a   : > { %v8745_v35 = vunpack.i.h.bf16 %v8743_v53  ;;  %v8744_v36 = vunpack.i.l.bf16 %v8743_v53  ;;  %v1793_v37 = vsel %vm1772_vm7, %v1760_v10, %v8739_v29  ;;  %v1794_v33 = vsel %vm1772_vm7, %v1761_v31, %v8740_v26  ;;  %v11161_v31 = vld [vmem:[#allocation4] sm:$0xff] }
 0x15b   : > { %v8748_v51 = vpop.permute.xlu0 %8747  ;;  %14455 = vst [vmem:[#allocation5_spill] sm:$0xff] %v11161_v31  ;;  %6671 = vst.msk [vmem:[#allocation4] sm:$0xff] %vm1937_vm4, %v14447_v41 }
 0x15c   : > { %v8750_v0 = vunpack.i.h.bf16 %v8748_v51  ;;  %v8749_v59 = vunpack.i.l.bf16 %v8748_v51  ;;  %v1795_v1 = vsel %vm1772_vm7, %v1762_v44, %v8744_v36  ;;  %v1796_v39 = vsel %vm1772_vm7, %v1763_v62, %v8745_v35 }
 0x15d   : > { %v8753_v43 = vpop.permute.xlu1 %8752  ;;  %v8360_v62 = vunpack.i.h.bf16 %v10613_v28  ;;  %v8359_v44 = vunpack.i.l.bf16 %v10613_v28 }
 0x15e   : > { %v8755_v46 = vunpack.i.h.bf16 %v8753_v43  ;;  %v8754_v9 = vunpack.i.l.bf16 %v8753_v43  ;;  %v1826_v22 = vsel %vm1805_vm8, %v1793_v37, %v8749_v59  ;;  %v1827_v16 = vsel %vm1805_vm8, %v1794_v33, %v8750_v0  ;;  %v11163_v0 = vld [vmem:[#allocation4 + $0x8] sm:$0x3] }
 0x15f   : > { %v8758_v56 = vpop.permute.xlu0 %8757  ;;  %6672 = vst.msk [vmem:[#allocation4 + $0x8] sm:$0x3] %vm3612_vm13, %v14447_v41  ;;  %v8365_v37 = vunpack.i.h.bf16 %v10618_v12  ;;  %v8364_v33 = vunpack.i.l.bf16 %v10618_v12 }
 0x160   : > { %v8760_v30 = vunpack.i.h.bf16 %v8758_v56  ;;  %v8759_v15 = vunpack.i.l.bf16 %v8758_v56  ;;  %v1828_v47 = vsel %vm1805_vm8, %v1795_v1, %v8754_v9  ;;  %v1829_v21 = vsel %vm1805_vm8, %v1796_v39, %v8755_v46 }
 0x161   : > { %v8763_v5 = vpop.permute.xlu1 %8762 }
 0x162   : > { %v8765_v63 = vunpack.i.h.bf16 %v8763_v5  ;;  %v8764_v6 = vunpack.i.l.bf16 %v8763_v5  ;;  %v1859_v54 = vsel %vm1838_vm9, %v1826_v22, %v8759_v15  ;;  %v1860_v49 = vsel %vm1838_vm9, %v1827_v16, %v8760_v30  ;;  %v9808_v22 = vld [vmem:[#allocation2 + $0x120] sm:$0xff] }
 0x163   : > { %v8768_v18 = vpop.permute.xlu0 %8767  ;;  %v1731_v16 = vsel %vm560_vm0, %v9808_v22, %v8359_v44 }
 0x164   : > { %v8770_v32 = vunpack.i.h.bf16 %v8768_v18  ;;  %v8769_v23 = vunpack.i.l.bf16 %v8768_v18  ;;  %v1861_v7 = vsel %vm1838_vm9, %v1828_v47, %v8764_v6  ;;  %v1862_v8 = vsel %vm1838_vm9, %v1829_v21, %v8765_v63  ;;  %v9807_v6 = vld [vmem:[#allocation2 + $0x128] sm:$0xff] }
 0x165   : > { %v8773_v48 = vpop.permute.xlu1 %8772 }
 0x166   : > { %v8775_v45 = vunpack.i.h.bf16 %v8773_v48  ;;  %v8774_v24 = vunpack.i.l.bf16 %v8773_v48  ;;  %v1892_v2 = vsel %vm1871_vm10, %v1859_v54, %v8769_v23  ;;  %v1893_v38 = vsel %vm1871_vm10, %v1860_v49, %v8770_v32  ;;  %v9809_v32 = vld [vmem:[#allocation2 + $0x140] sm:$0xff]  ;;  %v9810_v23 = vld [vmem:[#allocation2 + $0x138] sm:$0xff] }
 0x167   : > { %v8778_v60 = vpop.permute.xlu0 %8777  ;;  %v1734_v28 = vsel %vm560_vm0, %v9809_v32, %v8365_v37  ;;  %v1733_v12 = vsel %vm560_vm0, %v9810_v23, %v8364_v33 }
 0x168   : > { %v8780_v13 = vunpack.i.h.bf16 %v8778_v60  ;;  %v8779_v42 = vunpack.i.l.bf16 %v8778_v60  ;;  %v1894_v56 = vsel %vm1871_vm10, %v1861_v7, %v8774_v24  ;;  %v1895_v61 = vsel %vm1871_vm10, %v1862_v8, %v8775_v45 }
 0x169   : > { %v8783_v20 = vpop.permute.xlu1 %8782  ;;  %v1732_v60 = vsel %vm560_vm0, %v9807_v6, %v8360_v62 }
 0x16a   : > { %v8785_v53 = vunpack.i.h.bf16 %v8783_v20  ;;  %v8784_v51 = vunpack.i.l.bf16 %v8783_v20  ;;  %v1925_v40 = vsel %vm1904_vm11, %v1892_v2, %v8779_v42  ;;  %v1926_v57 = vsel %vm1904_vm11, %v1893_v38, %v8780_v13 }
 0x16b   : > { %v8788_v43 = vpop.permute.xlu0 %8787 }
 0x16c   : > { %v8790_v11 = vunpack.i.h.bf16 %v8788_v43  ;;  %v8789_v55 = vunpack.i.l.bf16 %v8788_v43  ;;  %v1927_v17 = vsel %vm1904_vm11, %v1894_v56, %v8784_v51  ;;  %v1928_v58 = vsel %vm1904_vm11, %v1895_v61, %v8785_v53 }
 0x16d   : > { %v8793_v25 = vpop.permute.xlu1 %8792 }
 0x16e   : > { %v1958_v26 = vsel %vm1937_vm4, %v1925_v40, %v8789_v55  ;;  %v1959_v29 = vsel %vm1937_vm4, %v1926_v57, %v8790_v11  ;;  %v8795_v5 = vunpack.i.h.bf16 %v8793_v25  ;;  %v8794_v19 = vunpack.i.l.bf16 %v8793_v25 }
 0x16f   : > { %v8798_v14 = vpop.permute.xlu0 %8797  ;;  %v1980_v34 = vpack.c.bf16 %v1959_v29, %v1958_v26 }
 0x170   : > { %v1960_v50 = vsel %vm1937_vm4, %v1927_v17, %v8794_v19  ;;  %v1961_v4 = vsel %vm1937_vm4, %v1928_v58, %v8795_v5  ;;  %v8800_v46 = vunpack.i.h.bf16 %v8798_v14  ;;  %v8799_v9 = vunpack.i.l.bf16 %v8798_v14 }
 0x171   : > { %8192 = vmatprep.mubr.msk.bf16.mxu0 %vm2013_vm12, %v1980_v34  ;;  %v8803_v27 = vpop.permute.xlu1 %8802  ;;  %v1981_v35 = vpack.c.bf16 %v1961_v4, %v1960_v50 }
 0x172   : > { %v8805_v30 = vunpack.i.h.bf16 %v8803_v27  ;;  %v8804_v15 = vunpack.i.l.bf16 %v8803_v27  ;;  %v1764_v42 = vsel %vm1739_vm6, %v1731_v16, %v8799_v9  ;;  %v1765_v20 = vsel %vm1739_vm6, %v1732_v60, %v8800_v46 }
 0x173   : > { %v8808_v36 = vpop.permute.xlu0 %8807  ;;  %8193 = vmatmul.mubr.msk.bf16.gmra.mrb[20].mxu0 %vm2013_vm12, %v1981_v35 }
 0x174   : > { %v8810_v1 = vunpack.i.h.bf16 %v8808_v36  ;;  %v8809_v39 = vunpack.i.l.bf16 %v8808_v36  ;;  %v1767_v54 = vsel %vm1739_vm6, %v1734_v28, %v8805_v30  ;;  %v1766_v49 = vsel %vm1739_vm6, %v1733_v12, %v8804_v15 }
 0x175   : > { %v8813_v18 = vpop.permute.xlu1 %8812 }
 0x176   : > { %v8815_v45 = vunpack.i.h.bf16 %v8813_v18  ;;  %v8814_v24 = vunpack.i.l.bf16 %v8813_v18  ;;  %v1797_v7 = vsel %vm1772_vm7, %v1764_v42, %v8809_v39  ;;  %v1798_v8 = vsel %vm1772_vm7, %v1765_v20, %v8810_v1 }
 0x177   : > { %v8818_v10 = vpop.permute.xlu0 %8817 }
 0x178   : > { %v8820_v47 = vunpack.i.h.bf16 %v8818_v10  ;;  %v8819_v21 = vunpack.i.l.bf16 %v8818_v10  ;;  %v1799_v11 = vsel %vm1772_vm7, %v1766_v49, %v8814_v24  ;;  %v1800_v55 = vsel %vm1772_vm7, %v1767_v54, %v8815_v45 }
 0x179   : > { %v8823_v59 = vpop.permute.xlu1 %8822  ;;  %v8375_v54 = vunpack.i.h.bf16 %v10624_v52  ;;  %v8374_v49 = vunpack.i.l.bf16 %v10624_v52 }
 0x17a   : > { %v8825_v51 = vunpack.i.h.bf16 %v8823_v59  ;;  %v8824_v43 = vunpack.i.l.bf16 %v8823_v59  ;;  %v1830_v57 = vsel %vm1805_vm8, %v1797_v7, %v8819_v21  ;;  %v1831_v25 = vsel %vm1805_vm8, %v1798_v8, %v8820_v47 }
 0x17b   : > { %v8828_v48 = vpop.permute.xlu0 %8827  ;;  %v8370_v47 = vunpack.i.h.bf16 %v10620_v3  ;;  %v8369_v21 = vunpack.i.l.bf16 %v10620_v3 }
 0x17c   : > { %v8830_v2 = vunpack.i.h.bf16 %v8828_v48  ;;  %v8829_v38 = vunpack.i.l.bf16 %v8828_v48  ;;  %v1832_v34 = vsel %vm1805_vm8, %v1799_v11, %v8824_v43  ;;  %v1833_v50 = vsel %vm1805_vm8, %v1800_v55, %v8825_v51  ;;  %v9811_v55 = vld [vmem:[#allocation2 + $0x158] sm:$0xff] }
 0x17d   : > { %v8833_v63 = vpop.permute.xlu1 %8832 }
 0x17e   : > { %v8835_v56 = vunpack.i.h.bf16 %v8833_v63  ;;  %v8834_v61 = vunpack.i.l.bf16 %v8833_v63  ;;  %v1863_v4 = vsel %vm1838_vm9, %v1830_v57, %v8829_v38  ;;  %v1864_v27 = vsel %vm1838_vm9, %v1831_v25, %v8830_v2  ;;  %v9813_v57 = vld [vmem:[#allocation2 + $0x170] sm:$0xff]  ;;  %v9814_v25 = vld [vmem:[#allocation2 + $0x168] sm:$0xff] }
 0x17f   : > { %v8838_v13 = vpop.permute.xlu0 %8837  ;;  %v1738_v3 = vsel %vm560_vm0, %v9813_v57, %v8375_v54  ;;  %v1737_v52 = vsel %vm560_vm0, %v9814_v25, %v8374_v49 }
 0x180   : > { %v8840_v26 = vunpack.i.h.bf16 %v8838_v13  ;;  %v8839_v29 = vunpack.i.l.bf16 %v8838_v13  ;;  %v1865_v35 = vsel %vm1838_vm9, %v1832_v34, %v8834_v61  ;;  %v1866_v36 = vsel %vm1838_vm9, %v1833_v50, %v8835_v56  ;;  %v9812_v61 = vld [vmem:[#allocation2 + $0x150] sm:$0xff] }
 0x181   : > { %v8843_v53 = vpop.permute.xlu1 %8842  ;;  %v1736_v56 = vsel %vm560_vm0, %v9811_v55, %v8370_v47 }
 0x182   : > { %v8845_v5 = vunpack.i.h.bf16 %v8843_v53  ;;  %v8844_v19 = vunpack.i.l.bf16 %v8843_v53  ;;  %v1896_v62 = vsel %vm1871_vm10, %v1863_v4, %v8839_v29  ;;  %v1897_v44 = vsel %vm1871_vm10, %v1864_v27, %v8840_v26 }
 0x183   : > { %v8848_v40 = vpop.permute.xlu0 %8847 }
 0x184   : > { %v8850_v17 = vunpack.i.h.bf16 %v8848_v40  ;;  %v8849_v58 = vunpack.i.l.bf16 %v8848_v40  ;;  %v1898_v48 = vsel %vm1871_vm10, %v1865_v35, %v8844_v19  ;;  %v1899_v46 = vsel %vm1871_vm10, %v1866_v36, %v8845_v5 }
 0x185   : > { %v8853_v14 = vpop.permute.xlu1 %8852  ;;  %v1735_v40 = vsel %vm560_vm0, %v9812_v61, %v8369_v21  ;;  %vm3956_vm0 = vcmask 1043459  }
 0x186   : > { %v8855_v18 = vunpack.i.h.bf16 %v8853_v14  ;;  %v8854_v10 = vunpack.i.l.bf16 %v8853_v14  ;;  %v1929_v9 = vsel %vm1904_vm11, %v1896_v62, %v8849_v58  ;;  %v1930_v30 = vsel %vm1904_vm11, %v1897_v44, %v8850_v17 }
 0x187   : > { %v8858_v59 = vpop.permute.xlu0 %8857 }
 0x188   : > { %v8860_v37 = vunpack.i.h.bf16 %v8858_v59  ;;  %v8859_v33 = vunpack.i.l.bf16 %v8858_v59  ;;  %v1931_v60 = vsel %vm1904_vm11, %v1898_v48, %v8854_v10  ;;  %v1932_v22 = vsel %vm1904_vm11, %v1899_v46, %v8855_v18 }
 0x189   : > { %v8863_v15 = vpop.permute.xlu1 %8862 }
 0x18a   : > { %v1962_v1 = vsel %vm1937_vm4, %v1929_v9, %v8859_v33  ;;  %v1963_v39 = vsel %vm1937_vm4, %v1930_v30, %v8860_v37  ;;  %v8865_v63 = vunpack.i.h.bf16 %v8863_v15  ;;  %v8864_v6 = vunpack.i.l.bf16 %v8863_v15 }
 0x18b   : > { %v8868_v16 = vpop.permute.xlu0 %8867  ;;  %v1982_v32 = vpack.c.bf16 %v1963_v39, %v1962_v1 }
 0x18c   : > { %v1964_v28 = vsel %vm1937_vm4, %v1931_v60, %v8864_v6  ;;  %v1965_v23 = vsel %vm1937_vm4, %v1932_v22, %v8865_v63  ;;  %v8870_v8 = vunpack.i.h.bf16 %v8868_v16  ;;  %v8869_v53 = vunpack.i.l.bf16 %v8868_v16 }
 0x18d   : > { %8196 = vmatprep.mubr.msk.bf16.mxu0 %vm2013_vm12, %v1982_v32  ;;  %v8873_v12 = vpop.permute.xlu1 %8872  ;;  %v1983_v45 = vpack.c.bf16 %v1965_v23, %v1964_v28 }
 0x18e   : > { %v8875_v51 = vunpack.i.h.bf16 %v8873_v12  ;;  %v8874_v43 = vunpack.i.l.bf16 %v8873_v12  ;;  %v1768_v19 = vsel %vm1739_vm6, %v1735_v40, %v8869_v53  ;;  %v1769_v17 = vsel %vm1739_vm6, %v1736_v56, %v8870_v8 }
 0x18f   : > { %v8878_v24 = vpop.permute.xlu0 %8877  ;;  %8197 = vmatmul.mubr.msk.bf16.gmra.mrb[24].mxu0 %vm2013_vm12, %v1983_v45 }
 0x190   : > { %v8880_v2 = vunpack.i.h.bf16 %v8878_v24  ;;  %v8879_v38 = vunpack.i.l.bf16 %v8878_v24  ;;  %v1771_v34 = vsel %vm1739_vm6, %v1738_v3, %v8875_v51  ;;  %v1770_v50 = vsel %vm1739_vm6, %v1737_v52, %v8874_v43 }
 0x191   : > { %v8883_v13 = vpop.permute.xlu1 %8882  ;;  %v9858_v3 = vmov 1983009808   ;;  %v2367_v52 = vlaneseq  ;;  %vm3960_vm6 = vcmask 1045509  }
 0x192   : > { %v8885_v26 = vunpack.i.h.bf16 %v8883_v13  ;;  %v8884_v29 = vunpack.i.l.bf16 %v8883_v13  ;;  %v1801_v4 = vsel %vm1772_vm7, %v1768_v19, %v8879_v38  ;;  %v1802_v27 = vsel %vm1772_vm7, %v1769_v17, %v8880_v2 }
 0x193   : > { %v8888_v42 = vpop.permute.xlu0 %8887  ;;  %v2365_v25 = vunpack.c.l.s4 %v9858_v3  ;;  %v4068_v17 = vrot.slane %v11161_v31, 1 }
 0x194   : > { %v8890_v58 = vunpack.i.h.bf16 %v8888_v42  ;;  %v8889_v14 = vunpack.i.l.bf16 %v8888_v42  ;;  %v1803_v62 = vsel %vm1772_vm7, %v1770_v50, %v8884_v29  ;;  %v1804_v44 = vsel %vm1772_vm7, %v1771_v34, %v8885_v26 }
 0x195   : > { %v8893_v20 = vpop.permute.xlu1 %8892  ;;  %v2366_v26 = vunpack.c.0.s8 %v2365_v25  ;;  %v2368_v29 = vshrl.u32 %v2367_v52, 7  ;;  %vm3962_vm7 = vcmask 1046534  }
 0x196   : > { %v8895_v36 = vunpack.i.h.bf16 %v8893_v20  ;;  %v8894_v18 = vunpack.i.l.bf16 %v8893_v20  ;;  %v1834_v46 = vsel %vm1805_vm8, %v1801_v4, %v8889_v14  ;;  %v1835_v9 = vsel %vm1805_vm8, %v1802_v27, %v8890_v58 }
 0x197   : > { %v8898_v7 = vpop.permute.xlu0 %8897  ;;  %v4069_v58 = vrot.slane %v11163_v0, 1  ;;  %v11253_v34 = vsub.s32 %v2366_v26, %v2368_v29 }
 0x198   : > { %v8900_v10 = vunpack.i.h.bf16 %v8898_v7  ;;  %v8899_v59 = vunpack.i.l.bf16 %v8898_v7  ;;  %v1836_v22 = vsel %vm1805_vm8, %v1803_v62, %v8894_v18  ;;  %v1837_v16 = vsel %vm1805_vm8, %v1804_v44, %v8895_v36 }
 0x199   : > { %v8903_v11 = vpop.permute.xlu1 %8902  ;;  %v11265_v44 = vsel %vm751_vm2, %v4068_v17, %v4069_v58  ;;  %vm3964_vm8 = vcmask 1047559  }
 0x19a   : > { %v8905_v37 = vunpack.i.h.bf16 %v8903_v11  ;;  %v8904_v33 = vunpack.i.l.bf16 %v8903_v11  ;;  %v1867_v32 = vsel %vm1838_vm9, %v1834_v46, %v8899_v59  ;;  %v1868_v28 = vsel %vm1838_vm9, %v1835_v9, %v8900_v10 }
 0x19b   : > { %v8908_v5 = vpop.permute.xlu0 %8907  ;;  %v11261_v59 = vsub.s32 0, %v2368_v29  ;;  %v4092_v46 = vrot.slane %v11161_v31, 2 }
 0x19c   : > { %v8910_v30 = vunpack.i.h.bf16 %v8908_v5  ;;  %v8909_v15 = vunpack.i.l.bf16 %v8908_v5  ;;  %v1869_v23 = vsel %vm1838_vm9, %v1836_v22, %v8904_v33  ;;  %v1870_v12 = vsel %vm1838_vm9, %v1837_v16, %v8905_v37  ;;  %v11248_v5 = vld [vmem:[%s14294_s2] ss:$0 sm:$0xff] }
 0x19d   : > { %v8913_v35 = vpop.permute.xlu1 %8912  ;;  %vm4300_vm9 = vcmask 523264  }
 0x19e   : > { %v8915_v1 = vunpack.i.h.bf16 %v8913_v35  ;;  %v8914_v39 = vunpack.i.l.bf16 %v8913_v35  ;;  %v1900_v42 = vsel %vm1871_vm10, %v1867_v32, %v8909_v15  ;;  %v1901_v20 = vsel %vm1871_vm10, %v1868_v28, %v8910_v30 }
 0x19f   : > { %v8918_v48 = vpop.permute.xlu0 %8917 }
 0x1a0   : > { %v8920_v63 = vunpack.i.h.bf16 %v8918_v48  ;;  %v8919_v6 = vunpack.i.l.bf16 %v8918_v48  ;;  %v1902_v54 = vsel %vm1871_vm10, %v1869_v23, %v8914_v39  ;;  %v1903_v49 = vsel %vm1871_vm10, %v1870_v12, %v8915_v1 }
 0x1a1   : > { %v8923_v60 = vpop.permute.xlu1 %8922  ;;  %v4093_v1 = vrot.slane %v11163_v0, 2  ;;  %vm4309_vm10 = vcmask 785408  }
 0x1a2   : > { %v8925_v45 = vunpack.i.h.bf16 %v8923_v60  ;;  %v8924_v24 = vunpack.i.l.bf16 %v8923_v60  ;;  %v1933_v7 = vsel %vm1904_vm11, %v1900_v42, %v8919_v6  ;;  %v1934_v8 = vsel %vm1904_vm11, %v1901_v20, %v8920_v63 }
 0x1a3   : > { %v8928_v13 = vpop.permute.xlu0 %8927 }
 0x1a4   : > { %v8930_v47 = vunpack.i.h.bf16 %v8928_v13  ;;  %v8929_v21 = vunpack.i.l.bf16 %v8928_v13  ;;  %v1935_v11 = vsel %vm1904_vm11, %v1902_v54, %v8924_v24  ;;  %v1936_v55 = vsel %vm1904_vm11, %v1903_v49, %v8925_v45 }
 0x1a5   : > { %v8933_v53 = vpop.permute.xlu1 %8932 }
 0x1a6   : > { %v1966_v51 = vsel %vm1937_vm4, %v1933_v7, %v8929_v21  ;;  %v1967_v43 = vsel %vm1937_vm4, %v1934_v8, %v8930_v47  ;;  %v8935_v2 = vunpack.i.h.bf16 %v8933_v53  ;;  %v8934_v38 = vunpack.i.l.bf16 %v8933_v53 }
 0x1a7   : > { %v1984_v56 = vpack.c.bf16 %v1967_v43, %v1966_v51 }
 0x1a8   : > { %v1968_v61 = vsel %vm1937_vm4, %v1935_v11, %v8934_v38  ;;  %v1969_v40 = vsel %vm1937_vm4, %v1936_v55, %v8935_v2 }
 0x1a9   : > { %8200 = vmatprep.mubr.msk.bf16.mxu0 %vm2013_vm12, %v1984_v56  ;;  %v1985_v57 = vpack.c.bf16 %v1969_v40, %v1968_v61 }
 0x1ab   : > { %8201 = vmatmul.mubr.msk.bf16.gmra.mrb[28].mxu0 %vm2013_vm12, %v1985_v57 }
 0x1ba   : > { %v8174_v19 = vpop.f32.mrb[0].mxu0 }
 0x1bb   : > { %v2109_v14 = vadd.f32 %v8174_v19, %v11248_v5  ;;  %v2100_v50 = vpop.f32.mrb[1].mxu0 }
 0x1bc   : > { %v2101_v4 = vadd.f32 %v11248_v5, %v2100_v50  ;;  %v8175_v27 = vpop.f32.mrb[2].mxu0 }
 0x1bd   : > { %v11256_v35 = vmax.f32 %v2109_v14, 0.0  ;;  %v2112_v36 = vadd.f32 %v8175_v27, %v11248_v5  ;;  %v2103_v18 = vpop.f32.mrb[3].mxu0 }
 0x1be   : > { %v11259_v10 = vmax.f32 %v2101_v4, 0.0  ;;  %v2104_v62 = vadd.f32 %v11248_v5, %v2103_v18 }
 0x1bf   : > { %14456 = vst [vmem:[#allocation6_spill] sm:$0xff] %v11256_v35  ;;  %v2397_v37 = vcombine.high %v11256_v35, %v11256_v35  ;;  %v2404_v33 = vrot.slane %v11256_v35, %v11253_v34  ;;  %4748 = vst.msk [vmem:[#allocation3 + $0x31] sm:$0xff] %vm1937_vm4, %v11256_v35  ;;  %v11273_v48 = vmax.f32 %v2112_v36, 0.0 }
 0x1c0   : > { %14457 = vst [vmem:[#allocation7_spill] sm:$0xff] %v11259_v10  ;;  %v2363_v9 = vcombine.high %v11259_v10, %v11259_v10  ;;  %v2370_v30 = vrot.slane %v11259_v10, %v11253_v34  ;;  %4746 = vst.msk [vmem:[#allocation3 + $0x19] sm:$0xff] %vm1937_vm4, %v11259_v10  ;;  %v11282_v15 = vmax.f32 %v2104_v62, 0.0  ;;  %v9713_v62 = vld [vmem:[%s14297_s5 + $0x40] sm:$0xff]  }
 0x1c1   : > { %14458 = vst [vmem:[#allocation8_spill] sm:$0xff] %v11273_v48  ;;  %v2411_v39 = vrot.slane %v2397_v37, %v11253_v34  ;;  %v2412_v63 = vcombine.high %v2404_v33, %v2404_v33  ;;  %v7705_v6 = vrot.slane %v2404_v33, 9  ;;  %v2414_v60 = vcombine.high %v11273_v48, %v11273_v48  ;;  %4749 = vst.msk [vmem:[#allocation3 + $0x39] sm:$0xff] %vm1937_vm4, %v11273_v48  ;;  %v9714_v37 = vld [vmem:[%s14297_s5] sm:$0xff]  }
 0x1c2   : > { %14459 = vst [vmem:[#allocation9_spill] sm:$0xff] %v11282_v15  ;;  %v2377_v22 = vrot.slane %v2363_v9, %v11253_v34  ;;  %v2378_v16 = vcombine.high %v2370_v30, %v2370_v30  ;;  %v7697_v32 = vrot.slane %v2370_v30, 9  ;;  %v2421_v28 = vrot.slane %v11273_v48, %v11253_v34  ;;  %4747 = vst.msk [vmem:[#allocation3 + $0x21] sm:$0xff] %vm1937_vm4, %v11282_v15 }
 0x1c3   : > { %v2413_v23 = vcombine.high %v2411_v39, %v2411_v39  ;;  %v7706_v12 = vrot.slane %v2412_v63, 9  ;;  %v7707_v45 = vrot.slane %v2411_v39, 9  ;;  %v3427_v24 = vmax.f32 %v2404_v33, %v7705_v6  ;;  %7986 = vmatprep.subr.bf16.mxu0 %v9713_v62 }
 0x1c4   : > { %v2379_v13 = vcombine.high %v2377_v22, %v2377_v22  ;;  %v7698_v42 = vrot.slane %v2378_v16, 9  ;;  %v7699_v20 = vrot.slane %v2377_v22, 9  ;;  %v3419_v47 = vmax.f32 %v2370_v30, %v7697_v32  ;;  %7987 = vmatpush3.bf16.msra.mxu0 %v9714_v37 }
 0x1c5   : > { %v7708_v21 = vrot.slane %v2413_v23, 9  ;;  %v3428_v54 = vmax.f32 %v2412_v63, %v7706_v12  ;;  %v3429_v49 = vmax.f32 %v2411_v39, %v7707_v45  ;;  %v2428_v7 = vrot.slane %v2414_v60, %v11253_v34  ;;  %v9715_v45 = vld [vmem:[%s14297_s5 + $0x48] sm:$0xff]  }
 0x1c6   : > { %v7700_v8 = vrot.slane %v2379_v13, 9  ;;  %v3420_v53 = vmax.f32 %v2378_v16, %v7698_v42  ;;  %v3421_v51 = vmax.f32 %v2377_v22, %v7699_v20  ;;  %v3547_v43 = vmax.f32 %v3419_v47, %v3427_v24  ;;  %v4784_v18 = vld [vmem:[#allocation3 + $0x30] sm:$0xff]  ;;  %v9716_v24 = vld [vmem:[%s14297_s5 + $0x8] sm:$0xff]   ;;  %7988 = vmatprep.subr.bf16.mxu0 %v9715_v45 }
 0x1c7   : > { %v3430_v2 = vmax.f32 %v2413_v23, %v7708_v21  ;;  %v2429_v38 = vcombine.high %v2421_v28, %v2421_v28  ;;  %v2430_v11 = vcombine.high %v2428_v7, %v2428_v7  ;;  %v7709_v55 = vrot.slane %v2421_v28, 9  ;;  %v4781_v21 = vld [vmem:[#allocation3 + $0x18] sm:$0xff] }
 0x1c8   : > { %v3422_v56 = vmax.f32 %v2379_v13, %v7700_v8  ;;  %v3548_v61 = vmax.f32 %v3420_v53, %v3428_v54  ;;  %v3549_v40 = vmax.f32 %v3421_v51, %v3429_v49  ;;  %v3699_v57 = vrot.slane %v3547_v43, %v11261_v59  ;;  %v11297_v29 = vld [vmem:[#allocation3 + $0x38] sm:$0xff]  ;;  %v4786_v63 = vld [vmem:[#allocation3 + $0x40] sm:$0x3]  ;;  %7989 = vmatpush3.bf16.msra.mxu0 %v9716_v24 }
 0x1c9   : > { %v7710_v3 = vrot.slane %v2429_v38, 9  ;;  %v7711_v25 = vrot.slane %v2428_v7, 9  ;;  %v7712_v52 = vrot.slane %v2430_v11, 9  ;;  %v3431_v26 = vmax.f32 %v2421_v28, %v7709_v55  ;;  %v11320_v16 = vld [vmem:[#allocation3 + $0x20] sm:$0xff] }
 0x1ca   : > { %v3550_v19 = vmax.f32 %v3422_v56, %v3430_v2  ;;  %v3703_v17 = vrot.slane %v3548_v61, %v11261_v59  ;;  %v3707_v58 = vrot.slane %v3549_v40, %v11261_v59  ;;  %v2380_v14 = vcombine.high %v11282_v15, %v11282_v15  ;;  %v4783_v61 = vld [vmem:[#allocation3 + $0x28] sm:$0x3]  ;;  %v9717_v40 = vld [vmem:[%s14297_s5 + $0x50] sm:$0xff]  }
 0x1cb   : > { %v11303_v50 = vmax.f32 %v2429_v38, %v7710_v3  ;;  %v3433_v4 = vmax.f32 %v2428_v7, %v7711_v25  ;;  %v11305_v27 = vmax.f32 %v2430_v11, %v7712_v52  ;;  %v2387_v36 = vrot.slane %v11282_v15, %v11253_v34  ;;  %7990 = vmatprep.subr.bf16.mxu0 %v9717_v40 }
 0x1cc   : > { %v3711_v33 = vrot.slane %v3550_v19, %v11261_v59  ;;  %v3953_v9 = vsel %vm3952_vm14, %v3703_v17, %v3699_v57  ;;  %v2394_v30 = vrot.slane %v2380_v14, %v11253_v34  ;;  %v8951_v39 = vpack.i.bf16 %v11297_v29, %v4784_v18  ;;  %v9718_v57 = vld [vmem:[%s14297_s5 + $0x10] sm:$0xff]  }
 0x1cd   : > { %v3955_v6 = vsel %vm3954_vm15, %v3707_v58, %v3953_v9  ;;  %v2395_v60 = vcombine.high %v2387_v36, %v2387_v36  ;;  %v7701_v22 = vrot.slane %v2387_v36, 9  ;;  %v4890_v12 = vrot.slane %v4784_v18, 1  ;;  %7991 = vmatpush3.bf16.msra.mxu0 %v9718_v57 }
 0x1ce   : > { %v2396_v32 = vcombine.high %v2394_v30, %v2394_v30  ;;  %v7703_v28 = vrot.slane %v2394_v30, 9  ;;  %v3957_v23 = vsel %vm3956_vm0, %v3711_v33, %v3955_v6  ;;  %8952 = vrot.lane.b32.xlu1 %v8951_v39, %s9859_s27  ;;  %8947 = vrot.lane.b32.xlu0 %v8951_v39, %s9857_s19  ;;  %v4891_v20 = vrot.slane %v11297_v29, 1 }
 0x1cf   : > { %v7702_v13 = vrot.slane %v2395_v60, 9  ;;  %v3423_v42 = vmax.f32 %v2387_v36, %v7701_v22  ;;  %v4893_v47 = vrot.slane %v4786_v63, 1  ;;  %v8956_v7 = vpack.i.bf16 %v11320_v16, %v4781_v21 }
 0x1d0   : > { %v7704_v54 = vrot.slane %v2396_v32, 9  ;;  %v3425_v49 = vmax.f32 %v2394_v30, %v7703_v28  ;;  %v4970_v8 = vrot.slane %v4784_v18, 2  ;;  %v11334_v43 = vsel %vm751_vm2, %v4890_v12, %v4891_v20 }
 0x1d1   : > { %v3424_v53 = vmax.f32 %v2395_v60, %v7702_v13  ;;  %v3551_v51 = vmax.f32 %v3423_v42, %v3431_v26  ;;  %v11337_v2 = vsel %vm751_vm2, %v4891_v20, %v4893_v47  ;;  %v4971_v56 = vrot.slane %v11297_v29, 2 }
 0x1d2   : > { %v3426_v38 = vmax.f32 %v2396_v32, %v7704_v54  ;;  %v3553_v11 = vmax.f32 %v3425_v49, %v3433_v4  ;;  %v8961_v55 = vpack.i.bf16 %v11337_v2, %v11334_v43  ;;  %8957 = vrot.lane.b32.xlu1 %v8956_v7, %s9859_s27  ;;  %v4973_v52 = vrot.slane %v4786_v63, 2 }
 0x1d3   : > { %v3552_v3 = vmax.f32 %v3424_v53, %v11303_v50  ;;  %v3715_v25 = vrot.slane %v3551_v51, %v11261_v59  ;;  %v4885_v26 = vrot.slane %v4781_v21, 1  ;;  %v11355_v17 = vsel %vm832_vm3, %v4970_v8, %v4971_v56 }
 0x1d4   : > { %v3554_v19 = vmax.f32 %v3426_v38, %v11305_v27  ;;  %v3723_v29 = vrot.slane %v3553_v11, %v11261_v59  ;;  %8962 = vrot.lane.b32.xlu0 %v8961_v55, %s9859_s27  ;;  %14460 = vst [vmem:[#allocation10_spill] sm:$0xff] %v11355_v17  ;;  %v4886_v58 = vrot.slane %v11320_v16, 1  ;;  %v11361_v4 = vsel %vm832_vm3, %v4971_v56, %v4973_v52  ;;  %v9719_v38 = vld [vmem:[%s14297_s5 + $0x58] sm:$0xff]  }
 0x1d5   : > { %v3719_v14 = vrot.slane %v3552_v3, %v11261_v59  ;;  %v3959_v50 = vsel %vm3958_vm1, %v3715_v25, %v3957_v23  ;;  %14461 = vst [vmem:[#allocation11_spill] sm:$0xff] %v11361_v4  ;;  %v4888_v36 = vrot.slane %v4783_v61, 1  ;;  %v8966_v18 = vpack.i.bf16 %v11361_v4, %v11355_v17  ;;  %7992 = vmatprep.subr.bf16.mxu0 %v9719_v38  ;;  %v11889_v17 = vld [vmem:[#allocation4 + $0x90] sm:$0xff] }
 0x1d6   : > { %v3727_v27 = vrot.slane %v3554_v19, %v11261_v59  ;;  %v11367_v62 = vsel %vm751_vm2, %v4885_v26, %v4886_v58  ;;  %v8178_v37 = vpop.f32.mrb[4].mxu0  ;;  %v4965_v63 = vrot.slane %v4781_v21, 2  ;;  %v4966_v32 = vrot.slane %v11320_v16, 2  ;;  %14507 = vst [vmem:[#allocation52_spill] sm:$0xff] %v11889_v17  ;;  %6689 = vst.msk [vmem:[#allocation4 + $0x90] sm:$0xff] %vm1937_vm4, %v14447_v41 }
 0x1d7   : > { %v3961_v33 = vsel %vm3960_vm6, %v3719_v14, %v3959_v50  ;;  %v11371_v9 = vsel %vm751_vm2, %v4886_v58, %v4888_v36  ;;  %v2125_v30 = vadd.f32 %v8178_v37, %v11248_v5  ;;  %v2116_v39 = vpop.f32.mrb[5].mxu0  ;;  %v4968_v45 = vrot.slane %v4783_v61, 2 }
 0x1d8   : > { %v3963_v6 = vsel %vm3962_vm7, %v3723_v29, %v3961_v33  ;;  %8967 = vrot.lane.b32.xlu0 %v8966_v18, %s9856_s20  ;;  %v8986_v60 = vpack.i.bf16 %v11371_v9, %v11367_v62  ;;  %v2117_v22 = vadd.f32 %v11248_v5, %v2116_v39  ;;  %v8179_v28 = vpop.f32.mrb[6].mxu0  ;;  %v4967_v20 = vsel %vm832_vm3, %v4965_v63, %v4966_v32 }
 0x1d9   : > { %v3965_v23 = vsel %vm3964_vm8, %v3727_v27, %v3963_v6  ;;  %v11381_v12 = vmax.f32 %v2125_v30, 0.0  ;;  %v2128_v24 = vadd.f32 %v8179_v28, %v11248_v5  ;;  %v2119_v13 = vpop.f32.mrb[7].mxu0  ;;  %v4969_v54 = vsel %vm832_vm3, %v4966_v32, %v4968_v45 }
 0x1da   : > { %4024 = vst.msk [vmem:[#allocation4 + $0x11] sm:$0xff] %vm1937_vm4, %v3965_v23  ;;  %8987 = vrot.lane.b32.xlu1 %v8986_v60, %s9856_s20  ;;  %v11386_v42 = vmax.f32 %v2117_v22, 0.0  ;;  %v2120_v47 = vadd.f32 %v11248_v5, %v2119_v13  ;;  %v11406_v53 = vpack.i.bf16 %v4969_v54, %v4967_v20 }
 0x1db   : > { %14462 = vst [vmem:[#allocation12_spill] sm:$0xff] %v11381_v12  ;;  %v2465_v16 = vcombine.high %v11381_v12, %v11381_v12  ;;  %v2472_v21 = vrot.slane %v11381_v12, %v11253_v34  ;;  %4752 = vst.msk [vmem:[#allocation3 + $0x61] sm:$0xff] %vm1937_vm4, %v11381_v12  ;;  %v11397_v49 = vmax.f32 %v2128_v24, 0.0 }
 0x1dc   : > { %14463 = vst [vmem:[#allocation13_spill] sm:$0xff] %v11386_v42  ;;  %8972 = vrot.lane.b32.xlu0 %v8961_v55, %s9856_s20  ;;  %v2431_v7 = vcombine.high %v11386_v42, %v11386_v42  ;;  %v2438_v8 = vrot.slane %v11386_v42, %v11253_v34  ;;  %4750 = vst.msk [vmem:[#allocation3 + $0x49] sm:$0xff] %vm1937_vm4, %v11386_v42  ;;  %v11408_v51 = vmax.f32 %v2120_v47, 0.0 }
 0x1dd   : > { %14464 = vst [vmem:[#allocation14_spill] sm:$0xff] %v11397_v49  ;;  %v2479_v11 = vrot.slane %v2465_v16, %v11253_v34  ;;  %v2480_v55 = vcombine.high %v2472_v21, %v2472_v21  ;;  %v7721_v56 = vrot.slane %v2472_v21, 9  ;;  %v2482_v61 = vcombine.high %v11397_v49, %v11397_v49  ;;  %4753 = vst.msk [vmem:[#allocation3 + $0x69] sm:$0xff] %vm1937_vm4, %v11397_v49 }
 0x1de   : > { %14465 = vst [vmem:[#allocation15_spill] sm:$0xff] %v11408_v51  ;;  %v2445_v40 = vrot.slane %v2431_v7, %v11253_v34  ;;  %v2446_v57 = vcombine.high %v2438_v8, %v2438_v8  ;;  %v7713_v3 = vrot.slane %v2438_v8, 9  ;;  %8992 = vrot.lane.b32.xlu1 %v11406_v53, %s9857_s19  ;;  %v2489_v25 = vrot.slane %v11397_v49, %v11253_v34 }
 0x1df   : > { %4751 = vst.msk [vmem:[#allocation3 + $0x51] sm:$0xff] %vm1937_vm4, %v11408_v51  ;;  %v2481_v52 = vcombine.high %v2479_v11, %v2479_v11  ;;  %v7722_v26 = vrot.slane %v2480_v55, 9  ;;  %v7723_v19 = vrot.slane %v2479_v11, 9  ;;  %v3443_v29 = vmax.f32 %v2472_v21, %v7721_v56 }
 0x1e0   : > { %v2447_v58 = vcombine.high %v2445_v40, %v2445_v40  ;;  %v7714_v14 = vrot.slane %v2446_v57, 9  ;;  %v7715_v50 = vrot.slane %v2445_v40, 9  ;;  %v3435_v36 = vmax.f32 %v2438_v8, %v7713_v3  ;;  %8977 = vrot.lane.b32.xlu0 %v8966_v18, %s9857_s19  ;;  %v9720_v18 = vld [vmem:[%s14297_s5 + $0x18] sm:$0xff]  }
 0x1e1   : > { %v7724_v27 = vrot.slane %v2481_v52, 9  ;;  %v3444_v37 = vmax.f32 %v2480_v55, %v7722_v26  ;;  %v3445_v33 = vmax.f32 %v2479_v11, %v7723_v19  ;;  %v2496_v30 = vrot.slane %v2482_v61, %v11253_v34  ;;  %v11427_v39 = vld [vmem:[#allocation4 + $0x10] sm:$0xff]  ;;  %v11429_v63 = vld [vmem:[#allocation4 + $0x18] sm:$0x3]  ;;  %7993 = vmatpush3.bf16.msra.mxu0 %v9720_v18 }
 0x1e2   : > { %14466 = vst [vmem:[#allocation16_spill] sm:$0xff] %v11427_v39  ;;  %v7716_v6 = vrot.slane %v2447_v58, 9  ;;  %v3436_v60 = vmax.f32 %v2446_v57, %v7714_v14  ;;  %v3437_v22 = vmax.f32 %v2445_v40, %v7715_v50  ;;  %v3555_v32 = vmax.f32 %v3435_v36, %v3443_v29  ;;  %6673 = vst.msk [vmem:[#allocation4 + $0x10] sm:$0xff] %vm1937_vm4, %v14447_v41  ;;  %v4790_v19 = vld [vmem:[#allocation3 + $0x60] sm:$0xff] }
 0x1e3   : > { %6674 = vst.msk [vmem:[#allocation4 + $0x18] sm:$0x3] %vm3612_vm13, %v14447_v41  ;;  %v3446_v28 = vmax.f32 %v2481_v52, %v7724_v27  ;;  %v2497_v23 = vcombine.high %v2489_v25, %v2489_v25  ;;  %v2498_v45 = vcombine.high %v2496_v30, %v2496_v30  ;;  %v7725_v24 = vrot.slane %v2489_v25, 9 }
 0x1e4   : > { %v3438_v13 = vmax.f32 %v2447_v58, %v7716_v6  ;;  %v3556_v20 = vmax.f32 %v3436_v60, %v3444_v37  ;;  %v3557_v47 = vmax.f32 %v3437_v22, %v3445_v33  ;;  %v11443_v16 = vsel %vm832_vm3, %v4092_v46, %v4093_v1  ;;  %v4791_v0 = vld [vmem:[#allocation3 + $0x68] sm:$0xff]  ;;  %v4792_v36 = vld [vmem:[#allocation3 + $0x70] sm:$0x3]  ;;  %8982 = vrot.lane.b32.xlu0 %v11406_v53, %s9856_s20 }
 0x1e5   : > { %v3731_v21 = vrot.slane %v3555_v32, %v11261_v59  ;;  %v7726_v54 = vrot.slane %v2497_v23, 9  ;;  %v7727_v7 = vrot.slane %v2496_v30, 9  ;;  %v7728_v8 = vrot.slane %v2498_v45, 9 }
 0x1e6   : > { %v3558_v38 = vmax.f32 %v3438_v13, %v3446_v28  ;;  %v3735_v11 = vrot.slane %v3556_v20, %v11261_v59  ;;  %v3739_v55 = vrot.slane %v3557_v47, %v11261_v59  ;;  %v2448_v56 = vcombine.high %v11408_v51, %v11408_v51  ;;  %v11452_v1 = vld [vmem:[#allocation3 + $0x50] sm:$0xff] }
 0x1e7   : > { %v3447_v61 = vmax.f32 %v2489_v25, %v7725_v24  ;;  %v3448_v40 = vmax.f32 %v2497_v23, %v7726_v54  ;;  %v3449_v57 = vmax.f32 %v2496_v30, %v7727_v7  ;;  %v2455_v46 = vrot.slane %v11408_v51, %v11253_v34  ;;  %v11458_v25 = vld [vmem:[#allocation3 + $0x48] sm:$0xff] }
 0x1e8   : > { %v3743_v3 = vrot.slane %v3558_v38, %v11261_v59  ;;  %v3966_v52 = vsel %vm3952_vm14, %v3735_v11, %v3731_v21  ;;  %v2462_v26 = vrot.slane %v2448_v56, %v11253_v34  ;;  %v8996_v50 = vpack.i.bf16 %v4791_v0, %v4790_v19  ;;  %v11475_v11 = vld [vmem:[#allocation3 + $0x58] sm:$0x3] }
 0x1e9   : > { %v3967_v29 = vsel %vm3954_vm15, %v3739_v55, %v3966_v52  ;;  %v2463_v58 = vcombine.high %v2455_v46, %v2455_v46  ;;  %v7717_v14 = vrot.slane %v2455_v46, 9  ;;  %v3450_v27 = vmax.f32 %v2498_v45, %v7728_v8 }
 0x1ea   : > { %v2464_v37 = vcombine.high %v2462_v26, %v2462_v26  ;;  %v7719_v33 = vrot.slane %v2462_v26, 9  ;;  %v9006_v30 = vpack.i.bf16 %v11452_v1, %v11458_v25  ;;  %v3968_v22 = vsel %vm3956_vm0, %v3743_v3, %v3967_v29  ;;  %8997 = vrot.lane.b32.xlu1 %v8996_v50, %s9857_s19 }
 0x1eb   : > { %v7718_v6 = vrot.slane %v2463_v58, 9  ;;  %v3439_v60 = vmax.f32 %v2455_v46, %v7717_v14  ;;  %v4900_v32 = vrot.slane %v4790_v19, 1  ;;  %v4901_v23 = vrot.slane %v4791_v0, 1 }
 0x1ec   : > { %v7720_v18 = vrot.slane %v2464_v37, 9  ;;  %v3441_v28 = vmax.f32 %v2462_v26, %v7719_v33  ;;  %v4903_v24 = vrot.slane %v4792_v36, 1  ;;  %9007 = vrot.lane.b32.xlu0 %v9006_v30, %s9857_s19  ;;  %v4980_v8 = vrot.slane %v4790_v19, 2 }
 0x1ed   : > { %v3440_v45 = vmax.f32 %v2463_v58, %v7718_v6  ;;  %v3559_v13 = vmax.f32 %v3439_v60, %v3447_v61  ;;  %v11468_v53 = vsel %vm751_vm2, %v4900_v32, %v4901_v23  ;;  %v4981_v38 = vrot.slane %v4791_v0, 2  ;;  %v9722_v32 = vld [vmem:[%s14297_s5 + $0x20] sm:$0xff]  }
 0x1ee   : > { %v3442_v20 = vmax.f32 %v2464_v37, %v7720_v18  ;;  %v3561_v47 = vmax.f32 %v3441_v28, %v3449_v57  ;;  %14467 = vst [vmem:[#allocation17_spill] sm:$0xff] %v11468_v53  ;;  %v11471_v21 = vsel %vm751_vm2, %v4901_v23, %v4903_v24  ;;  %9002 = vrot.lane.b32.xlu1 %v8996_v50, %s9859_s27  ;;  %v4983_v57 = vrot.slane %v4792_v36, 2  ;;  %v9723_v18 = vld [vmem:[%s14297_s5 + $0x68] sm:$0xff]  }
 0x1ef   : > { %v3560_v54 = vmax.f32 %v3440_v45, %v3448_v40  ;;  %v3747_v7 = vrot.slane %v3559_v13, %v11261_v59  ;;  %v9026_v61 = vpack.i.bf16 %v11471_v21, %v11468_v53  ;;  %v11483_v40 = vsel %vm832_vm3, %v4980_v8, %v4981_v38 }
 0x1f0   : > { %v3562_v55 = vmax.f32 %v3442_v20, %v3450_v27  ;;  %v3755_v56 = vrot.slane %v3561_v47, %v11261_v59  ;;  %14468 = vst [vmem:[#allocation18_spill] sm:$0xff] %v11483_v40  ;;  %v11487_v0 = vsel %vm832_vm3, %v4981_v38, %v4983_v57  ;;  %v4895_v26 = vrot.slane %v11458_v25, 1 }
 0x1f1   : > { %v3751_v46 = vrot.slane %v3560_v54, %v11261_v59  ;;  %v3969_v3 = vsel %vm3958_vm1, %v3747_v7, %v3968_v22  ;;  %9027 = vrot.lane.b32.xlu0 %v9026_v61, %s9856_s20  ;;  %14469 = vst [vmem:[#allocation19_spill] sm:$0xff] %v11487_v0  ;;  %v4896_v19 = vrot.slane %v11452_v1, 1  ;;  %v4898_v29 = vrot.slane %v11475_v11, 1 }
 0x1f2   : > { %v8182_v52 = vpop.f32.mrb[8].mxu0  ;;  %v3759_v58 = vrot.slane %v3562_v55, %v11261_v59  ;;  %9012 = vrot.lane.b32.xlu1 %v9006_v30, %s9859_s27  ;;  %v9031_v50 = vpack.i.bf16 %v11487_v0, %v11483_v40  ;;  %v9721_v30 = vld [vmem:[%s14297_s5 + $0x60] sm:$0xff]   ;;  %v9724_v55 = vld [vmem:[%s14297_s5 + $0x28] sm:$0xff]  }
 0x1f3   : > { %v3970_v14 = vsel %vm3960_vm6, %v3751_v46, %v3969_v3  ;;  %v2141_v36 = vadd.f32 %v8182_v52, %v11248_v5  ;;  %v2132_v27 = vpop.f32.mrb[9].mxu0  ;;  %v11501_v60 = vsel %vm751_vm2, %v4895_v26, %v4896_v19  ;;  %v11504_v22 = vsel %vm751_vm2, %v4896_v19, %v4898_v29  ;;  %7994 = vmatprep.subr.bf16.mxu0 %v9721_v30  ;;  %v9725_v3 = vld [vmem:[%s14297_s5 + $0x70] sm:$0xff]  }
 0x1f4   : > { %v3971_v37 = vsel %vm3962_vm7, %v3755_v56, %v3970_v14  ;;  %v2133_v33 = vadd.f32 %v11248_v5, %v2132_v27  ;;  %v8183_v6 = vpop.f32.mrb[10].mxu0  ;;  %v9036_v20 = vpack.i.bf16 %v11504_v22, %v11501_v60  ;;  %7995 = vmatpush3.bf16.msra.mxu0 %v9722_v32  ;;  %v9726_v32 = vld [vmem:[%s14297_s5 + $0x30] sm:$0xff]  }
 0x1f5   : > { %v3972_v28 = vsel %vm3964_vm8, %v3759_v58, %v3971_v37  ;;  %v11516_v23 = vmax.f32 %v2141_v36, 0.0  ;;  %v2144_v24 = vadd.f32 %v8183_v6, %v11248_v5  ;;  %v2135_v45 = vpop.f32.mrb[11].mxu0  ;;  %9032 = vrot.lane.b32.xlu0 %v9031_v50, %s9857_s19  ;;  %7996 = vmatprep.subr.bf16.mxu0 %v9723_v18 }
 0x1f6   : > { %4025 = vst.msk [vmem:[#allocation4 + $0x21] sm:$0xff] %vm1937_vm4, %v3972_v28  ;;  %v11521_v13 = vmax.f32 %v2133_v33, 0.0  ;;  %v2136_v47 = vadd.f32 %v11248_v5, %v2135_v45  ;;  %9017 = vrot.lane.b32.xlu1 %v9026_v61, %s9859_s27 }
 0x1f7   : > { %14470 = vst [vmem:[#allocation20_spill] sm:$0xff] %v11516_v23  ;;  %v2533_v54 = vcombine.high %v11516_v23, %v11516_v23  ;;  %v2540_v7 = vrot.slane %v11516_v23, %v11253_v34  ;;  %4756 = vst.msk [vmem:[#allocation3 + $0x91] sm:$0xff] %vm1937_vm4, %v11516_v23  ;;  %v11533_v8 = vmax.f32 %v2144_v24, 0.0 }
 0x1f8   : > { %14471 = vst [vmem:[#allocation21_spill] sm:$0xff] %v11521_v13  ;;  %v2499_v56 = vcombine.high %v11521_v13, %v11521_v13  ;;  %v2506_v57 = vrot.slane %v11521_v13, %v11253_v34  ;;  %4754 = vst.msk [vmem:[#allocation3 + $0x79] sm:$0xff] %vm1937_vm4, %v11521_v13  ;;  %v11545_v46 = vmax.f32 %v2136_v47, 0.0  ;;  %7997 = vmatpush3.bf16.msra.mxu0 %v9724_v55  ;;  %v9727_v47 = vld [vmem:[%s14297_s5 + $0x78] sm:$0xff]  }
 0x1f9   : > { %14472 = vst [vmem:[#allocation22_spill] sm:$0xff] %v11533_v8  ;;  %v2547_v52 = vrot.slane %v2533_v54, %v11253_v34  ;;  %v2548_v26 = vcombine.high %v2540_v7, %v2540_v7  ;;  %v7737_v19 = vrot.slane %v2540_v7, 9  ;;  %v2550_v29 = vcombine.high %v11533_v8, %v11533_v8  ;;  %4757 = vst.msk [vmem:[#allocation3 + $0x99] sm:$0xff] %vm1937_vm4, %v11533_v8 }
 0x1fa   : > { %14473 = vst [vmem:[#allocation23_spill] sm:$0xff] %v11545_v46  ;;  %v2513_v58 = vrot.slane %v2499_v56, %v11253_v34  ;;  %v2514_v14 = vcombine.high %v2506_v57, %v2506_v57  ;;  %v7729_v36 = vrot.slane %v2506_v57, 9  ;;  %v2557_v27 = vrot.slane %v11533_v8, %v11253_v34  ;;  %9037 = vrot.lane.b32.xlu0 %v9036_v20, %s9859_s27 }
 0x1fb   : > { %4755 = vst.msk [vmem:[#allocation3 + $0x81] sm:$0xff] %vm1937_vm4, %v11545_v46  ;;  %v2549_v37 = vcombine.high %v2547_v52, %v2547_v52  ;;  %v7738_v33 = vrot.slane %v2548_v26, 9  ;;  %v7739_v6 = vrot.slane %v2547_v52, 9  ;;  %v3459_v30 = vmax.f32 %v2540_v7, %v7737_v19  ;;  %9022 = vrot.lane.b32.xlu1 %v9031_v50, %s9856_s20  ;;  %7998 = vmatprep.subr.bf16.mxu0 %v9725_v3 }
 0x1fc   : > { %v2515_v18 = vcombine.high %v2513_v58, %v2513_v58  ;;  %v7730_v28 = vrot.slane %v2514_v14, 9  ;;  %v7731_v24 = vrot.slane %v2513_v58, 9  ;;  %v3451_v45 = vmax.f32 %v2506_v57, %v7729_v36  ;;  %7999 = vmatpush3.bf16.msra.mxu0 %v9726_v32 }
 0x1fd   : > { %v7740_v54 = vrot.slane %v2549_v37, 9  ;;  %v3460_v56 = vmax.f32 %v2548_v26, %v7738_v33  ;;  %v3461_v38 = vmax.f32 %v2547_v52, %v7739_v6  ;;  %v2564_v7 = vrot.slane %v2550_v29, %v11253_v34  ;;  %v11570_v50 = vld [vmem:[#allocation4 + $0x20] sm:$0xff]  ;;  %v11572_v55 = vld [vmem:[#allocation4 + $0x28] sm:$0x3]  ;;  %v9728_v29 = vld [vmem:[%s14297_s5 + $0x38] sm:$0xff]   ;;  %8000 = vmatprep.subr.bf16.mxu0 %v9727_v47 }
 0x1fe   : > { %14474 = vst [vmem:[#allocation24_spill] sm:$0xff] %v11570_v50  ;;  %v7732_v19 = vrot.slane %v2515_v18, 9  ;;  %v3452_v61 = vmax.f32 %v2514_v14, %v7730_v28  ;;  %v3453_v8 = vmax.f32 %v2513_v58, %v7731_v24  ;;  %v3563_v23 = vmax.f32 %v3451_v45, %v3459_v30  ;;  %9047 = vrot.lane.b32.xlu0 %v9036_v20, %s9856_s20 }
 0x1ff   : > { %6675 = vst.msk [vmem:[#allocation4 + $0x20] sm:$0xff] %vm1937_vm4, %v14447_v41  ;;  %v3462_v57 = vmax.f32 %v2549_v37, %v7740_v54  ;;  %v2565_v3 = vcombine.high %v2557_v27, %v2557_v27  ;;  %v2566_v52 = vcombine.high %v2564_v7, %v2564_v7  ;;  %v7741_v26 = vrot.slane %v2557_v27, 9 }
 0x200   : > { %6676 = vst.msk [vmem:[#allocation4 + $0x28] sm:$0x3] %vm3612_vm13, %v14447_v41  ;;  %v3454_v14 = vmax.f32 %v2515_v18, %v7732_v19  ;;  %v3564_v58 = vmax.f32 %v3452_v61, %v3460_v56  ;;  %v3565_v36 = vmax.f32 %v3453_v8, %v3461_v38  ;;  %v4978_v20 = vrot.slane %v11475_v11, 2  ;;  %8001 = vmatpush3.bf16.msra.mxu0 %v9728_v29  ;;  %v11605_v29 = vld [vmem:[#allocation3 + $0x98] sm:$0xff] }
 0x201   : > { %v3763_v33 = vrot.slane %v3563_v23, %v11261_v59  ;;  %v7742_v6 = vrot.slane %v2565_v3, 9  ;;  %v7743_v30 = vrot.slane %v2564_v7, 9  ;;  %v7744_v28 = vrot.slane %v2566_v52, 9 }
 0x202   : > { %v3566_v37 = vmax.f32 %v3454_v14, %v3462_v57  ;;  %v3767_v24 = vrot.slane %v3564_v58, %v11261_v59  ;;  %v3771_v32 = vrot.slane %v3565_v36, %v11261_v59  ;;  %v2516_v45 = vcombine.high %v11545_v46, %v11545_v46 }
 0x203   : > { %v3463_v54 = vmax.f32 %v2557_v27, %v7741_v26  ;;  %v3464_v18 = vmax.f32 %v2565_v3, %v7742_v6  ;;  %v3465_v61 = vmax.f32 %v2564_v7, %v7743_v30  ;;  %v2523_v11 = vrot.slane %v11545_v46, %v11253_v34  ;;  %v4795_v6 = vld [vmem:[#allocation3 + $0x88] sm:$0x3] }
 0x204   : > { %v3973_v23 = vsel %vm3952_vm14, %v3767_v24, %v3763_v33  ;;  %v3466_v8 = vmax.f32 %v2566_v52, %v7744_v28  ;;  %v2530_v38 = vrot.slane %v2516_v45, %v11253_v34  ;;  %v14475_v47 = vrot.slane %v11452_v1, 2  ;;  %v4793_v52 = vld [vmem:[#allocation3 + $0x78] sm:$0xff]  ;;  %v4794_v33 = vld [vmem:[#allocation3 + $0x80] sm:$0xff] }
 0x205   : > { %v14476_v56 = vrot.slane %v11458_v25, 2  ;;  %v3775_v27 = vrot.slane %v3566_v37, %v11261_v59  ;;  %v2531_v57 = vcombine.high %v2523_v11, %v2523_v11  ;;  %v7733_v7 = vrot.slane %v2523_v11, 9  ;;  %v11612_v37 = vld [vmem:[#allocation3 + $0x90] sm:$0xff] }
 0x206   : > { %v14478_v3 = vmov %v14475_v47  ;;  %v3974_v14 = vsel %vm3954_vm15, %v3771_v32, %v3973_v23  ;;  %v2532_v58 = vcombine.high %v2530_v38, %v2530_v38  ;;  %v7735_v36 = vrot.slane %v2530_v38, 9 }
 0x207   : > { %v11597_v19 = vsel %vm832_vm3, %v14476_v56, %v14475_v47  ;;  %v11603_v26 = vsel %vm832_vm3, %v14478_v3, %v4978_v20  ;;  %v7734_v30 = vrot.slane %v2531_v57, 9  ;;  %v3455_v28 = vmax.f32 %v2523_v11, %v7733_v7 }
 0x208   : > { %14477 = vst [vmem:[#allocation25_spill] sm:$0xff] %v11597_v19  ;;  %14479 = vst [vmem:[#allocation26_spill] sm:$0xff] %v11603_v26  ;;  %v9041_v25 = vpack.i.bf16 %v11603_v26, %v11597_v19  ;;  %v7736_v20 = vrot.slane %v2532_v58, 9  ;;  %v3457_v24 = vmax.f32 %v2530_v38, %v7735_v36  ;;  %v9056_v32 = vpack.i.bf16 %v11605_v29, %v11612_v37 }
 0x209   : > { %v4905_v45 = vrot.slane %v4793_v52, 1  ;;  %v3456_v23 = vmax.f32 %v2531_v57, %v7734_v30  ;;  %v3567_v47 = vmax.f32 %v3455_v28, %v3463_v54  ;;  %v4906_v56 = vrot.slane %v4794_v33, 1 }
 0x20a   : > { %9042 = vrot.lane.b32.xlu1 %v9041_v25, %s9856_s20  ;;  %9052 = vrot.lane.b32.xlu0 %v9041_v25, %s9857_s19  ;;  %v4908_v3 = vrot.slane %v4795_v6, 1  ;;  %v3458_v11 = vmax.f32 %v2532_v58, %v7736_v20  ;;  %v3569_v7 = vmax.f32 %v3457_v24, %v3465_v61  ;;  %v3975_v1 = vsel %vm3956_vm0, %v3775_v27, %v3974_v14 }
 0x20b   : > { %v3568_v46 = vmax.f32 %v3456_v23, %v3464_v18  ;;  %v3779_v13 = vrot.slane %v3567_v47, %v11261_v59  ;;  %v11621_v38 = vsel %vm751_vm2, %v4905_v45, %v4906_v56  ;;  %v4985_v57 = vrot.slane %v4793_v52, 2 }
 0x20c   : > { %14480 = vst [vmem:[#allocation27_spill] sm:$0xff] %v11621_v38  ;;  %v11624_v36 = vsel %vm751_vm2, %v4906_v56, %v4908_v3  ;;  %v3570_v49 = vmax.f32 %v3458_v11, %v3466_v8  ;;  %v4986_v61 = vrot.slane %v4794_v33, 2  ;;  %v3787_v18 = vrot.slane %v3569_v7, %v11261_v59  ;;  %v11661_v7 = vld [vmem:[#allocation3 + $0xa0] sm:$0x3] }
 0x20d   : > { %14481 = vst [vmem:[#allocation28_spill] sm:$0xff] %v11624_v36  ;;  %v11629_v54 = vpack.i.bf16 %v11624_v36, %v11621_v38  ;;  %v3783_v27 = vrot.slane %v3568_v46, %v11261_v59  ;;  %v3976_v14 = vsel %vm3958_vm1, %v3779_v13, %v3975_v1  ;;  %v4988_v58 = vrot.slane %v4795_v6, 2 }
 0x20e   : > { %9057 = vrot.lane.b32.xlu1 %v9056_v32, %s9857_s19  ;;  %v3791_v25 = vrot.slane %v3570_v49, %v11261_v59  ;;  %v11638_v8 = vsel %vm832_vm3, %v4985_v57, %v4986_v61  ;;  %v9066_v30 = vpack.i.bf16 %v4794_v33, %v4793_v52  ;;  %v8186_v28 = vpop.f32.mrb[12].mxu0  ;;  %v4071_v20 = vrot.slane %v11427_v39, 1 }
 0x20f   : > { %9107 = vrot.lane.b32.xlu0 %v11629_v54, %s9856_s20  ;;  %14482 = vst [vmem:[#allocation29_spill] sm:$0xff] %v11638_v8  ;;  %v3977_v24 = vsel %vm3960_vm6, %v3783_v27, %v3976_v14  ;;  %v11643_v46 = vsel %vm832_vm3, %v4986_v61, %v4988_v58  ;;  %v2157_v13 = vadd.f32 %v8186_v28, %v11248_v5  ;;  %v2148_v6 = vpop.f32.mrb[13].mxu0  ;;  %v4072_v49 = vrot.slane %v11429_v63, 1 }
 0x210   : > { %14483 = vst [vmem:[#allocation30_spill] sm:$0xff] %v11643_v46  ;;  %v3978_v1 = vsel %vm3962_vm7, %v3787_v18, %v3977_v24  ;;  %v11651_v52 = vpack.i.bf16 %v11643_v46, %v11638_v8  ;;  %v2149_v33 = vadd.f32 %v11248_v5, %v2148_v6  ;;  %v8187_v45 = vpop.f32.mrb[14].mxu0  ;;  %v4910_v27 = vrot.slane %v11612_v37, 1 }
 0x211   : > { %v3979_v23 = vsel %vm3964_vm8, %v3791_v25, %v3978_v1  ;;  %v11655_v47 = vmax.f32 %v2157_v13, 0.0  ;;  %v11658_v56 = vsel %vm751_vm2, %v4071_v20, %v4072_v49  ;;  %v2160_v3 = vadd.f32 %v8187_v45, %v11248_v5  ;;  %v2151_v11 = vpop.f32.mrb[15].mxu0 }
 0x212   : > { %9062 = vrot.lane.b32.xlu1 %v9056_v32, %s9859_s27  ;;  %14485 = vst [vmem:[#allocation32_spill] sm:$0xff] %v11658_v56  ;;  %4026 = vst.msk [vmem:[#allocation4 + $0x31] sm:$0xff] %vm1937_vm4, %v3979_v23  ;;  %v11666_v32 = vmax.f32 %v2149_v33, 0.0  ;;  %v9116_v57 = vpack.i.bf16 %v11658_v56, %v11265_v44  ;;  %v2152_v61 = vadd.f32 %v11248_v5, %v2151_v11  ;;  %v4913_v20 = vrot.slane %v11661_v7, 1 }
 0x213   : > { %14484 = vst [vmem:[#allocation31_spill] sm:$0xff] %v11655_v47  ;;  %9112 = vrot.lane.b32.xlu0 %v11651_v52, %s9857_s19  ;;  %v2601_v18 = vcombine.high %v11655_v47, %v11655_v47  ;;  %v2608_v14 = vrot.slane %v11655_v47, %v11253_v34  ;;  %4760 = vst.msk [vmem:[#allocation3 + $0xc1] sm:$0xff] %vm1937_vm4, %v11655_v47  ;;  %v11678_v58 = vmax.f32 %v2160_v3, 0.0  ;;  %v4099_v26 = vrot.slane %v11572_v55, 2 }
 0x214   : > { %14486 = vst [vmem:[#allocation33_spill] sm:$0xff] %v11666_v32  ;;  %v2567_v5 = vcombine.high %v11666_v32, %v11666_v32  ;;  %v2574_v44 = vrot.slane %v11666_v32, %v11253_v34  ;;  %4758 = vst.msk [vmem:[#allocation3 + $0xa9] sm:$0xff] %vm1937_vm4, %v11666_v32  ;;  %v11688_v28 = vmax.f32 %v2152_v61, 0.0 }
 0x215   : > { %14487 = vst [vmem:[#allocation34_spill] sm:$0xff] %v11678_v58  ;;  %v2615_v24 = vrot.slane %v2601_v18, %v11253_v34  ;;  %v2616_v13 = vcombine.high %v2608_v14, %v2608_v14  ;;  %v7753_v6 = vrot.slane %v2608_v14, 9  ;;  %v2618_v49 = vcombine.high %v11678_v58, %v11678_v58  ;;  %4761 = vst.msk [vmem:[#allocation3 + $0xc9] sm:$0xff] %vm1937_vm4, %v11678_v58 }
 0x216   : > { %9067 = vrot.lane.b32.xlu1 %v9066_v30, %s9857_s19  ;;  %14488 = vst [vmem:[#allocation35_spill] sm:$0xff] %v11688_v28  ;;  %v2581_v1 = vrot.slane %v2567_v5, %v11253_v34  ;;  %v2582_v33 = vcombine.high %v2574_v44, %v2574_v44  ;;  %v7745_v45 = vrot.slane %v2574_v44, 9  ;;  %v2625_v23 = vrot.slane %v11678_v58, %v11253_v34 }
 0x217   : > { %9117 = vrot.lane.b32.xlu0 %v9116_v57, %s9856_s20  ;;  %4759 = vst.msk [vmem:[#allocation3 + $0xb1] sm:$0xff] %vm1937_vm4, %v11688_v28  ;;  %v2617_v3 = vcombine.high %v2615_v24, %v2615_v24  ;;  %v7754_v11 = vrot.slane %v2616_v13, 9  ;;  %v7755_v61 = vrot.slane %v2615_v24, 9  ;;  %v3475_v18 = vmax.f32 %v2608_v14, %v7753_v6 }
 0x218   : > { %v2583_v25 = vcombine.high %v2581_v1, %v2581_v1  ;;  %v7746_v47 = vrot.slane %v2582_v33, 9  ;;  %v7747_v32 = vrot.slane %v2581_v1, 9  ;;  %v3467_v12 = vmax.f32 %v2574_v44, %v7745_v45 }
 0x219   : > { %v7756_v5 = vrot.slane %v2617_v3, 9  ;;  %v3476_v51 = vmax.f32 %v2616_v13, %v7754_v11  ;;  %v3477_v42 = vmax.f32 %v2615_v24, %v7755_v61  ;;  %v2632_v57 = vrot.slane %v2618_v49, %v11253_v34  ;;  %v11704_v48 = vld [vmem:[#allocation4 + $0x30] sm:$0xff]  ;;  %v11706_v58 = vld [vmem:[#allocation4 + $0x38] sm:$0x3] }
 0x21a   : > { %9072 = vrot.lane.b32.xlu1 %v9066_v30, %s9859_s27  ;;  %14489 = vst [vmem:[#allocation36_spill] sm:$0xff] %v11704_v48  ;;  %v7748_v35 = vrot.slane %v2583_v25, 9  ;;  %v3468_v15 = vmax.f32 %v2582_v33, %v7746_v47  ;;  %v3469_v10 = vmax.f32 %v2581_v1, %v7747_v32  ;;  %v3571_v46 = vmax.f32 %v3467_v12, %v3475_v18 }
 0x21b   : > { %6677 = vst.msk [vmem:[#allocation4 + $0x30] sm:$0xff] %vm1937_vm4, %v14447_v41  ;;  %v3478_v30 = vmax.f32 %v2617_v3, %v7756_v5  ;;  %v2633_v14 = vcombine.high %v2625_v23, %v2625_v23  ;;  %v2634_v44 = vcombine.high %v2632_v57, %v2632_v57  ;;  %v7757_v24 = vrot.slane %v2625_v23, 9 }
 0x21c   : > { %6678 = vst.msk [vmem:[#allocation4 + $0x38] sm:$0x3] %vm3612_vm13, %v14447_v41  ;;  %v3470_v13 = vmax.f32 %v2583_v25, %v7748_v35  ;;  %v3572_v6 = vmax.f32 %v3468_v15, %v3476_v51  ;;  %v3573_v49 = vmax.f32 %v3469_v10, %v3477_v42  ;;  %v14490_v45 = vrot.slane %v11605_v29, 1 }
 0x21d   : > { %v3795_v12 = vrot.slane %v3571_v46, %v11261_v59  ;;  %v7758_v47 = vrot.slane %v2633_v14, 9  ;;  %v7759_v32 = vrot.slane %v2632_v57, 9  ;;  %v7760_v1 = vrot.slane %v2634_v44, 9 }
 0x21e   : > { %v11715_v11 = vsel %vm751_vm2, %v4910_v27, %v14490_v45  ;;  %v3574_v33 = vmax.f32 %v3470_v13, %v3478_v30  ;;  %v3799_v61 = vrot.slane %v3572_v6, %v11261_v59  ;;  %v3803_v3 = vrot.slane %v3573_v49, %v11261_v59 }
 0x21f   : > { %14491 = vst [vmem:[#allocation37_spill] sm:$0xff] %v11715_v11  ;;  %v2584_v35 = vcombine.high %v11688_v28, %v11688_v28  ;;  %v3479_v15 = vmax.f32 %v2625_v23, %v7757_v24  ;;  %v3480_v10 = vmax.f32 %v2633_v14, %v7758_v47  ;;  %v3481_v42 = vmax.f32 %v2632_v57, %v7759_v32 }
 0x220   : > { %v2591_v51 = vrot.slane %v11688_v28, %v11253_v34  ;;  %v3980_v27 = vsel %vm3952_vm14, %v3799_v61, %v3795_v12  ;;  %v3482_v46 = vmax.f32 %v2634_v44, %v7760_v1  ;;  %v14492_v18 = vmov %v14490_v45 }
 0x221   : > { %v2598_v25 = vrot.slane %v2584_v35, %v11253_v34  ;;  %v11729_v5 = vsel %vm751_vm2, %v14492_v18, %v4913_v20  ;;  %v3807_v30 = vrot.slane %v3574_v33, %v11261_v59  ;;  %v3981_v57 = vsel %vm3954_vm15, %v3803_v3, %v3980_v27 }
 0x222   : > { %14493 = vst [vmem:[#allocation38_spill] sm:$0xff] %v11729_v5  ;;  %v2599_v13 = vcombine.high %v2591_v51, %v2591_v51  ;;  %v7749_v6 = vrot.slane %v2591_v51, 9  ;;  %v9076_v23 = vpack.i.bf16 %v11729_v5, %v11715_v11  ;;  %v4095_v44 = vrot.slane %v11427_v39, 2 }
 0x223   : > { %v2600_v14 = vcombine.high %v2598_v25, %v2598_v25  ;;  %v7751_v24 = vrot.slane %v2598_v25, 9  ;;  %v4096_v20 = vrot.slane %v11429_v63, 2  ;;  %v4990_v12 = vrot.slane %v11612_v37, 2 }
 0x224   : > { %v7750_v49 = vrot.slane %v2599_v13, 9  ;;  %v3471_v45 = vmax.f32 %v2591_v51, %v7749_v6  ;;  %9077 = vrot.lane.b32.xlu1 %v9076_v23, %s9859_s27  ;;  %v4991_v1 = vrot.slane %v11605_v29, 2  ;;  %v4993_v33 = vrot.slane %v11661_v7, 2  ;;  %v4803_v51 = vld [vmem:[#allocation3 + $0xc8] sm:$0xff] }
 0x225   : > { %v7752_v47 = vrot.slane %v2600_v14, 9  ;;  %v3473_v32 = vmax.f32 %v2598_v25, %v7751_v24  ;;  %v3982_v35 = vsel %vm3956_vm0, %v3807_v30, %v3981_v57  ;;  %v11743_v27 = vsel %vm832_vm3, %v4095_v44, %v4096_v20  ;;  %v4804_v57 = vld [vmem:[#allocation3 + $0xd0] sm:$0x3] }
 0x226   : > { %v3472_v61 = vmax.f32 %v2599_v13, %v7750_v49  ;;  %v3575_v3 = vmax.f32 %v3471_v45, %v3479_v15  ;;  %v9121_v63 = vpack.i.bf16 %v11743_v27, %v11443_v16  ;;  %v11748_v37 = vsel %vm832_vm3, %v4990_v12, %v4991_v1  ;;  %v4802_v15 = vld [vmem:[#allocation3 + $0xc0] sm:$0xff] }
 0x227   : > { %v3474_v18 = vmax.f32 %v2600_v14, %v7752_v47  ;;  %v3577_v6 = vmax.f32 %v3473_v32, %v3481_v42  ;;  %14494 = vst [vmem:[#allocation39_spill] sm:$0xff] %v11748_v37  ;;  %v11752_v7 = vsel %vm832_vm3, %v4991_v1, %v4993_v33  ;;  %v11757_v42 = vpack.i.bf16 %v4803_v51, %v4802_v15  ;;  %v11770_v47 = vld [vmem:[%s14294_s2] ss:$0 sm:$0xff] }
 0x228   : > { %v3576_v25 = vmax.f32 %v3472_v61, %v3480_v10  ;;  %v3811_v29 = vrot.slane %v3575_v3, %v11261_v59  ;;  %14495 = vst [vmem:[#allocation40_spill] sm:$0xff] %v11752_v7  ;;  %9122 = vrot.lane.b32.xlu0 %v9121_v63, %s9857_s19  ;;  %v9081_v13 = vpack.i.bf16 %v11752_v7, %v11748_v37  ;;  %v4921_v44 = vrot.slane %v4803_v51, 1 }
 0x229   : > { %v3578_v30 = vmax.f32 %v3474_v18, %v3482_v46  ;;  %v3819_v14 = vrot.slane %v3577_v6, %v11261_v59  ;;  %v9146_v24 = vpack.i.bf16 %v11570_v50, %v11427_v39  ;;  %v4920_v46 = vrot.slane %v4802_v15, 1 }
 0x22a   : > { %v3815_v16 = vrot.slane %v3576_v25, %v11261_v59  ;;  %v3983_v10 = vsel %vm3958_vm1, %v3811_v29, %v3982_v35  ;;  %9082 = vrot.lane.b32.xlu1 %v9081_v13, %s9856_s20  ;;  %v8190_v49 = vpop.f32.mrb[16].mxu0  ;;  %v4923_v12 = vrot.slane %v4804_v57, 1  ;;  %v5000_v35 = vrot.slane %v4802_v15, 2 }
 0x22b   : > { %v3823_v45 = vrot.slane %v3578_v30, %v11261_v59  ;;  %v2173_v32 = vadd.f32 %v11770_v47, %v8190_v49  ;;  %v2164_v1 = vpop.f32.mrb[17].mxu0  ;;  %v11777_v61 = vsel %vm751_vm2, %v4920_v46, %v4921_v44  ;;  %v5001_v29 = vrot.slane %v4803_v51, 2 }
 0x22c   : > { %v3984_v20 = vsel %vm3960_vm6, %v3815_v16, %v3983_v10  ;;  %9127 = vrot.lane.b32.xlu0 %v11757_v42, %s9857_s19  ;;  %14496 = vst [vmem:[#allocation41_spill] sm:$0xff] %v11777_v61  ;;  %v2165_v3 = vadd.f32 %v11770_v47, %v2164_v1  ;;  %v8191_v18 = vpop.f32.mrb[18].mxu0  ;;  %v11782_v63 = vsel %vm751_vm2, %v4921_v44, %v4923_v12  ;;  %v5003_v15 = vrot.slane %v4804_v57, 2 }
 0x22d   : > { %v3985_v33 = vsel %vm3962_vm7, %v3819_v14, %v3984_v20  ;;  %14497 = vst [vmem:[#allocation42_spill] sm:$0xff] %v11782_v63  ;;  %v11784_v25 = vmax.f32 %v2173_v32, 0.0  ;;  %v2167_v30 = vpop.f32.mrb[19].mxu0  ;;  %v11790_v16 = vpack.i.bf16 %v11782_v63, %v11777_v61  ;;  %v2176_v10 = vadd.f32 %v11770_v47, %v8191_v18 }
 0x22e   : > { %v3986_v6 = vsel %vm3964_vm8, %v3823_v45, %v3985_v33  ;;  %9087 = vrot.lane.b32.xlu1 %v9076_v23, %s9856_s20  ;;  %v11792_v14 = vmax.f32 %v2165_v3, 0.0  ;;  %v11802_v23 = vsel %vm832_vm3, %v5000_v35, %v5001_v29  ;;  %v2168_v44 = vadd.f32 %v11770_v47, %v2167_v30 }
 0x22f   : > { %14498 = vst [vmem:[#allocation43_spill] sm:$0xff] %v11784_v25  ;;  %4027 = vst.msk [vmem:[#allocation4 + $0x41] sm:$0xff] %vm1937_vm4, %v3986_v6  ;;  %v2669_v46 = vcombine.high %v11784_v25, %v11784_v25  ;;  %v2676_v51 = vrot.slane %v11784_v25, %v11253_v34  ;;  %v11813_v45 = vsel %vm832_vm3, %v5001_v29, %v5003_v15  ;;  %v11815_v20 = vmax.f32 %v2176_v10, 0.0 }
 0x230   : > { %14499 = vst [vmem:[#allocation44_spill] sm:$0xff] %v11792_v14  ;;  %4764 = vst.msk [vmem:[#allocation3 + $0xf1] sm:$0xff] %vm1937_vm4, %v11784_v25  ;;  %9147 = vrot.lane.b32.xlu0 %v9146_v24, %s9859_s27  ;;  %v2635_v57 = vcombine.high %v11792_v14, %v11792_v14  ;;  %v2642_v49 = vrot.slane %v11792_v14, %v11253_v34  ;;  %v11820_v24 = vpack.i.bf16 %v11813_v45, %v11802_v23 }
 0x231   : > { %14500 = vst [vmem:[#allocation45_spill] sm:$0xff] %v11802_v23  ;;  %4762 = vst.msk [vmem:[#allocation3 + $0xd9] sm:$0xff] %vm1937_vm4, %v11792_v14  ;;  %v2683_v12 = vrot.slane %v2669_v46, %v11253_v34  ;;  %v2684_v32 = vcombine.high %v2676_v51, %v2676_v51  ;;  %v7769_v1 = vrot.slane %v2676_v51, 9  ;;  %v2686_v18 = vcombine.high %v11815_v20, %v11815_v20 }
 0x232   : > { %14501 = vst [vmem:[#allocation46_spill] sm:$0xff] %v11813_v45  ;;  %14502 = vst [vmem:[#allocation47_spill] sm:$0xff] %v11815_v20  ;;  %9092 = vrot.lane.b32.xlu1 %v9081_v13, %s9857_s19  ;;  %v2649_v33 = vrot.slane %v2635_v57, %v11253_v34  ;;  %v2650_v3 = vcombine.high %v2642_v49, %v2642_v49  ;;  %v7761_v35 = vrot.slane %v2642_v49, 9  ;;  %v4101_v39 = vrot.slane %v11704_v48, 2 }
 0x233   : > { %4765 = vst.msk [vmem:[#allocation3 + $0xf9] sm:$0xff] %vm1937_vm4, %v11815_v20  ;;  %v2685_v6 = vcombine.high %v2683_v12, %v2683_v12  ;;  %v7770_v29 = vrot.slane %v2684_v32, 9  ;;  %v7771_v30 = vrot.slane %v2683_v12, 9  ;;  %v3491_v15 = vmax.f32 %v2676_v51, %v7769_v1 }
 0x234   : > { %9152 = vrot.lane.b32.xlu0 %v11790_v16, %s9859_s27  ;;  %v2651_v10 = vcombine.high %v2649_v33, %v2649_v33  ;;  %v7762_v46 = vrot.slane %v2650_v3, 9  ;;  %v7763_v13 = vrot.slane %v2649_v33, 9  ;;  %v3483_v25 = vmax.f32 %v2642_v49, %v7761_v35 }
 0x235   : > { %v7772_v57 = vrot.slane %v2685_v6, 9  ;;  %v3492_v14 = vmax.f32 %v2684_v32, %v7770_v29  ;;  %v3493_v28 = vmax.f32 %v2683_v12, %v7771_v30  ;;  %v2693_v45 = vrot.slane %v11815_v20, %v11253_v34 }
 0x236   : > { %v11832_v23 = vld [vmem:[#allocation4 + $0x40] sm:$0xff]  ;;  %v11834_v7 = vld [vmem:[#allocation4 + $0x48] sm:$0x3]  ;;  %9097 = vrot.lane.b32.xlu1 %v11629_v54, %s9859_s27  ;;  %v7764_v51 = vrot.slane %v2651_v10, 9  ;;  %v3484_v1 = vmax.f32 %v2650_v3, %v7762_v46  ;;  %v3485_v37 = vmax.f32 %v2649_v33, %v7763_v13  ;;  %v3579_v8 = vmax.f32 %v3483_v25, %v3491_v15  ;;  %v11845_v54 = vpop.permute.xlu1 %8937 }
 0x237   : > { %14503 = vst [vmem:[#allocation48_spill] sm:$0xff] %v11832_v23  ;;  %6679 = vst.msk [vmem:[#allocation4 + $0x40] sm:$0xff] %vm1937_vm4, %v14447_v41  ;;  %v3494_v49 = vmax.f32 %v2685_v6, %v7772_v57  ;;  %v2700_v12 = vrot.slane %v2686_v18, %v11253_v34  ;;  %v2701_v32 = vcombine.high %v2693_v45, %v2693_v45  ;;  %v7773_v35 = vrot.slane %v2693_v45, 9 }
 0x238   : > { %6680 = vst.msk [vmem:[#allocation4 + $0x48] sm:$0x3] %vm3612_vm13, %v14447_v41  ;;  %v3486_v29 = vmax.f32 %v2651_v10, %v7764_v51  ;;  %v3580_v30 = vmax.f32 %v3484_v1, %v3492_v14  ;;  %v3581_v20 = vmax.f32 %v3485_v37, %v3493_v28  ;;  %9157 = vrot.lane.b32.xlu0 %v11820_v24, %s9856_s20  ;;  %v11852_v14 = vmax.f32 %v2168_v44, 0.0  ;;  %v11854_v28 = vld [vmem:[#allocation3 + $0xa8] sm:$0xff]  ;;  %v11856_v37 = vld [vmem:[#allocation3 + $0xb0] sm:$0xff] }
 0x239   : > { %v3827_v25 = vrot.slane %v3579_v8, %v11261_v59  ;;  %v2702_v33 = vcombine.high %v2700_v12, %v2700_v12  ;;  %v7774_v3 = vrot.slane %v2701_v32, 9  ;;  %v7775_v15 = vrot.slane %v2700_v12, 9  ;;  %v11865_v44 = vld [vmem:[#allocation3 + $0xb8] sm:$0x3] }
 0x23a   : > { %9102 = vrot.lane.b32.xlu1 %v11651_v52, %s9856_s20  ;;  %v3582_v6 = vmax.f32 %v3486_v29, %v3494_v49  ;;  %v3831_v18 = vrot.slane %v3580_v30, %v11261_v59  ;;  %v3835_v10 = vrot.slane %v3581_v20, %v11261_v59  ;;  %14504 = vst [vmem:[#allocation49_spill] sm:$0xff] %v11852_v14  ;;  %4763 = vst.msk [vmem:[#allocation3 + $0xe1] sm:$0xff] %vm1937_vm4, %v11852_v14 }
 0x23b   : > { %v7776_v46 = vrot.slane %v2702_v33, 9  ;;  %v3495_v13 = vmax.f32 %v2693_v45, %v7773_v35  ;;  %v3496_v57 = vmax.f32 %v2701_v32, %v7774_v3  ;;  %v2652_v51 = vcombine.high %v11852_v14, %v11852_v14 }
 0x23c   : > { %v3987_v8 = vsel %vm3952_vm14, %v3831_v18, %v3827_v25  ;;  %v2659_v52 = vrot.slane %v11852_v14, %v11253_v34  ;;  %v3839_v20 = vrot.slane %v3582_v6, %v11261_v59  ;;  %v3497_v1 = vmax.f32 %v2700_v12, %v7775_v15  ;;  %v11874_v25 = vpop.permute.xlu1 %8942 }
 0x23d   : > { %v4995_v49 = vrot.slane %v11854_v28, 2  ;;  %v4996_v45 = vrot.slane %v11856_v37, 2  ;;  %v3988_v32 = vsel %vm3954_vm15, %v3835_v10, %v3987_v8  ;;  %v2666_v35 = vrot.slane %v2652_v51, %v11253_v34 }
 0x23e   : > { %9132 = vrot.lane.b32.xlu1 %v11757_v42, %s9859_s27  ;;  %v2667_v29 = vcombine.high %v2659_v52, %v2659_v52  ;;  %v7765_v30 = vrot.slane %v2659_v52, 9  ;;  %v9136_v3 = vpack.i.bf16 %v11856_v37, %v11854_v28  ;;  %v4998_v15 = vrot.slane %v11865_v44, 2 }
 0x23f   : > { %v11879_v12 = vsel %vm832_vm3, %v4995_v49, %v4996_v45  ;;  %v4098_v6 = vrot.slane %v11570_v50, 2  ;;  %v2668_v18 = vcombine.high %v2666_v35, %v2666_v35  ;;  %v7767_v8 = vrot.slane %v2666_v35, 9 }
 0x240   : > { %14505 = vst [vmem:[#allocation50_spill] sm:$0xff] %v11879_v12  ;;  %v7766_v10 = vrot.slane %v2667_v29, 9  ;;  %v3487_v42 = vmax.f32 %v2659_v52, %v7765_v30  ;;  %v3498_v14 = vmax.f32 %v2702_v33, %v7776_v46  ;;  %v3989_v51 = vsel %vm3956_vm0, %v3839_v20, %v3988_v32  ;;  %v11902_v32 = vpop.permute.xlu1 %8952 }
 0x241   : > { %v11885_v19 = vsel %vm832_vm3, %v4996_v45, %v4998_v15  ;;  %v7768_v0 = vrot.slane %v2668_v18, 9  ;;  %v3489_v49 = vmax.f32 %v2666_v35, %v7767_v8  ;;  %v11896_v33 = vsel %vm832_vm3, %v4098_v6, %v4099_v26  ;;  %v11906_v35 = vpop.permute.xlu0 %8947  ;;  %v9816_v15 = vld [vmem:[#allocation3 + $0x8] sm:$0xff] }
 0x242   : > { %14506 = vst [vmem:[#allocation51_spill] sm:$0xff] %v11885_v19  ;;  %v3488_v40 = vmax.f32 %v2667_v29, %v7766_v10  ;;  %v3583_v4 = vmax.f32 %v3487_v42, %v3495_v13  ;;  %9137 = vrot.lane.b32.xlu1 %v9136_v3, %s9857_s19  ;;  %v11893_v56 = vpack.i.bf16 %v11885_v19, %v11879_v12  ;;  %14508 = vst [vmem:[#allocation53_spill] sm:$0xff] %v11896_v33 }
 0x243   : > { %v8940_v46 = vunpack.i.h.bf16 %v11845_v54  ;;  %v3490_v52 = vmax.f32 %v2668_v18, %v7768_v0  ;;  %v3585_v45 = vmax.f32 %v3489_v49, %v3497_v1  ;;  %v8939_v0 = vunpack.i.l.bf16 %v11845_v54 }
 0x244   : > { %v3584_v20 = vmax.f32 %v3488_v40, %v3496_v57  ;;  %v3843_v13 = vrot.slane %v3583_v4, %v11261_v59  ;;  %9177 = vrot.lane.b32.xlu0 %v11893_v56, %s9856_s20  ;;  %v4809_v40 = vld [vmem:[#allocation3 + $0xf8] sm:$0xff]  ;;  %v9191_v1 = vpack.i.bf16 %v11896_v33, %v11743_v27  ;;  %v8944_v27 = vunpack.i.l.bf16 %v11874_v25 }
 0x245   : > { %v3586_v29 = vmax.f32 %v3490_v52, %v3498_v14  ;;  %v3851_v4 = vrot.slane %v3585_v45, %v11261_v59  ;;  %v5707_v6 = vsel %vm1937_vm4, %v9816_v15, %v8940_v46  ;;  %v8945_v14 = vunpack.i.h.bf16 %v11874_v25  ;;  %v9817_v25 = vld [vmem:[#allocation3] sm:$0xff] }
 0x246   : > { %v3847_v26 = vrot.slane %v3584_v20, %v11261_v59  ;;  %v3990_v30 = vsel %vm3958_vm1, %v3843_v13, %v3989_v51  ;;  %9142 = vrot.lane.b32.xlu1 %v9136_v3, %s9859_s27  ;;  %v8194_v57 = vpop.f32.mrb[20].mxu0  ;;  %v4808_v3 = vld [vmem:[#allocation3 + $0xf0] sm:$0xff]  ;;  %v4915_v52 = vrot.slane %v11854_v28, 1  ;;  %v4916_v20 = vrot.slane %v11856_v37, 1  ;;  %v8958_v13 = vpop.permute.xlu1 %8957 }
 0x247   : > { %v2180_v18 = vpop.f32.mrb[21].mxu0  ;;  %v3855_v10 = vrot.slane %v3586_v29, %v11261_v59  ;;  %v9196_v51 = vpack.i.bf16 %v4809_v40, %v4808_v3  ;;  %v4918_v45 = vrot.slane %v11865_v44, 1  ;;  %v11932_v29 = vld [vmem:[#allocation4 + $0x98] sm:$0x3]  ;;  %v11946_v44 = vld [vmem:[#allocation3 + $0xe0] sm:$0xff]  ;;  %v8960_v15 = vunpack.i.h.bf16 %v8958_v13 }
 0x248   : > { %v3991_v8 = vsel %vm3960_vm6, %v3847_v26, %v3990_v30  ;;  %v11919_v54 = vpop.f32.mrb[22].mxu0  ;;  %9192 = vrot.lane.b32.xlu0 %v9191_v1, %s9856_s20  ;;  %14509 = vst [vmem:[#allocation54_spill] sm:$0xff] %v11932_v29  ;;  %v5706_v26 = vsel %vm1937_vm4, %v9817_v25, %v8939_v0  ;;  %v5739_v30 = vsel %vm4300_vm9, %v5707_v6, %v8945_v14  ;;  %v4810_v1 = vld [vmem:[#allocation3 + $0x100] sm:$0x3]  ;;  %6690 = vst.msk [vmem:[#allocation4 + $0x98] sm:$0x3] %vm3612_vm13, %v14447_v41 }
 0x249   : > { %v3992_v42 = vsel %vm3962_vm7, %v3851_v4, %v3991_v8  ;;  %v11924_v49 = vpop.f32.mrb[23].mxu0  ;;  %v11937_v4 = vpop.permute.xlu0 %8962  ;;  %v11944_v37 = vsel %vm751_vm2, %v4915_v52, %v4916_v20  ;;  %v11950_v0 = vsel %vm751_vm2, %v4916_v20, %v4918_v45  ;;  %v4930_v6 = vrot.slane %v4808_v3, 1  ;;  %v11955_v8 = vld [vmem:[#allocation3 + $0xd8] sm:$0xff]  ;;  %v9729_v25 = vld [vmem:[%s14295_s3 + $0x40] sm:$0xff]  }
 0x24a   : > { %v3993_v46 = vsel %vm3964_vm8, %v3855_v10, %v3992_v42  ;;  %9162 = vrot.lane.b32.xlu1 %v11790_v16, %s9856_s20  ;;  %14510 = vst [vmem:[#allocation55_spill] sm:$0xff] %v11944_v37  ;;  %14511 = vst [vmem:[#allocation56_spill] sm:$0xff] %v11950_v0  ;;  %v4931_v14 = vrot.slane %v4809_v40, 1  ;;  %v5738_v10 = vsel %vm4300_vm9, %v5706_v26, %v8944_v27  ;;  %v8959_v42 = vunpack.i.l.bf16 %v8958_v13  ;;  %v11973_v13 = vld [vmem:[#allocation3 + $0xe8] sm:$0x3]  ;;  %v9730_v26 = vld [vmem:[%s14295_s3] sm:$0xff]  }
 0x24b   : > { %4028 = vst.msk [vmem:[#allocation4 + $0x51] sm:$0xff] %vm1937_vm4, %v3993_v46  ;;  %v4933_v46 = vrot.slane %v4810_v1, 1  ;;  %v11961_v20 = vpack.i.bf16 %v11946_v44, %v11955_v8  ;;  %v9171_v3 = vpack.i.bf16 %v11950_v0, %v11944_v37  ;;  %v2189_v45 = vadd.f32 %v11770_v47, %v8194_v57  ;;  %7940 = vmatprep.subr.bf16.mxu1 %v9729_v25 }
 0x24c   : > { %9197 = vrot.lane.b32.xlu0 %v9196_v51, %s9857_s19  ;;  %v11964_v40 = vsel %vm751_vm2, %v4930_v6, %v4931_v14  ;;  %v11985_v6 = vsel %vm4309_vm10, %v5739_v30, %v8960_v15  ;;  %v2181_v57 = vadd.f32 %v11770_v47, %v2180_v18  ;;  %v12005_v15 = vpop.permute.xlu1 %8987  ;;  %v2192_v52 = vadd.f32 %v11770_v47, %v11919_v54  ;;  %v9731_v54 = vld [vmem:[%s14295_s3 + $0x48] sm:$0xff]  }
 0x24d   : > { %14512 = vst [vmem:[#allocation57_spill] sm:$0xff] %v11964_v40  ;;  %v11970_v27 = vsel %vm751_vm2, %v4931_v14, %v4933_v46  ;;  %v11987_v14 = vpop.permute.xlu0 %8967  ;;  %v11992_v46 = vsel %vm4309_vm10, %v5738_v10, %v8959_v42  ;;  %v11998_v28 = vmax.f32 %v2189_v45, 0.0  ;;  %v4926_v10 = vrot.slane %v11946_v44, 1  ;;  %7941 = vmatpush3.bf16.msra.mxu1 %v9730_v26  ;;  %v9732_v51 = vld [vmem:[%s14295_s3 + $0x8] sm:$0xff]  }
 0x24e   : > { %9167 = vrot.lane.b32.xlu1 %v11820_v24, %s9857_s19  ;;  %14513 = vst [vmem:[#allocation58_spill] sm:$0xff] %v11970_v27  ;;  %v11996_v16 = vpack.i.bf16 %v11970_v27, %v11964_v40  ;;  %v4925_v24 = vrot.slane %v11955_v8, 1  ;;  %v12007_v18 = vmax.f32 %v2181_v57, 0.0  ;;  %v4928_v42 = vrot.slane %v11973_v13, 1  ;;  %7942 = vmatprep.subr.bf16.mxu1 %v9731_v54 }
 0x24f   : > { %14515 = vst [vmem:[#allocation60_spill] sm:$0xff] %v11998_v28  ;;  %v2737_v25 = vcombine.high %v11998_v28, %v11998_v28  ;;  %v2744_v57 = vrot.slane %v11998_v28, %v11253_v34  ;;  %4768 = vst.msk [vmem:[#allocation3 + $0x121] sm:$0xff] %vm1937_vm4, %v11998_v28  ;;  %v8969_v36 = vunpack.i.l.bf16 %v11987_v14 }
 0x250   : > { %9202 = vrot.lane.b32.xlu0 %v11961_v20, %s9857_s19  ;;  %14514 = vst [vmem:[#allocation59_spill] sm:$0xff] %v11996_v16  ;;  %14516 = vst [vmem:[#allocation61_spill] sm:$0xff] %v12007_v18  ;;  %v2703_v26 = vcombine.high %v12007_v18, %v12007_v18  ;;  %v2710_v45 = vrot.slane %v12007_v18, %v11253_v34  ;;  %v12039_v28 = vsel %vm751_vm2, %v4925_v24, %v4926_v10 }
 0x251   : > { %4766 = vst.msk [vmem:[#allocation3 + $0x109] sm:$0xff] %vm1937_vm4, %v12007_v18  ;;  %14517 = vst [vmem:[#allocation62_spill] sm:$0xff] %v12039_v28  ;;  %v12042_v19 = vsel %vm751_vm2, %v4926_v10, %v4928_v42  ;;  %v2751_v12 = vrot.slane %v2737_v25, %v11253_v34  ;;  %v2752_v40 = vcombine.high %v2744_v57, %v2744_v57  ;;  %v7785_v27 = vrot.slane %v2744_v57, 9  ;;  %v9733_v25 = vld [vmem:[%s14295_s3 + $0x50] sm:$0xff]  }
 0x252   : > { %9172 = vrot.lane.b32.xlu1 %v9171_v3, %s9859_s27  ;;  %v12001_v1 = vld [vmem:[#allocation4 + $0x50] sm:$0xff]  ;;  %v12003_v30 = vld [vmem:[#allocation4 + $0x58] sm:$0x3]  ;;  %14518 = vst [vmem:[#allocation63_spill] sm:$0xff] %v12042_v19  ;;  %v2717_v37 = vrot.slane %v2703_v26, %v11253_v34  ;;  %v2718_v18 = vcombine.high %v2710_v45, %v2710_v45  ;;  %v7777_v0 = vrot.slane %v2710_v45, 9  ;;  %v12051_v24 = vmax.f32 %v2192_v52, 0.0  ;;  %7943 = vmatpush3.bf16.msra.mxu1 %v9732_v51  ;;  %v12063_v52 = vpop.permute.xlu0 %8972  ;;  %v12065_v51 = vpop.permute.xlu1 %8992 }
 0x253   : > { %6681 = vst.msk [vmem:[#allocation4 + $0x50] sm:$0xff] %vm1937_vm4, %v14447_v41  ;;  %v2753_v10 = vcombine.high %v2751_v12, %v2751_v12  ;;  %v7786_v42 = vrot.slane %v2752_v40, 9  ;;  %v7787_v61 = vrot.slane %v2751_v12, 9  ;;  %7944 = vmatprep.subr.bf16.mxu1 %v9733_v25 }
 0x254   : > { %6682 = vst.msk [vmem:[#allocation4 + $0x58] sm:$0x3] %vm3612_vm13, %v14447_v41  ;;  %9217 = vrot.lane.b32.xlu0 %v11996_v16, %s9859_s27  ;;  %v12048_v16 = vpack.i.bf16 %v12042_v19, %v12039_v28  ;;  %14520 = vst [vmem:[#allocation65_spill] sm:$0xff] %v12051_v24  ;;  %v9734_v28 = vld [vmem:[%s14295_s3 + $0x10] sm:$0xff]   ;;  %v2719_v54 = vcombine.high %v2717_v37, %v2717_v37  ;;  %v7778_v19 = vrot.slane %v2718_v18, 9  ;;  %v7779_v26 = vrot.slane %v2717_v37, 9 }
 0x255   : > { %v3499_v63 = vmax.f32 %v2710_v45, %v7777_v0  ;;  %4769 = vst.msk [vmem:[#allocation3 + $0x129] sm:$0xff] %vm1937_vm4, %v12051_v24  ;;  %v3509_v29 = vmax.f32 %v2751_v12, %v7787_v61  ;;  %v2754_v17 = vcombine.high %v12051_v24, %v12051_v24  ;;  %v2761_v5 = vrot.slane %v12051_v24, %v11253_v34  ;;  %v9736_v12 = vld [vmem:[%s14295_s3 + $0x18] sm:$0xff]  }
 0x256   : > { %9182 = vrot.lane.b32.xlu1 %v9171_v3, %s9856_s20  ;;  %14519 = vst [vmem:[#allocation64_spill] sm:$0xff] %v12048_v16  ;;  %v3507_v3 = vmax.f32 %v2744_v57, %v7785_v27  ;;  %v7788_v27 = vrot.slane %v2753_v10, 9  ;;  %v3508_v57 = vmax.f32 %v2752_v40, %v7786_v42  ;;  %v7780_v0 = vrot.slane %v2719_v54, 9  ;;  %7945 = vmatpush3.bf16.msra.mxu1 %v9734_v28  ;;  %v12087_v24 = vpop.permute.xlu0 %8977 }
 0x257   : > { %v3500_v45 = vmax.f32 %v2718_v18, %v7778_v19  ;;  %v2768_v61 = vrot.slane %v2754_v17, %v11253_v34  ;;  %v8990_v19 = vunpack.i.h.bf16 %v12005_v15  ;;  %v2769_v18 = vcombine.high %v2761_v5, %v2761_v5 }
 0x258   : > { %9222 = vrot.lane.b32.xlu0 %v12048_v16, %s9859_s27  ;;  %v3501_v16 = vmax.f32 %v2717_v37, %v7779_v26  ;;  %v3587_v38 = vmax.f32 %v3499_v63, %v3507_v3  ;;  %v3510_v11 = vmax.f32 %v2753_v10, %v7788_v27  ;;  %v3502_v63 = vmax.f32 %v2719_v54, %v7780_v0  ;;  %v9738_v0 = vld [vmem:[%s14295_s3 + $0x20] sm:$0xff]  }
 0x259   : > { %v3588_v28 = vmax.f32 %v3500_v45, %v3508_v57  ;;  %v2770_v10 = vcombine.high %v2768_v61, %v2768_v61  ;;  %v7789_v42 = vrot.slane %v2761_v5, 9  ;;  %v7791_v3 = vrot.slane %v2768_v61, 9 }
 0x25a   : > { %9187 = vrot.lane.b32.xlu1 %v11893_v56, %s9857_s19  ;;  %v9735_v56 = vld [vmem:[%s14295_s3 + $0x58] sm:$0xff]   ;;  %v3589_v37 = vmax.f32 %v3501_v16, %v3509_v29  ;;  %v3590_v17 = vmax.f32 %v3502_v63, %v3510_v11  ;;  %v3859_v25 = vrot.slane %v3587_v38, %v11261_v59  ;;  %v14521_v16 = vunpack.i.h.bf16 %v11987_v14  ;;  %v9737_v38 = vld [vmem:[%s14295_s3 + $0x60] sm:$0xff]  }
 0x25b   : > { %7946 = vmatprep.subr.bf16.mxu1 %v9735_v56  ;;  %v3863_v26 = vrot.slane %v3588_v28, %v11261_v59  ;;  %v7790_v57 = vrot.slane %v2769_v18, 9  ;;  %v7792_v11 = vrot.slane %v2770_v10, 9  ;;  %v12105_v45 = vsel %vm1937_vm4, %v11334_v43, %v8969_v36 }
 0x25c   : > { %v12082_v40 = vpop.permute.xlu1 %8997  ;;  %v3867_v27 = vrot.slane %v3589_v37, %v11261_v59  ;;  %7947 = vmatpush3.bf16.msra.mxu1 %v9736_v12  ;;  %v12095_v54 = vsel %vm1937_vm4, %v11337_v2, %v14521_v16  ;;  %v2184_v2 = vadd.f32 %v11770_v47, %v11924_v49  ;;  %v9818_v12 = vld [vmem:[#allocation3 + $0x20] sm:$0xff]  ;;  %v3871_v28 = vrot.slane %v3590_v17, %v11261_v59  ;;  %v9740_v17 = vld [vmem:[%s14295_s3 + $0x28] sm:$0xff]  }
 0x25d   : > { %v3994_v56 = vsel %vm3952_vm14, %v3863_v26, %v3859_v25  ;;  %v12112_v63 = vsel %vm1937_vm4, %v9818_v12, %v8990_v19  ;;  %v12115_v37 = vmax.f32 %v2761_v5, %v7789_v42  ;;  %v12117_v16 = vmax.f32 %v2768_v61, %v7791_v3  ;;  %7948 = vmatprep.subr.bf16.mxu1 %v9737_v38 }
 0x25e   : > { %v3995_v36 = vsel %vm3954_vm15, %v3867_v27, %v3994_v56  ;;  %v12124_v25 = vmax.f32 %v2769_v18, %v7790_v57  ;;  %v12126_v49 = vmax.f32 %v2184_v2, 0.0  ;;  %v12130_v19 = vmax.f32 %v2770_v10, %v7792_v11  ;;  %v9739_v18 = vld [vmem:[%s14295_s3 + $0x68] sm:$0xff]   ;;  %9207 = vrot.lane.b32.xlu1 %v11961_v20, %s9859_s27  ;;  %v8983_v27 = vpop.permute.xlu0 %8982 }
 0x25f   : > { %v5005_v5 = vrot.slane %v11955_v8, 2  ;;  %v5006_v61 = vrot.slane %v11946_v44, 2  ;;  %v5008_v42 = vrot.slane %v11973_v13, 2  ;;  %v9211_v44 = vpack.i.bf16 %v11704_v48, %v11570_v50 }
 0x260   : > { %v12119_v29 = vpop.permute.xlu1 %9002  ;;  %14523 = vst [vmem:[#allocation67_spill] sm:$0xff] %v12126_v49  ;;  %7949 = vmatpush3.bf16.msra.mxu1 %v9738_v0  ;;  %v2720_v10 = vcombine.high %v12126_v49, %v12126_v49  ;;  %v2727_v8 = vrot.slane %v12126_v49, %v11253_v34  ;;  %4767 = vst.msk [vmem:[#allocation3 + $0x111] sm:$0xff] %vm1937_vm4, %v12126_v49  ;;  %v4074_v13 = vrot.slane %v11570_v50, 1  ;;  %v4075_v0 = vrot.slane %v11572_v55, 1  ;;  %v9741_v55 = vld [vmem:[%s14295_s3 + $0x70] sm:$0xff]  }
 0x261   : > { %14522 = vst [vmem:[#allocation66_spill] sm:$0xff] %v12119_v29  ;;  %v12157_v11 = vsel %vm832_vm3, %v5005_v5, %v5006_v61  ;;  %v12160_v38 = vsel %vm832_vm3, %v5006_v61, %v5008_v42  ;;  %v4077_v56 = vrot.slane %v11704_v48, 1  ;;  %7950 = vmatprep.subr.bf16.mxu1 %v9739_v18  ;;  %v3996_v5 = vsel %vm3956_vm0, %v3871_v28, %v3995_v36  ;;  %v9742_v18 = vld [vmem:[%s14295_s3 + $0x30] sm:$0xff]  }
 0x262   : > { %v12121_v43 = vpop.f32.mrb[24].mxu0  ;;  %14524 = vst [vmem:[#allocation68_spill] sm:$0xff] %v12157_v11  ;;  %14525 = vst [vmem:[#allocation69_spill] sm:$0xff] %v12160_v38  ;;  %v2734_v20 = vrot.slane %v2720_v10, %v11253_v34  ;;  %v2735_v2 = vcombine.high %v2727_v8, %v2727_v8  ;;  %v7781_v12 = vrot.slane %v2727_v8, 9  ;;  %v12167_v14 = vpack.i.bf16 %v12160_v38, %v12157_v11  ;;  %v12182_v28 = vpop.permute.xlu0 %9007 }
 0x263   : > { %v12128_v26 = vpop.f32.mrb[25].mxu0  ;;  %v4078_v49 = vrot.slane %v11706_v58, 1  ;;  %v8985_v61 = vunpack.i.h.bf16 %v8983_v27  ;;  %v8984_v42 = vunpack.i.l.bf16 %v8983_v27  ;;  %9212 = vrot.lane.b32.xlu1 %v9211_v44, %s9857_s19  ;;  %v12185_v36 = vsel %vm751_vm2, %v4074_v13, %v4075_v0 }
 0x264   : > { %v12135_v3 = vpop.f32.mrb[26].mxu0  ;;  %14526 = vst [vmem:[#allocation70_spill] sm:$0xff] %v12167_v14  ;;  %7951 = vmatpush3.bf16.msra.mxu1 %v9740_v17  ;;  %v12171_v50 = vpop.permute.xlu1 %9012  ;;  %v2736_v10 = vcombine.high %v2734_v20, %v2734_v20  ;;  %v7782_v38 = vrot.slane %v2735_v2, 9  ;;  %v7783_v11 = vrot.slane %v2734_v20, 9  ;;  %v3503_v17 = vmax.f32 %v2727_v8, %v7781_v12  ;;  %9227 = vrot.lane.b32.xlu0 %v12167_v14, %s9856_s20 }
 0x265   : > { %v12154_v57 = vpop.f32.mrb[27].mxu0  ;;  %14527 = vst [vmem:[#allocation71_spill] sm:$0xff] %v12185_v36  ;;  %v12188_v27 = vsel %vm751_vm2, %v4077_v56, %v4078_v49  ;;  %v5803_v31 = vsel %vm1937_vm4, %v11371_v9, %v8985_v61  ;;  %7952 = vmatprep.subr.bf16.mxu1 %v9741_v55  ;;  %v5802_v13 = vsel %vm1937_vm4, %v11367_v62, %v8984_v42  ;;  %v4102_v49 = vrot.slane %v11706_v58, 2  ;;  %v9743_v9 = vld [vmem:[%s14295_s3 + $0x78] sm:$0xff]  }
 0x266   : > { %14528 = vst [vmem:[#allocation72_spill] sm:$0xff] %v12188_v27  ;;  %v7784_v8 = vrot.slane %v2736_v10, 9  ;;  %v3504_v12 = vmax.f32 %v2735_v2, %v7782_v38  ;;  %v3505_v53 = vmax.f32 %v2734_v20, %v7783_v11  ;;  %v3591_v14 = vmax.f32 %v3503_v17, %v12115_v37  ;;  %v9744_v38 = vld [vmem:[%s14295_s3 + $0x38] sm:$0xff]   ;;  %v9819_v20 = vld [vmem:[#allocation3 + $0x18] sm:$0xff]  ;;  %v12227_v55 = vpop.permute.xlu0 %9027 }
 0x267   : > { %v9236_v44 = vpack.i.bf16 %v12188_v27, %v12185_v36  ;;  %v14529_v62 = vunpack.i.l.bf16 %v12005_v15  ;;  %v8975_v2 = vunpack.i.h.bf16 %v12063_v52  ;;  %v8974_v61 = vunpack.i.l.bf16 %v12063_v52 }
 0x268   : > { %7953 = vmatpush3.bf16.msra.mxu1 %v9742_v18  ;;  %v3506_v0 = vmax.f32 %v2736_v10, %v7784_v8  ;;  %v3592_v56 = vmax.f32 %v3504_v12, %v12124_v25  ;;  %v3593_v11 = vmax.f32 %v3505_v53, %v12117_v16  ;;  %v3875_v37 = vrot.slane %v3591_v14, %v11261_v59  ;;  %v12220_v14 = vpop.permute.xlu1 %9017 }
 0x269   : > { %v12211_v58 = vsel %vm1937_vm4, %v9819_v20, %v14529_v62  ;;  %9237 = vrot.lane.b32.xlu0 %v9236_v44, %s9856_s20  ;;  %9232 = vrot.lane.b32.xlu1 %v9236_v44, %s9859_s27  ;;  %v12218_v53 = vsel %vm832_vm3, %v4101_v39, %v4102_v49  ;;  %v9256_v42 = vpack.i.bf16 %v12001_v1, %v11832_v23  ;;  %v14531_v18 = vunpack.i.l.bf16 %v11906_v35  ;;  %v9821_v20 = vld [vmem:[#allocation3 + $0x30] sm:$0xff] }
 0x26a   : > { %14530 = vst [vmem:[#allocation73_spill] sm:$0xff] %v12218_v53  ;;  %v3594_v16 = vmax.f32 %v3506_v0, %v12130_v19  ;;  %v3879_v15 = vrot.slane %v3592_v56, %v11261_v59  ;;  %v3997_v25 = vsel %vm3958_vm1, %v3875_v37, %v3996_v5  ;;  %7954 = vmatprep.subr.bf16.mxu1 %v9743_v9  ;;  %v14532_v19 = vunpack.i.h.bf16 %v11906_v35  ;;  %v9820_v0 = vld [vmem:[#allocation3 + $0x38] sm:$0xff] }
 0x26b   : > { %v3883_v52 = vrot.slane %v3593_v11, %v11261_v59  ;;  %v9241_v39 = vpack.i.bf16 %v12218_v53, %v11896_v33  ;;  %v5834_v10 = vsel %vm4300_vm9, %v5802_v13, %v14531_v18  ;;  %v14533_v12 = vunpack.i.l.bf16 %v11937_v4 }
 0x26c   : > { %v5835_v17 = vsel %vm4300_vm9, %v5803_v31, %v14532_v19  ;;  %7955 = vmatpush3.bf16.msra.mxu1 %v9744_v38  ;;  %v3887_v5 = vrot.slane %v3594_v16, %v11261_v59  ;;  %v3998_v8 = vsel %vm3960_vm6, %v3879_v15, %v3997_v25  ;;  %v14534_v49 = vunpack.i.h.bf16 %v11937_v4 }
 0x26d   : > { %v5866_v44 = vsel %vm4309_vm10, %v5834_v10, %v14533_v12  ;;  %v12247_v13 = vsel %vm1937_vm4, %v9820_v0, %v8975_v2  ;;  %v3999_v35 = vsel %vm3962_vm7, %v3883_v52, %v3998_v8  ;;  %9242 = vrot.lane.b32.xlu0 %v9241_v39, %s9857_s19  ;;  %9257 = vrot.lane.b32.xlu1 %v9256_v42, %s9857_s19  ;;  %v4080_v56 = vrot.slane %v11832_v23, 1  ;;  %v12265_v25 = vpop.permute.xlu1 %9022  ;;  %v12278_v10 = vpop.permute.xlu0 %9032 }
 0x26e   : > { %v5867_v9 = vsel %vm4309_vm10, %v5835_v17, %v14534_v49  ;;  %v4000_v11 = vsel %vm3964_vm8, %v3887_v5, %v3999_v35  ;;  %v4081_v37 = vrot.slane %v11834_v7, 1  ;;  %v4083_v4 = vrot.slane %v12001_v1, 1 }
 0x26f   : > { %v5899_v31 = vpack.c.bf16 %v5867_v9, %v5866_v44  ;;  %v4084_v38 = vrot.slane %v12003_v30, 1  ;;  %v12258_v62 = vsel %vm1937_vm4, %v9821_v20, %v8974_v61  ;;  %4029 = vst.msk [vmem:[#allocation4 + $0x61] sm:$0xff] %vm1937_vm4, %v4000_v11  ;;  %v9246_v2 = vpack.i.bf16 %v11832_v23, %v11704_v48 }
 0x270   : > { %v4104_v16 = vrot.slane %v11832_v23, 2  ;;  %v4105_v15 = vrot.slane %v11834_v7, 2  ;;  %v14535_v61 = vpack.c.bf16 %v11985_v6, %v11992_v46  ;;  %v12273_v39 = vsel %vm751_vm2, %v4080_v56, %v4081_v37 }
 0x271   : > { %6177 = vmatprep.mubr.bf16.mxu0 %v5899_v31  ;;  %14536 = vst [vmem:[#allocation74_spill] sm:$0xff] %v12273_v39  ;;  %v12276_v18 = vsel %vm751_vm2, %v4083_v4, %v4084_v38  ;;  %9247 = vrot.lane.b32.xlu0 %v9246_v2, %s9859_s27  ;;  %v2205_v9 = vadd.f32 %v11770_v47, %v12121_v43  ;;  %v4107_v35 = vrot.slane %v12001_v1, 2  ;;  %v4108_v31 = vrot.slane %v12003_v30, 2 }
 0x272   : > { %6178 = vmatmul.mubr.bf16.vlgmr.msra.gmra.mrb[32].mxu0 %v14535_v61  ;;  %14537 = vst [vmem:[#allocation75_spill] sm:$0xff] %v12276_v18  ;;  %v9261_v17 = vpack.i.bf16 %v12276_v18, %v12273_v39  ;;  %v12286_v6 = vsel %vm832_vm3, %v4104_v16, %v4105_v15  ;;  %v2197_v0 = vadd.f32 %v11770_v47, %v12128_v26  ;;  %v9030_v4 = vunpack.i.h.bf16 %v12227_v55  ;;  %v9822_v39 = vld [vmem:[#allocation3 + $0x68] sm:$0xff] }
 0x273   : > { %14538 = vst [vmem:[#allocation76_spill] sm:$0xff] %v12286_v6  ;;  %v9251_v44 = vpack.i.bf16 %v12286_v6, %v12218_v53  ;;  %v2208_v56 = vadd.f32 %v11770_v47, %v12135_v3  ;;  %v2200_v11 = vadd.f32 %v11770_v47, %v12154_v57  ;;  %v12309_v43 = vmax.f32 %v2205_v9, 0.0  ;;  %v12322_v47 = vpop.permute.xlu0 %9037 }
 0x274   : > { %9262 = vrot.lane.b32.xlu1 %v9261_v17, %s9859_s27  ;;  %v12311_v38 = vmax.f32 %v2197_v0, 0.0  ;;  %v12316_v30 = vsel %vm832_vm3, %v4107_v35, %v4108_v31  ;;  %v9029_v9 = vunpack.i.l.bf16 %v12227_v55  ;;  %v12376_v36 = vsel %vm1937_vm4, %v9822_v39, %v9030_v4 }
 0x275   : > { %9252 = vrot.lane.b32.xlu0 %v9251_v44, %s9856_s20  ;;  %14539 = vst [vmem:[#allocation77_spill] sm:$0xff] %v12309_v43  ;;  %14541 = vst [vmem:[#allocation79_spill] sm:$0xff] %v12316_v30  ;;  %v12318_v20 = vmax.f32 %v2208_v56, 0.0  ;;  %v12320_v3 = vmax.f32 %v2200_v11, 0.0  ;;  %v2805_v16 = vcombine.high %v12309_v43, %v12309_v43  ;;  %v2812_v15 = vrot.slane %v12309_v43, %v11253_v34 }
 0x276   : > { %14540 = vst [vmem:[#allocation78_spill] sm:$0xff] %v12311_v38  ;;  %v12324_v57 = vld [vmem:[#allocation4 + $0x60] sm:$0xff]  ;;  %v12326_v2 = vld [vmem:[#allocation4 + $0x68] sm:$0x3]  ;;  %4772 = vst.msk [vmem:[#allocation3 + $0x151] sm:$0xff] %vm1937_vm4, %v12309_v43  ;;  %v2771_v61 = vcombine.high %v12311_v38, %v12311_v38  ;;  %v2778_v44 = vrot.slane %v12311_v38, %v11253_v34  ;;  %v9271_v0 = vpack.i.bf16 %v12316_v30, %v12286_v6 }
 0x277   : > { %14542 = vst [vmem:[#allocation80_spill] sm:$0xff] %v12318_v20  ;;  %14543 = vst [vmem:[#allocation81_spill] sm:$0xff] %v12320_v3  ;;  %v2822_v31 = vcombine.high %v12318_v20, %v12318_v20  ;;  %v2819_v56 = vrot.slane %v2805_v16, %v11253_v34  ;;  %v2820_v55 = vcombine.high %v2812_v15, %v2812_v15  ;;  %v7801_v11 = vrot.slane %v2812_v15, 9  ;;  %v12369_v53 = vpop.permute.xlu0 %9047 }
 0x278   : > { %4770 = vst.msk [vmem:[#allocation3 + $0x139] sm:$0xff] %vm1937_vm4, %v12311_v38  ;;  %6683 = vst.msk [vmem:[#allocation4 + $0x60] sm:$0xff] %vm1937_vm4, %v14447_v41  ;;  %v2785_v49 = vrot.slane %v2771_v61, %v11253_v34  ;;  %v2786_v7 = vcombine.high %v2778_v44, %v2778_v44  ;;  %v7793_v19 = vrot.slane %v2778_v44, 9  ;;  %v2829_v46 = vrot.slane %v12318_v20, %v11253_v34 }
 0x279   : > { %6684 = vst.msk [vmem:[#allocation4 + $0x68] sm:$0x3] %vm3612_vm13, %v14447_v41  ;;  %9267 = vrot.lane.b32.xlu0 %v9261_v17, %s9856_s20  ;;  %v2836_v5 = vrot.slane %v2822_v31, %v11253_v34  ;;  %v2821_v17 = vcombine.high %v2819_v56, %v2819_v56  ;;  %v7802_v52 = vrot.slane %v2820_v55, 9  ;;  %v7803_v16 = vrot.slane %v2819_v56, 9 }
 0x27a   : > { %4773 = vst.msk [vmem:[#allocation3 + $0x159] sm:$0xff] %vm1937_vm4, %v12318_v20  ;;  %4771 = vst.msk [vmem:[#allocation3 + $0x141] sm:$0xff] %vm1937_vm4, %v12320_v3  ;;  %v3523_v8 = vmax.f32 %v2812_v15, %v7801_v11  ;;  %v2787_v61 = vcombine.high %v2785_v49, %v2785_v49  ;;  %v7794_v43 = vrot.slane %v2786_v7, 9  ;;  %v7795_v38 = vrot.slane %v2785_v49, 9 }
 0x27b   : > { %v3515_v6 = vmax.f32 %v2778_v44, %v7793_v19  ;;  %v7804_v18 = vrot.slane %v2821_v17, 9  ;;  %v3524_v31 = vmax.f32 %v2820_v55, %v7802_v52  ;;  %v3525_v23 = vmax.f32 %v2819_v56, %v7803_v16  ;;  %v9823_v56 = vld [vmem:[#allocation3 + $0x60] sm:$0xff] }
 0x27c   : > { %v12313_v26 = vpop.permute.xlu1 %9042  ;;  %v7796_v48 = vrot.slane %v2787_v61, 9  ;;  %v3516_v27 = vmax.f32 %v2786_v7, %v7794_v43  ;;  %v3517_v15 = vmax.f32 %v2785_v49, %v7795_v38  ;;  %v2837_v44 = vcombine.high %v2829_v46, %v2829_v46 }
 0x27d   : > { %9272 = vrot.lane.b32.xlu0 %v9271_v0, %s9857_s19  ;;  %v3595_v11 = vmax.f32 %v3515_v6, %v3523_v8  ;;  %v3526_v19 = vmax.f32 %v2821_v17, %v7804_v18  ;;  %v2838_v29 = vcombine.high %v2836_v5, %v2836_v5  ;;  %v7805_v52 = vrot.slane %v2829_v46, 9 }
 0x27e   : > { %v12360_v35 = vpop.f32.mrb[28].mxu0  ;;  %v3596_v20 = vmax.f32 %v3516_v27, %v3524_v31  ;;  %v12381_v0 = vsel %vm1937_vm4, %v9823_v56, %v9029_v9  ;;  %v7807_v8 = vrot.slane %v2836_v5, 9  ;;  %v12389_v27 = vpop.permute.xlu0 %9052  ;;  %v7806_v4 = vrot.slane %v2837_v44, 9 }
 0x27f   : > { %v12365_v42 = vpop.f32.mrb[29].mxu0  ;;  %v3891_v6 = vrot.slane %v3595_v11, %v11261_v59  ;;  %v2795_v43 = vrot.slane %v12320_v3, %v11253_v34  ;;  %v9040_v38 = vunpack.i.h.bf16 %v12322_v47  ;;  %v3527_v55 = vmax.f32 %v2829_v46, %v7805_v52 }
 0x280   : > { %v12358_v37 = vpop.permute.xlu1 %9057  ;;  %v12367_v12 = vpop.f32.mrb[30].mxu0  ;;  %v3895_v18 = vrot.slane %v3596_v20, %v11261_v59  ;;  %v3529_v17 = vmax.f32 %v2836_v5, %v7807_v8  ;;  %v9039_v56 = vunpack.i.l.bf16 %v12322_v47  ;;  %v9276_v52 = vpack.i.bf16 %v12324_v57, %v12001_v1 }
 0x281   : > { %14544 = vst [vmem:[#allocation82_spill] sm:$0xff] %v12367_v12  ;;  %v12371_v33 = vpop.f32.mrb[31].mxu0  ;;  %v3597_v12 = vmax.f32 %v3517_v15, %v3525_v23  ;;  %v2803_v16 = vcombine.high %v2795_v43, %v2795_v43  ;;  %v14546_v47 = vunpack.i.l.bf16 %v12182_v28 }
 0x282   : > { %14545 = vst [vmem:[#allocation83_spill] sm:$0xff] %v12371_v33  ;;  %v3518_v33 = vmax.f32 %v2787_v61, %v7796_v48  ;;  %v2788_v48 = vcombine.high %v12320_v3, %v12320_v3  ;;  %v4001_v9 = vsel %vm3952_vm14, %v3895_v18, %v3891_v6  ;;  %v7797_v61 = vrot.slane %v2795_v43, 9  ;;  %v12402_v23 = vpop.permute.xlu0 %9107  ;;  %9277 = vrot.lane.b32.xlu0 %v9276_v52, %s9859_s27 }
 0x283   : > { %v3899_v49 = vrot.slane %v3597_v12, %v11261_v59  ;;  %v3528_v6 = vmax.f32 %v2837_v44, %v7806_v4  ;;  %v7798_v18 = vrot.slane %v2803_v16, 9  ;;  %v5836_v44 = vsel %vm4300_vm9, %v12105_v45, %v14546_v47 }
 0x284   : > { %v12378_v41 = vpop.permute.xlu1 %9062  ;;  %v3598_v39 = vmax.f32 %v3518_v33, %v3526_v19  ;;  %v7808_v33 = vrot.slane %v2838_v29, 9  ;;  %v2802_v20 = vrot.slane %v2788_v48, %v11253_v34  ;;  %v3519_v46 = vmax.f32 %v2795_v43, %v7797_v61 }
 0x285   : > { %v4002_v15 = vsel %vm3954_vm15, %v3899_v49, %v4001_v9  ;;  %v3520_v7 = vmax.f32 %v2803_v16, %v7798_v18  ;;  %v14547_v9 = vunpack.i.h.bf16 %v12182_v28  ;;  %v9044_v28 = vunpack.i.l.bf16 %v12313_v26 }
 0x286   : > { %v3903_v12 = vrot.slane %v3598_v39, %v11261_v59  ;;  %v2804_v11 = vcombine.high %v2802_v20, %v2802_v20  ;;  %v7799_v19 = vrot.slane %v2802_v20, 9  ;;  %v3530_v8 = vmax.f32 %v2838_v29, %v7808_v33 }
 0x287   : > { %v3599_v3 = vmax.f32 %v3519_v46, %v3527_v55  ;;  %v5837_v29 = vsel %vm4300_vm9, %v12095_v54, %v14547_v9  ;;  %v5868_v33 = vsel %vm4309_vm10, %v5836_v44, %v9039_v56  ;;  %v14550_v46 = vunpack.i.l.bf16 %v11902_v32 }
 0x288   : > { %v12398_v31 = vpop.permute.xlu1 %9067  ;;  %v7800_v39 = vrot.slane %v2804_v11, 9  ;;  %v3521_v48 = vmax.f32 %v2802_v20, %v7799_v19  ;;  %v4003_v49 = vsel %vm3956_vm0, %v3903_v12, %v4002_v15  ;;  %v3600_v20 = vmax.f32 %v3520_v7, %v3528_v6 }
 0x289   : > { %v3907_v55 = vrot.slane %v3599_v3, %v11261_v59  ;;  %v9020_v12 = vunpack.i.h.bf16 %v12220_v14  ;;  %v5869_v16 = vsel %vm4309_vm10, %v5837_v29, %v9040_v38  ;;  %v14548_v19 = vunpack.i.l.bf16 %v12065_v51 }
 0x28a   : > { %v3522_v4 = vmax.f32 %v2804_v11, %v7800_v39  ;;  %v3601_v43 = vmax.f32 %v3521_v48, %v3529_v17  ;;  %v5902_v45 = vpack.c.bf16 %v5869_v16, %v5868_v33  ;;  %v9045_v17 = vunpack.i.h.bf16 %v12313_v26  ;;  %v12425_v11 = vpop.permute.xlu0 %9112 }
 0x28b   : > { %v3911_v54 = vrot.slane %v3600_v20, %v11261_v59  ;;  %v4004_v3 = vsel %vm3958_vm1, %v3907_v55, %v4003_v49  ;;  %v5740_v38 = vsel %vm4300_vm9, %v12211_v58, %v14548_v19  ;;  %v5806_v6 = vsel %vm1937_vm4, %v11501_v60, %v9044_v28 }
 0x28c   : > { %v12421_v61 = vpop.permute.xlu1 %9072  ;;  %v3602_v15 = vmax.f32 %v3522_v4, %v3530_v8  ;;  %v3915_v7 = vrot.slane %v3601_v43, %v11261_v59  ;;  %6185 = vmatprep.mubr.bf16.mxu0 %v5902_v45  ;;  %v14549_v26 = vunpack.i.h.bf16 %v12065_v51  ;;  %v5772_v52 = vsel %vm4309_vm10, %v5740_v38, %v14550_v46 }
 0x28d   : > { %v4005_v8 = vsel %vm3960_vm6, %v3911_v54, %v4004_v3  ;;  %v14551_v39 = vunpack.i.h.bf16 %v11902_v32  ;;  %v4110_v48 = vrot.slane %v12324_v57, 2  ;;  %v4111_v49 = vrot.slane %v12326_v2, 2 }
 0x28e   : > { %v3919_v56 = vrot.slane %v3602_v15, %v11261_v59  ;;  %v5741_v18 = vsel %vm4300_vm9, %v12112_v63, %v14549_v26  ;;  %v4006_v60 = vsel %vm3962_vm7, %v3915_v7, %v4005_v8  ;;  %v9025_v51 = vunpack.i.h.bf16 %v12265_v25 }
 0x28f   : > { %v5773_v58 = vsel %vm4309_vm10, %v5741_v18, %v14551_v39  ;;  %v5807_v63 = vsel %vm1937_vm4, %v11504_v22, %v9045_v17  ;;  %v9019_v4 = vunpack.i.l.bf16 %v12220_v14  ;;  %v9024_v32 = vunpack.i.l.bf16 %v12265_v25  ;;  %v12470_v25 = vpop.permute.xlu0 %9117  ;;  %v9825_v18 = vld [vmem:[#allocation3 + $0x48] sm:$0xff]  ;;  %v9826_v39 = vld [vmem:[%s14294_s2] ss:$0 sm:$0xff] }
 0x290   : > { %v5901_v47 = vpack.c.bf16 %v5773_v58, %v5772_v52  ;;  %v4007_v44 = vsel %vm3964_vm8, %v3919_v56, %v4006_v60  ;;  %v12458_v43 = vsel %vm832_vm3, %v4110_v48, %v4111_v49  ;;  %v9050_v29 = vunpack.i.h.bf16 %v12369_v53 }
 0x291   : > { %4030 = vst.msk [vmem:[#allocation4 + $0x71] sm:$0xff] %vm1937_vm4, %v4007_v44  ;;  %v9049_v33 = vunpack.i.l.bf16 %v12369_v53  ;;  %v9281_v22 = vpack.i.bf16 %v12458_v43, %v12316_v30  ;;  %v14552_v20 = vunpack.i.l.bf16 %v12082_v40  ;;  %v9055_v55 = vunpack.i.h.bf16 %v12389_v27  ;;  %v14597_v30 = vld [vmem:[#allocation70_spill] sm:$0xff] }
 0x292   : > { %6186 = vmatmul.mubr.bf16.gmra.mrb[36].mxu0 %v5901_v47  ;;  %v9054_v16 = vunpack.i.l.bf16 %v12389_v27  ;;  %v14553_v15 = vunpack.i.h.bf16 %v12082_v40  ;;  %v12480_v17 = vsel %vm1937_vm4, %v11471_v21, %v9025_v51  ;;  %v14554_v54 = vunpack.i.l.bf16 %v12087_v24 }
 0x293   : > { %v5838_v14 = vsel %vm4300_vm9, %v5806_v6, %v14552_v20  ;;  %9282 = vrot.lane.b32.xlu0 %v9281_v22, %s9856_s20  ;;  %v14555_v27 = vunpack.i.h.bf16 %v12087_v24  ;;  %v14556_v19 = vunpack.i.l.bf16 %v12171_v50  ;;  %v14557_v38 = vunpack.i.h.bf16 %v12171_v50  ;;  %v14558_v6 = vld [vmem:[#allocation17_spill] sm:$0xff] }
 0x294   : > { %v5839_v45 = vsel %vm4300_vm9, %v5807_v63, %v14553_v15  ;;  %v5870_v53 = vsel %vm4309_vm10, %v5838_v14, %v9019_v4  ;;  %v5742_v7 = vsel %vm4300_vm9, %v12258_v62, %v14554_v54  ;;  %v12501_v26 = vsel %vm1937_vm4, %v14558_v6, %v9024_v32  ;;  %v9824_v62 = vld [vmem:[#allocation3 + $0x50] sm:$0xff]  ;;  %v14559_v63 = vld [vmem:[#allocation82_spill] sm:$0xff]  ;;  %v9827_v4 = vld [vmem:[#allocation3 + $0x80] sm:$0xff] }
 0x295   : > { %v5871_v28 = vsel %vm4309_vm10, %v5839_v45, %v9020_v12  ;;  %v5743_v40 = vsel %vm4300_vm9, %v12247_v13, %v14555_v27  ;;  %v5774_v21 = vsel %vm4309_vm10, %v5742_v7, %v14556_v19  ;;  %v9110_v12 = vunpack.i.h.bf16 %v12402_v23 }
 0x296   : > { %v12460_v9 = vpop.permute.xlu1 %9077  ;;  %v5905_v3 = vpack.c.bf16 %v5871_v28, %v5870_v53  ;;  %v5775_v56 = vsel %vm4309_vm10, %v5743_v40, %v14557_v38  ;;  %v5713_v24 = vsel %vm1937_vm4, %v9824_v62, %v9050_v29  ;;  %v5712_v13 = vsel %vm1937_vm4, %v9825_v18, %v9049_v33 }
 0x297   : > { %v12507_v52 = vsel %vm4300_vm9, %v5712_v13, %v9054_v16  ;;  %v12510_v50 = vsel %vm4300_vm9, %v5713_v24, %v9055_v55  ;;  %v2221_v58 = vadd.f32 %v9826_v39, %v12360_v35  ;;  %v5904_v49 = vpack.c.bf16 %v5775_v56, %v5774_v21  ;;  %v14561_v35 = vld [vmem:[#allocation83_spill] sm:$0xff] }
 0x298   : > { %6193 = vmatprep.mubr.bf16.mxu0 %v5905_v3  ;;  %v2213_v51 = vadd.f32 %v9826_v39, %v12365_v42  ;;  %v2224_v47 = vadd.f32 %v9826_v39, %v14559_v63  ;;  %v12525_v32 = vsel %vm1937_vm4, %v9827_v4, %v9110_v12  ;;  %v2216_v22 = vadd.f32 %v9826_v39, %v14561_v35  ;;  %v12531_v20 = vld [vmem:[#allocation4 + $0x70] sm:$0xff]  ;;  %v12533_v14 = vld [vmem:[#allocation4 + $0x78] sm:$0x3] }
 0x299   : > { %v12528_v33 = vmax.f32 %v2221_v58, 0.0  ;;  %v14564_v45 = vmov 0.0   ;;  %v9286_v7 = vpack.i.bf16 %v12531_v20, %v12324_v57 }
 0x29a   : > { %v12522_v44 = vpop.permute.xlu0 %9122  ;;  %6194 = vmatmul.mubr.bf16.gmra.mrb[40].mxu0 %v5904_v49  ;;  %v12537_v16 = vmax.f32 %v2213_v51, 0.0  ;;  %v12539_v15 = vmax.f32 %v2224_v47, 0.0  ;;  %6685 = vst.msk [vmem:[#allocation4 + $0x70] sm:$0xff] %vm1937_vm4, %v14564_v45  ;;  %v12551_v54 = vmax.f32 %v2216_v22, 0.0 }
 0x29b   : > { %14560 = vst [vmem:[#allocation17_spill] sm:$0xff] %v12528_v33  ;;  %6686 = vst.msk [vmem:[#allocation4 + $0x78] sm:$0x3] %vm3612_vm13, %v14564_v45  ;;  %v2873_v53 = vcombine.high %v12528_v33, %v12528_v33  ;;  %v2880_v28 = vrot.slane %v12528_v33, %v11253_v34  ;;  %9287 = vrot.lane.b32.xlu1 %v9286_v7, %s9857_s19 }
 0x29c   : > { %v12517_v48 = vpop.permute.xlu1 %9082  ;;  %14562 = vst [vmem:[#allocation82_spill] sm:$0xff] %v12537_v16  ;;  %14563 = vst [vmem:[#allocation83_spill] sm:$0xff] %v12539_v15  ;;  %v2839_v3 = vcombine.high %v12537_v16, %v12537_v16  ;;  %v2846_v19 = vrot.slane %v12537_v16, %v11253_v34  ;;  %v2890_v21 = vcombine.high %v12539_v15, %v12539_v15 }
 0x29d   : > { %4776 = vst.msk [vmem:[#allocation3 + $0x181] sm:$0xff] %vm1937_vm4, %v12528_v33  ;;  %14565 = vst [vmem:[#allocation84_spill] sm:$0xff] %v12551_v54  ;;  %v2887_v56 = vrot.slane %v2873_v53, %v11253_v34  ;;  %v2888_v12 = vcombine.high %v2880_v28, %v2880_v28  ;;  %v7817_v6 = vrot.slane %v2880_v28, 9  ;;  %v2897_v62 = vrot.slane %v12539_v15, %v11253_v34  ;;  %v9828_v33 = vld [vmem:[#allocation3 + $0x78] sm:$0xff] }
 0x29e   : > { %4774 = vst.msk [vmem:[#allocation3 + $0x169] sm:$0xff] %vm1937_vm4, %v12537_v16  ;;  %4777 = vst.msk [vmem:[#allocation3 + $0x189] sm:$0xff] %vm1937_vm4, %v12539_v15  ;;  %v12568_v38 = vpop.permute.xlu0 %9127  ;;  %v2853_v24 = vrot.slane %v2839_v3, %v11253_v34  ;;  %v2854_v18 = vcombine.high %v2846_v19, %v2846_v19  ;;  %v7809_v13 = vrot.slane %v2846_v19, 9  ;;  %v2904_v39 = vrot.slane %v2890_v21, %v11253_v34 }
 0x29f   : > { %4775 = vst.msk [vmem:[#allocation3 + $0x171] sm:$0xff] %vm1937_vm4, %v12551_v54  ;;  %v2889_v58 = vcombine.high %v2887_v56, %v2887_v56  ;;  %v7818_v49 = vrot.slane %v2888_v12, 9  ;;  %v7819_v51 = vrot.slane %v2887_v56, 9  ;;  %v3539_v63 = vmax.f32 %v2880_v28, %v7817_v6 }
 0x2a0   : > { %v12555_v27 = vpop.permute.xlu1 %9087  ;;  %v2855_v4 = vcombine.high %v2853_v24, %v2853_v24  ;;  %v7810_v35 = vrot.slane %v2854_v18, 9  ;;  %v7811_v22 = vrot.slane %v2853_v24, 9  ;;  %v3531_v53 = vmax.f32 %v2846_v19, %v7809_v13 }
 0x2a1   : > { %v7820_v29 = vrot.slane %v2889_v58, 9  ;;  %v3540_v42 = vmax.f32 %v2888_v12, %v7818_v49  ;;  %v3541_v5 = vmax.f32 %v2887_v56, %v7819_v51  ;;  %v2905_v7 = vcombine.high %v2897_v62, %v2897_v62 }
 0x2a2   : > { %v7812_v46 = vrot.slane %v2855_v4, 9  ;;  %v3532_v3 = vmax.f32 %v2854_v18, %v7810_v35  ;;  %v3533_v8 = vmax.f32 %v2853_v24, %v7811_v22  ;;  %v3603_v55 = vmax.f32 %v3531_v53, %v3539_v63  ;;  %v12580_v40 = vpop.permute.xlu0 %9147 }
 0x2a3   : > { %v3542_v21 = vmax.f32 %v2889_v58, %v7820_v29  ;;  %v2906_v60 = vcombine.high %v2904_v39, %v2904_v39  ;;  %v7821_v15 = vrot.slane %v2897_v62, 9  ;;  %v2856_v28 = vcombine.high %v12551_v54, %v12551_v54 }
 0x2a4   : > { %v12578_v47 = vpop.permute.xlu1 %9092  ;;  %v14566_v19 = vunpack.i.l.bf16 %v12402_v23  ;;  %v3534_v12 = vmax.f32 %v2855_v4, %v7812_v46  ;;  %v3604_v13 = vmax.f32 %v3532_v3, %v3540_v42  ;;  %v3605_v18 = vmax.f32 %v3533_v8, %v3541_v5 }
 0x2a5   : > { %v3923_v49 = vrot.slane %v3603_v55, %v11261_v59  ;;  %v7822_v29 = vrot.slane %v2905_v7, 9  ;;  %v7823_v58 = vrot.slane %v2904_v39, 9  ;;  %v2863_v22 = vrot.slane %v12551_v54, %v11253_v34 }
 0x2a6   : > { %v5716_v56 = vsel %vm1937_vm4, %v9828_v33, %v14566_v19  ;;  %v3606_v51 = vmax.f32 %v3534_v12, %v3542_v21  ;;  %v3927_v63 = vrot.slane %v3604_v13, %v11261_v59  ;;  %v3931_v35 = vrot.slane %v3605_v18, %v11261_v59  ;;  %v12601_v3 = vpop.permute.xlu0 %9152 }
 0x2a7   : > { %v7824_v33 = vrot.slane %v2906_v60, 9  ;;  %v3543_v46 = vmax.f32 %v2897_v62, %v7821_v15  ;;  %v2870_v5 = vrot.slane %v2856_v28, %v11253_v34  ;;  %v2871_v4 = vcombine.high %v2863_v22, %v2863_v22 }
 0x2a8   : > { %v12584_v6 = vpop.permute.xlu1 %9097  ;;  %v3935_v42 = vrot.slane %v3606_v51, %v11261_v59  ;;  %v4008_v55 = vsel %vm3952_vm14, %v3927_v63, %v3923_v49  ;;  %v7813_v53 = vrot.slane %v2863_v22, 9  ;;  %v3545_v19 = vmax.f32 %v2904_v39, %v7823_v58 }
 0x2a9   : > { %v4009_v21 = vsel %vm3954_vm15, %v3931_v35, %v4008_v55  ;;  %v2872_v12 = vcombine.high %v2870_v5, %v2870_v5  ;;  %v7815_v13 = vrot.slane %v2870_v5, 9  ;;  %v14567_v18 = vunpack.i.l.bf16 %v12425_v11 }
 0x2aa   : > { %v3544_v34 = vmax.f32 %v2905_v7, %v7822_v29  ;;  %v7814_v62 = vrot.slane %v2871_v4, 9  ;;  %v3535_v28 = vmax.f32 %v2863_v22, %v7813_v53  ;;  %v14568_v51 = vunpack.i.h.bf16 %v12425_v11 }
 0x2ab   : > { %v12607_v15 = vsel %vm4300_vm9, %v5716_v56, %v14567_v18  ;;  %v3546_v63 = vmax.f32 %v2906_v60, %v7824_v33  ;;  %v7816_v24 = vrot.slane %v2872_v12, 9  ;;  %v3537_v35 = vmax.f32 %v2870_v5, %v7815_v13  ;;  %v12624_v5 = vpop.permute.xlu0 %9157 }
 0x2ac   : > { %v12597_v8 = vpop.permute.xlu1 %9102  ;;  %v12613_v49 = vsel %vm4300_vm9, %v12525_v32, %v14568_v51  ;;  %v3536_v58 = vmax.f32 %v2871_v4, %v7814_v62  ;;  %v3607_v55 = vmax.f32 %v3535_v28, %v3543_v46  ;;  %v4010_v23 = vsel %vm3956_vm0, %v3935_v42, %v4009_v21 }
 0x2ad   : > { %v4086_v56 = vrot.slane %v12324_v57, 1  ;;  %v3538_v7 = vmax.f32 %v2872_v12, %v7816_v24  ;;  %v3609_v29 = vmax.f32 %v3537_v35, %v3545_v19  ;;  %v4087_v22 = vrot.slane %v12326_v2, 1  ;;  %v14569_v35 = vld [vmem:[#allocation16_spill] sm:$0xff] }
 0x2ae   : > { %v4089_v11 = vrot.slane %v12531_v20, 1  ;;  %v3608_v53 = vmax.f32 %v3536_v58, %v3544_v34  ;;  %v3939_v32 = vrot.slane %v3607_v55, %v11261_v59  ;;  %v9075_v60 = vunpack.i.h.bf16 %v12421_v61  ;;  %v14570_v55 = vld [vmem:[#allocation5_spill] sm:$0xff] }
 0x2af   : > { %v4090_v33 = vrot.slane %v12533_v14, 1  ;;  %v3610_v46 = vmax.f32 %v3538_v7, %v3546_v63  ;;  %v9074_v42 = vunpack.i.l.bf16 %v12421_v61  ;;  %v9120_v4 = vunpack.i.h.bf16 %v12470_v25 }
 0x2b0   : > { %v12615_v39 = vpop.permute.xlu1 %9132  ;;  %v9119_v24 = vunpack.i.l.bf16 %v12470_v25  ;;  %v3943_v2 = vrot.slane %v3608_v53, %v11261_v59  ;;  %v4011_v19 = vsel %vm3958_vm1, %v3939_v32, %v4010_v23  ;;  %v12634_v12 = vsel %vm751_vm2, %v4086_v56, %v4087_v22 }
 0x2b1   : > { %v12637_v13 = vsel %vm751_vm2, %v4089_v11, %v4090_v33  ;;  %v3947_v18 = vrot.slane %v3609_v29, %v11261_v59  ;;  %v9085_v62 = vunpack.i.h.bf16 %v12517_v48  ;;  %v3951_v25 = vrot.slane %v3610_v46, %v11261_v59 }
 0x2b2   : > { %v9296_v34 = vpack.i.bf16 %v12637_v13, %v12634_v12  ;;  %v4012_v28 = vsel %vm3960_vm6, %v3943_v2, %v4011_v19  ;;  %v4113_v51 = vrot.slane %v12531_v20, 2  ;;  %v4114_v23 = vrot.slane %v12533_v14, 2 }
 0x2b3   : > { %v4013_v63 = vsel %vm3962_vm7, %v3947_v18, %v4012_v28  ;;  %v12650_v58 = vsel %vm1937_vm4, %v14569_v35, %v9120_v4  ;;  %v12654_v56 = vsel %vm1937_vm4, %v14570_v55, %v9119_v24  ;;  %v9084_v59 = vunpack.i.l.bf16 %v12517_v48  ;;  %v14572_v4 = vld [vmem:[#allocation38_spill] sm:$0xff]  ;;  %v14573_v18 = vld [vmem:[#allocation37_spill] sm:$0xff] }
 0x2b4   : > { %v12629_v21 = vpop.permute.xlu1 %9137  ;;  %9297 = vrot.lane.b32.xlu0 %v9296_v34, %s9856_s20  ;;  %9292 = vrot.lane.b32.xlu1 %v9296_v34, %s9859_s27  ;;  %v4014_v14 = vsel %vm3964_vm8, %v3951_v25, %v4013_v63  ;;  %v9080_v29 = vunpack.i.h.bf16 %v12460_v9  ;;  %v9079_v22 = vunpack.i.l.bf16 %v12460_v9  ;;  %v12665_v11 = vsel %vm832_vm3, %v4113_v51, %v4114_v23 }
 0x2b5   : > { %14571 = vst [vmem:[#allocation16_spill] sm:$0xff] %v12665_v11  ;;  %4031 = vst.msk [vmem:[#allocation4 + $0x81] sm:$0xff] %vm1937_vm4, %v4014_v14  ;;  %v9301_v48 = vpack.i.bf16 %v12665_v11, %v12458_v43  ;;  %v9100_v46 = vunpack.i.h.bf16 %v12584_v6  ;;  %v12677_v24 = vsel %vm1937_vm4, %v14572_v4, %v9085_v62  ;;  %v9090_v9 = vunpack.i.h.bf16 %v12555_v27  ;;  %v14578_v14 = vld [vmem:[#allocation28_spill] sm:$0xff] }
 0x2b6   : > { %v12667_v53 = vpop.permute.xlu0 %9177  ;;  %v9099_v2 = vunpack.i.l.bf16 %v12584_v6  ;;  %v9105_v19 = vunpack.i.h.bf16 %v12597_v8  ;;  %v12684_v34 = vsel %vm1937_vm4, %v14573_v18, %v9084_v59  ;;  %v9089_v25 = vunpack.i.l.bf16 %v12555_v27  ;;  %v14576_v59 = vld [vmem:[#allocation66_spill] sm:$0xff] }
 0x2b7   : > { %v9104_v28 = vunpack.i.l.bf16 %v12597_v8  ;;  %v14574_v51 = vunpack.i.l.bf16 %v12398_v31  ;;  %v14575_v63 = vunpack.i.h.bf16 %v12398_v31  ;;  %v14577_v27 = vunpack.i.l.bf16 %v14576_v59 }
 0x2b8   : > { %v12659_v7 = vpop.permute.xlu1 %9142  ;;  %9302 = vrot.lane.b32.xlu0 %v9301_v48, %s9857_s19  ;;  %v5811_v48 = vsel %vm1937_vm4, %v14578_v14, %v9105_v19  ;;  %v14580_v31 = vunpack.i.h.bf16 %v14576_v59 }
 0x2b9   : > { %v5840_v62 = vsel %vm4300_vm9, %v12501_v26, %v14574_v51  ;;  %v5841_v35 = vsel %vm4300_vm9, %v12480_v17, %v14575_v63  ;;  %v5776_v8 = vsel %vm4309_vm10, %v12507_v52, %v14577_v27  ;;  %v14579_v26 = vld [vmem:[#allocation27_spill] sm:$0xff]  ;;  %v9829_v51 = vld [vmem:[#allocation3 + $0x98] sm:$0xff]  ;;  %v9830_v27 = vld [vmem:[#allocation3 + $0x90] sm:$0xff] }
 0x2ba   : > { %v5872_v55 = vsel %vm4309_vm10, %v5840_v62, %v9099_v2  ;;  %v5810_v4 = vsel %vm1937_vm4, %v14579_v26, %v9104_v28  ;;  %v5873_v18 = vsel %vm4309_vm10, %v5841_v35, %v9100_v46  ;;  %v5777_v17 = vsel %vm4309_vm10, %v12510_v50, %v14580_v31  ;;  %v12719_v19 = vpop.permute.xlu0 %9192  ;;  %v14592_v62 = vld [vmem:[#allocation56_spill] sm:$0xff] }
 0x2bb   : > { %v12715_v2 = vsel %vm1937_vm4, %v9829_v51, %v9090_v9  ;;  %v5908_v63 = vpack.c.bf16 %v5873_v18, %v5872_v55  ;;  %v12722_v28 = vsel %vm1937_vm4, %v9830_v27, %v9089_v25  ;;  %v5907_v35 = vpack.c.bf16 %v5777_v17, %v5776_v8  ;;  %v14583_v17 = vld [vmem:[#allocation52_spill] sm:$0xff] }
 0x2bc   : > { %v12693_v23 = vpop.permute.xlu1 %9162  ;;  %v14581_v50 = vunpack.i.l.bf16 %v12358_v37  ;;  %v4048_v55 = vld [vmem:[#allocation4 + $0x80] sm:$0xff]  ;;  %v14582_v18 = vunpack.i.h.bf16 %v12358_v37  ;;  %v4049_v51 = vld [vmem:[#allocation4 + $0x88] sm:$0x3]  ;;  %v9139_v26 = vunpack.i.l.bf16 %v12629_v21  ;;  %v14596_v52 = vld [vmem:[#allocation64_spill] sm:$0xff] }
 0x2bd   : > { %6201 = vmatprep.mubr.bf16.mxu0 %v5908_v63  ;;  %6687 = vst.msk [vmem:[#allocation4 + $0x80] sm:$0xff] %vm1937_vm4, %v14564_v45  ;;  %v9311_v63 = vpack.i.bf16 %v4048_v55, %v12531_v20  ;;  %v4119_v14 = vrot.slane %v4049_v51, 1  ;;  %v4813_v37 = vld [vmem:[#allocation3 + $0x118] sm:$0x3] }
 0x2be   : > { %v5842_v59 = vsel %vm4300_vm9, %v5810_v4, %v14581_v50  ;;  %v5843_v25 = vsel %vm4300_vm9, %v5811_v48, %v14582_v18  ;;  %6202 = vmatmul.mubr.bf16.gmra.mrb[44].mxu0 %v5907_v35  ;;  %v9306_v4 = vpack.i.bf16 %v14583_v17, %v4048_v55  ;;  %6688 = vst.msk [vmem:[#allocation4 + $0x88] sm:$0x3] %vm3612_vm13, %v14564_v45  ;;  %v12747_v35 = vpop.permute.xlu0 %9197  ;;  %v14585_v45 = vunpack.i.h.bf16 %v12278_v10  ;;  %v14591_v48 = vld [vmem:[#allocation41_spill] sm:$0xff] }
 0x2bf   : > { %v5874_v31 = vsel %vm4309_vm10, %v5842_v59, %v9079_v22  ;;  %v5875_v27 = vsel %vm4309_vm10, %v5843_v25, %v9080_v29  ;;  %9312 = vrot.lane.b32.xlu0 %v9311_v63, %s9859_s27  ;;  %v14584_v29 = vunpack.i.l.bf16 %v12278_v10  ;;  %v4118_v25 = vrot.slane %v4048_v55, 1  ;;  %v14586_v63 = vld [vmem:[#allocation54_spill] sm:$0xff] }
 0x2c0   : > { %v12728_v9 = vpop.permute.xlu1 %9167  ;;  %v5911_v50 = vpack.c.bf16 %v5875_v27, %v5874_v31  ;;  %9307 = vrot.lane.b32.xlu1 %v9306_v4, %s9857_s19  ;;  %v5747_v18 = vsel %vm4300_vm9, %v12376_v36, %v14585_v45  ;;  %v4134_v27 = vrot.slane %v14583_v17, 1  ;;  %v9160_v10 = vunpack.i.h.bf16 %v12624_v5 }
 0x2c1   : > { %v5746_v59 = vsel %vm4300_vm9, %v12381_v0, %v14584_v29  ;;  %v5779_v4 = vsel %vm4309_vm10, %v5747_v18, %v9075_v60  ;;  %v4135_v0 = vrot.slane %v14586_v63, 1  ;;  %v9159_v36 = vunpack.i.l.bf16 %v12624_v5 }
 0x2c2   : > { %6209 = vmatprep.mubr.bf16.mxu0 %v5911_v50  ;;  %v5778_v31 = vsel %vm4309_vm10, %v5746_v59, %v9074_v42  ;;  %v9180_v50 = vunpack.i.h.bf16 %v12667_v53  ;;  %v12773_v45 = vsel %vm751_vm2, %v4118_v25, %v4119_v14  ;;  %v9179_v42 = vunpack.i.l.bf16 %v12667_v53  ;;  %v12784_v14 = vld [vmem:[#allocation3 + $0xf0] sm:$0xff]  ;;  %v12787_v25 = vld [vmem:[#allocation3 + $0xf8] sm:$0xff] }
 0x2c3   : > { %v4136_v61 = vsel %vm751_vm2, %v4134_v27, %v4135_v0  ;;  %v4129_v60 = vrot.slane %v4048_v55, 2  ;;  %v4130_v59 = vrot.slane %v4049_v51, 2  ;;  %v5910_v32 = vpack.c.bf16 %v5779_v4, %v5778_v31  ;;  %14588 = vst [vmem:[#allocation38_spill] sm:$0xff] %v12784_v14  ;;  %14589 = vst [vmem:[#allocation37_spill] sm:$0xff] %v12787_v25  ;;  %v12790_v51 = vpop.permute.xlu0 %9202  ;;  %v12795_v31 = vld [vmem:[%s14295_s3 + $0x80] sm:$0xff]   ;;  %v14590_v4 = vld [vmem:[#allocation42_spill] sm:$0xff] }
 0x2c4   : > { %v12767_v29 = vpop.permute.xlu1 %9172  ;;  %v9326_v33 = vpack.i.bf16 %v4136_v61, %v12773_v45  ;;  %v9165_v22 = vunpack.i.h.bf16 %v12693_v23  ;;  %v5010_v53 = vrot.slane %v12784_v14, 2  ;;  %v5011_v55 = vrot.slane %v12787_v25, 2  ;;  %8204 = vmatprep.subr.bf16.mxu1 %v12795_v31 }
 0x2c5   : > { %v12781_v5 = vsel %vm832_vm3, %v4129_v60, %v4130_v59  ;;  %v12799_v27 = vsel %vm1937_vm4, %v14590_v4, %v9160_v10  ;;  %v9164_v61 = vunpack.i.l.bf16 %v12693_v23  ;;  %v9833_v60 = vld [vmem:[#allocation3 + $0x100] sm:$0x3]  ;;  %v12807_v6 = vsel %vm1937_vm4, %v14591_v48, %v9159_v36  ;;  %v12818_v4 = vld [vmem:[#allocation3 + $0x110] sm:$0xff] }
 0x2c6   : > { %14587 = vst [vmem:[#allocation5_spill] sm:$0xff] %v12781_v5  ;;  %6210 = vmatmul.mubr.bf16.gmra.mrb[48].mxu0 %v5910_v32  ;;  %9327 = vrot.lane.b32.xlu1 %v9326_v33, %s9859_s27  ;;  %v9316_v0 = vpack.i.bf16 %v12781_v5, %v12665_v11  ;;  %v5013_v59 = vrot.slane %v9833_v60, 2  ;;  %v12811_v8 = vsel %vm1937_vm4, %v14592_v62, %v9180_v50  ;;  %v14593_v10 = vld [vmem:[#allocation55_spill] sm:$0xff]  ;;  %14594 = vst [vmem:[#allocation66_spill] sm:$0xff] %v12818_v4 }
 0x2c7   : > { %v5814_v32 = vsel %vm1937_vm4, %v14593_v10, %v9179_v42  ;;  %v12816_v33 = vsel %vm832_vm3, %v5010_v53, %v5011_v55  ;;  %v9834_v42 = vld [vmem:[#allocation3 + $0xc8] sm:$0xff]  ;;  %v9835_v60 = vld [vmem:[#allocation3 + $0xc0] sm:$0xff]  ;;  %v12851_v50 = vpop.permute.xlu0 %9217  ;;  %v9175_v46 = vunpack.i.h.bf16 %v12767_v29  ;;  %v5016_v54 = vrot.slane %v12818_v4, 2 }
 0x2c8   : > { %v9183_v23 = vpop.permute.xlu1 %9182  ;;  %9317 = vrot.lane.b32.xlu0 %v9316_v0, %s9856_s20  ;;  %v12825_v62 = vsel %vm832_vm3, %v5011_v55, %v5013_v59  ;;  %v12830_v53 = vsel %vm1937_vm4, %v9834_v42, %v9165_v22  ;;  %v12832_v10 = vld [vmem:[#allocation3 + $0x108] sm:$0xff]  ;;  %v12837_v48 = vsel %vm1937_vm4, %v9835_v60, %v9164_v61  ;;  %v4936_v0 = vrot.slane %v12818_v4, 1 }
 0x2c9   : > { %14595 = vst [vmem:[#allocation28_spill] sm:$0xff] %v12832_v10  ;;  %v12841_v55 = vpack.i.bf16 %v12825_v62, %v12816_v33  ;;  %v4938_v59 = vrot.slane %v4813_v37, 1  ;;  %v12848_v42 = vpack.i.bf16 %v12818_v4, %v12832_v10  ;;  %v4935_v36 = vrot.slane %v12832_v10, 1 }
 0x2ca   : > { %9332 = vrot.lane.b32.xlu1 %v14596_v52, %s9856_s20  ;;  %v9174_v52 = vunpack.i.l.bf16 %v12767_v29  ;;  %v9351_v22 = vpack.i.bf16 %v12787_v25, %v12784_v14  ;;  %v9185_v18 = vunpack.i.h.bf16 %v9183_v23  ;;  %v5018_v16 = vrot.slane %v4813_v37, 2 }
 0x2cb   : > { %v12867_v61 = vsel %vm751_vm2, %v4935_v36, %v4936_v0  ;;  %v12870_v60 = vsel %vm751_vm2, %v4936_v0, %v4938_v59  ;;  %v9184_v29 = vunpack.i.l.bf16 %v9183_v23  ;;  %v5844_v11 = vsel %vm4300_vm9, %v12684_v34, %v9139_v26  ;;  %v12899_v0 = vld [vmem:[#allocation3 + $0x128] sm:$0xff]  ;;  %v9223_v59 = vpop.permute.xlu0 %9222 }
 0x2cc   : > { %9322 = vrot.lane.b32.xlu0 %v12841_v55, %s9856_s20  ;;  %v12862_v5 = vpop.permute.xlu1 %9187  ;;  %14598 = vst [vmem:[#allocation27_spill] sm:$0xff] %v12867_v61  ;;  %v5015_v14 = vrot.slane %v12832_v10, 2  ;;  %v14599_v4 = vunpack.i.h.bf16 %v12629_v21  ;;  %v5876_v25 = vsel %vm4309_vm10, %v5844_v11, %v9174_v52  ;;  %v9205_v23 = vunpack.i.h.bf16 %v12790_v51 }
 0x2cd   : > { %v9204_v34 = vunpack.i.l.bf16 %v12790_v51  ;;  %v14601_v21 = vunpack.i.h.bf16 %v12378_v41 }
 0x2ce   : > { %9342 = vrot.lane.b32.xlu1 %v14597_v30, %s9857_s19  ;;  %v5845_v37 = vsel %vm4300_vm9, %v12677_v24, %v14599_v4  ;;  %v14600_v30 = vunpack.i.l.bf16 %v12378_v41  ;;  %v12894_v11 = vsel %vm832_vm3, %v5015_v14, %v5016_v54  ;;  %v12897_v4 = vsel %vm832_vm3, %v5016_v54, %v5018_v16  ;;  %v9836_v41 = vld [vmem:[#allocation3 + $0xb0] sm:$0xff] }
 0x2cf   : > { %v5877_v26 = vsel %vm4309_vm10, %v5845_v37, %v9175_v46  ;;  %v5781_v24 = vsel %vm4309_vm10, %v12613_v49, %v14601_v21  ;;  %v12904_v46 = vpack.i.bf16 %v12870_v60, %v12867_v61  ;;  %v12907_v51 = vsel %vm1937_vm4, %v9836_v41, %v9185_v18  ;;  %v4816_v54 = vld [vmem:[#allocation3 + $0x130] sm:$0x3] }
 0x2d0   : > { %v5780_v36 = vsel %vm4309_vm10, %v12607_v15, %v14600_v30  ;;  %9337 = vrot.lane.b32.xlu0 %v12848_v42, %s9857_s19  ;;  %v5914_v15 = vpack.c.bf16 %v5877_v26, %v5876_v25  ;;  %v14602_v14 = vunpack.i.l.bf16 %v12568_v38  ;;  %v9837_v25 = vld [vmem:[#allocation3 + $0xa8] sm:$0xff]  ;;  %v14604_v30 = vunpack.i.h.bf16 %v12568_v38  ;;  %v12923_v21 = vpop.permute.xlu1 %9207 }
 0x2d1   : > { %v5913_v49 = vpack.c.bf16 %v5781_v24, %v5780_v36  ;;  %v5720_v52 = vsel %vm1937_vm4, %v9837_v25, %v9184_v29  ;;  %v14605_v36 = vunpack.i.l.bf16 %v12601_v3  ;;  %v14606_v38 = vunpack.i.h.bf16 %v12601_v3 }
 0x2d2   : > { %9352 = vrot.lane.b32.xlu1 %v9351_v22, %s9859_s27  ;;  %v5846_v16 = vsel %vm4300_vm9, %v5814_v32, %v14602_v14  ;;  %6217 = vmatprep.mubr.bf16.mxu0 %v5914_v15  ;;  %v12914_v22 = vld [vmem:[#allocation3 + $0x120] sm:$0xff]  ;;  %v5847_v18 = vsel %vm4300_vm9, %v12811_v8, %v14604_v30  ;;  %v12929_v32 = vpack.i.bf16 %v12897_v4, %v12894_v11  ;;  %v4941_v24 = vrot.slane %v12899_v0, 1 }
 0x2d3   : > { %14603 = vst [vmem:[#allocation52_spill] sm:$0xff] %v12914_v22  ;;  %v5878_v26 = vsel %vm4309_vm10, %v5846_v16, %v14605_v36  ;;  %6218 = vmatmul.mubr.bf16.gmra.mrb[52].mxu0 %v5913_v49  ;;  %v5879_v8 = vsel %vm4309_vm10, %v5847_v18, %v14606_v38  ;;  %v9190_v15 = vunpack.i.h.bf16 %v12862_v5  ;;  %v4943_v14 = vrot.slane %v4816_v54, 1  ;;  %v14607_v16 = vld [vmem:[#allocation59_spill] sm:$0xff] }
 0x2d4   : > { %9347 = vrot.lane.b32.xlu0 %v12904_v46, %s9859_s27  ;;  %v5917_v41 = vpack.c.bf16 %v5879_v8, %v5878_v26  ;;  %v9224_v25 = vunpack.i.l.bf16 %v9223_v59  ;;  %v4940_v30 = vrot.slane %v12914_v22, 1  ;;  %v14608_v36 = vunpack.i.l.bf16 %v12578_v47 }
 0x2d5   : > { %v14609_v3 = vunpack.i.h.bf16 %v12578_v47  ;;  %v9189_v38 = vunpack.i.l.bf16 %v12862_v5  ;;  %v9225_v26 = vunpack.i.h.bf16 %v9223_v59  ;;  %v14611_v29 = vunpack.i.h.bf16 %v12659_v7  ;;  %v12955_v61 = vpop.permute.xlu1 %9212 }
 0x2d6   : > { %9362 = vrot.lane.b32.xlu1 %v14607_v16, %s9856_s20  ;;  %v5750_v49 = vsel %vm4300_vm9, %v12722_v28, %v14608_v36  ;;  %6225 = vmatprep.mubr.bf16.mxu0 %v5917_v41  ;;  %v9228_v8 = vpop.permute.xlu0 %9227  ;;  %v14610_v16 = vunpack.i.l.bf16 %v12659_v7  ;;  %v12961_v47 = vpack.i.bf16 %v12899_v0, %v12914_v22  ;;  %v12967_v28 = vsel %vm751_vm2, %v4941_v24, %v4943_v14 }
 0x2d7   : > { %v5751_v18 = vsel %vm4300_vm9, %v12715_v2, %v14609_v3  ;;  %v12964_v2 = vsel %vm751_vm2, %v4940_v30, %v4941_v24  ;;  %v5021_v5 = vrot.slane %v12899_v0, 2  ;;  %v9230_v7 = vunpack.i.h.bf16 %v9228_v8 }
 0x2d8   : > { %v5782_v37 = vsel %vm4309_vm10, %v5750_v49, %v14610_v16  ;;  %v5783_v10 = vsel %vm4309_vm10, %v5751_v18, %v14611_v29  ;;  %9357 = vrot.lane.b32.xlu0 %v12929_v32, %s9856_s20  ;;  %v9229_v59 = vunpack.i.l.bf16 %v9228_v8  ;;  %v5023_v29 = vrot.slane %v4816_v54, 2  ;;  %v14612_v54 = vld [vmem:[#allocation63_spill] sm:$0xff] }
 0x2d9   : > { %v5848_v41 = vsel %vm4300_vm9, %v12807_v6, %v9204_v34  ;;  %v5916_v36 = vpack.c.bf16 %v5783_v10, %v5782_v37  ;;  %v5849_v49 = vsel %vm4300_vm9, %v12799_v27, %v9205_v23  ;;  %v5020_v14 = vrot.slane %v12914_v22, 2  ;;  %v12989_v23 = vld [vmem:[#allocation3 + $0x140] sm:$0xff]  ;;  %v14622_v22 = vld [vmem:[#allocation32_spill] sm:$0xff] }
 0x2da   : > { %9372 = vrot.lane.b32.xlu1 %v12841_v55, %s9857_s19  ;;  %v5880_v30 = vsel %vm4309_vm10, %v5848_v41, %v9224_v25  ;;  %v5881_v3 = vsel %vm4309_vm10, %v5849_v49, %v9225_v26  ;;  %v12985_v55 = vpack.i.bf16 %v12967_v28, %v12964_v2  ;;  %v5752_v34 = vsel %vm4300_vm9, %v5720_v52, %v9189_v38  ;;  %v14613_v25 = vld [vmem:[#allocation62_spill] sm:$0xff]  ;;  %v4819_v49 = vld [vmem:[#allocation3 + $0x148] sm:$0x3] }
 0x2db   : > { %6226 = vmatmul.mubr.bf16.gmra.mrb[56].mxu0 %v5916_v36  ;;  %v12987_v10 = vpop.permute.xlu0 %9237  ;;  %v5920_v27 = vpack.c.bf16 %v5881_v3, %v5880_v30  ;;  %v5819_v37 = vsel %vm1937_vm4, %v14612_v54, %v9230_v7  ;;  %v5818_v18 = vsel %vm1937_vm4, %v14613_v25, %v9229_v59  ;;  %v12997_v26 = vsel %vm832_vm3, %v5020_v14, %v5021_v5  ;;  %v9233_v16 = vpop.permute.xlu1 %9232  ;;  %v13006_v38 = vld [vmem:[#allocation3 + $0x138] sm:$0xff] }
 0x2dc   : > { %9367 = vrot.lane.b32.xlu0 %v12961_v47, %s9857_s19  ;;  %v13000_v8 = vsel %vm832_vm3, %v5021_v5, %v5023_v29  ;;  %v9215_v41 = vunpack.i.h.bf16 %v12955_v61  ;;  %v9214_v52 = vunpack.i.l.bf16 %v12955_v61  ;;  %v5753_v7 = vsel %vm4300_vm9, %v12907_v51, %v9190_v15 }
 0x2dd   : > { %6233 = vmatprep.mubr.bf16.mxu0 %v5920_v27  ;;  %v9239_v59 = vunpack.i.l.bf16 %v12987_v10  ;;  %v13013_v5 = vpack.i.bf16 %v12989_v23, %v13006_v38  ;;  %v14614_v29 = vunpack.i.l.bf16 %v12615_v39  ;;  %v14615_v36 = vunpack.i.h.bf16 %v12615_v39 }
 0x2de   : > { %9382 = vrot.lane.b32.xlu1 %v12848_v42, %s9859_s27  ;;  %v13025_v51 = vpack.i.bf16 %v13000_v8, %v12997_v26  ;;  %v4946_v30 = vrot.slane %v12989_v23, 1  ;;  %v14616_v14 = vunpack.i.l.bf16 %v12747_v35  ;;  %v14617_v39 = vunpack.i.h.bf16 %v12747_v35 }
 0x2df   : > { %v5784_v42 = vsel %vm4309_vm10, %v5752_v34, %v14614_v29  ;;  %v5785_v61 = vsel %vm4309_vm10, %v5753_v7, %v14615_v36  ;;  %v13027_v15 = vpop.permute.xlu0 %9242  ;;  %v9235_v54 = vunpack.i.h.bf16 %v9233_v16  ;;  %v9234_v25 = vunpack.i.l.bf16 %v9233_v16 }
 0x2e0   : > { %9377 = vrot.lane.b32.xlu0 %v12985_v55, %s9859_s27  ;;  %v5850_v3 = vsel %vm4300_vm9, %v5818_v18, %v14616_v14  ;;  %v5851_v27 = vsel %vm4300_vm9, %v5819_v37, %v14617_v39  ;;  %v4945_v7 = vrot.slane %v13006_v38, 1  ;;  %v5919_v29 = vpack.c.bf16 %v5785_v61, %v5784_v42  ;;  %v14620_v14 = vld [vmem:[#allocation24_spill] sm:$0xff]  ;;  %v13048_v39 = vpop.permute.xlu1 %9257 }
 0x2e1   : > { %v14618_v36 = vunpack.i.l.bf16 %v12851_v50  ;;  %v14619_v18 = vunpack.i.h.bf16 %v12851_v50  ;;  %v4294_v37 = vsel %vm1937_vm4, %v14620_v14, %v9239_v59  ;;  %v4948_v16 = vrot.slane %v4819_v49, 1 }
 0x2e2   : > { %9392 = vrot.lane.b32.xlu1 %v12904_v46, %s9856_s20  ;;  %v14621_v6 = vunpack.i.l.bf16 %v12719_v19  ;;  %v9245_v42 = vunpack.i.h.bf16 %v13027_v15  ;;  %v13058_v50 = vsel %vm751_vm2, %v4945_v7, %v4946_v30  ;;  %v14623_v59 = vunpack.i.h.bf16 %v12719_v19 }
 0x2e3   : > { %v5882_v24 = vsel %vm4309_vm10, %v5850_v3, %v14618_v36  ;;  %v5883_v35 = vsel %vm4309_vm10, %v5851_v27, %v14619_v18  ;;  %6234 = vmatmul.mubr.bf16.gmra.mrb[60].mxu0 %v5919_v29  ;;  %v13060_v61 = vpop.permute.xlu0 %9247  ;;  %v14624_v3 = vld [vmem:[#allocation71_spill] sm:$0xff]  ;;  %v14625_v29 = vunpack.i.l.bf16 %v12522_v44  ;;  %v9259_v19 = vunpack.i.l.bf16 %v13048_v39 }
 0x2e4   : > { %v5923_v34 = vpack.c.bf16 %v5883_v35, %v5882_v24  ;;  %v4318_v46 = vsel %vm1937_vm4, %v14622_v22, %v14621_v6  ;;  %9387 = vrot.lane.b32.xlu0 %v13025_v51, %s9856_s20  ;;  %v4319_v24 = vsel %vm1937_vm4, %v14624_v3, %v14623_v59  ;;  %v9244_v22 = vunpack.i.l.bf16 %v13027_v15 }
 0x2e5   : > { %v4326_v27 = vsel %vm4300_vm9, %v4318_v46, %v9214_v52  ;;  %v4327_v6 = vsel %vm4300_vm9, %v4319_v24, %v9215_v41  ;;  %v4301_v7 = vsel %vm4300_vm9, %v12654_v56, %v14625_v29  ;;  %v14626_v52 = vunpack.i.h.bf16 %v12522_v44 }
 0x2e6   : > { %6241 = vmatprep.mubr.bf16.mxu0 %v5923_v34  ;;  %v4334_v36 = vsel %vm4309_vm10, %v4326_v27, %v9234_v25  ;;  %9402 = vrot.lane.b32.xlu1 %v12929_v32, %s9857_s19  ;;  %v4335_v18 = vsel %vm4309_vm10, %v4327_v6, %v9235_v54  ;;  %v14627_v41 = vunpack.i.l.bf16 %v12580_v40  ;;  %v13086_v35 = vsel %vm751_vm2, %v4946_v30, %v4948_v16  ;;  %v9263_v16 = vpop.permute.xlu1 %9262 }
 0x2e7   : > { %v4302_v34 = vsel %vm4300_vm9, %v12650_v58, %v14626_v52  ;;  %v4343_v56 = vpack.c.bf16 %v4335_v18, %v4334_v36  ;;  %v14628_v14 = vunpack.i.h.bf16 %v12580_v40  ;;  %v5025_v46 = vrot.slane %v13006_v38, 2  ;;  %v9253_v59 = vpop.permute.xlu0 %9252  ;;  %v9746_v40 = vld [vmem:[%s14295_s3 + $0x88] sm:$0xff]  }
 0x2e8   : > { %v4310_v25 = vsel %vm4309_vm10, %v4301_v7, %v14627_v41  ;;  %9397 = vrot.lane.b32.xlu0 %v13013_v5, %s9857_s19  ;;  %v5026_v58 = vrot.slane %v12989_v23, 2  ;;  %v5028_v54 = vrot.slane %v4819_v49, 2  ;;  %v14629_v3 = vunpack.i.l.bf16 %v12728_v9 }
 0x2e9   : > { %v4311_v32 = vsel %vm4309_vm10, %v4302_v34, %v14628_v14  ;;  %4549 = vmatprep.mubr.bf16.mxu1 %v4343_v56  ;;  %v9255_v24 = vunpack.i.h.bf16 %v9253_v59  ;;  %v9254_v27 = vunpack.i.l.bf16 %v9253_v59  ;;  %v14630_v6 = vunpack.i.h.bf16 %v12728_v9  ;;  %v14633_v34 = vld [vmem:[#allocation74_spill] sm:$0xff] }
 0x2ea   : > { %v4342_v44 = vpack.c.bf16 %v4311_v32, %v4310_v25  ;;  %v5754_v30 = vsel %vm4300_vm9, %v12837_v48, %v14629_v3  ;;  %v14631_v49 = vunpack.i.l.bf16 %v12923_v21  ;;  %9412 = vrot.lane.b32.xlu1 %v12961_v47, %s9859_s27  ;;  %v9406_v48 = vpack.i.bf16 %v13086_v35, %v13058_v50  ;;  %v14634_v47 = vld [vmem:[#allocation72_spill] sm:$0xff] }
 0x2eb   : > { %v5755_v36 = vsel %vm4300_vm9, %v12830_v53, %v14630_v6  ;;  %v9249_v7 = vunpack.i.l.bf16 %v13060_v61  ;;  %v13115_v18 = vsel %vm832_vm3, %v5025_v46, %v5026_v58  ;;  %v14632_v9 = vunpack.i.h.bf16 %v12923_v21  ;;  %v13131_v46 = vld [vmem:[#allocation3 + $0x158] sm:$0xff] }
 0x2ec   : > { %v5786_v29 = vsel %vm4309_vm10, %v5754_v30, %v14631_v49  ;;  %4550 = vmatmul.mubr.bf16.vlgmr.msra.gmra.mrb[0].mxu1 %v4342_v44  ;;  %v13121_v52 = vsel %vm832_vm3, %v5026_v58, %v5028_v54  ;;  %v4321_v41 = vsel %vm1937_vm4, %v14633_v34, %v9255_v24  ;;  %v4320_v25 = vsel %vm1937_vm4, %v14634_v47, %v9254_v27  ;;  %v4822_v44 = vld [vmem:[#allocation3 + $0x160] sm:$0x3]  ;;  %v14636_v54 = vld [vmem:[#allocation36_spill] sm:$0xff]  ;;  %v13186_v47 = vld [vmem:[#allocation3 + $0x170] sm:$0xff] }
 0x2ed   : > { %v5787_v53 = vsel %vm4309_vm10, %v5755_v36, %v14632_v9  ;;  %8205 = vmatpush3.bf16.msra.mxu1 %v12795_v31  ;;  %v9260_v14 = vunpack.i.h.bf16 %v13048_v39  ;;  %9407 = vrot.lane.b32.xlu0 %v9406_v48, %s9859_s27  ;;  %v9250_v21 = vunpack.i.h.bf16 %v13060_v61  ;;  %v9264_v32 = vunpack.i.l.bf16 %v9263_v16  ;;  %v13142_v39 = vld [vmem:[%s14297_s5 + $0x80] sm:$0xff]  }
 0x2ee   : > { %v5922_v56 = vpack.c.bf16 %v5787_v53, %v5786_v29  ;;  %8206 = vmatprep.subr.bf16.mxu1 %v9746_v40  ;;  %v14635_v58 = vunpack.i.h.bf16 %v12987_v10  ;;  %v4303_v3 = vsel %vm4300_vm9, %v4294_v37, %v9244_v22  ;;  %v9265_v30 = vunpack.i.h.bf16 %v9263_v16  ;;  %9422 = vrot.lane.b32.xlu1 %v12985_v55, %s9856_s20  ;;  %v13148_v61 = vld [vmem:[#allocation3 + $0x150] sm:$0xff] }
 0x2ef   : > { %v4328_v31 = vsel %vm4300_vm9, %v4320_v25, %v9259_v19  ;;  %v9416_v10 = vpack.i.bf16 %v13121_v52, %v13115_v18  ;;  %v4329_v24 = vsel %vm4300_vm9, %v4321_v41, %v9260_v14  ;;  %v4312_v22 = vsel %vm4309_vm10, %v4303_v3, %v9249_v7  ;;  %v4825_v25 = vld [vmem:[#allocation3 + $0x178] sm:$0x3] }
 0x2f0   : > { %v4295_v59 = vsel %vm1937_vm4, %v14636_v54, %v14635_v58  ;;  %6242 = vmatmul.mubr.bf16.gmra.mrb[64].mxu0 %v5922_v56  ;;  %v4336_v37 = vsel %vm4309_vm10, %v4328_v31, %v9264_v32  ;;  %v4951_v16 = vrot.slane %v13131_v46, 1  ;;  %v4953_v27 = vrot.slane %v4822_v44, 1 }
 0x2f1   : > { %v4304_v19 = vsel %vm4300_vm9, %v4295_v59, %v9245_v42  ;;  %v4337_v55 = vsel %vm4309_vm10, %v4329_v24, %v9265_v30  ;;  %8207 = vmatpush3.bf16.msra.mxu1 %v9746_v40  ;;  %9417 = vrot.lane.b32.xlu0 %v9416_v10, %s9856_s20  ;;  %v4950_v49 = vrot.slane %v13148_v61, 1  ;;  %v9426_v15 = vpack.i.bf16 %v13131_v46, %v13148_v61  ;;  %v4827_v24 = vld [vmem:[#allocation3 + $0x188] sm:$0xff] }
 0x2f2   : > { %v4346_v6 = vpack.c.bf16 %v4337_v55, %v4336_v37  ;;  %v4313_v36 = vsel %vm4309_vm10, %v4304_v19, %v9250_v21  ;;  %8216 = vmatprep.subr.bf16.mxu1 %v13142_v39  ;;  %9432 = vrot.lane.b32.xlu1 %v13025_v51, %s9857_s19  ;;  %v13170_v40 = vsel %vm751_vm2, %v4951_v16, %v4953_v27  ;;  %v5031_v7 = vrot.slane %v13131_v46, 2  ;;  %v4828_v37 = vld [vmem:[#allocation3 + $0x190] sm:$0x3]  ;;  %v4826_v55 = vld [vmem:[#allocation3 + $0x180] sm:$0xff] }
 0x2f3   : > { %v4345_v29 = vpack.c.bf16 %v4313_v36, %v4312_v22  ;;  %v13167_v42 = vsel %vm751_vm2, %v4950_v49, %v4951_v16  ;;  %v5033_v9 = vrot.slane %v4822_v44, 2  ;;  %v5030_v53 = vrot.slane %v13148_v61, 2 }
 0x2f4   : > { %4557 = vmatprep.mubr.bf16.mxu1 %v4346_v6  ;;  %v9436_v51 = vpack.i.bf16 %v13170_v40, %v13167_v42  ;;  %v4956_v14 = vrot.slane %v13186_v47, 1  ;;  %v4958_v21 = vrot.slane %v4825_v25, 1  ;;  %v5036_v58 = vrot.slane %v13186_v47, 2 }
 0x2f5   : > { %4558 = vmatmul.mubr.bf16.gmra.mrb[4].mxu1 %v4345_v29  ;;  %9427 = vrot.lane.b32.xlu0 %v9426_v15, %s9857_s19  ;;  %v13180_v34 = vsel %vm832_vm3, %v5030_v53, %v5031_v7  ;;  %v13183_v41 = vsel %vm832_vm3, %v5031_v7, %v5033_v9  ;;  %v5081_v49 = vrot.slane %v4827_v24, 2  ;;  %v5083_v29 = vrot.slane %v4828_v37, 2 }
 0x2f6   : > { %9442 = vrot.lane.b32.xlu1 %v13013_v5, %s9859_s27  ;;  %v9446_v56 = vpack.i.bf16 %v13183_v41, %v13180_v34  ;;  %v13191_v5 = vld [vmem:[#allocation3 + $0x168] sm:$0xff]  ;;  %v13204_v59 = vsel %vm751_vm2, %v4956_v14, %v4958_v21  ;;  %v5046_v7 = vrot.slane %v4828_v37, 1  ;;  %v5080_v9 = vrot.slane %v4826_v55, 2 }
 0x2f7   : > { %v4955_v32 = vrot.slane %v13191_v5, 1  ;;  %v9456_v44 = vpack.i.bf16 %v13186_v47, %v13191_v5  ;;  %v5035_v3 = vrot.slane %v13191_v5, 2  ;;  %v5043_v53 = vrot.slane %v4826_v55, 1  ;;  %v4831_v37 = vld [vmem:[#allocation3 + $0x1a8] sm:$0x3] }
 0x2f8   : > { %v13237_v21 = vsel %vm832_vm3, %v5081_v49, %v5083_v29  ;;  %v9268_v29 = vpop.permute.xlu0 %9267 }
 0x2f9   : > { %9437 = vrot.lane.b32.xlu0 %v9436_v51, %s9859_s27  ;;  %v13201_v54 = vsel %vm751_vm2, %v4955_v32, %v4956_v14  ;;  %v13212_v31 = vsel %vm832_vm3, %v5035_v3, %v5036_v58  ;;  %v13234_v14 = vsel %vm832_vm3, %v5080_v9, %v5081_v49  ;;  %v4829_v3 = vld [vmem:[#allocation3 + $0x198] sm:$0xff]  ;;  %v5091_v9 = vrot.slane %v4831_v37, 1 }
 0x2fa   : > { %9452 = vrot.lane.b32.xlu1 %v9406_v48, %s9856_s20  ;;  %v5038_v48 = vrot.slane %v4825_v25, 2  ;;  %v9466_v30 = vpack.i.bf16 %v13204_v59, %v13201_v54  ;;  %v9486_v25 = vpack.i.bf16 %v4827_v24, %v4826_v55  ;;  %v5093_v49 = vrot.slane %v4829_v3, 2 }
 0x2fc   : > { %v9273_v16 = vpop.permute.xlu0 %9272 }
 0x2fd   : > { %9447 = vrot.lane.b32.xlu0 %v9446_v56, %s9856_s20 }
 0x2fe   : > { %9462 = vrot.lane.b32.xlu1 %v9416_v10, %s9857_s19  ;;  %v13215_v10 = vsel %vm832_vm3, %v5036_v58, %v5038_v48 }
 0x2ff   : > { %v9476_v36 = vpack.i.bf16 %v13215_v10, %v13212_v31 }
 0x301   : > { %9457 = vrot.lane.b32.xlu0 %v9456_v44, %s9857_s19 }
 0x302   : > { %9472 = vrot.lane.b32.xlu1 %v9426_v15, %s9859_s27  ;;  %v5044_v15 = vrot.slane %v4827_v24, 1  ;;  %v4830_v24 = vld [vmem:[#allocation3 + $0x1a0] sm:$0xff] }
 0x303   : > { %v5094_v55 = vrot.slane %v4830_v24, 2  ;;  %v9516_v58 = vpack.i.bf16 %v4830_v24, %v4829_v3 }
 0x304   : > { %v13243_v32 = vsel %vm751_vm2, %v5044_v15, %v5046_v7  ;;  %v5088_v7 = vrot.slane %v4829_v3, 1 }
 0x305   : > { %9467 = vrot.lane.b32.xlu0 %v9466_v30, %s9859_s27 }
 0x306   : > { %9482 = vrot.lane.b32.xlu1 %v9436_v51, %s9856_s20  ;;  %v13240_v51 = vsel %vm751_vm2, %v5043_v53, %v5044_v15  ;;  %v5089_v15 = vrot.slane %v4830_v24, 1  ;;  %v9506_v53 = vpack.i.bf16 %v13237_v21, %v13234_v14 }
 0x307   : > { %v9496_v48 = vpack.i.bf16 %v13243_v32, %v13240_v51 }
 0x308   : > { %v5090_v6 = vsel %vm751_vm2, %v5088_v7, %v5089_v15  ;;  %v5092_v27 = vsel %vm751_vm2, %v5089_v15, %v5091_v9  ;;  %v9270_v15 = vunpack.i.h.bf16 %v9268_v29  ;;  %v9269_v7 = vunpack.i.l.bf16 %v9268_v29  ;;  %v14640_v29 = vld [vmem:[#allocation75_spill] sm:$0xff] }
 0x309   : > { %9477 = vrot.lane.b32.xlu0 %v9476_v36, %s9856_s20 }
 0x30a   : > { %9492 = vrot.lane.b32.xlu1 %v9446_v56, %s9857_s19  ;;  %v5096_v56 = vrot.slane %v4831_v37, 2  ;;  %v9278_v37 = vpop.permute.xlu0 %9277 }
 0x30b   : > { %v9279_v19 = vunpack.i.l.bf16 %v9278_v37 }
 0x30d   : > { %9487 = vrot.lane.b32.xlu0 %v9486_v25, %s9857_s19  ;;  %v9288_v24 = vpop.permute.xlu1 %9287 }
 0x30e   : > { %9502 = vrot.lane.b32.xlu1 %v9456_v44, %s9859_s27  ;;  %v13258_v44 = vsel %vm832_vm3, %v5093_v49, %v5094_v55  ;;  %v9526_v49 = vpack.i.bf16 %v5092_v27, %v5090_v6  ;;  %v9283_v3 = vpop.permute.xlu0 %9282  ;;  %v9290_v22 = vunpack.i.h.bf16 %v9288_v24  ;;  %v4297_v27 = vsel %vm1937_vm4, %v12001_v1, %v9270_v15  ;;  %v14639_v6 = vld [vmem:[#allocation48_spill] sm:$0xff] }
 0x30f   : > { %14637 = vst [vmem:[#allocation54_spill] sm:$0xff] %v13258_v44  ;;  %v9285_v9 = vunpack.i.h.bf16 %v9283_v3 }
 0x311   : > { %9497 = vrot.lane.b32.xlu0 %v9496_v48, %s9859_s27  ;;  %v13264_v48 = vsel %vm832_vm3, %v5094_v55, %v5096_v56  ;;  %v9275_v56 = vunpack.i.h.bf16 %v9273_v16  ;;  %v9274_v55 = vunpack.i.l.bf16 %v9273_v16  ;;  %v4323_v16 = vsel %vm1937_vm4, %v12634_v12, %v9285_v9 }
 0x312   : > { %9512 = vrot.lane.b32.xlu1 %v9466_v30, %s9856_s20  ;;  %14638 = vst [vmem:[#allocation42_spill] sm:$0xff] %v13264_v48  ;;  %v9289_v30 = vunpack.i.l.bf16 %v9288_v24  ;;  %v4331_v1 = vsel %vm4300_vm9, %v4323_v16, %v9290_v22 }
 0x315   : > { %9507 = vrot.lane.b32.xlu0 %v9506_v53, %s9856_s20  ;;  %v9284_v53 = vunpack.i.l.bf16 %v9283_v3 }
 0x316   : > { %9522 = vrot.lane.b32.xlu1 %v9476_v36, %s9857_s19  ;;  %v9280_v36 = vunpack.i.h.bf16 %v9278_v37 }
 0x317   : > { %v4322_v3 = vsel %vm1937_vm4, %v14640_v29, %v9284_v53 }
 0x318   : > { %v4330_v24 = vsel %vm4300_vm9, %v4322_v3, %v9289_v30 }
 0x319   : > { %9517 = vrot.lane.b32.xlu0 %v9516_v58, %s9857_s19 }
 0x31a   : > { %9532 = vrot.lane.b32.xlu1 %v9486_v25, %s9859_s27  ;;  %v4296_v25 = vsel %vm1937_vm4, %v14639_v6, %v9269_v7 }
 0x31b   : > { %v4305_v58 = vsel %vm4300_vm9, %v4296_v25, %v9274_v55 }
 0x31c   : > { %v4314_v15 = vsel %vm4309_vm10, %v4305_v58, %v9279_v19 }
 0x31d   : > { %9527 = vrot.lane.b32.xlu0 %v9526_v49, %s9859_s27  ;;  %v4306_v49 = vsel %vm4300_vm9, %v4297_v27, %v9275_v56 }
 0x31e   : > { %v4315_v7 = vsel %vm4309_vm10, %v4306_v49, %v9280_v36 }
 0x31f   : > { %v4348_v12 = vpack.c.bf16 %v4315_v7, %v4314_v15 }
 0x326   : > { %v9293_v44 = vpop.permute.xlu1 %9292  ;;  %v9298_v27 = vpop.permute.xlu0 %9297 }
 0x327   : > { %v9295_v37 = vunpack.i.h.bf16 %v9293_v44  ;;  %v9294_v48 = vunpack.i.l.bf16 %v9293_v44  ;;  %v9299_v25 = vunpack.i.l.bf16 %v9298_v27  ;;  %v9300_v29 = vunpack.i.h.bf16 %v9298_v27 }
 0x329   : > { %v4338_v55 = vsel %vm4309_vm10, %v4330_v24, %v9294_v48  ;;  %v4339_v56 = vsel %vm4309_vm10, %v4331_v1, %v9295_v37  ;;  %v4298_v48 = vsel %vm1937_vm4, %v12324_v57, %v9299_v25  ;;  %v4299_v15 = vsel %vm1937_vm4, %v12531_v20, %v9300_v29 }
 0x32a   : > { %v4349_v6 = vpack.c.bf16 %v4339_v56, %v4338_v55  ;;  %v9303_v9 = vpop.permute.xlu0 %9302 }
 0x32b   : > { %v9304_v22 = vunpack.i.l.bf16 %v9303_v9  ;;  %v9305_v19 = vunpack.i.h.bf16 %v9303_v9 }
 0x32c   : > { %4565 = vmatprep.mubr.bf16.mxu1 %v4349_v6 }
 0x32d   : > { %4566 = vmatmul.mubr.bf16.gmra.mrb[8].mxu1 %v4348_v12  ;;  %v4307_v7 = vsel %vm4300_vm9, %v4298_v48, %v9304_v22 }
 0x331   : > { %v9313_v44 = vpop.permute.xlu0 %9312 }
 0x332   : > { %v9308_v53 = vpop.permute.xlu1 %9307  ;;  %v9314_v58 = vunpack.i.l.bf16 %v9313_v44  ;;  %v9315_v24 = vunpack.i.h.bf16 %v9313_v44 }
 0x333   : > { %v9310_v3 = vunpack.i.h.bf16 %v9308_v53  ;;  %v9309_v37 = vunpack.i.l.bf16 %v9308_v53  ;;  %v4308_v53 = vsel %vm4300_vm9, %v4299_v15, %v9305_v19 }
 0x334   : > { %v4316_v44 = vsel %vm4309_vm10, %v4307_v7, %v9314_v58  ;;  %v4317_v22 = vsel %vm4309_vm10, %v4308_v53, %v9315_v24  ;;  %v14641_v7 = vld [vmem:[#allocation53_spill] sm:$0xff]  ;;  %v9839_v24 = vld [vmem:[#allocation3 + $0xd8] sm:$0xff] }
 0x338   : > { %v9328_v30 = vpop.permute.xlu1 %9327 }
 0x339   : > { %v9330_v27 = vunpack.i.h.bf16 %v9328_v30  ;;  %v9329_v6 = vunpack.i.l.bf16 %v9328_v30 }
 0x33a   : > { %v9318_v16 = vpop.permute.xlu0 %9317 }
 0x33b   : > { %v9320_v36 = vunpack.i.h.bf16 %v9318_v16  ;;  %v9319_v49 = vunpack.i.l.bf16 %v9318_v16 }
 0x33c   : > { %v9333_v1 = vpop.permute.xlu1 %9332 }
 0x33d   : > { %v4325_v55 = vsel %vm1937_vm4, %v12773_v45, %v9320_v36  ;;  %v4324_v56 = vsel %vm1937_vm4, %v12637_v13, %v9319_v49  ;;  %v9335_v20 = vunpack.i.h.bf16 %v9333_v1  ;;  %v9334_v13 = vunpack.i.l.bf16 %v9333_v1 }
 0x33e   : > { %v9323_v12 = vpop.permute.xlu0 %9322  ;;  %v4332_v57 = vsel %vm4300_vm9, %v4324_v56, %v9309_v37  ;;  %v4333_v9 = vsel %vm4300_vm9, %v4325_v55, %v9310_v3  ;;  %v4351_v3 = vpack.c.bf16 %v4317_v22, %v4316_v44  ;;  %v9838_v55 = vld [vmem:[#allocation3 + $0xe0] sm:$0xff]  ;;  %v14642_v56 = vld [vmem:[#allocation73_spill] sm:$0xff] }
 0x33f   : > { %v4340_v29 = vsel %vm4309_vm10, %v4332_v57, %v9329_v6  ;;  %v4341_v45 = vsel %vm4309_vm10, %v4333_v9, %v9330_v27  ;;  %v9325_v16 = vunpack.i.h.bf16 %v9323_v12  ;;  %v9324_v30 = vunpack.i.l.bf16 %v9323_v12  ;;  %v14643_v12 = vld [vmem:[#allocation58_spill] sm:$0xff] }
 0x340   : > { %v9343_v25 = vpop.permute.xlu1 %9342  ;;  %v4352_v37 = vpack.c.bf16 %v4341_v45, %v4340_v29  ;;  %v5725_v19 = vsel %vm1937_vm4, %v9838_v55, %v9335_v20  ;;  %v4344_v6 = vpack.c.bf16 %v14642_v56, %v14641_v7  ;;  %v5724_v1 = vsel %vm1937_vm4, %v9839_v24, %v9334_v13  ;;  %v14644_v29 = vld [vmem:[#allocation57_spill] sm:$0xff] }
 0x341   : > { %v9345_v36 = vunpack.i.h.bf16 %v9343_v25  ;;  %v9344_v49 = vunpack.i.l.bf16 %v9343_v25  ;;  %v5821_v9 = vsel %vm1937_vm4, %v14643_v12, %v9325_v16  ;;  %v5820_v20 = vsel %vm1937_vm4, %v14644_v29, %v9324_v30  ;;  %v14646_v29 = vld [vmem:[#allocation79_spill] sm:$0xff] }
 0x342   : > { %v9338_v48 = vpop.permute.xlu0 %9337  ;;  %4573 = vmatprep.mubr.bf16.mxu1 %v4352_v37 }
 0x343   : > { %v9340_v58 = vunpack.i.h.bf16 %v9338_v48  ;;  %v9339_v15 = vunpack.i.l.bf16 %v9338_v48  ;;  %4574 = vmatmul.mubr.bf16.gmra.mrb[12].mxu1 %v4351_v3  ;;  %v5756_v45 = vsel %vm4300_vm9, %v5724_v1, %v9344_v49  ;;  %v5757_v22 = vsel %vm4300_vm9, %v5725_v19, %v9345_v36 }
 0x344   : > { %v9353_v27 = vpop.permute.xlu1 %9352  ;;  %8208 = vmatprep.mubr.msk.bf16.mxu1 %vm1937_vm4, %v4344_v6  ;;  %v4137_v36 = vrot.slane %v14583_v17, 2  ;;  %v4138_v1 = vrot.slane %v14586_v63, 2 }
 0x345   : > { %v8002_v57 = vpop.f32.mrb[32].mxu0  ;;  %v9355_v53 = vunpack.i.h.bf16 %v9353_v27  ;;  %v9354_v44 = vunpack.i.l.bf16 %v9353_v27  ;;  %v5852_v27 = vsel %vm4300_vm9, %v5820_v20, %v9339_v15  ;;  %v5853_v30 = vsel %vm4300_vm9, %v5821_v9, %v9340_v58  ;;  %v9748_v15 = vld [vmem:[%s14297_s5 + $0x88] sm:$0xff]   ;;  %v14645_v58 = vld [vmem:[#allocation16_spill] sm:$0xff] }
 0x346   : > { %v8003_v25 = vpop.f32.mrb[33].mxu0  ;;  %v9348_v48 = vpop.permute.xlu0 %9347  ;;  %v4350_v9 = vpack.c.bf16 %v14645_v58, %v12458_v43  ;;  %v14647_v20 = vld [vmem:[#allocation76_spill] sm:$0xff]  ;;  %v4139_v63 = vsel %vm832_vm3, %v4137_v36, %v4138_v1 }
 0x347   : > { %v13315_v37 = vadd.f32 %v8003_v25, %v8002_v57  ;;  %v8005_v13 = vpop.f32.mrb[34].mxu0  ;;  %v9350_v55 = vunpack.i.h.bf16 %v9348_v48  ;;  %v9349_v7 = vunpack.i.l.bf16 %v9348_v48  ;;  %v5788_v16 = vsel %vm4309_vm10, %v5756_v45, %v9354_v44 }
 0x348   : > { %v5789_v3 = vsel %vm4309_vm10, %v5757_v22, %v9355_v53  ;;  %v8006_v56 = vpop.f32.mrb[35].mxu0  ;;  %v9363_v49 = vpop.permute.xlu1 %9362  ;;  %v14648_v45 = vpack.c.bf16 %v14646_v29, %v14647_v20 }
 0x349   : > { %v13322_v19 = vadd.f32 %v8006_v56, %v8005_v13  ;;  %v5884_v6 = vsel %vm4309_vm10, %v5852_v27, %v9349_v7  ;;  %v5885_v57 = vsel %vm4309_vm10, %v5853_v30, %v9350_v55  ;;  %v5925_v24 = vpack.c.bf16 %v5789_v3, %v5788_v16  ;;  %v14649_v56 = vld [vmem:[#allocation5_spill] sm:$0xff] }
 0x34a   : > { %v9358_v12 = vpop.permute.xlu0 %9357  ;;  %v5926_v44 = vpack.c.bf16 %v5885_v57, %v5884_v6  ;;  %v9365_v53 = vunpack.i.h.bf16 %v9363_v49  ;;  %v9364_v25 = vunpack.i.l.bf16 %v9363_v49  ;;  %v4353_v27 = vpack.c.bf16 %v4139_v63, %v14649_v56  ;;  %v14650_v30 = vld [vmem:[#allocation37_spill] sm:$0xff]  ;;  %v14651_v6 = vld [vmem:[#allocation38_spill] sm:$0xff]  ;;  %v14654_v63 = vld [vmem:[#allocation11_spill] sm:$0xff] }
 0x34b   : > { %8209 = vmatmul.mubr.msk.bf16.vlgmr.msra.gmra.mrb[16].mxu1 %vm1937_vm4, %v14648_v45  ;;  %v9360_v22 = vunpack.i.h.bf16 %v9358_v12  ;;  %v9359_v48 = vunpack.i.l.bf16 %v9358_v12  ;;  %v14652_v12 = vld [vmem:[#allocation27_spill] sm:$0xff] }
 0x34c   : > { %6249 = vmatprep.mubr.bf16.mxu0 %v5926_v44  ;;  %v9373_v17 = vpop.permute.xlu1 %9372  ;;  %8212 = vmatprep.mubr.msk.bf16.mxu1 %vm1937_vm4, %v4350_v9  ;;  %v5727_v49 = vsel %vm1937_vm4, %v14650_v30, %v9365_v53  ;;  %v5726_v36 = vsel %vm1937_vm4, %v14651_v6, %v9364_v25 }
 0x34d   : > { %6250 = vmatmul.mubr.bf16.gmra.mrb[68].mxu0 %v5925_v24  ;;  %v9375_v13 = vunpack.i.h.bf16 %v9373_v17  ;;  %v9374_v55 = vunpack.i.l.bf16 %v9373_v17  ;;  %8217 = vmatpush3.bf16.msra.mxu1 %v13142_v39  ;;  %v5823_v1 = vsel %vm1937_vm4, %v12870_v60, %v9360_v22  ;;  %v5822_v39 = vsel %vm1937_vm4, %v14652_v12, %v9359_v48  ;;  %v14653_v60 = vld [vmem:[#allocation10_spill] sm:$0xff]  ;;  %v14656_v12 = vld [vmem:[#allocation19_spill] sm:$0xff] }
 0x34e   : > { %v9368_v7 = vpop.permute.xlu0 %9367  ;;  %8218 = vmatprep.subr.bf16.mxu1 %v9748_v15  ;;  %v5900_v22 = vpack.c.bf16 %v14654_v63, %v14653_v60 }
 0x34f   : > { %v9370_v43 = vunpack.i.h.bf16 %v9368_v7  ;;  %v9369_v16 = vunpack.i.l.bf16 %v9368_v7  ;;  %v5758_v58 = vsel %vm4300_vm9, %v5726_v36, %v9374_v55  ;;  %v5759_v9 = vsel %vm4300_vm9, %v5727_v49, %v9375_v13 }
 0x350   : > { %v9383_v3 = vpop.permute.xlu1 %9382 }
 0x351   : > { %v9385_v57 = vunpack.i.h.bf16 %v9383_v3  ;;  %v9384_v24 = vunpack.i.l.bf16 %v9383_v3  ;;  %8219 = vmatpush3.bf16.msra.mxu1 %v9748_v15  ;;  %v5854_v20 = vsel %vm4300_vm9, %v5822_v39, %v9369_v16  ;;  %v5855_v45 = vsel %vm4300_vm9, %v5823_v1, %v9370_v43  ;;  %v14655_v1 = vld [vmem:[#allocation18_spill] sm:$0xff] }
 0x352   : > { %v9378_v44 = vpop.permute.xlu0 %9377  ;;  %v5906_v39 = vpack.c.bf16 %v14656_v12, %v14655_v1  ;;  %v14662_v1 = vld [vmem:[#allocation29_spill] sm:$0xff] }
 0x353   : > { %v9380_v17 = vunpack.i.h.bf16 %v9378_v44  ;;  %v9379_v29 = vunpack.i.l.bf16 %v9378_v44  ;;  %v5790_v53 = vsel %vm4309_vm10, %v5758_v58, %v9384_v24  ;;  %v5791_v25 = vsel %vm4309_vm10, %v5759_v9, %v9385_v57  ;;  %8213 = vmatmul.mubr.msk.bf16.gmra.mrb[20].mxu1 %vm1937_vm4, %v4353_v27  ;;  %v14657_v58 = vld [vmem:[#allocation66_spill] sm:$0xff] }
 0x354   : > { %v9393_v48 = vpop.permute.xlu1 %9392  ;;  %v5928_v55 = vpack.c.bf16 %v5791_v25, %v5790_v53  ;;  %8220 = vmatprep.mubr.msk.bf16.mxu1 %vm1937_vm4, %v5900_v22  ;;  %v14659_v53 = vld [vmem:[#allocation26_spill] sm:$0xff]  ;;  %v14660_v25 = vld [vmem:[#allocation25_spill] sm:$0xff] }
 0x355   : > { %v5886_v15 = vsel %vm4309_vm10, %v5854_v20, %v9379_v29  ;;  %v5887_v13 = vsel %vm4309_vm10, %v5855_v45, %v9380_v17  ;;  %v9395_v16 = vunpack.i.h.bf16 %v9393_v48  ;;  %v9394_v30 = vunpack.i.l.bf16 %v9393_v48  ;;  %v14658_v17 = vld [vmem:[#allocation28_spill] sm:$0xff] }
 0x356   : > { %v9388_v7 = vpop.permute.xlu0 %9387  ;;  %v5929_v3 = vpack.c.bf16 %v5887_v13, %v5886_v15  ;;  %v14661_v20 = vpack.c.bf16 %v14659_v53, %v14660_v25 }
 0x357   : > { %v9390_v43 = vunpack.i.h.bf16 %v9388_v7  ;;  %v9389_v49 = vunpack.i.l.bf16 %v9388_v7  ;;  %v5729_v9 = vsel %vm1937_vm4, %v14657_v58, %v9395_v16  ;;  %v5728_v29 = vsel %vm1937_vm4, %v14658_v17, %v9394_v30  ;;  %v14665_v58 = vld [vmem:[#allocation40_spill] sm:$0xff] }
 0x358   : > { %6257 = vmatprep.mubr.bf16.mxu0 %v5929_v3  ;;  %v9403_v56 = vpop.permute.xlu1 %9402 }
 0x359   : > { %6258 = vmatmul.mubr.bf16.gmra.mrb[72].mxu0 %v5928_v55  ;;  %v9405_v6 = vunpack.i.h.bf16 %v9403_v56  ;;  %v9404_v36 = vunpack.i.l.bf16 %v9403_v56  ;;  %v5825_v63 = vsel %vm1937_vm4, %v12967_v28, %v9390_v43  ;;  %v5824_v22 = vsel %vm1937_vm4, %v12964_v2, %v9389_v49 }
 0x35a   : > { %v9398_v57 = vpop.permute.xlu0 %9397 }
 0x35b   : > { %v9400_v27 = vunpack.i.h.bf16 %v9398_v57  ;;  %v9399_v24 = vunpack.i.l.bf16 %v9398_v57  ;;  %8221 = vmatmul.mubr.msk.bf16.vlgmr.msra.gmra.mrb[24].mxu1 %vm1937_vm4, %v14661_v20  ;;  %v5760_v15 = vsel %vm4300_vm9, %v5728_v29, %v9404_v36  ;;  %v5761_v13 = vsel %vm4300_vm9, %v5729_v9, %v9405_v6  ;;  %v14663_v6 = vld [vmem:[#allocation30_spill] sm:$0xff] }
 0x35c   : > { %v9413_v44 = vpop.permute.xlu1 %9412  ;;  %8224 = vmatprep.mubr.msk.bf16.mxu1 %vm1937_vm4, %v5906_v39  ;;  %v5909_v12 = vpack.c.bf16 %v14663_v6, %v14662_v1 }
 0x35d   : > { %v9415_v45 = vunpack.i.h.bf16 %v9413_v44  ;;  %v9414_v60 = vunpack.i.l.bf16 %v9413_v44  ;;  %v5856_v16 = vsel %vm4300_vm9, %v5824_v22, %v9399_v24  ;;  %v5857_v28 = vsel %vm4300_vm9, %v5825_v63, %v9400_v27  ;;  %v14664_v44 = vld [vmem:[#allocation39_spill] sm:$0xff]  ;;  %v14666_v63 = vld [vmem:[#allocation50_spill] sm:$0xff] }
 0x35e   : > { %v5912_v9 = vpack.c.bf16 %v14665_v58, %v14664_v44  ;;  %v14667_v22 = vld [vmem:[#allocation51_spill] sm:$0xff] }
 0x35f   : > { %v9408_v48 = vpop.permute.xlu0 %9407  ;;  %v5792_v3 = vsel %vm4309_vm10, %v5760_v15, %v9414_v60  ;;  %v5793_v56 = vsel %vm4309_vm10, %v5761_v13, %v9415_v45 }
 0x360   : > { %v9410_v55 = vunpack.i.h.bf16 %v9408_v48  ;;  %v9409_v7 = vunpack.i.l.bf16 %v9408_v48  ;;  %v9423_v30 = vpop.permute.xlu1 %9422  ;;  %v5931_v49 = vpack.c.bf16 %v5793_v56, %v5792_v3  ;;  %v5915_v48 = vpack.c.bf16 %v14667_v22, %v14666_v63 }
 0x361   : > { %v9425_v39 = vunpack.i.h.bf16 %v9423_v30  ;;  %v9424_v24 = vunpack.i.l.bf16 %v9423_v30 }
 0x362   : > { %v5888_v2 = vsel %vm4309_vm10, %v5856_v16, %v9409_v7  ;;  %v5889_v43 = vsel %vm4309_vm10, %v5857_v28, %v9410_v55  ;;  %v14668_v16 = vld [vmem:[#allocation52_spill] sm:$0xff] }
 0x363   : > { %v9418_v57 = vpop.permute.xlu0 %9417  ;;  %v5932_v36 = vpack.c.bf16 %v5889_v43, %v5888_v2  ;;  %8225 = vmatmul.mubr.msk.bf16.gmra.mrb[28].mxu1 %vm1937_vm4, %v5909_v12  ;;  %v5731_v15 = vsel %vm1937_vm4, %v12899_v0, %v9425_v39  ;;  %v5730_v28 = vsel %vm1937_vm4, %v14668_v16, %v9424_v24  ;;  %v14670_v24 = vld [vmem:[#allocation46_spill] sm:$0xff] }
 0x364   : > { %v9433_v17 = vpop.permute.xlu1 %9432  ;;  %v9420_v29 = vunpack.i.h.bf16 %v9418_v57  ;;  %v9419_v27 = vunpack.i.l.bf16 %v9418_v57  ;;  %8228 = vmatprep.mubr.msk.bf16.mxu1 %vm1937_vm4, %v5912_v9 }
 0x365   : > { %6265 = vmatprep.mubr.bf16.mxu0 %v5932_v36  ;;  %v8008_v53 = vpop.f32.mrb[36].mxu0  ;;  %v9435_v25 = vunpack.i.h.bf16 %v9433_v17  ;;  %v9434_v20 = vunpack.i.l.bf16 %v9433_v17  ;;  %v14669_v17 = vld [vmem:[#allocation45_spill] sm:$0xff] }
 0x366   : > { %6266 = vmatmul.mubr.bf16.gmra.mrb[76].mxu0 %v5931_v49  ;;  %v8009_v60 = vpop.f32.mrb[37].mxu0  ;;  %v5827_v30 = vsel %vm1937_vm4, %v13086_v35, %v9420_v29  ;;  %v5826_v57 = vsel %vm1937_vm4, %v13058_v50, %v9419_v27  ;;  %v5918_v50 = vpack.c.bf16 %v14670_v24, %v14669_v17 }
 0x367   : > { %v9428_v45 = vpop.permute.xlu0 %9427  ;;  %v13393_v13 = vadd.f32 %v8009_v60, %v8008_v53  ;;  %v8011_v55 = vpop.f32.mrb[38].mxu0  ;;  %v5762_v0 = vsel %vm4300_vm9, %v5730_v28, %v9434_v20  ;;  %v5763_v36 = vsel %vm4300_vm9, %v5731_v15, %v9435_v25 }
 0x368   : > { %v9430_v7 = vunpack.i.h.bf16 %v9428_v45  ;;  %v9429_v3 = vunpack.i.l.bf16 %v9428_v45  ;;  %v9443_v56 = vpop.permute.xlu1 %9442  ;;  %v8012_v2 = vpop.f32.mrb[39].mxu0 }
 0x369   : > { %v9445_v43 = vunpack.i.h.bf16 %v9443_v56  ;;  %v9444_v49 = vunpack.i.l.bf16 %v9443_v56  ;;  %v13403_v1 = vadd.f32 %v8012_v2, %v8011_v55 }
 0x36a   : > { %v5858_v35 = vsel %vm4300_vm9, %v5826_v57, %v9429_v3  ;;  %v5859_v9 = vsel %vm4300_vm9, %v5827_v30, %v9430_v7  ;;  %v14672_v57 = vld [vmem:[#allocation69_spill] sm:$0xff] }
 0x36b   : > { %v9438_v6 = vpop.permute.xlu0 %9437  ;;  %v5794_v44 = vsel %vm4309_vm10, %v5762_v0, %v9444_v49  ;;  %v5795_v58 = vsel %vm4309_vm10, %v5763_v36, %v9445_v43  ;;  %8229 = vmatmul.mubr.msk.bf16.gmra.mrb[32].mxu1 %vm1937_vm4, %v5915_v48  ;;  %v14671_v49 = vld [vmem:[#allocation68_spill] sm:$0xff] }
 0x36c   : > { %v9440_v12 = vunpack.i.h.bf16 %v9438_v6  ;;  %v9439_v39 = vunpack.i.l.bf16 %v9438_v6  ;;  %v9453_v29 = vpop.permute.xlu1 %9452  ;;  %v5934_v25 = vpack.c.bf16 %v5795_v58, %v5794_v44  ;;  %8232 = vmatprep.mubr.msk.bf16.mxu1 %vm1937_vm4, %v5918_v50  ;;  %v5921_v0 = vpack.c.bf16 %v14672_v57, %v14671_v49 }
 0x36d   : > { %v8014_v20 = vpop.f32.mrb[40].mxu0  ;;  %v9455_v7 = vunpack.i.h.bf16 %v9453_v29  ;;  %v9454_v3 = vunpack.i.l.bf16 %v9453_v29 }
 0x36e   : > { %v5890_v27 = vsel %vm4309_vm10, %v5858_v35, %v9439_v39  ;;  %v5891_v53 = vsel %vm4309_vm10, %v5859_v9, %v9440_v12  ;;  %v8015_v63 = vpop.f32.mrb[41].mxu0 }
 0x36f   : > { %v9448_v45 = vpop.permute.xlu0 %9447  ;;  %v5935_v60 = vpack.c.bf16 %v5891_v53, %v5890_v27  ;;  %v13415_v22 = vadd.f32 %v8015_v63, %v8014_v20  ;;  %v8017_v15 = vpop.f32.mrb[42].mxu0  ;;  %v5733_v39 = vsel %vm1937_vm4, %v12989_v23, %v9455_v7  ;;  %v5732_v44 = vsel %vm1937_vm4, %v13006_v38, %v9454_v3 }
 0x370   : > { %v9463_v55 = vpop.permute.xlu1 %9462  ;;  %v9450_v56 = vunpack.i.h.bf16 %v9448_v45  ;;  %v8018_v48 = vpop.f32.mrb[43].mxu0  ;;  %v9449_v16 = vunpack.i.l.bf16 %v9448_v45  ;;  %v14673_v23 = vpack.c.bf16 %v12825_v62, %v12816_v33  ;;  %v14674_v3 = vpack.c.bf16 %v12897_v4, %v12894_v11 }
 0x371   : > { %6273 = vmatprep.mubr.bf16.mxu0 %v5935_v60  ;;  %v13417_v28 = vadd.f32 %v8018_v48, %v8017_v15  ;;  %v9465_v30 = vunpack.i.h.bf16 %v9463_v55  ;;  %v9464_v2 = vunpack.i.l.bf16 %v9463_v55 }
 0x372   : > { %6274 = vmatmul.mubr.bf16.gmra.mrb[80].mxu0 %v5934_v25  ;;  %v5829_v9 = vsel %vm1937_vm4, %v13170_v40, %v9450_v56  ;;  %v5828_v17 = vsel %vm1937_vm4, %v13167_v42, %v9449_v16  ;;  %v14675_v16 = vpack.c.bf16 %v13000_v8, %v12997_v26 }
 0x373   : > { %v9458_v43 = vpop.permute.xlu0 %9457  ;;  %8233 = vmatmul.mubr.msk.bf16.gmra.mrb[36].mxu1 %vm1937_vm4, %v5921_v0  ;;  %v5764_v24 = vsel %vm4300_vm9, %v5732_v44, %v9464_v2  ;;  %v5765_v50 = vsel %vm4300_vm9, %v5733_v39, %v9465_v30 }
 0x374   : > { %v9460_v36 = vunpack.i.h.bf16 %v9458_v43  ;;  %v9459_v6 = vunpack.i.l.bf16 %v9458_v43  ;;  %v9473_v12 = vpop.permute.xlu1 %9472  ;;  %8236 = vmatprep.mubr.msk.bf16.mxu1 %vm1937_vm4, %v14673_v23 }
 0x375   : > { %v9475_v58 = vunpack.i.h.bf16 %v9473_v12  ;;  %v9474_v35 = vunpack.i.l.bf16 %v9473_v12 }
 0x376   : > { %v5860_v40 = vsel %vm4300_vm9, %v5828_v17, %v9459_v6  ;;  %v5861_v42 = vsel %vm4300_vm9, %v5829_v9, %v9460_v36 }
 0x377   : > { %v9468_v38 = vpop.permute.xlu0 %9467  ;;  %v5796_v53 = vsel %vm4309_vm10, %v5764_v24, %v9474_v35  ;;  %v5797_v25 = vsel %vm4309_vm10, %v5765_v50, %v9475_v58 }
 0x378   : > { %v9470_v29 = vunpack.i.h.bf16 %v9468_v38  ;;  %v9469_v27 = vunpack.i.l.bf16 %v9468_v38  ;;  %v9483_v20 = vpop.permute.xlu1 %9482  ;;  %v5937_v63 = vpack.c.bf16 %v5797_v25, %v5796_v53  ;;  %v14677_v38 = vpack.c.bf16 %v13183_v41, %v13180_v34 }
 0x379   : > { %v9485_v55 = vunpack.i.h.bf16 %v9483_v20  ;;  %v9484_v7 = vunpack.i.l.bf16 %v9483_v20 }
 0x37a   : > { %v5892_v45 = vsel %vm4309_vm10, %v5860_v40, %v9469_v27  ;;  %v5893_v60 = vsel %vm4309_vm10, %v5861_v42, %v9470_v29 }
 0x37b   : > { %v9478_v33 = vpop.permute.xlu0 %9477  ;;  %v5938_v62 = vpack.c.bf16 %v5893_v60, %v5892_v45  ;;  %8237 = vmatmul.mubr.msk.bf16.gmra.mrb[40].mxu1 %vm1937_vm4, %v14674_v3  ;;  %v5735_v36 = vsel %vm1937_vm4, %v13131_v46, %v9485_v55  ;;  %v5734_v11 = vsel %vm1937_vm4, %v13148_v61, %v9484_v7 }
 0x37c   : > { %v9493_v15 = vpop.permute.xlu1 %9492  ;;  %v9480_v56 = vunpack.i.h.bf16 %v9478_v33  ;;  %v9479_v48 = vunpack.i.l.bf16 %v9478_v33  ;;  %8240 = vmatprep.mubr.msk.bf16.mxu1 %vm1937_vm4, %v14675_v16 }
 0x37d   : > { %6281 = vmatprep.mubr.bf16.mxu0 %v5938_v62  ;;  %v9495_v30 = vunpack.i.h.bf16 %v9493_v15  ;;  %v9494_v2 = vunpack.i.l.bf16 %v9493_v15  ;;  %v14678_v62 = vpack.c.bf16 %v13215_v10, %v13212_v31 }
 0x37e   : > { %6282 = vmatmul.mubr.bf16.gmra.mrb[84].mxu0 %v5937_v63  ;;  %v5831_v12 = vsel %vm1937_vm4, %v13204_v59, %v9480_v56  ;;  %v5830_v26 = vsel %vm1937_vm4, %v13201_v54, %v9479_v48  ;;  %v14676_v59 = vpack.c.bf16 %v13121_v52, %v13115_v18 }
 0x37f   : > { %v9488_v43 = vpop.permute.xlu0 %9487  ;;  %v5766_v8 = vsel %vm4300_vm9, %v5734_v11, %v9494_v2  ;;  %v5767_v39 = vsel %vm4300_vm9, %v5735_v36, %v9495_v30 }
 0x380   : > { %v9490_v49 = vunpack.i.h.bf16 %v9488_v43  ;;  %v9489_v57 = vunpack.i.l.bf16 %v9488_v43  ;;  %v9503_v0 = vpop.permute.xlu1 %9502 }
 0x381   : > { %v9505_v4 = vunpack.i.h.bf16 %v9503_v0  ;;  %v9504_v6 = vunpack.i.l.bf16 %v9503_v0 }
 0x382   : > { %v5862_v61 = vsel %vm4300_vm9, %v5830_v26, %v9489_v57  ;;  %v5863_v17 = vsel %vm4300_vm9, %v5831_v12, %v9490_v49 }
 0x383   : > { %v9498_v44 = vpop.permute.xlu0 %9497  ;;  %v5798_v46 = vsel %vm4309_vm10, %v5766_v8, %v9504_v6  ;;  %v5799_v9 = vsel %vm4309_vm10, %v5767_v39, %v9505_v4  ;;  %8241 = vmatmul.mubr.msk.bf16.gmra.mrb[44].mxu1 %vm1937_vm4, %v14676_v59  ;;  %v14680_v4 = vld [vmem:[#allocation42_spill] sm:$0xff] }
 0x384   : > { %v9500_v58 = vunpack.i.h.bf16 %v9498_v44  ;;  %v9499_v35 = vunpack.i.l.bf16 %v9498_v44  ;;  %v9513_v24 = vpop.permute.xlu1 %9512  ;;  %v5940_v23 = vpack.c.bf16 %v5799_v9, %v5798_v46  ;;  %8244 = vmatprep.mubr.msk.bf16.mxu1 %vm1937_vm4, %v14677_v38  ;;  %v14681_v6 = vld [vmem:[#allocation54_spill] sm:$0xff] }
 0x385   : > { %v9515_v25 = vunpack.i.h.bf16 %v9513_v24  ;;  %v9514_v40 = vunpack.i.l.bf16 %v9513_v24  ;;  %v14682_v12 = vpack.c.bf16 %v14680_v4, %v14681_v6 }
 0x386   : > { %v5894_v54 = vsel %vm4309_vm10, %v5862_v61, %v9499_v35  ;;  %v5895_v50 = vsel %vm4309_vm10, %v5863_v17, %v9500_v58 }
 0x387   : > { %v9508_v29 = vpop.permute.xlu0 %9507  ;;  %v5941_v27 = vpack.c.bf16 %v5895_v50, %v5894_v54  ;;  %v5737_v34 = vsel %vm1937_vm4, %v13186_v47, %v9515_v25  ;;  %v5736_v41 = vsel %vm1937_vm4, %v13191_v5, %v9514_v40  ;;  %v14679_v5 = vpack.c.bf16 %v13237_v21, %v13234_v14  ;;  %v9749_v25 = vld [vmem:[%s14297_s5 + $0x80] sm:$0xff]   ;;  %v9750_v40 = vld [vmem:[%s14297_s5 + $0x88] sm:$0xff]  }
 0x388   : > { %v9523_v53 = vpop.permute.xlu1 %9522  ;;  %v9510_v18 = vunpack.i.h.bf16 %v9508_v29  ;;  %v9509_v52 = vunpack.i.l.bf16 %v9508_v29  ;;  %8252 = vmatprep.subr.bf16.mxu0 %v9749_v25 }
 0x389   : > { %6289 = vmatprep.mubr.bf16.mxu0 %v5941_v27  ;;  %v9525_v42 = vunpack.i.h.bf16 %v9523_v53  ;;  %v9524_v20 = vunpack.i.l.bf16 %v9523_v53  ;;  %8253 = vmatpush3.bf16.msra.mxu0 %v9749_v25 }
 0x38a   : > { %6290 = vmatmul.mubr.bf16.gmra.mrb[88].mxu0 %v5940_v23  ;;  %v5833_v7 = vsel %vm1937_vm4, %v13243_v32, %v9510_v18  ;;  %v5832_v3 = vsel %vm1937_vm4, %v13240_v51, %v9509_v52  ;;  %8254 = vmatprep.subr.bf16.mxu0 %v9750_v40 }
 0x38b   : > { %v9518_v45 = vpop.permute.xlu0 %9517  ;;  %8245 = vmatmul.mubr.msk.bf16.gmra.mrb[48].mxu1 %vm1937_vm4, %v14678_v62  ;;  %v5768_v56 = vsel %vm4300_vm9, %v5736_v41, %v9524_v20  ;;  %v5769_v47 = vsel %vm4300_vm9, %v5737_v34, %v9525_v42 }
 0x38c   : > { %v9520_v60 = vunpack.i.h.bf16 %v9518_v45  ;;  %v9519_v63 = vunpack.i.l.bf16 %v9518_v45  ;;  %v9533_v33 = vpop.permute.xlu1 %9532  ;;  %8248 = vmatprep.mubr.msk.bf16.mxu1 %vm1937_vm4, %v14679_v5 }
 0x38d   : > { %v9535_v15 = vunpack.i.h.bf16 %v9533_v33  ;;  %v9534_v55 = vunpack.i.l.bf16 %v9533_v33  ;;  %8255 = vmatpush3.bf16.msra.mxu0 %v9750_v40 }
 0x38e   : > { %v5864_v32 = vsel %vm4300_vm9, %v5832_v3, %v9519_v63  ;;  %v5865_v51 = vsel %vm4300_vm9, %v5833_v7, %v9520_v60 }
 0x38f   : > { %v9528_v31 = vpop.permute.xlu0 %9527  ;;  %v5800_v16 = vsel %vm4309_vm10, %v5768_v56, %v9534_v55  ;;  %v5801_v30 = vsel %vm4309_vm10, %v5769_v47, %v9535_v15 }
 0x390   : > { %v9530_v10 = vunpack.i.h.bf16 %v9528_v31  ;;  %v9529_v48 = vunpack.i.l.bf16 %v9528_v31  ;;  %v5943_v57 = vpack.c.bf16 %v5801_v30, %v5800_v16 }
 0x391   : > { %v8020_v2 = vpop.f32.mrb[44].mxu0 }
 0x392   : > { %v5896_v43 = vsel %vm4309_vm10, %v5864_v32, %v9529_v48  ;;  %v5897_v49 = vsel %vm4309_vm10, %v5865_v51, %v9530_v10  ;;  %v8021_v14 = vpop.f32.mrb[45].mxu0 }
 0x393   : > { %v5944_v21 = vpack.c.bf16 %v5897_v49, %v5896_v43  ;;  %v13498_v0 = vadd.f32 %v8021_v14, %v8020_v2  ;;  %v8023_v36 = vpop.f32.mrb[46].mxu0  ;;  %8249 = vmatmul.mubr.msk.bf16.gmra.mrb[52].mxu1 %vm1937_vm4, %v14682_v12 }
 0x394   : > { %v8024_v11 = vpop.f32.mrb[47].mxu0 }
 0x395   : > { %6297 = vmatprep.mubr.bf16.mxu0 %v5944_v21  ;;  %v13504_v26 = vadd.f32 %v8024_v11, %v8023_v36 }
 0x396   : > { %6298 = vmatmul.mubr.bf16.gmra.mrb[92].mxu0 %v5943_v57 }
 0x399   : > { %v8026_v8 = vpop.f32.mrb[48].mxu0 }
 0x39a   : > { %v8027_v39 = vpop.f32.mrb[49].mxu0 }
 0x39b   : > { %v13506_v44 = vadd.f32 %v8027_v39, %v8026_v8  ;;  %v8029_v58 = vpop.f32.mrb[50].mxu0  ;;  %v7825_v8 = vld [vmem:[%s14296_s4] ss:$0 sm:$0xff] }
 0x39c   : > { %v8030_v35 = vpop.f32.mrb[51].mxu0 }
 0x39d   : > { %v13508_v46 = vadd.f32 %v8030_v35, %v8029_v58 }
 0x3a6   : > { %v8032_v9 = vpop.f32.mrb[52].mxu0 }
 0x3a7   : > { %v8033_v61 = vpop.f32.mrb[53].mxu0 }
 0x3a8   : > { %v13510_v17 = vadd.f32 %v8033_v61, %v8032_v9  ;;  %v8035_v24 = vpop.f32.mrb[54].mxu0 }
 0x3a9   : > { %v8036_v59 = vpop.f32.mrb[55].mxu0 }
 0x3aa   : > { %v13512_v54 = vadd.f32 %v8036_v59, %v8035_v24 }
 0x3ae   : > { %v8038_v50 = vpop.f32.mrb[56].mxu0 }
 0x3af   : > { %v8039_v23 = vpop.f32.mrb[57].mxu0 }
 0x3b0   : > { %v13514_v38 = vadd.f32 %v8039_v23, %v8038_v50  ;;  %v8041_v29 = vpop.f32.mrb[58].mxu0 }
 0x3b1   : > { %v8042_v27 = vpop.f32.mrb[59].mxu0 }
 0x3b2   : > { %v13516_v53 = vadd.f32 %v8042_v27, %v8041_v29 }
 0x3b6   : > { %v8044_v18 = vpop.f32.mrb[60].mxu0 }
 0x3b7   : > { %v8045_v52 = vpop.f32.mrb[61].mxu0 }
 0x3b8   : > { %v13524_v42 = vadd.f32 %v8045_v52, %v8044_v18  ;;  %v8047_v20 = vpop.f32.mrb[62].mxu0 }
 0x3b9   : > { %v8048_v45 = vpop.f32.mrb[63].mxu0 }
 0x3ba   : > { %v13526_v60 = vadd.f32 %v8048_v45, %v8047_v20 }
 0x3bf   : > { %v7956_v63 = vpop.f32.mrb[0].mxu1 }
 0x3c0   : > { %v7957_v33 = vpop.f32.mrb[1].mxu1 }
 0x3c1   : > { %v7958_v34 = vadd.f32 %v7957_v33, %v7956_v63  ;;  %v7959_v41 = vpop.f32.mrb[2].mxu1 }
 0x3c2   : > { %v7960_v62 = vpop.f32.mrb[3].mxu1 }
 0x3c3   : > { %v8050_v15 = vpop.f32.mrb[64].mxu0  ;;  %v7961_v55 = vadd.f32 %v7960_v62, %v7959_v41  ;;  %v4552_v35 = vadd.f32 %v7958_v34, %v7825_v8 }
 0x3c4   : > { %v8051_v7 = vpop.f32.mrb[65].mxu0 }
 0x3c5   : > { %v13528_v3 = vadd.f32 %v8051_v7, %v8050_v15  ;;  %v8053_v56 = vpop.f32.mrb[66].mxu0  ;;  %v4555_v27 = vadd.f32 %v7961_v55, %v7825_v8 }
 0x3c6   : > { %v8054_v47 = vpop.f32.mrb[67].mxu0 }
 0x3c7   : > { %v13530_v5 = vadd.f32 %v8054_v47, %v8053_v56 }
 0x3c8   : > { %v7962_v31 = vpop.f32.mrb[4].mxu1 }
 0x3c9   : > { %v7963_v10 = vpop.f32.mrb[5].mxu1 }
 0x3ca   : > { %v7964_v48 = vadd.f32 %v7963_v10, %v7962_v31  ;;  %v7965_v16 = vpop.f32.mrb[6].mxu1 }
 0x3cb   : > { %v7966_v30 = vpop.f32.mrb[7].mxu1 }
 0x3cc   : > { %v7967_v32 = vadd.f32 %v7966_v30, %v7965_v16  ;;  %v4560_v39 = vadd.f32 %v7964_v48, %v7825_v8  ;;  %v13567_v30 = vld [vmem:[#allocation4] sm:$0xff] }
 0x3cd   : > { %14689 = vst [vmem:[#allocation63_spill] sm:$0xff] %v13567_v30 }
 0x3ce   : > { %v4563_v59 = vadd.f32 %v7967_v32, %v7825_v8  ;;  %v13569_v32 = vld [vmem:[#allocation4 + $0x8] sm:$0x3] }
 0x400   : > { %v7968_v51 = vpop.f32.mrb[8].mxu1 }
 0x401   : > { %v7969_v2 = vpop.f32.mrb[9].mxu1 }
 0x402   : > { %v7970_v43 = vadd.f32 %v7969_v2, %v7968_v51  ;;  %v7971_v49 = vpop.f32.mrb[10].mxu1 }
 0x403   : > { %v7972_v57 = vpop.f32.mrb[11].mxu1 }
 0x404   : > { %v7973_v14 = vadd.f32 %v7972_v57, %v7971_v49  ;;  %v4568_v7 = vadd.f32 %v7970_v43, %v7825_v8  ;;  %v13577_v43 = vld [vmem:[%s14298_s6] ss:$0 sm:$0xff] }
 0x406   : > { %v4571_v16 = vadd.f32 %v7973_v14, %v7825_v8 }
 0x416   : > { %v7974_v21 = vpop.f32.mrb[12].mxu1 }
 0x417   : > { %v7975_v36 = vpop.f32.mrb[13].mxu1 }
 0x418   : > { %v7976_v11 = vadd.f32 %v7975_v36, %v7974_v21  ;;  %v7977_v4 = vpop.f32.mrb[14].mxu1 }
 0x419   : > { %v7978_v6 = vpop.f32.mrb[15].mxu1 }
 0x41a   : > { %v7979_v12 = vadd.f32 %v7978_v6, %v7977_v4  ;;  %v4576_v15 = vadd.f32 %v7976_v11, %v7825_v8 }
 0x41c   : > { %v4579_v31 = vadd.f32 %v7979_v12, %v7825_v8 }
 0x41e   : > { %v8210_v58 = vpop.f32.mrb[16].mxu1 }
 0x41f   : > { %v13535_v61 = vadd.f32 %v8210_v58, %v4560_v39  ;;  %v4616_v24 = vpop.f32.mrb[17].mxu1  ;;  %v6735_v39 = vrot.slane %v13567_v30, 1  ;;  %v6736_v58 = vrot.slane %v13569_v32, 1 }
 0x420   : > { %v8056_v9 = vpop.f32.mrb[68].mxu0  ;;  %v13537_v23 = vadd.f32 %v4616_v24, %v4552_v35  ;;  %v8211_v29 = vpop.f32.mrb[18].mxu1 }
 0x421   : > { %14683 = vst [vmem:[#allocation41_spill] sm:$0xff] %v13535_v61  ;;  %v8057_v50 = vpop.f32.mrb[69].mxu0  ;;  %v14419_v18 = vmax.f32 %v13535_v61, 0.0  ;;  %v13542_v52 = vadd.f32 %v8211_v29, %v4563_v59  ;;  %v4619_v20 = vpop.f32.mrb[19].mxu1 }
 0x422   : > { %14684 = vst [vmem:[#allocation56_spill] sm:$0xff] %v13537_v23  ;;  %v13539_v25 = vadd.f32 %v8057_v50, %v8056_v9  ;;  %v8059_v40 = vpop.f32.mrb[70].mxu0  ;;  %v14421_v63 = vmax.f32 %v13537_v23, 0.0  ;;  %v13545_v33 = vadd.f32 %v4619_v20, %v4555_v27  ;;  %v6188_v27 = vadd.f32 %v13393_v13, %v13577_v43 }
 0x423   : > { %14685 = vst [vmem:[#allocation55_spill] sm:$0xff] %v13542_v52  ;;  %v8060_v45 = vpop.f32.mrb[71].mxu0  ;;  %6693 = vst.msk [vmem:[#allocation4 + $0x31] sm:$0xff] %vm1937_vm4, %v14419_v18  ;;  %v14418_v41 = vmax.f32 %v13542_v52, 0.0  ;;  %v6180_v20 = vadd.f32 %v13315_v37, %v13577_v43 }
 0x424   : > { %14686 = vst [vmem:[#allocation64_spill] sm:$0xff] %v13545_v33  ;;  %v13547_v34 = vadd.f32 %v8060_v45, %v8059_v40  ;;  %6691 = vst.msk [vmem:[#allocation4 + $0x11] sm:$0xff] %vm1937_vm4, %v14421_v63  ;;  %v14420_v62 = vmax.f32 %v13545_v33, 0.0  ;;  %v6199_v63 = vadd.f32 %v13417_v28, %v13577_v43 }
 0x425   : > { %6694 = vst.msk [vmem:[#allocation4 + $0x41] sm:$0xff] %vm1937_vm4, %v14418_v41 }
 0x426   : > { %6692 = vst.msk [vmem:[#allocation4 + $0x21] sm:$0xff] %vm1937_vm4, %v14420_v62  ;;  %v8214_v55 = vpop.f32.mrb[20].mxu1  ;;  %v6207_v62 = vadd.f32 %v13504_v26, %v13577_v43 }
 0x427   : > { %v13563_v56 = vadd.f32 %v8214_v55, %v4576_v15  ;;  %v4632_v47 = vpop.f32.mrb[21].mxu1 }
 0x428   : > { %v13565_v10 = vadd.f32 %v4632_v47, %v4568_v7  ;;  %v8215_v48 = vpop.f32.mrb[22].mxu1 }
 0x429   : > { %14687 = vst [vmem:[#allocation70_spill] sm:$0xff] %v13563_v56  ;;  %v14415_v51 = vmax.f32 %v13563_v56, 0.0  ;;  %v13572_v2 = vadd.f32 %v8215_v48, %v4579_v31  ;;  %v4635_v49 = vpop.f32.mrb[23].mxu1 }
 0x42a   : > { %14688 = vst [vmem:[#allocation59_spill] sm:$0xff] %v13565_v10  ;;  %v14417_v57 = vmax.f32 %v13565_v10, 0.0  ;;  %v13580_v21 = vadd.f32 %v4635_v49, %v4571_v16  ;;  %v13582_v14 = vld [vmem:[#allocation4 + $0x30] sm:$0xff]  ;;  %v13584_v11 = vld [vmem:[#allocation4 + $0x38] sm:$0x3] }
 0x42b   : > { %14690 = vst [vmem:[#allocation62_spill] sm:$0xff] %v13572_v2  ;;  %6697 = vst.msk [vmem:[#allocation4 + $0x71] sm:$0xff] %vm1937_vm4, %v14415_v51  ;;  %v14414_v4 = vmax.f32 %v13572_v2, 0.0  ;;  %v6768_v12 = vrot.slane %v13582_v14, 2  ;;  %v13591_v8 = vld [vmem:[#allocation4 + $0x10] sm:$0xff]  ;;  %v6769_v59 = vrot.slane %v13584_v11, 2 }
 0x42c   : > { %14691 = vst [vmem:[#allocation24_spill] sm:$0xff] %v13580_v21  ;;  %v8062_v36 = vpop.f32.mrb[72].mxu0  ;;  %14692 = vst [vmem:[#allocation32_spill] sm:$0xff] %v13591_v8  ;;  %v14416_v35 = vmax.f32 %v13580_v21, 0.0  ;;  %v6702_v50 = vld [vmem:[#allocation4 + $0x18] sm:$0x3] }
 0x42d   : > { %v8063_v6 = vpop.f32.mrb[73].mxu0  ;;  %6695 = vst.msk [vmem:[#allocation4 + $0x51] sm:$0xff] %vm1937_vm4, %v14417_v57  ;;  %v6762_v29 = vrot.slane %v13591_v8, 2  ;;  %6698 = vst.msk [vmem:[#allocation4 + $0x81] sm:$0xff] %vm1937_vm4, %v14414_v4  ;;  %v13610_v45 = vld [vmem:[#allocation4 + $0x20] sm:$0xff]  ;;  %v6763_v55 = vrot.slane %v6702_v50, 2  ;;  %v6204_v4 = vadd.f32 %v13498_v0, %v13577_v43 }
 0x42e   : > { %v13599_v9 = vadd.f32 %v8063_v6, %v8062_v36  ;;  %v8065_v24 = vpop.f32.mrb[74].mxu0  ;;  %14693 = vst [vmem:[#allocation71_spill] sm:$0xff] %v13610_v45  ;;  %v13612_v15 = vld [vmem:[#allocation4 + $0x28] sm:$0x3]  ;;  %v6738_v7 = vrot.slane %v13591_v8, 1  ;;  %6696 = vst.msk [vmem:[#allocation4 + $0x61] sm:$0xff] %vm1937_vm4, %v14416_v35  ;;  %v6191_v36 = vadd.f32 %v13403_v1, %v13577_v43  ;;  %v6183_v6 = vadd.f32 %v13322_v19, %v13577_v43 }
 0x42f   : > { %v8066_v40 = vpop.f32.mrb[75].mxu0  ;;  %v8222_v47 = vpop.f32.mrb[24].mxu1  ;;  %v6765_v13 = vrot.slane %v13610_v45, 2  ;;  %v6766_v48 = vrot.slane %v13612_v15, 2  ;;  %v6739_v16 = vrot.slane %v6702_v50, 1  ;;  %v13630_v51 = vld [vmem:[#allocation4 + $0x40] sm:$0xff]  ;;  %v13643_v1 = vsel %vm832_vm3, %v6762_v29, %v6763_v55 }
 0x430   : > { %v13618_v31 = vadd.f32 %v8066_v40, %v8065_v24  ;;  %v13622_v37 = vadd.f32 %v8222_v47, %v6188_v27  ;;  %v6340_v49 = vpop.f32.mrb[25].mxu1  ;;  %v13632_v24 = vld [vmem:[#allocation4 + $0x48] sm:$0x3]  ;;  %v13640_v27 = vsel %vm832_vm3, %v6768_v12, %v6769_v59  ;;  %v13652_v57 = vld [vmem:[#allocation4 + $0x90] sm:$0xff] }
 0x431   : > { %v13634_v40 = vadd.f32 %v6340_v49, %v6180_v20  ;;  %v8223_v35 = vpop.f32.mrb[26].mxu1  ;;  %v13637_v50 = vsel %vm832_vm3, %v6765_v13, %v6766_v48  ;;  %v6737_v49 = vsel %vm751_vm2, %v6735_v39, %v6736_v58  ;;  %14694 = vst [vmem:[#allocation74_spill] sm:$0xff] %v13652_v57  ;;  %v13654_v13 = vld [vmem:[#allocation4 + $0x98] sm:$0x3]  ;;  %v13659_v59 = vsel %vm751_vm2, %v6738_v7, %v6739_v16 }
 0x432   : > { %v13645_v19 = vadd.f32 %v8223_v35, %v6191_v36  ;;  %v6343_v47 = vpop.f32.mrb[27].mxu1  ;;  %v7009_v0 = vpack.c.bf16 %v13640_v27, %v13637_v50  ;;  %v9588_v20 = vpack.i.bf16 %v13637_v50, %v13643_v1  ;;  %14695 = vst [vmem:[#allocation72_spill] sm:$0xff] %v13654_v13  ;;  %14696 = vst [vmem:[#allocation36_spill] sm:$0xff] %v13659_v59  ;;  %v6771_v35 = vrot.slane %v13630_v51, 2  ;;  %v13663_v55 = vld [vmem:[#allocation4 + $0x70] sm:$0xff] }
 0x433   : > { %v13656_v12 = vadd.f32 %v6343_v47, %v6183_v6  ;;  %v6772_v29 = vrot.slane %v13632_v24, 2  ;;  %v13665_v48 = vld [vmem:[#allocation4 + $0x78] sm:$0x3]  ;;  %v6196_v39 = vadd.f32 %v13415_v22, %v13577_v43  ;;  %v6780_v7 = vrot.slane %v13663_v55, 2 }
 0x434   : > { %14697 = vst [vmem:[#allocation48_spill] sm:$0xff] %v13665_v48  ;;  %8256 = vmatprep.mubr.msk.bf16.mxu0 %vm1937_vm4, %v7009_v0  ;;  %9589 = vrot.lane.b32.xlu1 %v9588_v20, %s9856_s20  ;;  %v13671_v58 = vld [vmem:[#allocation4 + $0x50] sm:$0xff]  ;;  %v13673_v36 = vld [vmem:[#allocation4 + $0x58] sm:$0x3]  ;;  %v6781_v16 = vrot.slane %v13665_v48, 2  ;;  %v6759_v6 = vrot.slane %v13567_v30, 2  ;;  %v9593_v18 = vpack.i.bf16 %v13659_v59, %v6737_v49 }
 0x435   : > { %v6774_v47 = vrot.slane %v13671_v58, 2  ;;  %v6775_v41 = vrot.slane %v13673_v36, 2  ;;  %v6760_v0 = vrot.slane %v13569_v32, 2  ;;  %v13681_v20 = vld [vmem:[#allocation4 + $0x80] sm:$0xff]  ;;  %v6804_v22 = vrot.slane %v13652_v57, 2 }
 0x436   : > { %v13689_v2 = vld [vmem:[#allocation4 + $0x60] sm:$0xff]  ;;  %v13691_v56 = vld [vmem:[#allocation4 + $0x68] sm:$0x3]  ;;  %v6805_v32 = vrot.slane %v13654_v13, 2  ;;  %v8226_v10 = vpop.f32.mrb[28].mxu1  ;;  %v13697_v61 = vsel %vm832_vm3, %v6771_v35, %v6772_v29  ;;  %v13710_v13 = vsel %vm832_vm3, %v6780_v7, %v6781_v16  ;;  %v6796_v35 = vrot.slane %v13681_v20, 2 }
 0x437   : > { %v13693_v21 = vld [vmem:[#allocation4 + $0x88] sm:$0x3]  ;;  %v13700_v49 = vsel %vm832_vm3, %v6774_v47, %v6775_v41  ;;  %v6777_v26 = vrot.slane %v13689_v2, 2  ;;  %v6778_v28 = vrot.slane %v13691_v56, 2  ;;  %v13704_v33 = vadd.f32 %v8226_v10, %v6204_v4  ;;  %v6356_v23 = vpop.f32.mrb[29].mxu1 }
 0x438   : > { %9594 = vrot.lane.b32.xlu1 %v9593_v18, %s9856_s20  ;;  %v7012_v59 = vpack.c.bf16 %v13700_v49, %v13697_v61  ;;  %v13713_v41 = vadd.f32 %v6356_v23, %v6196_v39  ;;  %v8227_v29 = vpop.f32.mrb[30].mxu1  ;;  %v6797_v18 = vrot.slane %v13693_v21, 2  ;;  %v9598_v23 = vpack.i.bf16 %v13582_v14, %v13610_v45 }
 0x439   : > { %v8068_v52 = vpop.f32.mrb[76].mxu0  ;;  %v13718_v10 = vsel %vm832_vm3, %v6777_v26, %v6778_v28  ;;  %v13721_v4 = vadd.f32 %v8227_v29, %v6207_v62  ;;  %v6359_v48 = vpop.f32.mrb[31].mxu1  ;;  %v6741_v26 = vrot.slane %v13610_v45, 1  ;;  %v6742_v62 = vrot.slane %v13612_v15, 1 }
 0x43a   : > { %v8069_v30 = vpop.f32.mrb[77].mxu0  ;;  %8257 = vmatmul.mubr.msk.bf16.vlgmr.msra.gmra.mrb[96].mxu0 %vm1937_vm4, %v7012_v59  ;;  %v7015_v16 = vpack.c.bf16 %v13710_v13, %v13718_v10  ;;  %v13738_v59 = vsel %vm832_vm3, %v6796_v35, %v6797_v18  ;;  %v6806_v28 = vsel %vm832_vm3, %v6804_v22, %v6805_v32  ;;  %v6744_v29 = vrot.slane %v13582_v14, 1 }
 0x43b   : > { %v13715_v47 = vadd.f32 %v8069_v30, %v8068_v52  ;;  %v8071_v57 = vpop.f32.mrb[78].mxu0  ;;  %v6761_v52 = vsel %vm832_vm3, %v6759_v6, %v6760_v0  ;;  %v13729_v30 = vadd.f32 %v6359_v48, %v6199_v63  ;;  %v6745_v63 = vrot.slane %v13584_v11, 1 }
 0x43c   : > { %v8072_v7 = vpop.f32.mrb[79].mxu0  ;;  %8260 = vmatprep.mubr.msk.bf16.mxu0 %vm1937_vm4, %v7015_v16  ;;  %9599 = vrot.lane.b32.xlu1 %v9598_v23, %s9857_s19  ;;  %v9603_v48 = vpack.i.bf16 %v13643_v1, %v6761_v52  ;;  %v6212_v15 = vadd.f32 %v13506_v44, %v13577_v43  ;;  %v13749_v0 = vsel %vm751_vm2, %v6741_v26, %v6742_v62 }
 0x43d   : > { %v13731_v39 = vadd.f32 %v8072_v7, %v8071_v57  ;;  %v6220_v57 = vadd.f32 %v13510_v17, %v13577_v43  ;;  %v6223_v11 = vadd.f32 %v13512_v54, %v13577_v43  ;;  %v7018_v22 = vpack.c.bf16 %v6806_v28, %v13738_v59 }
 0x43e   : > { %v8230_v6 = vpop.f32.mrb[32].mxu1  ;;  %v6215_v32 = vadd.f32 %v13508_v46, %v13577_v43  ;;  %v13762_v44 = vsel %vm751_vm2, %v6744_v29, %v6745_v63  ;;  %v6236_v29 = vadd.f32 %v13524_v42, %v13577_v43  ;;  %v6239_v42 = vadd.f32 %v13526_v60, %v13577_v43 }
 0x43f   : > { %v13751_v35 = vadd.f32 %v8230_v6, %v6220_v57  ;;  %v6372_v18 = vpop.f32.mrb[33].mxu1  ;;  %14698 = vst [vmem:[#allocation75_spill] sm:$0xff] %v13762_v44  ;;  %v9608_v23 = vpack.i.bf16 %v13762_v44, %v13749_v0  ;;  %v9613_v57 = vpack.i.bf16 %v13610_v45, %v13591_v8  ;;  %v6786_v6 = vrot.slane %v13693_v21, 1 }
 0x440   : > { %9604 = vrot.lane.b32.xlu1 %v9603_v48, %s9857_s19  ;;  %v13757_v17 = vadd.f32 %v6372_v18, %v6212_v15  ;;  %v8231_v1 = vpop.f32.mrb[34].mxu1  ;;  %v6785_v48 = vrot.slane %v13681_v20, 1  ;;  %v6252_v60 = vadd.f32 %v13539_v25, %v13577_v43  ;;  %v6467_v25 = vmax.f32 %v13634_v40, 0.0 }
 0x441   : > { %v13764_v7 = vadd.f32 %v8231_v1, %v6223_v11  ;;  %v6375_v16 = vpop.f32.mrb[35].mxu1  ;;  %v6228_v11 = vadd.f32 %v13514_v38, %v13577_v43  ;;  %v6470_v40 = vmax.f32 %v13645_v19, 0.0 }
 0x442   : > { %8261 = vmatmul.mubr.msk.bf16.gmra.mrb[100].mxu0 %vm1937_vm4, %v7018_v22  ;;  %v13769_v54 = vadd.f32 %v6375_v16, %v6215_v32  ;;  %v13792_v32 = vsel %vm751_vm2, %v6785_v48, %v6786_v6 }
 0x444   : > { %9609 = vrot.lane.b32.xlu1 %v9608_v23, %s9859_s27 }
 0x445   : > { %v8074_v52 = vpop.f32.mrb[80].mxu0 }
 0x446   : > { %v8075_v26 = vpop.f32.mrb[81].mxu0  ;;  %v8234_v15 = vpop.f32.mrb[36].mxu1 }
 0x447   : > { %v13772_v62 = vadd.f32 %v8075_v26, %v8074_v52  ;;  %v8077_v46 = vpop.f32.mrb[82].mxu0  ;;  %v13786_v22 = vadd.f32 %v8234_v15, %v6236_v29  ;;  %v6388_v1 = vpop.f32.mrb[37].mxu1  ;;  %v6231_v52 = vadd.f32 %v13516_v53, %v13577_v43  ;;  %v6255_v15 = vadd.f32 %v13547_v34, %v13577_v43 }
 0x448   : > { %v8078_v63 = vpop.f32.mrb[83].mxu0  ;;  %9614 = vrot.lane.b32.xlu1 %v9613_v57, %s9859_s27  ;;  %v13794_v16 = vadd.f32 %v6388_v1, %v6228_v11  ;;  %v8235_v21 = vpop.f32.mrb[38].mxu1  ;;  %v6244_v57 = vadd.f32 %v13528_v3, %v13577_v43  ;;  %v6247_v1 = vadd.f32 %v13530_v5, %v13577_v43  ;;  %v6750_v34 = vrot.slane %v13671_v58, 1 }
 0x449   : > { %v13782_v18 = vadd.f32 %v8078_v63, %v8077_v46  ;;  %v13798_v26 = vadd.f32 %v8235_v21, %v6239_v42  ;;  %v6391_v38 = vpop.f32.mrb[39].mxu1  ;;  %v9618_v46 = vpack.i.bf16 %v13697_v61, %v13640_v27  ;;  %v6469_v42 = vmax.f32 %v13622_v37, 0.0 }
 0x44a   : > { %v13802_v29 = vadd.f32 %v6391_v38, %v6231_v52  ;;  %v6751_v37 = vrot.slane %v13673_v36, 1  ;;  %v9633_v36 = vpack.i.bf16 %v13640_v27, %v13637_v50  ;;  %v6263_v50 = vadd.f32 %v13618_v31, %v13577_v43 }
 0x44c   : > { %9619 = vrot.lane.b32.xlu1 %v9618_v46, %s9856_s20 }
 0x44e   : > { %v8238_v63 = vpop.f32.mrb[40].mxu1 }
 0x44f   : > { %v6413_v6 = vadd.f32 %v8238_v63, %v6252_v60  ;;  %v6404_v53 = vpop.f32.mrb[41].mxu1 }
 0x450   : > { %9624 = vrot.lane.b32.xlu1 %v9608_v23, %s9856_s20  ;;  %v6405_v21 = vadd.f32 %v6404_v53, %v6244_v57  ;;  %v8239_v52 = vpop.f32.mrb[42].mxu1  ;;  %v9628_v23 = vpack.i.bf16 %v13671_v58, %v13630_v51  ;;  %v6468_v57 = vmax.f32 %v13656_v12, 0.0  ;;  %v6260_v12 = vadd.f32 %v13599_v9, %v13577_v43 }
 0x451   : > { %v8080_v48 = vpop.f32.mrb[84].mxu0  ;;  %v6485_v46 = vmax.f32 %v6413_v6, 0.0  ;;  %v6416_v60 = vadd.f32 %v8239_v52, %v6255_v15  ;;  %v6407_v63 = vpop.f32.mrb[43].mxu1  ;;  %v6748_v52 = vrot.slane %v13632_v24, 1  ;;  %v6271_v24 = vadd.f32 %v13731_v39, %v13577_v43 }
 0x452   : > { %v8081_v11 = vpop.f32.mrb[85].mxu0  ;;  %v6483_v45 = vmax.f32 %v6405_v21, 0.0  ;;  %v6408_v44 = vadd.f32 %v6407_v63, %v6247_v1  ;;  %v6473_v9 = vmax.f32 %v13704_v33, 0.0  ;;  %v6471_v63 = vmax.f32 %v13713_v41, 0.0 }
 0x453   : > { %v8082_v38 = vadd.f32 %v8081_v11, %v8080_v48  ;;  %v8083_v3 = vpop.f32.mrb[86].mxu0  ;;  %v9540_v48 = vpack.i.bf16 %v6469_v42, %v6485_v46  ;;  %v6486_v53 = vmax.f32 %v6416_v60, 0.0  ;;  %v6747_v11 = vrot.slane %v13630_v51, 1 }
 0x454   : > { %v8084_v28 = vpop.f32.mrb[87].mxu0  ;;  %9629 = vrot.lane.b32.xlu1 %v9628_v23, %s9857_s19  ;;  %v9536_v6 = vpack.i.bf16 %v6467_v25, %v6483_v45  ;;  %v6484_v15 = vmax.f32 %v6408_v44, 0.0  ;;  %v13832_v45 = vsel %vm751_vm2, %v6750_v34, %v6751_v37  ;;  %v6474_v37 = vmax.f32 %v13721_v4, 0.0 }
 0x455   : > { %v8085_v5 = vadd.f32 %v8084_v28, %v8083_v3  ;;  %v9542_v8 = vpack.i.bf16 %v6470_v40, %v6486_v53  ;;  %v6268_v28 = vadd.f32 %v13715_v47, %v13577_v43  ;;  %v13840_v27 = vsel %vm751_vm2, %v6747_v11, %v6748_v52 }
 0x456   : > { %v9538_v19 = vpack.i.bf16 %v6468_v57, %v6484_v15  ;;  %v8242_v1 = vpop.f32.mrb[44].mxu1  ;;  %9537 = vxpose.xlu0.b32.start [1/16] (narrow) %v9536_v6, 32  ;;  %v9638_v60 = vpack.i.bf16 %v13832_v45, %v13840_v27  ;;  %v6472_v57 = vmax.f32 %v13729_v30, 0.0  ;;  %v6284_v41 = vadd.f32 %v8082_v38, %v13577_v43 }
 0x457   : > { %v6429_v44 = vadd.f32 %v8242_v1, %v6268_v28  ;;  %v6420_v42 = vpop.f32.mrb[45].mxu1  ;;  %v9643_v4 = vpack.i.bf16 %v13630_v51, %v13582_v14  ;;  %v6279_v38 = vadd.f32 %v13782_v18, %v13577_v43  ;;  %v6476_v18 = vmax.f32 %v13769_v54, 0.0 }
 0x458   : > { %9634 = vrot.lane.b32.xlu1 %v9633_v36, %s9857_s19  ;;  %v6421_v47 = vadd.f32 %v6420_v42, %v6260_v12  ;;  %v8243_v25 = vpop.f32.mrb[46].mxu1  ;;  %v6276_v12 = vadd.f32 %v13772_v62, %v13577_v43  ;;  %v6287_v42 = vadd.f32 %v8085_v5, %v13577_v43  ;;  %v6475_v62 = vmax.f32 %v13757_v17, 0.0 }
 0x459   : > { %v6489_v21 = vmax.f32 %v6429_v44, 0.0  ;;  %v6432_v3 = vadd.f32 %v8243_v25, %v6271_v24  ;;  %v6423_v46 = vpop.f32.mrb[47].mxu1  ;;  %v6477_v25 = vmax.f32 %v13751_v35, 0.0  ;;  %v6478_v5 = vmax.f32 %v13764_v7, 0.0 }
 0x45a   : > { %v6487_v23 = vmax.f32 %v6421_v47, 0.0  ;;  %v6424_v39 = vadd.f32 %v6423_v46, %v6263_v50  ;;  %9539 = vxpose.xlu0.b32.cont [2/16] (narrow) %v9538_v19, 32  ;;  %v6479_v54 = vmax.f32 %v13794_v16, 0.0  ;;  %v6756_v16 = vrot.slane %v13663_v55, 1 }
 0x45b   : > { %v13847_v31 = vpack.i.bf16 %v6473_v9, %v6489_v21  ;;  %v6490_v40 = vmax.f32 %v6432_v3, 0.0  ;;  %v9648_v21 = vpack.i.bf16 %v13718_v10, %v13700_v49 }
 0x45c   : > { %9639 = vrot.lane.b32.xlu1 %v9638_v60, %s9859_s27  ;;  %v9544_v53 = vpack.i.bf16 %v6471_v63, %v6487_v23  ;;  %v6488_v6 = vmax.f32 %v6424_v39, 0.0 }
 0x45d   : > { %v8086_v34 = vpop.f32.mrb[88].mxu0  ;;  %v13851_v52 = vpack.i.bf16 %v6474_v37, %v6490_v40 }
 0x45e   : > { %v8087_v33 = vpop.f32.mrb[89].mxu0  ;;  %v9546_v36 = vpack.i.bf16 %v6472_v57, %v6488_v6  ;;  %v8246_v19 = vpop.f32.mrb[48].mxu1  ;;  %9541 = vxpose.xlu0.b32.cont [3/16] (narrow) %v9540_v48, 32 }
 0x45f   : > { %v8088_v15 = vadd.f32 %v8087_v33, %v8086_v34  ;;  %v8089_v11 = vpop.f32.mrb[90].mxu0  ;;  %v6445_v30 = vadd.f32 %v8246_v19, %v6284_v41  ;;  %v6436_v44 = vpop.f32.mrb[49].mxu1 }
 0x460   : > { %v8090_v28 = vpop.f32.mrb[91].mxu0  ;;  %9644 = vrot.lane.b32.xlu1 %v9643_v4, %s9859_s27  ;;  %v6437_v24 = vadd.f32 %v6436_v44, %v6276_v12  ;;  %v8247_v47 = vpop.f32.mrb[50].mxu1  ;;  %v6754_v12 = vrot.slane %v13691_v56, 1  ;;  %v9860_v56 = vmov 0  }
 0x461   : > { %v8091_v1 = vadd.f32 %v8090_v28, %v8089_v11  ;;  %v6493_v50 = vmax.f32 %v6445_v30, 0.0  ;;  %v6448_v9 = vadd.f32 %v8247_v47, %v6287_v42  ;;  %v6439_v48 = vpop.f32.mrb[51].mxu1  ;;  %v6292_v33 = vadd.f32 %v8088_v15, %v13577_v43  ;;  %6634 = vmatprep.mubr.bf16.mxu1 %v9860_v56 }
 0x462   : > { %v6491_v3 = vmax.f32 %v6437_v24, 0.0  ;;  %v6440_v46 = vadd.f32 %v6439_v48, %v6279_v38  ;;  %9543 = vxpose.xlu0.b32.cont [4/16] (narrow) %v9542_v8, 32  ;;  %v6753_v15 = vrot.slane %v13689_v2, 1  ;;  %v14699_v24 = vld [vmem:[#allocation48_spill] sm:$0xff] }
 0x463   : > { %v9556_v63 = vpack.i.bf16 %v6477_v25, %v6493_v50  ;;  %v6494_v23 = vmax.f32 %v6448_v9, 0.0  ;;  %v6295_v41 = vadd.f32 %v8091_v1, %v13577_v43  ;;  %v6480_v1 = vmax.f32 %v13802_v29, 0.0 }
 0x464   : > { %9649 = vrot.lane.b32.xlu1 %v9648_v21, %s9856_s20  ;;  %v9552_v35 = vpack.i.bf16 %v6475_v62, %v6491_v3  ;;  %v6492_v39 = vmax.f32 %v6440_v46, 0.0  ;;  %v6757_v47 = vrot.slane %v14699_v24, 1  ;;  %v13887_v48 = vsel %vm751_vm2, %v6753_v15, %v6754_v12 }
 0x465   : > { %v9558_v34 = vpack.i.bf16 %v6478_v5, %v6494_v23  ;;  %v6481_v29 = vmax.f32 %v13786_v22, 0.0  ;;  %v9673_v22 = vpack.i.bf16 %v13689_v2, %v13671_v58 }
 0x466   : > { %v9554_v37 = vpack.i.bf16 %v6476_v18, %v6492_v39  ;;  %v8250_v40 = vpop.f32.mrb[52].mxu1  ;;  %9545 = vxpose.xlu0.b32.cont [5/16] (narrow) %v9544_v53, 32  ;;  %v9658_v53 = vpack.i.bf16 %v13663_v55, %v13689_v2  ;;  %v13894_v5 = vsel %vm751_vm2, %v6756_v16, %v6757_v47  ;;  %v14701_v39 = vld [vmem:[#allocation72_spill] sm:$0xff] }
 0x467   : > { %v6452_v57 = vpop.f32.mrb[53].mxu1 }
 0x468   : > { %9654 = vrot.lane.b32.xlu1 %v9638_v60, %s9856_s20  ;;  %v6453_v7 = vadd.f32 %v6452_v57, %v6292_v33  ;;  %v8251_v6 = vpop.f32.mrb[54].mxu1 }
 0x469   : > { %v8092_v17 = vpop.f32.mrb[92].mxu0  ;;  %v6455_v4 = vpop.f32.mrb[55].mxu1 }
 0x46a   : > { %v8093_v8 = vpop.f32.mrb[93].mxu0  ;;  %v6495_v30 = vmax.f32 %v6453_v7, 0.0  ;;  %v6456_v44 = vadd.f32 %v6455_v4, %v6295_v41  ;;  %9547 = vxpose.xlu0.b32.cont [6/16] (narrow) %v9546_v36, 32  ;;  %v9663_v36 = vpack.i.bf16 %v13700_v49, %v13697_v61  ;;  %v9668_v61 = vpack.i.bf16 %v13894_v5, %v13887_v48 }
 0x46b   : > { %v8094_v11 = vadd.f32 %v8093_v8, %v8092_v17  ;;  %v8095_v28 = vpop.f32.mrb[94].mxu0 }
 0x46c   : > { %v8096_v19 = vpop.f32.mrb[95].mxu0  ;;  %9659 = vrot.lane.b32.xlu1 %v9658_v53, %s9857_s19  ;;  %v9560_v38 = vpack.i.bf16 %v6479_v54, %v6495_v30  ;;  %v6496_v50 = vmax.f32 %v6456_v44, 0.0  ;;  %v14704_v44 = vld [vmem:[#allocation9_spill] sm:$0xff] }
 0x46d   : > { %v6300_v60 = vadd.f32 %v8094_v11, %v13577_v43  ;;  %v8097_v42 = vadd.f32 %v8096_v19, %v8095_v28 }
 0x46e   : > { %v9562_v62 = vpack.i.bf16 %v6480_v1, %v6496_v50  ;;  %9549 = vxpose.xlu0.b32.cont [7/16] (narrow) %v13847_v31, 32  ;;  %v14700_v31 = vld [vmem:[#allocation74_spill] sm:$0xff] }
 0x46f   : > { %v6461_v25 = vadd.f32 %v8250_v40, %v6300_v60  ;;  %v6303_v9 = vadd.f32 %v8097_v42, %v13577_v43  ;;  %v6482_v43 = vmax.f32 %v13798_v26, 0.0  ;;  %v9678_v26 = vpack.i.bf16 %v13738_v59, %v13710_v13 }
 0x470   : > { %9664 = vrot.lane.b32.xlu1 %v9663_v36, %s9857_s19  ;;  %v6801_v18 = vrot.slane %v14700_v31, 1  ;;  %v6802_v40 = vrot.slane %v14701_v39, 1  ;;  %v14702_v59 = vpack.i.bf16 %v13710_v13, %v13718_v10  ;;  %v9703_v13 = vpack.i.bf16 %v13681_v20, %v13663_v55 }
 0x471   : > { %v6497_v21 = vmax.f32 %v6461_v25, 0.0  ;;  %v6464_v3 = vadd.f32 %v8251_v6, %v6303_v9  ;;  %v14705_v25 = vld [vmem:[#allocation6_spill] sm:$0xff] }
 0x472   : > { %9551 = vxpose.xlu0.b32.cont [8/16] (narrow) %v13851_v52, 32  ;;  %v9688_v52 = vpack.i.bf16 %v14700_v31, %v13681_v20  ;;  %v14703_v20 = vld [vmem:[#allocation7_spill] sm:$0xff] }
 0x473   : > { %v6498_v46 = vmax.f32 %v6464_v3, 0.0  ;;  %v9564_v23 = vpack.i.bf16 %v6481_v29, %v6497_v21  ;;  %v14706_v29 = vld [vmem:[#allocation8_spill] sm:$0xff]  ;;  %v9752_v3 = vld [vmem:[%s14297_s5 + $0x40] sm:$0xff]  }
 0x474   : > { %9669 = vrot.lane.b32.xlu1 %v9668_v61, %s9859_s27 }
 0x475   : > { %v9566_v49 = vpack.i.bf16 %v6482_v43, %v6498_v46  ;;  %v9751_v46 = vld [vmem:[%s14299_s7] sm:$0xff]  }
 0x476   : > { %9553 = vxpose.xlu0.b32.cont [9/16] (narrow) %v9552_v35, 32  ;;  %v6803_v35 = vsel %vm751_vm2, %v6801_v18, %v6802_v40  ;;  %vm6663_vm2 = vcmask 1045508  }
 0x477   : > { %vm6664_vm3 = vmor %vm2062_vm5, %vm6663_vm2  ;;  %vm7441_vm5 = vcmask 520194  }
 0x478   : > { %9674 = vrot.lane.b32.xlu1 %v9673_v22, %s9859_s27  ;;  %v14707_v22 = vld [vmem:[#allocation13_spill] sm:$0xff] }
 0x47a   : > { %9555 = vxpose.xlu0.b32.cont [10/16] (narrow) %v9554_v37, 32 }
 0x47c   : > { %9679 = vrot.lane.b32.xlu1 %v9678_v26, %s9856_s20  ;;  %v9754_v26 = vld [vmem:[%s14297_s5 + $0x48] sm:$0xff]  }
 0x47e   : > { %9557 = vxpose.xlu0.b32.cont [11/16] (narrow) %v9556_v63, 32  ;;  %v9698_v63 = vpack.i.bf16 %v6803_v35, %v13792_v32  ;;  %v9755_v35 = vld [vmem:[%s14297_s5 + $0x8] sm:$0xff]  }
 0x480   : > { %9684 = vrot.lane.b32.xlu1 %v9668_v61, %s9856_s20  ;;  %s7919_s20 = sshll.u32 %s14757_s30, 5 }
 0x481   : > { %s507_s17 = scalar_lea.vmem %s14302_s10, %s7919_s20 }
 0x482   : > { %9559 = vxpose.xlu0.b32.cont [12/16] (narrow) %v9558_v34, 32 }
 0x484   : > { %9689 = vrot.lane.b32.xlu1 %v9688_v52, %s9857_s19 }
 0x486   : > { %9561 = vxpose.xlu0.b32.cont [13/16] (narrow) %v9560_v38, 32 }
 0x488   : > { %9694 = vrot.lane.b32.xlu1 %v14702_v59, %s9857_s19 }
 0x48a   : > { %9563 = vxpose.xlu0.b32.cont [14/16] (narrow) %v9562_v62, 32 }
 0x48c   : > { %9699 = vrot.lane.b32.xlu1 %v9698_v63, %s9859_s27  ;;  %v14708_v63 = vld [vmem:[#allocation36_spill] sm:$0xff] }
 0x48e   : > { %9565 = vxpose.xlu0.b32.cont [15/16] (narrow) %v9564_v23, 32  ;;  %v9753_v23 = vld [vmem:[%s14297_s5] sm:$0xff]  }
 0x492   : > { %9567 = vxpose.xlu0.b32.end [16/16] (narrow) %v9566_v49, 32 }
 0x4a6   : > { %v9590_v34 = vpop.permute.xlu1 %9589 }
 0x4a7   : > { %v9592_v61 = vunpack.i.h.bf16 %v9590_v34  ;;  %v9591_v49 = vunpack.i.l.bf16 %v9590_v34 }
 0x4a9   : > { %v6984_v59 = vsel %vm1937_vm4, %v13749_v0, %v9592_v61  ;;  %v6983_v34 = vsel %vm1937_vm4, %v14708_v63, %v9591_v49 }
 0x4aa   : > { %v13919_v37 = vpop.permute.xlu1 %9594 }
 0x4ae   : > { %v13921_v33 = vpop.permute.xlu1 %9599 }
 0x4af   : > { %v9602_v31 = vunpack.i.h.bf16 %v13921_v33  ;;  %v9601_v52 = vunpack.i.l.bf16 %v13921_v33  ;;  %v14709_v33 = vld [vmem:[#allocation15_spill] sm:$0xff] }
 0x4b2   : > { %v13923_v17 = vpop.permute.xlu1 %9604 }
 0x4b6   : > { %v13925_v57 = vpop.permute.xlu1 %9609 }
 0x4b7   : > { %v9612_v18 = vunpack.i.h.bf16 %v13925_v57  ;;  %v9611_v39 = vunpack.i.l.bf16 %v13925_v57  ;;  %v9757_v57 = vld [vmem:[%s14297_s5 + $0x50] sm:$0xff]  }
 0x4ba   : > { %v13927_v8 = vpop.permute.xlu1 %9614 }
 0x4bb   : > { %9704 = vrot.lane.b32.xlu0 %v9703_v13, %s9859_s27  ;;  %v6992_v13 = vsel %vm4300_vm9, %v6984_v59, %v9602_v31  ;;  %v9617_v61 = vunpack.i.h.bf16 %v13927_v8  ;;  %v9616_v49 = vunpack.i.l.bf16 %v13927_v8  ;;  %v14715_v31 = vld [vmem:[#allocation63_spill] sm:$0xff]  ;;  %v9767_v8 = vld [vmem:[%s14297_s5 + $0x78] sm:$0xff]  }
 0x4be   : > { %v13932_v10 = vpop.permute.xlu1 %9619 }
 0x4c2   : > { %v13934_v7 = vpop.permute.xlu1 %9624 }
 0x4c6   : > { %v13936_v6 = vpop.permute.xlu1 %9629 }
 0x4c7   : > { %v9632_v63 = vunpack.i.h.bf16 %v13936_v6 }
 0x4ca   : > { %v13938_v11 = vpop.permute.xlu1 %9634 }
 0x4ce   : > { %v13940_v41 = vpop.permute.xlu1 %9639 }
 0x4d2   : > { %v13942_v28 = vpop.permute.xlu1 %9644 }
 0x4d6   : > { %v13944_v54 = vpop.permute.xlu1 %9649  ;;  %v9568_v4 = vpop.trf.xlu0 }
 0x4d7   : > { %v9572_v19 = vunpack.i.h.bf16 %v9568_v4  ;;  %v9569_v53 = vunpack.i.l.bf16 %v9568_v4  ;;  %v6991_v4 = vsel %vm4300_vm9, %v6983_v34, %v9601_v52  ;;  %v9631_v34 = vunpack.i.l.bf16 %v13936_v6 }
 0x4d8   : > { %v6999_v0 = vsel %vm4309_vm10, %v6991_v4, %v9611_v39  ;;  %v14716_v39 = vld [vmem:[#allocation20_spill] sm:$0xff] }
 0x4d9   : > { %2259 = vxpose.xlu0.b32.start [1/16] (narrow) %v14703_v20, 32  ;;  %v9758_v20 = vld [vmem:[%s14297_s5 + $0x10] sm:$0xff]  }
 0x4da   : > { %v13947_v15 = vpop.permute.xlu1 %9654  ;;  %v9573_v12 = vpop.trf.xlu0 }
 0x4db   : > { %v9577_v30 = vunpack.i.h.bf16 %v9573_v12  ;;  %v9574_v60 = vunpack.i.l.bf16 %v9573_v12  ;;  %v14710_v12 = vld [vmem:[#allocation12_spill] sm:$0xff] }
 0x4dd   : > { %2260 = vxpose.xlu0.b32.cont [2/16] (narrow) %v14704_v44, 32  ;;  %v6564_v42 = vpack.c.bf16 %v9574_v60, %v9569_v53  ;;  %v6563_v1 = vpack.c.bf16 %v9577_v30, %v9572_v19  ;;  %v9756_v19 = vld [vmem:[%s14299_s7 + $0x8] ss:$0 sps:$4 sm:$0x77]   ;;  %v7000_v53 = vsel %vm4309_vm10, %v6992_v13, %v9612_v18  ;;  %v9759_v30 = vld [vmem:[%s14297_s5 + $0x58] sm:$0xff]   ;;  %v9622_v18 = vunpack.i.h.bf16 %v13932_v10 }
 0x4de   : > { %v9578_v16 = vpop.trf.xlu0  ;;  %v13950_v24 = vpop.permute.xlu1 %9659  ;;  %v7008_v44 = vpack.c.bf16 %v7000_v53, %v6999_v0  ;;  %v9641_v13 = vunpack.i.l.bf16 %v13940_v41  ;;  %v14717_v53 = vld [vmem:[#allocation75_spill] sm:$0xff] }
 0x4df   : > { %6602 = vmatprep.subr.bf16.mxu1 %v6564_v42  ;;  %v9582_v47 = vunpack.i.h.bf16 %v9578_v16  ;;  %v9579_v38 = vunpack.i.l.bf16 %v9578_v16  ;;  %v9760_v42 = vld [vmem:[%s14297_s5 + $0x18] sm:$0xff]   ;;  %v9761_v16 = vld [vmem:[%s14297_s5 + $0x60] sm:$0xff]   ;;  %v6986_v0 = vsel %vm1937_vm4, %v13840_v27, %v9622_v18  ;;  %v9637_v27 = vunpack.i.h.bf16 %v13938_v11 }
 0x4e0   : > { %6603 = vmatpush1.bf16.msra.mxu1 %v6563_v1  ;;  %v14711_v1 = vld [vmem:[#allocation14_spill] sm:$0xff] }
 0x4e1   : > { %2261 = vxpose.xlu0.b32.cont [3/16] (narrow) %v14705_v25, 32  ;;  %v14712_v25 = vld [vmem:[#allocation21_spill] sm:$0xff] }
 0x4e2   : > { %v9583_v50 = vpop.trf.xlu0  ;;  %v13957_v43 = vpop.permute.xlu1 %9664 }
 0x4e3   : > { %v9587_v9 = vunpack.i.h.bf16 %v9583_v50  ;;  %v9584_v36 = vunpack.i.l.bf16 %v9583_v50  ;;  %v9763_v50 = vld [vmem:[%s14297_s5 + $0x68] sm:$0xff]  }
 0x4e5   : > { %2262 = vxpose.xlu0.b32.cont [4/16] (narrow) %v14706_v29, 32  ;;  %v6566_v21 = vpack.c.bf16 %v9584_v36, %v9579_v38  ;;  %v6565_v62 = vpack.c.bf16 %v9587_v9, %v9582_v47  ;;  %v9762_v38 = vld [vmem:[%s14297_s5 + $0x20] sm:$0xff]   ;;  %v9764_v9 = vld [vmem:[%s14297_s5 + $0x28] sm:$0xff]   ;;  %v9597_v36 = vunpack.i.h.bf16 %v13919_v37  ;;  %v9596_v29 = vunpack.i.l.bf16 %v13919_v37  ;;  %v9766_v37 = vld [vmem:[%s14297_s5 + $0x30] sm:$0xff]  }
 0x4e6   : > { %v13974_v40 = vpop.permute.xlu1 %9669 }
 0x4e7   : > { %6604 = vmatprep.subr.bf16.mxu1 %v6566_v21  ;;  %v14713_v21 = vld [vmem:[#allocation23_spill] sm:$0xff]  ;;  %v6959_v52 = vsel %vm1937_vm4, %v14715_v31, %v9596_v29  ;;  %v9662_v29 = vunpack.i.h.bf16 %v13950_v24 }
 0x4e8   : > { %6605 = vmatpush1.bf16.msra.mxu1 %v6565_v62  ;;  %v9765_v62 = vld [vmem:[%s14297_s5 + $0x70] sm:$0xff]  }
 0x4e9   : > { %2263 = vxpose.xlu0.b32.cont [5/16] (narrow) %v14707_v22, 32  ;;  %8116 = vmatprep.subr.bf16.mxu1 %v9752_v3  ;;  %v9607_v3 = vunpack.i.h.bf16 %v13923_v17  ;;  %v14714_v22 = vld [vmem:[#allocation32_spill] sm:$0xff]  ;;  %v14721_v31 = vld [vmem:[#allocation35_spill] sm:$0xff] }
 0x4ea   : > { %v14002_v60 = vpop.permute.xlu1 %9674 }
 0x4eb   : > { %7885 = vmatmul.mubr.msk.bf16.vlgmr.msra.gmra.mrb[56].mxu1 %vm1937_vm4, %v9751_v46  ;;  %v9606_v46 = vunpack.i.l.bf16 %v13923_v17  ;;  %v9621_v17 = vunpack.i.l.bf16 %v13932_v10  ;;  %v9642_v10 = vunpack.i.h.bf16 %v13940_v41  ;;  %v6994_v41 = vsel %vm4300_vm9, %v6986_v0, %v9632_v63 }
 0x4ec   : > { %8117 = vmatpush3.bf16.msra.mxu1 %v9753_v23  ;;  %6644 = vmatprep.mubr.bf16.mxu1 %v9860_v56  ;;  %v9667_v63 = vunpack.i.h.bf16 %v13957_v43 }
 0x4ed   : > { %2264 = vxpose.xlu0.b32.cont [6/16] (narrow) %v14709_v33, 32  ;;  %8118 = vmatprep.subr.bf16.mxu1 %v9754_v26  ;;  %v6960_v26 = vsel %vm1937_vm4, %v14714_v22, %v9597_v36  ;;  %v6985_v6 = vsel %vm1937_vm4, %v14717_v53, %v9621_v17  ;;  %v9646_v36 = vunpack.i.l.bf16 %v13942_v28  ;;  %v9677_v53 = vunpack.i.h.bf16 %v14002_v60 }
 0x4ee   : > { %v14012_v47 = vpop.permute.xlu1 %9679  ;;  %v6968_v59 = vsel %vm4300_vm9, %v6960_v26, %v9607_v3  ;;  %v9671_v3 = vunpack.i.l.bf16 %v13974_v40 }
 0x4f0   : > { %8119 = vmatpush3.bf16.msra.mxu1 %v9755_v35  ;;  %v6967_v35 = vsel %vm4300_vm9, %v6959_v52, %v9606_v46 }
 0x4f1   : > { %2265 = vxpose.xlu0.b32.cont [7/16] (narrow) %v14710_v12, 32  ;;  %8120 = vmatprep.subr.bf16.mxu1 %v9757_v57  ;;  %v6975_v33 = vsel %vm4309_vm10, %v6967_v35, %v9616_v49  ;;  %v6976_v57 = vsel %vm4309_vm10, %v6968_v59, %v9617_v61  ;;  %v14720_v61 = vld [vmem:[#allocation71_spill] sm:$0xff]  ;;  %v9657_v35 = vunpack.i.h.bf16 %v13947_v15  ;;  %v9656_v59 = vunpack.i.l.bf16 %v13947_v15 }
 0x4f2   : > { %v14032_v23 = vpop.permute.xlu1 %9684  ;;  %v7007_v12 = vpack.c.bf16 %v6976_v57, %v6975_v33  ;;  %v9666_v57 = vunpack.i.l.bf16 %v13957_v43 }
 0x4f3   : > { %7886 = vmatmul.mubr.msk.bf16.gmra.mrb[60].mxu1 %vm1937_vm4, %v9756_v19  ;;  %v9768_v19 = vld [vmem:[%s14297_s5 + $0x38] sm:$0xff]   ;;  %v6964_v43 = vsel %vm1937_vm4, %v13671_v58, %v9657_v35 }
 0x4f4   : > { %8121 = vmatpush3.bf16.msra.mxu1 %v9758_v20  ;;  %7214 = vmatprep.mubr.bf16.mxu1 %v7008_v44  ;;  %v14718_v20 = vld [vmem:[#allocation22_spill] sm:$0xff]  ;;  %v9627_v44 = vunpack.i.h.bf16 %v13934_v7 }
 0x4f5   : > { %2266 = vxpose.xlu0.b32.cont [8/16] (narrow) %v14711_v1, 32  ;;  %8122 = vmatprep.subr.bf16.mxu1 %v9759_v30  ;;  %v6993_v30 = vsel %vm4300_vm9, %v6985_v6, %v9631_v34  ;;  %v9676_v6 = vunpack.i.l.bf16 %v14002_v60  ;;  %v6972_v60 = vsel %vm4300_vm9, %v6964_v43, %v9667_v63 }
 0x4f6   : > { %v14057_v4 = vpop.permute.xlu1 %9689  ;;  %v7001_v1 = vsel %vm4309_vm10, %v6993_v30, %v9641_v13  ;;  %v9681_v13 = vunpack.i.l.bf16 %v14012_v47 }
 0x4f7   : > { %v9691_v15 = vunpack.i.l.bf16 %v14057_v4 }
 0x4f8   : > { %8123 = vmatpush3.bf16.msra.mxu1 %v9760_v42  ;;  %v9626_v42 = vunpack.i.l.bf16 %v13934_v7  ;;  %v9661_v7 = vunpack.i.l.bf16 %v13950_v24 }
 0x4f9   : > { %2267 = vxpose.xlu0.b32.cont [9/16] (narrow) %v14712_v25, 32  ;;  %8124 = vmatprep.subr.bf16.mxu1 %v9761_v16  ;;  %v7002_v16 = vsel %vm4309_vm10, %v6994_v41, %v9642_v10  ;;  %v9652_v25 = vunpack.i.h.bf16 %v13944_v54  ;;  %v9682_v10 = vunpack.i.h.bf16 %v14012_v47  ;;  %v6963_v47 = vsel %vm1937_vm4, %v13630_v51, %v9656_v59 }
 0x4fa   : > { %v7011_v46 = vpack.c.bf16 %v7002_v16, %v7001_v1  ;;  %v6961_v49 = vsel %vm1937_vm4, %v14720_v61, %v9626_v42  ;;  %v14723_v1 = vld [vmem:[#allocation34_spill] sm:$0xff] }
 0x4fb   : > { %v6990_v42 = vsel %vm1937_vm4, %v13792_v32, %v9682_v10 }
 0x4fc   : > { %8125 = vmatpush3.bf16.msra.mxu1 %v9762_v38  ;;  %v9636_v38 = vunpack.i.l.bf16 %v13938_v11  ;;  %v14084_v11 = vpop.permute.xlu1 %9694 }
 0x4fd   : > { %2268 = vxpose.xlu0.b32.cont [10/16] (narrow) %v14713_v21, 32  ;;  %8126 = vmatprep.subr.bf16.mxu1 %v9763_v50  ;;  %v9651_v50 = vunpack.i.l.bf16 %v13944_v54  ;;  %v14719_v21 = vld [vmem:[#allocation33_spill] sm:$0xff]  ;;  %v6962_v54 = vsel %vm1937_vm4, %v13582_v14, %v9627_v44  ;;  %v6971_v44 = vsel %vm4300_vm9, %v6963_v47, %v9666_v57 }
 0x4fe   : > { %v6970_v24 = vsel %vm4300_vm9, %v6962_v54, %v9637_v27  ;;  %v14730_v54 = vld [vmem:[#allocation55_spill] sm:$0xff] }
 0x4ff   : > { %v14731_v61 = vmax.f32 %v14730_v54, 0.0 }
 0x500   : > { %8127 = vmatpush3.bf16.msra.mxu1 %v9764_v9  ;;  %v9647_v9 = vunpack.i.h.bf16 %v13942_v28  ;;  %v6969_v28 = vsel %vm4300_vm9, %v6961_v49, %v9636_v38  ;;  %v9700_v34 = vpop.permute.xlu1 %9699  ;;  %v6979_v38 = vsel %vm4309_vm10, %v6971_v44, %v9676_v6  ;;  %v14732_v49 = vld [vmem:[#allocation59_spill] sm:$0xff] }
 0x501   : > { %2269 = vxpose.xlu0.b32.cont [11/16] (narrow) %v14716_v39, 32  ;;  %8128 = vmatprep.subr.bf16.mxu1 %v9765_v62  ;;  %v9672_v62 = vunpack.i.h.bf16 %v13974_v40  ;;  %v6987_v40 = vsel %vm1937_vm4, %v13832_v45, %v9651_v50  ;;  %v6977_v18 = vsel %vm4309_vm10, %v6969_v28, %v9646_v36  ;;  %v9701_v30 = vunpack.i.l.bf16 %v9700_v34 }
 0x502   : > { %v6995_v26 = vsel %vm4300_vm9, %v6987_v40, %v9661_v7  ;;  %v6978_v17 = vsel %vm4309_vm10, %v6970_v24, %v9647_v9  ;;  %v14724_v9 = vld [vmem:[#allocation56_spill] sm:$0xff]  ;;  %v14733_v28 = vmax.f32 %v14732_v49, 0.0  ;;  %v9687_v24 = vunpack.i.h.bf16 %v14032_v23 }
 0x503   : > { %v7010_v33 = vpack.c.bf16 %v6978_v17, %v6977_v18  ;;  %v14725_v36 = vmax.f32 %v14724_v9, 0.0  ;;  %v9697_v40 = vunpack.i.h.bf16 %v14084_v11 }
 0x504   : > { %8129 = vmatpush3.bf16.msra.mxu1 %v9766_v37  ;;  %v6988_v37 = vsel %vm1937_vm4, %v13887_v48, %v9652_v25  ;;  %v7003_v48 = vsel %vm4309_vm10, %v6995_v26, %v9671_v3  ;;  %v6980_v25 = vsel %vm4309_vm10, %v6972_v60, %v9677_v53  ;;  %v14728_v3 = vld [vmem:[#allocation41_spill] sm:$0xff]  ;;  %v9696_v26 = vunpack.i.l.bf16 %v14084_v11 }
 0x505   : > { %2270 = vxpose.xlu0.b32.cont [12/16] (narrow) %v14718_v20, 32  ;;  %8130 = vmatprep.subr.bf16.mxu1 %v9767_v8  ;;  %v6996_v14 = vsel %vm4300_vm9, %v6988_v37, %v9662_v29  ;;  %v9692_v20 = vunpack.i.h.bf16 %v14057_v4  ;;  %v6989_v4 = vsel %vm1937_vm4, %v13894_v5, %v9681_v13  ;;  %v7013_v29 = vpack.c.bf16 %v6980_v25, %v6979_v38  ;;  %v14185_v13 = vld [vmem:[%s14300_s8 + $0x8] sm:$0xff] }
 0x506   : > { %v7004_v45 = vsel %vm4309_vm10, %v6996_v14, %v9672_v62  ;;  %v6997_v58 = vsel %vm4300_vm9, %v6989_v4, %v9691_v15  ;;  %v9686_v37 = vunpack.i.l.bf16 %v14032_v23  ;;  %v6966_v17 = vsel %vm1937_vm4, %v13663_v55, %v9687_v24  ;;  %v14738_v55 = vld [vmem:[#allocation62_spill] sm:$0xff] }
 0x507   : > { %v7014_v0 = vpack.c.bf16 %v7004_v45, %v7003_v48  ;;  %v6998_v51 = vsel %vm4300_vm9, %v6990_v42, %v9692_v20  ;;  %v7005_v32 = vsel %vm4309_vm10, %v6997_v58, %v9701_v30  ;;  %v6974_v23 = vsel %vm4300_vm9, %v6966_v17, %v9697_v40 }
 0x508   : > { %8131 = vmatpush3.bf16.msra.mxu1 %v9768_v19  ;;  %v14722_v19 = vld [vmem:[#allocation31_spill] sm:$0xff]  ;;  %v6965_v48 = vsel %vm1937_vm4, %v13689_v2, %v9686_v37  ;;  %v14739_v10 = vmax.f32 %v14738_v55, 0.0 }
 0x509   : > { %2271 = vxpose.xlu0.b32.cont [13/16] (narrow) %v14719_v21, 32  ;;  %v14726_v21 = vld [vmem:[#allocation64_spill] sm:$0xff]  ;;  %v6973_v59 = vsel %vm4300_vm9, %v6965_v48, %v9696_v26 }
 0x50a   : > { %v14727_v62 = vmax.f32 %v14726_v21, 0.0 }
 0x50b   : > { %7215 = vmatmul.mubr.bf16.vlgmr.msra.gmra.mrb[64].mxu1 %v7007_v12  ;;  %v9702_v12 = vunpack.i.h.bf16 %v9700_v34  ;;  %v14736_v34 = vld [vmem:[#allocation70_spill] sm:$0xff] }
 0x50c   : > { %7222 = vmatprep.mubr.bf16.mxu1 %v7011_v46  ;;  %v14729_v46 = vmax.f32 %v14728_v3, 0.0 }
 0x50d   : > { %v14096_v22 = vpop.f32.mrb[96].mxu0  ;;  %2272 = vxpose.xlu0.b32.cont [14/16] (narrow) %v14721_v31, 32  ;;  %v7006_v5 = vsel %vm4309_vm10, %v6998_v51, %v9702_v12  ;;  %v14734_v31 = vld [vmem:[#allocation24_spill] sm:$0xff] }
 0x50e   : > { %v14101_v52 = vpop.f32.mrb[97].mxu0  ;;  %v7017_v7 = vpack.c.bf16 %v7006_v5, %v7005_v32  ;;  %v14735_v18 = vmax.f32 %v14734_v31, 0.0  ;;  %v7888_v32 = vld [vmem:[%s14298_s6] ss:$0 sm:$0xff] }
 0x50f   : > { %v14105_v39 = vpop.f32.mrb[98].mxu0 }
 0x510   : > { %v14109_v8 = vpop.f32.mrb[99].mxu0 }
 0x511   : > { %2273 = vxpose.xlu0.b32.cont [15/16] (narrow) %v14722_v19, 32 }
 0x513   : > { %7223 = vmatmul.mubr.bf16.gmra.mrb[68].mxu1 %v7010_v33  ;;  %v14737_v33 = vmax.f32 %v14736_v34, 0.0 }
 0x514   : > { %7230 = vmatprep.mubr.bf16.mxu1 %v7014_v0 }
 0x515   : > { %v14126_v41 = vpop.f32.mrb[100].mxu0  ;;  %2274 = vxpose.xlu0.b32.end [16/16] (narrow) %v14723_v1, 32 }
 0x516   : > { %v14135_v16 = vpop.f32.mrb[101].mxu0 }
 0x517   : > { %v14139_v27 = vpop.f32.mrb[102].mxu0 }
 0x518   : > { %v14143_v50 = vpop.f32.mrb[103].mxu0 }
 0x519   : > { %4655 = vxpose.xlu0.b32.start [1/8] (short) (narrow) %v14725_v36, 32 }
 0x51b   : > { %7231 = vmatmul.mubr.bf16.gmra.mrb[72].mxu1 %v7013_v29 }
 0x51c   : > { %7238 = vmatprep.mubr.bf16.mxu1 %v7017_v7 }
 0x51d   : > { %4656 = vxpose.xlu0.b32.cont [2/8] (short) (narrow) %v14727_v62, 32 }
 0x521   : > { %4657 = vxpose.xlu0.b32.cont [3/8] (short) (narrow) %v14729_v46, 32 }
 0x525   : > { %4658 = vxpose.xlu0.b32.cont [4/8] (short) (narrow) %v14731_v61, 32 }
 0x529   : > { %4659 = vxpose.xlu0.b32.cont [5/8] (short) (narrow) %v14733_v28, 32 }
 0x52d   : > { %v9705_v14 = vpop.permute.xlu0 %9704  ;;  %4660 = vxpose.xlu0.b32.cont [6/8] (short) (narrow) %v14735_v18, 32 }
 0x52e   : > { %v9707_v45 = vunpack.i.h.bf16 %v9705_v14  ;;  %v9706_v35 = vunpack.i.l.bf16 %v9705_v14 }
 0x530   : > { %v6981_v63 = vsel %vm4309_vm10, %v6973_v59, %v9706_v35  ;;  %v6982_v11 = vsel %vm4309_vm10, %v6974_v23, %v9707_v45 }
 0x531   : > { %4661 = vxpose.xlu0.b32.cont [7/8] (short) (narrow) %v14737_v33, 32  ;;  %v7016_v57 = vpack.c.bf16 %v6982_v11, %v6981_v63 }
 0x533   : > { %7239 = vmatmul.mubr.bf16.gmra.mrb[76].mxu1 %v7016_v57 }
 0x535   : > { %4662 = vxpose.xlu0.b32.end [8/8] (short) (narrow) %v14739_v10, 32 }
 0x559   : > { %v2275_v2 = vpop.trf.xlu0 }
 0x55a   : > { %2323 = vst [vmem:[%s14179_s28] sm:$0xff] %v2275_v2 }
 0x55d   : > { %v2276_v19 = vpop.trf.xlu0 }
 0x55e   : > { %9709 = vset.pattern.permute.xlu0 %v9860_v56  ;;  %2325 = vst [vmem:[%s14179_s28 + $0x10] sm:$0xff] %v2276_v19 }
 0x55f   : > { %6580 = vperm.xlu0 %9709, %v14185_v13  }
 0x561   : > { %v2277_v0 = vpop.trf.xlu0 }
 0x562   : > { %2327 = vst [vmem:[%s14179_s28 + $0x20] sm:$0xff] %v2277_v0  ;;  %v9769_v0 = vld [vmem:[%s14299_s7] sm:$0xff]  }
 0x563   : > { %8268 = vmatprep.mubr.msk.bf16.mxu1 %vm1937_vm4, %v9769_v0 }
 0x565   : > { %v2278_v53 = vpop.trf.xlu0 }
 0x566   : > { %2329 = vst [vmem:[%s14179_s28 + $0x30] sm:$0xff] %v2278_v53 }
 0x599   : > { %v4671_v6 = vpop.trf.xlu0 }
 0x59a   : > { %4687 = vst.msk [vmem:[%s507_s17] sm:$0xff] %vm4300_vm9, %v4671_v6 }
 0x59d   : > { %v4672_v20 = vpop.trf.xlu0 }
 0x59e   : > { %4688 = vst.msk [vmem:[%s507_s17 + $0x8] sm:$0xff] %vm4300_vm9, %v4672_v20 }
 0x5a1   : > { %v4673_v15 = vpop.trf.xlu0 }
 0x5a2   : > { %4689 = vst.msk [vmem:[%s507_s17 + $0x10] sm:$0xff] %vm4300_vm9, %v4673_v15 }
 0x5a5   : > { %v4674_v12 = vpop.trf.xlu0 }
 0x5a6   : > { %4690 = vst.msk [vmem:[%s507_s17 + $0x18] sm:$0xff] %vm4300_vm9, %v4674_v12 }
 0x5be   : > { %v14200_v30 = vpop.f32.mrb[56].mxu1 }
 0x5bf   : > { %v14202_v43 = vpop.f32.mrb[57].mxu1 }
 0x5c0   : > { %v6640_v47 = vpop.f32.mrb[58].mxu1 }
 0x5c1   : > { %v6642_v44 = vpop.f32.mrb[59].mxu1 }
 0x5c6   : > { %v14204_v60 = vpop.f32.mrb[60].mxu1 }
 0x5c7   : > { %v14206_v42 = vpop.f32.mrb[61].mxu1 }
 0x5c8   : > { %v6650_v4 = vpop.f32.mrb[62].mxu1 }
 0x5c9   : > { %v6651_v1 = vpop.f32.mrb[63].mxu1  ;;  %v14741_v4 = vld [vmem:[#allocation49_spill] sm:$0xff] }
 0x5ca   : > { %v14742_v1 = vld [vmem:[#allocation43_spill] sm:$0xff] }
 0x5de   : > { %v6581_v58 = vpop.permute.xlu0 %6580  ;;  %v8132_v51 = vpop.f32.mrb[64].mxu1 }
 0x5df   : > { %v6641_v38 = vadd.f32 %v6640_v47, %v6581_v58  ;;  %v6643_v25 = vadd.f32 %v6642_v44, %v6581_v58  ;;  %v8133_v5 = vpop.f32.mrb[65].mxu1  ;;  %v14740_v44 = vld [vmem:[#allocation44_spill] sm:$0xff]  ;;  %v14743_v58 = vld [vmem:[#allocation47_spill] sm:$0xff] }
 0x5e0   : > { %v8134_v9 = vadd.f32 %v8133_v5, %v8132_v51  ;;  %v8135_v36 = vpop.f32.mrb[66].mxu1  ;;  %v14744_v51 = vld [vmem:[#allocation61_spill] sm:$0xff] }
 0x5e1   : > { %6655 = vst [vmem:[%s14212_s23 + $0x10] sm:$0xff] %v6641_v38  ;;  %6656 = vst [vmem:[%s14212_s23 + $0x18] sm:$0xff] %v6643_v25  ;;  %v8136_v29 = vpop.f32.mrb[67].mxu1  ;;  %v14745_v38 = vld [vmem:[#allocation67_spill] sm:$0xff]  ;;  %v14746_v25 = vld [vmem:[#allocation60_spill] sm:$0xff] }
 0x5e2   : > { %v7217_v7 = vadd.f32 %v8134_v9, %v7888_v32  ;;  %v8137_v21 = vadd.f32 %v8136_v29, %v8135_v36  ;;  %v14750_v5 = vld [vmem:[#allocation77_spill] sm:$0xff]  ;;  %v14751_v9 = vld [vmem:[#allocation80_spill] sm:$0xff]  ;;  %v14752_v36 = vld [vmem:[#allocation82_spill] sm:$0xff] }
 0x5e3   : > { %v14753_v29 = vld [vmem:[#allocation84_spill] sm:$0xff] }
 0x5e4   : > { %v7220_v62 = vadd.f32 %v8137_v21, %v7888_v32  ;;  %v7282_v3 = vadd.f32 %v14101_v52, %v7217_v7  ;;  %v14754_v7 = vld [vmem:[#allocation17_spill] sm:$0xff]  ;;  %v14755_v21 = vld [vmem:[#allocation83_spill] sm:$0xff] }
 0x5e6   : > { %v8138_v46 = vpop.f32.mrb[68].mxu1  ;;  %v7312_v54 = vmax.f32 %v7282_v3, 0.0  ;;  %v7285_v61 = vadd.f32 %v14109_v8, %v7220_v62  ;;  %v6570_v62 = vld [vmem:[%s14300_s8] sm:$0xff]  ;;  %v6572_v3 = vld [vmem:[%s14300_s8 + $0x10] sm:$0x1f] }
 0x5e7   : > { %v8139_v49 = vpop.f32.mrb[69].mxu1 }
 0x5e8   : > { %v8140_v28 = vadd.f32 %v8139_v49, %v8138_v46  ;;  %v8141_v24 = vpop.f32.mrb[70].mxu1  ;;  %7320 = vxpose.xlu1.b32.start [1/8] (short) (narrow) %v7312_v54, 32  ;;  %v7313_v14 = vmax.f32 %v7285_v61, 0.0 }
 0x5e9   : > { %v8142_v37 = vpop.f32.mrb[71].mxu1 }
 0x5ea   : > { %v7225_v40 = vadd.f32 %v8140_v28, %v7888_v32  ;;  %v8143_v26 = vadd.f32 %v8142_v37, %v8141_v24  ;;  %v9770_v37 = vld [vmem:[%s14299_s7 + $0x8] ss:$0 sps:$4 sm:$0x77]  }
 0x5ec   : > { %v7228_v31 = vadd.f32 %v8143_v26, %v7888_v32  ;;  %7321 = vxpose.xlu1.b32.cont [2/8] (short) (narrow) %v7313_v14, 32  ;;  %v7290_v18 = vadd.f32 %v14096_v22, %v7225_v40 }
 0x5ee   : > { %v8144_v17 = vpop.f32.mrb[72].mxu1  ;;  %v7314_v48 = vmax.f32 %v7290_v18, 0.0  ;;  %v7293_v52 = vadd.f32 %v14105_v39, %v7228_v31 }
 0x5ef   : > { %v8145_v45 = vpop.f32.mrb[73].mxu1 }
 0x5f0   : > { %v8146_v35 = vadd.f32 %v8145_v45, %v8144_v17  ;;  %v8147_v59 = vpop.f32.mrb[74].mxu1  ;;  %7322 = vxpose.xlu1.b32.cont [3/8] (short) (narrow) %v7314_v48, 32  ;;  %v7315_v11 = vmax.f32 %v7293_v52, 0.0 }
 0x5f1   : > { %v8148_v8 = vpop.f32.mrb[75].mxu1 }
 0x5f2   : > { %v7233_v23 = vadd.f32 %v8146_v35, %v7888_v32  ;;  %v8149_v63 = vadd.f32 %v8148_v8, %v8147_v59 }
 0x5f4   : > { %v7236_v34 = vadd.f32 %v8149_v63, %v7888_v32  ;;  %7323 = vxpose.xlu1.b32.cont [4/8] (short) (narrow) %v7315_v11, 32  ;;  %v7298_v33 = vadd.f32 %v14135_v16, %v7233_v23 }
 0x5f6   : > { %v7316_v57 = vmax.f32 %v7298_v33, 0.0  ;;  %v7301_v55 = vadd.f32 %v14143_v50, %v7236_v34 }
 0x5f8   : > { %7324 = vxpose.xlu1.b32.cont [5/8] (short) (narrow) %v7316_v57, 32  ;;  %v7317_v22 = vmax.f32 %v7301_v55, 0.0 }
 0x5fc   : > { %7325 = vxpose.xlu1.b32.cont [6/8] (short) (narrow) %v7317_v22, 32 }
 0x606   : > { %v8150_v10 = vpop.f32.mrb[76].mxu1 }
 0x607   : > { %v8151_v39 = vpop.f32.mrb[77].mxu1 }
 0x608   : > { %v8152_v2 = vadd.f32 %v8151_v39, %v8150_v10  ;;  %v8153_v19 = vpop.f32.mrb[78].mxu1 }
 0x609   : > { %v8154_v53 = vpop.f32.mrb[79].mxu1 }
 0x60a   : > { %v7241_v6 = vadd.f32 %v8152_v2, %v7888_v32  ;;  %v8155_v20 = vadd.f32 %v8154_v53, %v8153_v19 }
 0x60c   : > { %v7244_v16 = vadd.f32 %v8155_v20, %v7888_v32  ;;  %v7306_v15 = vadd.f32 %v14126_v41, %v7241_v6  ;;  %v14747_v41 = vld [vmem:[#allocation65_spill] sm:$0xff] }
 0x60d   : > { %v14749_v32 = vld [vmem:[#allocation81_spill] sm:$0xff] }
 0x60e   : > { %v7318_v50 = vmax.f32 %v7306_v15, 0.0  ;;  %v7309_v12 = vadd.f32 %v14139_v27, %v7244_v16  ;;  %v14748_v27 = vld [vmem:[#allocation78_spill] sm:$0xff] }
 0x610   : > { %7326 = vxpose.xlu1.b32.cont [7/8] (short) (narrow) %v7318_v50, 32  ;;  %v7319_v47 = vmax.f32 %v7309_v12, 0.0 }
 0x614   : > { %7327 = vxpose.xlu1.b32.end [8/8] (short) (narrow) %v7319_v47, 32 }
 0x618   : > { %2291 = vxpose.xlu1.b32.start [1/16] (narrow) %v14740_v44, 32 }
 0x61c   : > { %2292 = vxpose.xlu1.b32.cont [2/16] (narrow) %v14741_v4, 32 }
 0x620   : > { %2293 = vxpose.xlu1.b32.cont [3/16] (narrow) %v14742_v1, 32 }
 0x624   : > { %2294 = vxpose.xlu1.b32.cont [4/16] (narrow) %v14743_v58, 32 }
 0x628   : > { %2295 = vxpose.xlu1.b32.cont [5/16] (narrow) %v14744_v51, 32 }
 0x62c   : > { %2296 = vxpose.xlu1.b32.cont [6/16] (narrow) %v14745_v38, 32 }
 0x630   : > { %2297 = vxpose.xlu1.b32.cont [7/16] (narrow) %v14746_v25, 32 }
 0x634   : > { %2298 = vxpose.xlu1.b32.cont [8/16] (narrow) %v14747_v41, 32 }
 0x638   : > { %2299 = vxpose.xlu1.b32.cont [9/16] (narrow) %v14748_v27, 32 }
 0x63c   : > { %2300 = vxpose.xlu1.b32.cont [10/16] (narrow) %v14749_v32, 32 }
 0x640   : > { %2301 = vxpose.xlu1.b32.cont [11/16] (narrow) %v14750_v5, 32 }
 0x644   : > { %2302 = vxpose.xlu1.b32.cont [12/16] (narrow) %v14751_v9, 32 }
 0x648   : > { %2303 = vxpose.xlu1.b32.cont [13/16] (narrow) %v14752_v36, 32 }
 0x64c   : > { %2304 = vxpose.xlu1.b32.cont [14/16] (narrow) %v14753_v29, 32 }
 0x650   : > { %2305 = vxpose.xlu1.b32.cont [15/16] (narrow) %v14754_v7, 32 }
 0x654   : > { %2306 = vxpose.xlu1.b32.end [16/16] (narrow) %v14755_v21, 32 }
 0x672   : > { %9708 = vset.pattern.permute.xlu1 %v9860_v56  ;;  %v7359_v56 = vld [vmem:[%s14300_s8 + $0x10] sm:$0x1f] }
 0x673   : > { %6575 = vperm.xlu1 %9708, %v6570_v62  }
 0x677   : > { %6585 = vperm.xlu1 %9708, %v6572_v3  }
 0x678   : > { %v7336_v46 = vpop.trf.xlu1 }
 0x67b   : > { %7362 = vperm.xlu1 %9708, %v6570_v62  }
 0x67c   : > { %v7337_v54 = vpop.trf.xlu1 }
 0x67d   : > { %v7352_v61 = vpack.c.bf16 %v7337_v54, %v7336_v46 }
 0x67f   : > { %8264 = vmatprep.subr.bf16.mxu1 %v7352_v61  ;;  %7367 = vperm.xlu1 %9708, %v14185_v13  }
 0x680   : > { %8265 = vmatpush3.bf16.msra.mxu1 %v7352_v61  ;;  %v7338_v49 = vpop.trf.xlu1 }
 0x683   : > { %7372 = vperm.xlu1 %9708, %v7359_v56  }
 0x684   : > { %v7339_v28 = vpop.trf.xlu1 }
 0x685   : > { %v7353_v24 = vpack.c.bf16 %v7339_v28, %v7338_v49 }
 0x687   : > { %8266 = vmatprep.subr.bf16.mxu1 %v7353_v24 }
 0x688   : > { %8267 = vmatpush3.bf16.msra.mxu1 %v7353_v24 }
 0x68b   : > { %8269 = vmatmul.mubr.msk.bf16.vlgmr.msra.gmra.mrb[80].mxu1 %vm1937_vm4, %v9770_v37  ;;  %vm7439_vm4 = vcmask 517120  }
 0x698   : > { %v2307_v13 = vpop.trf.xlu1 }
 0x699   : > { %2324 = vst [vmem:[%s14179_s28 + $0x8] sm:$0xff] %v2307_v13 }
 0x69c   : > { %v2308_v40 = vpop.trf.xlu1 }
 0x69d   : > { %2326 = vst [vmem:[%s14179_s28 + $0x18] sm:$0xff] %v2308_v40 }
 0x6a0   : > { %v2309_v26 = vpop.trf.xlu1 }
 0x6a1   : > { %2328 = vst [vmem:[%s14179_s28 + $0x28] sm:$0xff] %v2309_v26 }
 0x6a4   : > { %v2310_v14 = vpop.trf.xlu1 }
 0x6a5   : > { %2330 = vst [vmem:[%s14179_s28 + $0x38] sm:$0xff] %v2310_v14 }
 0x6f2   : > { %v6576_v31 = vpop.permute.xlu1 %6575 }
 0x6f3   : > { %v6637_v18 = vadd.f32 %v14200_v30, %v6576_v31  ;;  %v6639_v17 = vadd.f32 %v14202_v43, %v6576_v31 }
 0x6f5   : > { %6653 = vst [vmem:[%s14212_s23] sm:$0xff] %v6637_v18  ;;  %6654 = vst [vmem:[%s14212_s23 + $0x8] sm:$0xff] %v6639_v17 }
 0x6f6   : > { %v6586_v48 = vpop.permute.xlu1 %6585 }
 0x6f7   : > { %v6647_v52 = vadd.f32 %v14204_v60, %v6586_v48  ;;  %v6649_v45 = vadd.f32 %v14206_v42, %v6586_v48 }
 0x6f9   : > { %6657 = vst [vmem:[%s14212_s23 + $0x20] sm:$0x3] %v6647_v52  ;;  %6658 = vst [vmem:[%s14212_s23 + $0x28] sm:$0x3] %v6649_v45  ;;  %v6661_v35 = vcombine.low %v6647_v52, %v6649_v45  ;;  %v6662_v59 = vcombine.high %v6647_v52, %v6649_v45  ;;  %s522_s23 = scalar_lea.vmem %s14305_s13, %s8274_s15 }
 0x6fa   : > { %v7363_v23 = vpop.permute.xlu1 %7362 }
 0x6fb   : > { %v7887_v30 = vrot.slane %v6661_v35, 10  ;;  %v6667_v43 = vrot.slane %v6662_v59, 6 }
 0x6fd   : > { %v6668_v8 = vsel %vm6664_vm3, %v7887_v30, %v6667_v43 }
 0x6fe   : > { %6670 = vst [vmem:[%s517_s26] sm:$0x77] %v6668_v8  ;;  %v7368_v60 = vpop.permute.xlu1 %7367 }
 0x702   : > { %v7373_v63 = vpop.permute.xlu1 %7372 }
 0x75e   : > { %v8270_v42 = vpop.f32.mrb[80].mxu1 }
 0x75f   : > { %v7423_v11 = vpop.f32.mrb[81].mxu1  ;;  %v7432_v34 = vadd.f32 %v8270_v42, %v7373_v63 }
 0x760   : > { %v7424_v33 = vadd.f32 %v7423_v11, %v7363_v23  ;;  %v8271_v57 = vpop.f32.mrb[82].mxu1 }
 0x761   : > { %v7426_v55 = vpop.f32.mrb[83].mxu1  ;;  %7440 = vst.msk [vmem:[%s522_s23 + $0x10] sm:$0x3] %vm7439_vm4, %v7432_v34 }
 0x762   : > { %7442 = vst.msk [vmem:[%s526_s18 - $0x2] sm:$0x1c] %vm7441_vm5, %v7432_v34  ;;  %v7427_v22 = vadd.f32 %v7426_v55, %v7368_v60 }
 0x763   : > { %7437 = vst.msk [vmem:[%s522_s23] sm:$0xff] %vm4300_vm9, %v7424_v33 }
 0x764   : > { %7438 = vst.msk [vmem:[%s522_s23 + $0x8] sm:$0xff] %vm4300_vm9, %v7427_v22 }
 0x765 PF: > { %s25_s29 = sadd.s32 1, %s9846_s29  }
 0x766   : > { %p22_p4 = scmp.ge.s32.totalorder %s25_s29, 4  }
 0x768   :  { %24 = sbr.rel (!%p22_p4) target bundleno = 1 (0x1), region = 149 }

</bundles_post_ra>
